<compile_context>
chip_gen: v5e
topology: v5e:2x2
jax: 0.10.0
libtpu: 0.0.40
codegen_flags: <defaults>
</compile_context>

<pallas_src>
import functools

import numpy as np
import jax
import jax.numpy as jnp
from jax import lax
from jax.experimental import pallas as pl
from jax.experimental.pallas import tpu as pltpu


# tap[phase][d] -> kernel index along that axis (same table for rows and columns).
# For output index 2m + phase, the contributing padded-input indices are m + phase + d,
# d in {0, 1}, hit with kernel tap tap[phase][d].
_TAP = ((3, 1), (2, 0))


# ------------------------------- Pallas kernel ------------------------------ #

def _upsample_fused_kernel(w_ref, x_ref, sc_ref, sr_ref, o_ref, *,
                           cin, cout, h, w, eps):
    """Fused ConvTranspose2d(4,2,1,no-bias) + InstanceNorm2d + ReLU for one batch element.

    w_ref : SMEM (cin*cout*16,)   flattened PyTorch-layout (Cin, Cout, 4, 4) weights
    x_ref : VMEM (1, cin, h+2, w+2)  zero-padded input
    sc_ref: VMEM (2, w, 2w)          column-phase 0/1 scatter matrices
    sr_ref: VMEM (2, 2h, h)          row-phase 0/1 scatter matrices
    o_ref : VMEM (1, cout, 2h, 2w)   normalized+ReLU'd deconv output (pre-concat)
    """
    H, W = h, w
    inv_area = 1.0 / float(4 * H * W)

    # Load the 9 shifted (H, W) windows per input channel once; every (phase, tap)
    # FMA below reuses them, so no im2col is ever materialized.
    win = {}
    for ci in range(cin):
        for a in range(3):
            for b in range(3):
                win[(ci, a, b)] = x_ref[0, ci, a:a + H, b:b + W]

    sc0 = sc_ref[0]
    sc1 = sc_ref[1]
    sr0 = sr_ref[0]
    sr1 = sr_ref[1]

    for co in range(cout):
        # --- transposed conv: 4 sub-pixel phases via VPU scalar-broadcast FMAs ---
        planes = {}
        for r in (0, 1):
            for c in (0, 1):
                acc = jnp.zeros((H, W), jnp.float32)
                for ci in range(cin):
                    for dy in (0, 1):
                        ky = _TAP[r][dy]
                        for dx in (0, 1):
                            kx = _TAP[c][dx]
                            widx = ((ci * cout + co) * 4 + ky) * 4 + kx
                            acc = acc + win[(ci, r + dy, c + dx)] * w_ref[widx]
                planes[(r, c)] = acc

        # --- InstanceNorm2d stats over the union of the 4 phase planes (biased var) ---
        total = (jnp.sum(planes[(0, 0)]) + jnp.sum(planes[(0, 1)])
                 + jnp.sum(planes[(1, 0)]) + jnp.sum(planes[(1, 1)]))
        mean = total * inv_area
        d = {k: v - mean for k, v in planes.items()}
        var = (jnp.sum(d[(0, 0)] * d[(0, 0)]) + jnp.sum(d[(0, 1)] * d[(0, 1)])
               + jnp.sum(d[(1, 0)] * d[(1, 0)]) + jnp.sum(d[(1, 1)] * d[(1, 1)])) * inv_area
        scale = lax.rsqrt(var + eps)

        # --- normalize + ReLU, then interleave phases at the final store ---
        # plane (r, c) value (i, j) belongs at output pixel (2i + r, 2j + c); the
        # interleave is expressed with tiny 0/1 scatter matmuls so it stays on-chip.
        rows = []
        for r in (0, 1):
            even = jnp.maximum(d[(r, 0)] * scale, 0.0)   # output columns 2j
            odd = jnp.maximum(d[(r, 1)] * scale, 0.0)    # output columns 2j + 1
            rows.append(jnp.dot(even, sc0, preferred_element_type=jnp.float32)
                        + jnp.dot(odd, sc1, preferred_element_type=jnp.float32))
        full = (jnp.dot(sr0, rows[0], preferred_element_type=jnp.float32)
                + jnp.dot(sr1, rows[1], preferred_element_type=jnp.float32))
        o_ref[0, co] = full


# --------------------------------- wrapper ---------------------------------- #

def upsample_forward(x, skip_input, weight, *, eps=1e-5):
    """x: (N, Cin, H, W); skip_input: (N, Cskip, 2H, 2W); weight: (Cin, Cout, 4, 4)."""
    N, Cin, H, W = x.shape
    Cin_w, Cout, KH, KW = weight.shape
    assert (Cin_w, KH, KW) == (Cin, 4, 4)
    OH, OW = 2 * H, 2 * W
    Ns, Cs, Hs, Ws = skip_input.shape
    assert (Ns, Hs, Ws) == (N, OH, OW)

    xp = jnp.pad(x.astype(jnp.float32), ((0, 0), (0, 0), (1, 1), (1, 1)))
    w_flat = weight.astype(jnp.float32).reshape(-1)

    # 0/1 scatter matrices that place the 2x2 sub-pixel phases into (OH, OW).
    sc_np = np.zeros((2, W, OW), np.float32)
    sr_np = np.zeros((2, OH, H), np.float32)
    jj = np.arange(W)
    ii = np.arange(H)
    for p in (0, 1):
        sc_np[p, jj, 2 * jj + p] = 1.0
        sr_np[p, 2 * ii + p, ii] = 1.0
    sc = jnp.asarray(sc_np)
    sr = jnp.asarray(sr_np)

    kernel = functools.partial(_upsample_fused_kernel,
                               cin=Cin, cout=Cout, h=H, w=W, eps=eps)

    y = pl.pallas_call(
        kernel,
        out_shape=jax.ShapeDtypeStruct((N, Cout, OH, OW), jnp.float32),
        grid=(N,),
        in_specs=[
            pl.BlockSpec(memory_space=pltpu.MemorySpace.SMEM),            # weights (scalars)
            pl.BlockSpec((1, Cin, H + 2, W + 2), lambda n: (n, 0, 0, 0)),  # padded x
            pl.BlockSpec((2, W, OW), lambda n: (0, 0, 0)),                 # col scatter
            pl.BlockSpec((2, OH, H), lambda n: (0, 0, 0)),                 # row scatter
        ],
        out_specs=pl.BlockSpec((1, Cout, OH, OW), lambda n: (n, 0, 0, 0)),
        compiler_params=pltpu.CompilerParams(dimension_semantics=("parallel",)),
    )(w_flat, xp, sc, sr)

    # Channel concat with the skip connection is pure data movement with no compute
    # attached -> leave it to XLA instead of routing skip through VMEM.
    return jnp.concatenate([y, skip_input.astype(y.dtype)], axis=1)


# ---------------------------- pure-JAX reference ----------------------------- #

def reference_forward(x, skip, w, eps=1e-5):
    kernel = jnp.flip(w, (2, 3)).transpose(1, 0, 2, 3)          # OIHW
    y = lax.conv_general_dilated(
        x, kernel, window_strides=(1, 1), padding=[(2, 2), (2, 2)],
        lhs_dilation=(2, 2), dimension_numbers=("NCHW", "OIHW", "NCHW"),
        precision=lax.Precision.HIGHEST)
    mean = y.mean(axis=(2, 3), keepdims=True)
    var = ((y - mean) ** 2).mean(axis=(2, 3), keepdims=True)
    y = jnp.maximum((y - mean) * lax.rsqrt(var + eps), 0.0)
    return jnp.concatenate([y, skip], axis=1)


if __name__ == "__main__":
    key = jax.random.PRNGKey(0)
    k1, k2, k3 = jax.random.split(key, 3)

    N, Cin, H, W = 2, 4, 16, 16
    Cout, Cskip = 4, 4

    x = jax.random.normal(k1, (N, Cin, H, W), jnp.float32)
    skip_input = jax.random.normal(k2, (N, Cskip, 2 * H, 2 * W), jnp.float32)
    # Deterministic synthetic ConvTranspose2d weight: shape (Cin, Cout, 4, 4), no bias.
    w = jax.random.normal(k3, (Cin, Cout, 4, 4), jnp.float32) * 0.1

    fwd = jax.jit(upsample_forward)
    out = jax.block_until_ready(fwd(x, skip_input, w))
    ref = reference_forward(x, skip_input, w)

    assert out.shape == (N, Cout + Cskip, 2 * H, 2 * W)
    np.testing.assert_allclose(np.asarray(out), np.asarray(ref), rtol=1e-4, atol=1e-4)
    print("KERNEL_OK")
</pallas_src>

<mosaic_0001>
module attributes {stable_mosaic.version = 11 : i64} {
  func.func @_upsample_fused_kernel(%arg0: i32, %arg1: memref<256xf32, #tpu.memory_space<smem>>, %arg2: memref<1x4x18x18xf32, #tpu.memory_space<vmem>>, %arg3: memref<2x16x32xf32, #tpu.memory_space<vmem>>, %arg4: memref<2x32x16xf32, #tpu.memory_space<vmem>>, %arg5: memref<1x4x32x32xf32, #tpu.memory_space<vmem>>) attributes {dimension_semantics = [#tpu.dimension_semantics<parallel>], iteration_bounds = array<i64: 2>, scalar_prefetch = 0 : i64, scratch_operands = 0 : i64, tpu.core_type = #tpu.core_type<tc>, window_params = [{transform_indices = @transform_0, window_bounds = array<i64: 256>}, {transform_indices = @transform_1, window_bounds = array<i64: 1, 4, 18, 18>}, {pipeline_mode = #tpu.pipeline_mode<synchronous>, transform_indices = @transform_2, window_bounds = array<i64: 2, 16, 32>}, {pipeline_mode = #tpu.pipeline_mode<synchronous>, transform_indices = @transform_3, window_bounds = array<i64: 2, 32, 16>}, {transform_indices = @transform_4, window_bounds = array<i64: 1, 4, 32, 32>}]} {
    %c0 = arith.constant 0 : index
    %c0_0 = arith.constant 0 : index
    %c0_1 = arith.constant 0 : index
    %c0_2 = arith.constant 0 : index
    %0 = vector.load %arg2[%c0, %c0_0, %c0_1, %c0_2] : memref<1x4x18x18xf32, #tpu.memory_space<vmem>>, vector<1x1x16x16xf32>
    %1 = vector.shape_cast %0 : vector<1x1x16x16xf32> to vector<16x16xf32>
    %c0_3 = arith.constant 0 : index
    %c0_4 = arith.constant 0 : index
    %c0_5 = arith.constant 0 : index
    %c1 = arith.constant 1 : index
    %2 = vector.load %arg2[%c0_3, %c0_4, %c0_5, %c1] : memref<1x4x18x18xf32, #tpu.memory_space<vmem>>, vector<1x1x16x16xf32>
    %3 = vector.shape_cast %2 : vector<1x1x16x16xf32> to vector<16x16xf32>
    %c0_6 = arith.constant 0 : index
    %c0_7 = arith.constant 0 : index
    %c0_8 = arith.constant 0 : index
    %c2 = arith.constant 2 : index
    %4 = vector.load %arg2[%c0_6, %c0_7, %c0_8, %c2] : memref<1x4x18x18xf32, #tpu.memory_space<vmem>>, vector<1x1x16x16xf32>
    %5 = vector.shape_cast %4 : vector<1x1x16x16xf32> to vector<16x16xf32>
    %c0_9 = arith.constant 0 : index
    %c0_10 = arith.constant 0 : index
    %c1_11 = arith.constant 1 : index
    %c0_12 = arith.constant 0 : index
    %6 = vector.load %arg2[%c0_9, %c0_10, %c1_11, %c0_12] : memref<1x4x18x18xf32, #tpu.memory_space<vmem>>, vector<1x1x16x16xf32>
    %7 = vector.shape_cast %6 : vector<1x1x16x16xf32> to vector<16x16xf32>
    %c0_13 = arith.constant 0 : index
    %c0_14 = arith.constant 0 : index
    %c1_15 = arith.constant 1 : index
    %c1_16 = arith.constant 1 : index
    %8 = vector.load %arg2[%c0_13, %c0_14, %c1_15, %c1_16] : memref<1x4x18x18xf32, #tpu.memory_space<vmem>>, vector<1x1x16x16xf32>
    %9 = vector.shape_cast %8 : vector<1x1x16x16xf32> to vector<16x16xf32>
    %c0_17 = arith.constant 0 : index
    %c0_18 = arith.constant 0 : index
    %c1_19 = arith.constant 1 : index
    %c2_20 = arith.constant 2 : index
    %10 = vector.load %arg2[%c0_17, %c0_18, %c1_19, %c2_20] : memref<1x4x18x18xf32, #tpu.memory_space<vmem>>, vector<1x1x16x16xf32>
    %11 = vector.shape_cast %10 : vector<1x1x16x16xf32> to vector<16x16xf32>
    %c0_21 = arith.constant 0 : index
    %c0_22 = arith.constant 0 : index
    %c2_23 = arith.constant 2 : index
    %c0_24 = arith.constant 0 : index
    %12 = vector.load %arg2[%c0_21, %c0_22, %c2_23, %c0_24] : memref<1x4x18x18xf32, #tpu.memory_space<vmem>>, vector<1x1x16x16xf32>
    %13 = vector.shape_cast %12 : vector<1x1x16x16xf32> to vector<16x16xf32>
    %c0_25 = arith.constant 0 : index
    %c0_26 = arith.constant 0 : index
    %c2_27 = arith.constant 2 : index
    %c1_28 = arith.constant 1 : index
    %14 = vector.load %arg2[%c0_25, %c0_26, %c2_27, %c1_28] : memref<1x4x18x18xf32, #tpu.memory_space<vmem>>, vector<1x1x16x16xf32>
    %15 = vector.shape_cast %14 : vector<1x1x16x16xf32> to vector<16x16xf32>
    %c0_29 = arith.constant 0 : index
    %c0_30 = arith.constant 0 : index
    %c2_31 = arith.constant 2 : index
    %c2_32 = arith.constant 2 : index
    %16 = vector.load %arg2[%c0_29, %c0_30, %c2_31, %c2_32] : memref<1x4x18x18xf32, #tpu.memory_space<vmem>>, vector<1x1x16x16xf32>
    %17 = vector.shape_cast %16 : vector<1x1x16x16xf32> to vector<16x16xf32>
    %c0_33 = arith.constant 0 : index
    %c1_34 = arith.constant 1 : index
    %c0_35 = arith.constant 0 : index
    %c0_36 = arith.constant 0 : index
    %18 = vector.load %arg2[%c0_33, %c1_34, %c0_35, %c0_36] : memref<1x4x18x18xf32, #tpu.memory_space<vmem>>, vector<1x1x16x16xf32>
    %19 = vector.shape_cast %18 : vector<1x1x16x16xf32> to vector<16x16xf32>
    %c0_37 = arith.constant 0 : index
    %c1_38 = arith.constant 1 : index
    %c0_39 = arith.constant 0 : index
    %c1_40 = arith.constant 1 : index
    %20 = vector.load %arg2[%c0_37, %c1_38, %c0_39, %c1_40] : memref<1x4x18x18xf32, #tpu.memory_space<vmem>>, vector<1x1x16x16xf32>
    %21 = vector.shape_cast %20 : vector<1x1x16x16xf32> to vector<16x16xf32>
    %c0_41 = arith.constant 0 : index
    %c1_42 = arith.constant 1 : index
    %c0_43 = arith.constant 0 : index
    %c2_44 = arith.constant 2 : index
    %22 = vector.load %arg2[%c0_41, %c1_42, %c0_43, %c2_44] : memref<1x4x18x18xf32, #tpu.memory_space<vmem>>, vector<1x1x16x16xf32>
    %23 = vector.shape_cast %22 : vector<1x1x16x16xf32> to vector<16x16xf32>
    %c0_45 = arith.constant 0 : index
    %c1_46 = arith.constant 1 : index
    %c1_47 = arith.constant 1 : index
    %c0_48 = arith.constant 0 : index
    %24 = vector.load %arg2[%c0_45, %c1_46, %c1_47, %c0_48] : memref<1x4x18x18xf32, #tpu.memory_space<vmem>>, vector<1x1x16x16xf32>
    %25 = vector.shape_cast %24 : vector<1x1x16x16xf32> to vector<16x16xf32>
    %c0_49 = arith.constant 0 : index
    %c1_50 = arith.constant 1 : index
    %c1_51 = arith.constant 1 : index
    %c1_52 = arith.constant 1 : index
    %26 = vector.load %arg2[%c0_49, %c1_50, %c1_51, %c1_52] : memref<1x4x18x18xf32, #tpu.memory_space<vmem>>, vector<1x1x16x16xf32>
    %27 = vector.shape_cast %26 : vector<1x1x16x16xf32> to vector<16x16xf32>
    %c0_53 = arith.constant 0 : index
    %c1_54 = arith.constant 1 : index
    %c1_55 = arith.constant 1 : index
    %c2_56 = arith.constant 2 : index
    %28 = vector.load %arg2[%c0_53, %c1_54, %c1_55, %c2_56] : memref<1x4x18x18xf32, #tpu.memory_space<vmem>>, vector<1x1x16x16xf32>
    %29 = vector.shape_cast %28 : vector<1x1x16x16xf32> to vector<16x16xf32>
    %c0_57 = arith.constant 0 : index
    %c1_58 = arith.constant 1 : index
    %c2_59 = arith.constant 2 : index
    %c0_60 = arith.constant 0 : index
    %30 = vector.load %arg2[%c0_57, %c1_58, %c2_59, %c0_60] : memref<1x4x18x18xf32, #tpu.memory_space<vmem>>, vector<1x1x16x16xf32>
    %31 = vector.shape_cast %30 : vector<1x1x16x16xf32> to vector<16x16xf32>
    %c0_61 = arith.constant 0 : index
    %c1_62 = arith.constant 1 : index
    %c2_63 = arith.constant 2 : index
    %c1_64 = arith.constant 1 : index
    %32 = vector.load %arg2[%c0_61, %c1_62, %c2_63, %c1_64] : memref<1x4x18x18xf32, #tpu.memory_space<vmem>>, vector<1x1x16x16xf32>
    %33 = vector.shape_cast %32 : vector<1x1x16x16xf32> to vector<16x16xf32>
    %c0_65 = arith.constant 0 : index
    %c1_66 = arith.constant 1 : index
    %c2_67 = arith.constant 2 : index
    %c2_68 = arith.constant 2 : index
    %34 = vector.load %arg2[%c0_65, %c1_66, %c2_67, %c2_68] : memref<1x4x18x18xf32, #tpu.memory_space<vmem>>, vector<1x1x16x16xf32>
    %35 = vector.shape_cast %34 : vector<1x1x16x16xf32> to vector<16x16xf32>
    %c0_69 = arith.constant 0 : index
    %c2_70 = arith.constant 2 : index
    %c0_71 = arith.constant 0 : index
    %c0_72 = arith.constant 0 : index
    %36 = vector.load %arg2[%c0_69, %c2_70, %c0_71, %c0_72] : memref<1x4x18x18xf32, #tpu.memory_space<vmem>>, vector<1x1x16x16xf32>
    %37 = vector.shape_cast %36 : vector<1x1x16x16xf32> to vector<16x16xf32>
    %c0_73 = arith.constant 0 : index
    %c2_74 = arith.constant 2 : index
    %c0_75 = arith.constant 0 : index
    %c1_76 = arith.constant 1 : index
    %38 = vector.load %arg2[%c0_73, %c2_74, %c0_75, %c1_76] : memref<1x4x18x18xf32, #tpu.memory_space<vmem>>, vector<1x1x16x16xf32>
    %39 = vector.shape_cast %38 : vector<1x1x16x16xf32> to vector<16x16xf32>
    %c0_77 = arith.constant 0 : index
    %c2_78 = arith.constant 2 : index
    %c0_79 = arith.constant 0 : index
    %c2_80 = arith.constant 2 : index
    %40 = vector.load %arg2[%c0_77, %c2_78, %c0_79, %c2_80] : memref<1x4x18x18xf32, #tpu.memory_space<vmem>>, vector<1x1x16x16xf32>
    %41 = vector.shape_cast %40 : vector<1x1x16x16xf32> to vector<16x16xf32>
    %c0_81 = arith.constant 0 : index
    %c2_82 = arith.constant 2 : index
    %c1_83 = arith.constant 1 : index
    %c0_84 = arith.constant 0 : index
    %42 = vector.load %arg2[%c0_81, %c2_82, %c1_83, %c0_84] : memref<1x4x18x18xf32, #tpu.memory_space<vmem>>, vector<1x1x16x16xf32>
    %43 = vector.shape_cast %42 : vector<1x1x16x16xf32> to vector<16x16xf32>
    %c0_85 = arith.constant 0 : index
    %c2_86 = arith.constant 2 : index
    %c1_87 = arith.constant 1 : index
    %c1_88 = arith.constant 1 : index
    %44 = vector.load %arg2[%c0_85, %c2_86, %c1_87, %c1_88] : memref<1x4x18x18xf32, #tpu.memory_space<vmem>>, vector<1x1x16x16xf32>
    %45 = vector.shape_cast %44 : vector<1x1x16x16xf32> to vector<16x16xf32>
    %c0_89 = arith.constant 0 : index
    %c2_90 = arith.constant 2 : index
    %c1_91 = arith.constant 1 : index
    %c2_92 = arith.constant 2 : index
    %46 = vector.load %arg2[%c0_89, %c2_90, %c1_91, %c2_92] : memref<1x4x18x18xf32, #tpu.memory_space<vmem>>, vector<1x1x16x16xf32>
    %47 = vector.shape_cast %46 : vector<1x1x16x16xf32> to vector<16x16xf32>
    %c0_93 = arith.constant 0 : index
    %c2_94 = arith.constant 2 : index
    %c2_95 = arith.constant 2 : index
    %c0_96 = arith.constant 0 : index
    %48 = vector.load %arg2[%c0_93, %c2_94, %c2_95, %c0_96] : memref<1x4x18x18xf32, #tpu.memory_space<vmem>>, vector<1x1x16x16xf32>
    %49 = vector.shape_cast %48 : vector<1x1x16x16xf32> to vector<16x16xf32>
    %c0_97 = arith.constant 0 : index
    %c2_98 = arith.constant 2 : index
    %c2_99 = arith.constant 2 : index
    %c1_100 = arith.constant 1 : index
    %50 = vector.load %arg2[%c0_97, %c2_98, %c2_99, %c1_100] : memref<1x4x18x18xf32, #tpu.memory_space<vmem>>, vector<1x1x16x16xf32>
    %51 = vector.shape_cast %50 : vector<1x1x16x16xf32> to vector<16x16xf32>
    %c0_101 = arith.constant 0 : index
    %c2_102 = arith.constant 2 : index
    %c2_103 = arith.constant 2 : index
    %c2_104 = arith.constant 2 : index
    %52 = vector.load %arg2[%c0_101, %c2_102, %c2_103, %c2_104] : memref<1x4x18x18xf32, #tpu.memory_space<vmem>>, vector<1x1x16x16xf32>
    %53 = vector.shape_cast %52 : vector<1x1x16x16xf32> to vector<16x16xf32>
    %c0_105 = arith.constant 0 : index
    %c3 = arith.constant 3 : index
    %c0_106 = arith.constant 0 : index
    %c0_107 = arith.constant 0 : index
    %54 = vector.load %arg2[%c0_105, %c3, %c0_106, %c0_107] : memref<1x4x18x18xf32, #tpu.memory_space<vmem>>, vector<1x1x16x16xf32>
    %55 = vector.shape_cast %54 : vector<1x1x16x16xf32> to vector<16x16xf32>
    %c0_108 = arith.constant 0 : index
    %c3_109 = arith.constant 3 : index
    %c0_110 = arith.constant 0 : index
    %c1_111 = arith.constant 1 : index
    %56 = vector.load %arg2[%c0_108, %c3_109, %c0_110, %c1_111] : memref<1x4x18x18xf32, #tpu.memory_space<vmem>>, vector<1x1x16x16xf32>
    %57 = vector.shape_cast %56 : vector<1x1x16x16xf32> to vector<16x16xf32>
    %c0_112 = arith.constant 0 : index
    %c3_113 = arith.constant 3 : index
    %c0_114 = arith.constant 0 : index
    %c2_115 = arith.constant 2 : index
    %58 = vector.load %arg2[%c0_112, %c3_113, %c0_114, %c2_115] : memref<1x4x18x18xf32, #tpu.memory_space<vmem>>, vector<1x1x16x16xf32>
    %59 = vector.shape_cast %58 : vector<1x1x16x16xf32> to vector<16x16xf32>
    %c0_116 = arith.constant 0 : index
    %c3_117 = arith.constant 3 : index
    %c1_118 = arith.constant 1 : index
    %c0_119 = arith.constant 0 : index
    %60 = vector.load %arg2[%c0_116, %c3_117, %c1_118, %c0_119] : memref<1x4x18x18xf32, #tpu.memory_space<vmem>>, vector<1x1x16x16xf32>
    %61 = vector.shape_cast %60 : vector<1x1x16x16xf32> to vector<16x16xf32>
    %c0_120 = arith.constant 0 : index
    %c3_121 = arith.constant 3 : index
    %c1_122 = arith.constant 1 : index
    %c1_123 = arith.constant 1 : index
    %62 = vector.load %arg2[%c0_120, %c3_121, %c1_122, %c1_123] : memref<1x4x18x18xf32, #tpu.memory_space<vmem>>, vector<1x1x16x16xf32>
    %63 = vector.shape_cast %62 : vector<1x1x16x16xf32> to vector<16x16xf32>
    %c0_124 = arith.constant 0 : index
    %c3_125 = arith.constant 3 : index
    %c1_126 = arith.constant 1 : index
    %c2_127 = arith.constant 2 : index
    %64 = vector.load %arg2[%c0_124, %c3_125, %c1_126, %c2_127] : memref<1x4x18x18xf32, #tpu.memory_space<vmem>>, vector<1x1x16x16xf32>
    %65 = vector.shape_cast %64 : vector<1x1x16x16xf32> to vector<16x16xf32>
    %c0_128 = arith.constant 0 : index
    %c3_129 = arith.constant 3 : index
    %c2_130 = arith.constant 2 : index
    %c0_131 = arith.constant 0 : index
    %66 = vector.load %arg2[%c0_128, %c3_129, %c2_130, %c0_131] : memref<1x4x18x18xf32, #tpu.memory_space<vmem>>, vector<1x1x16x16xf32>
    %67 = vector.shape_cast %66 : vector<1x1x16x16xf32> to vector<16x16xf32>
    %c0_132 = arith.constant 0 : index
    %c3_133 = arith.constant 3 : index
    %c2_134 = arith.constant 2 : index
    %c1_135 = arith.constant 1 : index
    %68 = vector.load %arg2[%c0_132, %c3_133, %c2_134, %c1_135] : memref<1x4x18x18xf32, #tpu.memory_space<vmem>>, vector<1x1x16x16xf32>
    %69 = vector.shape_cast %68 : vector<1x1x16x16xf32> to vector<16x16xf32>
    %c0_136 = arith.constant 0 : index
    %c3_137 = arith.constant 3 : index
    %c2_138 = arith.constant 2 : index
    %c2_139 = arith.constant 2 : index
    %70 = vector.load %arg2[%c0_136, %c3_137, %c2_138, %c2_139] : memref<1x4x18x18xf32, #tpu.memory_space<vmem>>, vector<1x1x16x16xf32>
    %71 = vector.shape_cast %70 : vector<1x1x16x16xf32> to vector<16x16xf32>
    %c0_140 = arith.constant 0 : index
    %c0_141 = arith.constant 0 : index
    %c0_142 = arith.constant 0 : index
    %72 = vector.load %arg3[%c0_140, %c0_141, %c0_142] : memref<2x16x32xf32, #tpu.memory_space<vmem>>, vector<1x16x32xf32>
    %73 = vector.shape_cast %72 : vector<1x16x32xf32> to vector<16x32xf32>
    %c1_143 = arith.constant 1 : index
    %c0_144 = arith.constant 0 : index
    %c0_145 = arith.constant 0 : index
    %74 = vector.load %arg3[%c1_143, %c0_144, %c0_145] : memref<2x16x32xf32, #tpu.memory_space<vmem>>, vector<1x16x32xf32>
    %75 = vector.shape_cast %74 : vector<1x16x32xf32> to vector<16x32xf32>
    %c0_146 = arith.constant 0 : index
    %c0_147 = arith.constant 0 : index
    %c0_148 = arith.constant 0 : index
    %76 = vector.load %arg4[%c0_146, %c0_147, %c0_148] : memref<2x32x16xf32, #tpu.memory_space<vmem>>, vector<1x32x16xf32>
    %77 = vector.shape_cast %76 : vector<1x32x16xf32> to vector<32x16xf32>
    %c1_149 = arith.constant 1 : index
    %c0_150 = arith.constant 0 : index
    %c0_151 = arith.constant 0 : index
    %78 = vector.load %arg4[%c1_149, %c0_150, %c0_151] : memref<2x32x16xf32, #tpu.memory_space<vmem>>, vector<1x32x16xf32>
    %79 = vector.shape_cast %78 : vector<1x32x16xf32> to vector<32x16xf32>
    %cst = arith.constant 0.000000e+00 : f32
    %80 = vector.broadcast %cst : f32 to vector<16x16xf32>
    %c15 = arith.constant 15 : index
    %81 = memref.load %arg1[%c15] : memref<256xf32, #tpu.memory_space<smem>>
    %82 = vector.broadcast %81 : f32 to vector<16x16xf32>
    %83 = arith.mulf %1, %82 : vector<16x16xf32>
    %84 = arith.addf %80, %83 : vector<16x16xf32>
    %c13 = arith.constant 13 : index
    %85 = memref.load %arg1[%c13] : memref<256xf32, #tpu.memory_space<smem>>
    %86 = vector.broadcast %85 : f32 to vector<16x16xf32>
    %87 = arith.mulf %3, %86 : vector<16x16xf32>
    %88 = arith.addf %84, %87 : vector<16x16xf32>
    %c7 = arith.constant 7 : index
    %89 = memref.load %arg1[%c7] : memref<256xf32, #tpu.memory_space<smem>>
    %90 = vector.broadcast %89 : f32 to vector<16x16xf32>
    %91 = arith.mulf %7, %90 : vector<16x16xf32>
    %92 = arith.addf %88, %91 : vector<16x16xf32>
    %c5 = arith.constant 5 : index
    %93 = memref.load %arg1[%c5] : memref<256xf32, #tpu.memory_space<smem>>
    %94 = vector.broadcast %93 : f32 to vector<16x16xf32>
    %95 = arith.mulf %9, %94 : vector<16x16xf32>
    %96 = arith.addf %92, %95 : vector<16x16xf32>
    %c79 = arith.constant 79 : index
    %97 = memref.load %arg1[%c79] : memref<256xf32, #tpu.memory_space<smem>>
    %98 = vector.broadcast %97 : f32 to vector<16x16xf32>
    %99 = arith.mulf %19, %98 : vector<16x16xf32>
    %100 = arith.addf %96, %99 : vector<16x16xf32>
    %c77 = arith.constant 77 : index
    %101 = memref.load %arg1[%c77] : memref<256xf32, #tpu.memory_space<smem>>
    %102 = vector.broadcast %101 : f32 to vector<16x16xf32>
    %103 = arith.mulf %21, %102 : vector<16x16xf32>
    %104 = arith.addf %100, %103 : vector<16x16xf32>
    %c71 = arith.constant 71 : index
    %105 = memref.load %arg1[%c71] : memref<256xf32, #tpu.memory_space<smem>>
    %106 = vector.broadcast %105 : f32 to vector<16x16xf32>
    %107 = arith.mulf %25, %106 : vector<16x16xf32>
    %108 = arith.addf %104, %107 : vector<16x16xf32>
    %c69 = arith.constant 69 : index
    %109 = memref.load %arg1[%c69] : memref<256xf32, #tpu.memory_space<smem>>
    %110 = vector.broadcast %109 : f32 to vector<16x16xf32>
    %111 = arith.mulf %27, %110 : vector<16x16xf32>
    %112 = arith.addf %108, %111 : vector<16x16xf32>
    %c143 = arith.constant 143 : index
    %113 = memref.load %arg1[%c143] : memref<256xf32, #tpu.memory_space<smem>>
    %114 = vector.broadcast %113 : f32 to vector<16x16xf32>
    %115 = arith.mulf %37, %114 : vector<16x16xf32>
    %116 = arith.addf %112, %115 : vector<16x16xf32>
    %c141 = arith.constant 141 : index
    %117 = memref.load %arg1[%c141] : memref<256xf32, #tpu.memory_space<smem>>
    %118 = vector.broadcast %117 : f32 to vector<16x16xf32>
    %119 = arith.mulf %39, %118 : vector<16x16xf32>
    %120 = arith.addf %116, %119 : vector<16x16xf32>
    %c135 = arith.constant 135 : index
    %121 = memref.load %arg1[%c135] : memref<256xf32, #tpu.memory_space<smem>>
    %122 = vector.broadcast %121 : f32 to vector<16x16xf32>
    %123 = arith.mulf %43, %122 : vector<16x16xf32>
    %124 = arith.addf %120, %123 : vector<16x16xf32>
    %c133 = arith.constant 133 : index
    %125 = memref.load %arg1[%c133] : memref<256xf32, #tpu.memory_space<smem>>
    %126 = vector.broadcast %125 : f32 to vector<16x16xf32>
    %127 = arith.mulf %45, %126 : vector<16x16xf32>
    %128 = arith.addf %124, %127 : vector<16x16xf32>
    %c207 = arith.constant 207 : index
    %129 = memref.load %arg1[%c207] : memref<256xf32, #tpu.memory_space<smem>>
    %130 = vector.broadcast %129 : f32 to vector<16x16xf32>
    %131 = arith.mulf %55, %130 : vector<16x16xf32>
    %132 = arith.addf %128, %131 : vector<16x16xf32>
    %c205 = arith.constant 205 : index
    %133 = memref.load %arg1[%c205] : memref<256xf32, #tpu.memory_space<smem>>
    %134 = vector.broadcast %133 : f32 to vector<16x16xf32>
    %135 = arith.mulf %57, %134 : vector<16x16xf32>
    %136 = arith.addf %132, %135 : vector<16x16xf32>
    %c199 = arith.constant 199 : index
    %137 = memref.load %arg1[%c199] : memref<256xf32, #tpu.memory_space<smem>>
    %138 = vector.broadcast %137 : f32 to vector<16x16xf32>
    %139 = arith.mulf %61, %138 : vector<16x16xf32>
    %140 = arith.addf %136, %139 : vector<16x16xf32>
    %c197 = arith.constant 197 : index
    %141 = memref.load %arg1[%c197] : memref<256xf32, #tpu.memory_space<smem>>
    %142 = vector.broadcast %141 : f32 to vector<16x16xf32>
    %143 = arith.mulf %63, %142 : vector<16x16xf32>
    %144 = arith.addf %140, %143 : vector<16x16xf32>
    %cst_152 = arith.constant 0.000000e+00 : f32
    %145 = vector.broadcast %cst_152 : f32 to vector<16x16xf32>
    %c14 = arith.constant 14 : index
    %146 = memref.load %arg1[%c14] : memref<256xf32, #tpu.memory_space<smem>>
    %147 = vector.broadcast %146 : f32 to vector<16x16xf32>
    %148 = arith.mulf %3, %147 : vector<16x16xf32>
    %149 = arith.addf %145, %148 : vector<16x16xf32>
    %c12 = arith.constant 12 : index
    %150 = memref.load %arg1[%c12] : memref<256xf32, #tpu.memory_space<smem>>
    %151 = vector.broadcast %150 : f32 to vector<16x16xf32>
    %152 = arith.mulf %5, %151 : vector<16x16xf32>
    %153 = arith.addf %149, %152 : vector<16x16xf32>
    %c6 = arith.constant 6 : index
    %154 = memref.load %arg1[%c6] : memref<256xf32, #tpu.memory_space<smem>>
    %155 = vector.broadcast %154 : f32 to vector<16x16xf32>
    %156 = arith.mulf %9, %155 : vector<16x16xf32>
    %157 = arith.addf %153, %156 : vector<16x16xf32>
    %c4 = arith.constant 4 : index
    %158 = memref.load %arg1[%c4] : memref<256xf32, #tpu.memory_space<smem>>
    %159 = vector.broadcast %158 : f32 to vector<16x16xf32>
    %160 = arith.mulf %11, %159 : vector<16x16xf32>
    %161 = arith.addf %157, %160 : vector<16x16xf32>
    %c78 = arith.constant 78 : index
    %162 = memref.load %arg1[%c78] : memref<256xf32, #tpu.memory_space<smem>>
    %163 = vector.broadcast %162 : f32 to vector<16x16xf32>
    %164 = arith.mulf %21, %163 : vector<16x16xf32>
    %165 = arith.addf %161, %164 : vector<16x16xf32>
    %c76 = arith.constant 76 : index
    %166 = memref.load %arg1[%c76] : memref<256xf32, #tpu.memory_space<smem>>
    %167 = vector.broadcast %166 : f32 to vector<16x16xf32>
    %168 = arith.mulf %23, %167 : vector<16x16xf32>
    %169 = arith.addf %165, %168 : vector<16x16xf32>
    %c70 = arith.constant 70 : index
    %170 = memref.load %arg1[%c70] : memref<256xf32, #tpu.memory_space<smem>>
    %171 = vector.broadcast %170 : f32 to vector<16x16xf32>
    %172 = arith.mulf %27, %171 : vector<16x16xf32>
    %173 = arith.addf %169, %172 : vector<16x16xf32>
    %c68 = arith.constant 68 : index
    %174 = memref.load %arg1[%c68] : memref<256xf32, #tpu.memory_space<smem>>
    %175 = vector.broadcast %174 : f32 to vector<16x16xf32>
    %176 = arith.mulf %29, %175 : vector<16x16xf32>
    %177 = arith.addf %173, %176 : vector<16x16xf32>
    %c142 = arith.constant 142 : index
    %178 = memref.load %arg1[%c142] : memref<256xf32, #tpu.memory_space<smem>>
    %179 = vector.broadcast %178 : f32 to vector<16x16xf32>
    %180 = arith.mulf %39, %179 : vector<16x16xf32>
    %181 = arith.addf %177, %180 : vector<16x16xf32>
    %c140 = arith.constant 140 : index
    %182 = memref.load %arg1[%c140] : memref<256xf32, #tpu.memory_space<smem>>
    %183 = vector.broadcast %182 : f32 to vector<16x16xf32>
    %184 = arith.mulf %41, %183 : vector<16x16xf32>
    %185 = arith.addf %181, %184 : vector<16x16xf32>
    %c134 = arith.constant 134 : index
    %186 = memref.load %arg1[%c134] : memref<256xf32, #tpu.memory_space<smem>>
    %187 = vector.broadcast %186 : f32 to vector<16x16xf32>
    %188 = arith.mulf %45, %187 : vector<16x16xf32>
    %189 = arith.addf %185, %188 : vector<16x16xf32>
    %c132 = arith.constant 132 : index
    %190 = memref.load %arg1[%c132] : memref<256xf32, #tpu.memory_space<smem>>
    %191 = vector.broadcast %190 : f32 to vector<16x16xf32>
    %192 = arith.mulf %47, %191 : vector<16x16xf32>
    %193 = arith.addf %189, %192 : vector<16x16xf32>
    %c206 = arith.constant 206 : index
    %194 = memref.load %arg1[%c206] : memref<256xf32, #tpu.memory_space<smem>>
    %195 = vector.broadcast %194 : f32 to vector<16x16xf32>
    %196 = arith.mulf %57, %195 : vector<16x16xf32>
    %197 = arith.addf %193, %196 : vector<16x16xf32>
    %c204 = arith.constant 204 : index
    %198 = memref.load %arg1[%c204] : memref<256xf32, #tpu.memory_space<smem>>
    %199 = vector.broadcast %198 : f32 to vector<16x16xf32>
    %200 = arith.mulf %59, %199 : vector<16x16xf32>
    %201 = arith.addf %197, %200 : vector<16x16xf32>
    %c198 = arith.constant 198 : index
    %202 = memref.load %arg1[%c198] : memref<256xf32, #tpu.memory_space<smem>>
    %203 = vector.broadcast %202 : f32 to vector<16x16xf32>
    %204 = arith.mulf %63, %203 : vector<16x16xf32>
    %205 = arith.addf %201, %204 : vector<16x16xf32>
    %c196 = arith.constant 196 : index
    %206 = memref.load %arg1[%c196] : memref<256xf32, #tpu.memory_space<smem>>
    %207 = vector.broadcast %206 : f32 to vector<16x16xf32>
    %208 = arith.mulf %65, %207 : vector<16x16xf32>
    %209 = arith.addf %205, %208 : vector<16x16xf32>
    %cst_153 = arith.constant 0.000000e+00 : f32
    %210 = vector.broadcast %cst_153 : f32 to vector<16x16xf32>
    %c11 = arith.constant 11 : index
    %211 = memref.load %arg1[%c11] : memref<256xf32, #tpu.memory_space<smem>>
    %212 = vector.broadcast %211 : f32 to vector<16x16xf32>
    %213 = arith.mulf %7, %212 : vector<16x16xf32>
    %214 = arith.addf %210, %213 : vector<16x16xf32>
    %c9 = arith.constant 9 : index
    %215 = memref.load %arg1[%c9] : memref<256xf32, #tpu.memory_space<smem>>
    %216 = vector.broadcast %215 : f32 to vector<16x16xf32>
    %217 = arith.mulf %9, %216 : vector<16x16xf32>
    %218 = arith.addf %214, %217 : vector<16x16xf32>
    %c3_154 = arith.constant 3 : index
    %219 = memref.load %arg1[%c3_154] : memref<256xf32, #tpu.memory_space<smem>>
    %220 = vector.broadcast %219 : f32 to vector<16x16xf32>
    %221 = arith.mulf %13, %220 : vector<16x16xf32>
    %222 = arith.addf %218, %221 : vector<16x16xf32>
    %c1_155 = arith.constant 1 : index
    %223 = memref.load %arg1[%c1_155] : memref<256xf32, #tpu.memory_space<smem>>
    %224 = vector.broadcast %223 : f32 to vector<16x16xf32>
    %225 = arith.mulf %15, %224 : vector<16x16xf32>
    %226 = arith.addf %222, %225 : vector<16x16xf32>
    %c75 = arith.constant 75 : index
    %227 = memref.load %arg1[%c75] : memref<256xf32, #tpu.memory_space<smem>>
    %228 = vector.broadcast %227 : f32 to vector<16x16xf32>
    %229 = arith.mulf %25, %228 : vector<16x16xf32>
    %230 = arith.addf %226, %229 : vector<16x16xf32>
    %c73 = arith.constant 73 : index
    %231 = memref.load %arg1[%c73] : memref<256xf32, #tpu.memory_space<smem>>
    %232 = vector.broadcast %231 : f32 to vector<16x16xf32>
    %233 = arith.mulf %27, %232 : vector<16x16xf32>
    %234 = arith.addf %230, %233 : vector<16x16xf32>
    %c67 = arith.constant 67 : index
    %235 = memref.load %arg1[%c67] : memref<256xf32, #tpu.memory_space<smem>>
    %236 = vector.broadcast %235 : f32 to vector<16x16xf32>
    %237 = arith.mulf %31, %236 : vector<16x16xf32>
    %238 = arith.addf %234, %237 : vector<16x16xf32>
    %c65 = arith.constant 65 : index
    %239 = memref.load %arg1[%c65] : memref<256xf32, #tpu.memory_space<smem>>
    %240 = vector.broadcast %239 : f32 to vector<16x16xf32>
    %241 = arith.mulf %33, %240 : vector<16x16xf32>
    %242 = arith.addf %238, %241 : vector<16x16xf32>
    %c139 = arith.constant 139 : index
    %243 = memref.load %arg1[%c139] : memref<256xf32, #tpu.memory_space<smem>>
    %244 = vector.broadcast %243 : f32 to vector<16x16xf32>
    %245 = arith.mulf %43, %244 : vector<16x16xf32>
    %246 = arith.addf %242, %245 : vector<16x16xf32>
    %c137 = arith.constant 137 : index
    %247 = memref.load %arg1[%c137] : memref<256xf32, #tpu.memory_space<smem>>
    %248 = vector.broadcast %247 : f32 to vector<16x16xf32>
    %249 = arith.mulf %45, %248 : vector<16x16xf32>
    %250 = arith.addf %246, %249 : vector<16x16xf32>
    %c131 = arith.constant 131 : index
    %251 = memref.load %arg1[%c131] : memref<256xf32, #tpu.memory_space<smem>>
    %252 = vector.broadcast %251 : f32 to vector<16x16xf32>
    %253 = arith.mulf %49, %252 : vector<16x16xf32>
    %254 = arith.addf %250, %253 : vector<16x16xf32>
    %c129 = arith.constant 129 : index
    %255 = memref.load %arg1[%c129] : memref<256xf32, #tpu.memory_space<smem>>
    %256 = vector.broadcast %255 : f32 to vector<16x16xf32>
    %257 = arith.mulf %51, %256 : vector<16x16xf32>
    %258 = arith.addf %254, %257 : vector<16x16xf32>
    %c203 = arith.constant 203 : index
    %259 = memref.load %arg1[%c203] : memref<256xf32, #tpu.memory_space<smem>>
    %260 = vector.broadcast %259 : f32 to vector<16x16xf32>
    %261 = arith.mulf %61, %260 : vector<16x16xf32>
    %262 = arith.addf %258, %261 : vector<16x16xf32>
    %c201 = arith.constant 201 : index
    %263 = memref.load %arg1[%c201] : memref<256xf32, #tpu.memory_space<smem>>
    %264 = vector.broadcast %263 : f32 to vector<16x16xf32>
    %265 = arith.mulf %63, %264 : vector<16x16xf32>
    %266 = arith.addf %262, %265 : vector<16x16xf32>
    %c195 = arith.constant 195 : index
    %267 = memref.load %arg1[%c195] : memref<256xf32, #tpu.memory_space<smem>>
    %268 = vector.broadcast %267 : f32 to vector<16x16xf32>
    %269 = arith.mulf %67, %268 : vector<16x16xf32>
    %270 = arith.addf %266, %269 : vector<16x16xf32>
    %c193 = arith.constant 193 : index
    %271 = memref.load %arg1[%c193] : memref<256xf32, #tpu.memory_space<smem>>
    %272 = vector.broadcast %271 : f32 to vector<16x16xf32>
    %273 = arith.mulf %69, %272 : vector<16x16xf32>
    %274 = arith.addf %270, %273 : vector<16x16xf32>
    %cst_156 = arith.constant 0.000000e+00 : f32
    %275 = vector.broadcast %cst_156 : f32 to vector<16x16xf32>
    %c10 = arith.constant 10 : index
    %276 = memref.load %arg1[%c10] : memref<256xf32, #tpu.memory_space<smem>>
    %277 = vector.broadcast %276 : f32 to vector<16x16xf32>
    %278 = arith.mulf %9, %277 : vector<16x16xf32>
    %279 = arith.addf %275, %278 : vector<16x16xf32>
    %c8 = arith.constant 8 : index
    %280 = memref.load %arg1[%c8] : memref<256xf32, #tpu.memory_space<smem>>
    %281 = vector.broadcast %280 : f32 to vector<16x16xf32>
    %282 = arith.mulf %11, %281 : vector<16x16xf32>
    %283 = arith.addf %279, %282 : vector<16x16xf32>
    %c2_157 = arith.constant 2 : index
    %284 = memref.load %arg1[%c2_157] : memref<256xf32, #tpu.memory_space<smem>>
    %285 = vector.broadcast %284 : f32 to vector<16x16xf32>
    %286 = arith.mulf %15, %285 : vector<16x16xf32>
    %287 = arith.addf %283, %286 : vector<16x16xf32>
    %c0_158 = arith.constant 0 : index
    %288 = memref.load %arg1[%c0_158] : memref<256xf32, #tpu.memory_space<smem>>
    %289 = vector.broadcast %288 : f32 to vector<16x16xf32>
    %290 = arith.mulf %17, %289 : vector<16x16xf32>
    %291 = arith.addf %287, %290 : vector<16x16xf32>
    %c74 = arith.constant 74 : index
    %292 = memref.load %arg1[%c74] : memref<256xf32, #tpu.memory_space<smem>>
    %293 = vector.broadcast %292 : f32 to vector<16x16xf32>
    %294 = arith.mulf %27, %293 : vector<16x16xf32>
    %295 = arith.addf %291, %294 : vector<16x16xf32>
    %c72 = arith.constant 72 : index
    %296 = memref.load %arg1[%c72] : memref<256xf32, #tpu.memory_space<smem>>
    %297 = vector.broadcast %296 : f32 to vector<16x16xf32>
    %298 = arith.mulf %29, %297 : vector<16x16xf32>
    %299 = arith.addf %295, %298 : vector<16x16xf32>
    %c66 = arith.constant 66 : index
    %300 = memref.load %arg1[%c66] : memref<256xf32, #tpu.memory_space<smem>>
    %301 = vector.broadcast %300 : f32 to vector<16x16xf32>
    %302 = arith.mulf %33, %301 : vector<16x16xf32>
    %303 = arith.addf %299, %302 : vector<16x16xf32>
    %c64 = arith.constant 64 : index
    %304 = memref.load %arg1[%c64] : memref<256xf32, #tpu.memory_space<smem>>
    %305 = vector.broadcast %304 : f32 to vector<16x16xf32>
    %306 = arith.mulf %35, %305 : vector<16x16xf32>
    %307 = arith.addf %303, %306 : vector<16x16xf32>
    %c138 = arith.constant 138 : index
    %308 = memref.load %arg1[%c138] : memref<256xf32, #tpu.memory_space<smem>>
    %309 = vector.broadcast %308 : f32 to vector<16x16xf32>
    %310 = arith.mulf %45, %309 : vector<16x16xf32>
    %311 = arith.addf %307, %310 : vector<16x16xf32>
    %c136 = arith.constant 136 : index
    %312 = memref.load %arg1[%c136] : memref<256xf32, #tpu.memory_space<smem>>
    %313 = vector.broadcast %312 : f32 to vector<16x16xf32>
    %314 = arith.mulf %47, %313 : vector<16x16xf32>
    %315 = arith.addf %311, %314 : vector<16x16xf32>
    %c130 = arith.constant 130 : index
    %316 = memref.load %arg1[%c130] : memref<256xf32, #tpu.memory_space<smem>>
    %317 = vector.broadcast %316 : f32 to vector<16x16xf32>
    %318 = arith.mulf %51, %317 : vector<16x16xf32>
    %319 = arith.addf %315, %318 : vector<16x16xf32>
    %c128 = arith.constant 128 : index
    %320 = memref.load %arg1[%c128] : memref<256xf32, #tpu.memory_space<smem>>
    %321 = vector.broadcast %320 : f32 to vector<16x16xf32>
    %322 = arith.mulf %53, %321 : vector<16x16xf32>
    %323 = arith.addf %319, %322 : vector<16x16xf32>
    %c202 = arith.constant 202 : index
    %324 = memref.load %arg1[%c202] : memref<256xf32, #tpu.memory_space<smem>>
    %325 = vector.broadcast %324 : f32 to vector<16x16xf32>
    %326 = arith.mulf %63, %325 : vector<16x16xf32>
    %327 = arith.addf %323, %326 : vector<16x16xf32>
    %c200 = arith.constant 200 : index
    %328 = memref.load %arg1[%c200] : memref<256xf32, #tpu.memory_space<smem>>
    %329 = vector.broadcast %328 : f32 to vector<16x16xf32>
    %330 = arith.mulf %65, %329 : vector<16x16xf32>
    %331 = arith.addf %327, %330 : vector<16x16xf32>
    %c194 = arith.constant 194 : index
    %332 = memref.load %arg1[%c194] : memref<256xf32, #tpu.memory_space<smem>>
    %333 = vector.broadcast %332 : f32 to vector<16x16xf32>
    %334 = arith.mulf %69, %333 : vector<16x16xf32>
    %335 = arith.addf %331, %334 : vector<16x16xf32>
    %c192 = arith.constant 192 : index
    %336 = memref.load %arg1[%c192] : memref<256xf32, #tpu.memory_space<smem>>
    %337 = vector.broadcast %336 : f32 to vector<16x16xf32>
    %338 = arith.mulf %71, %337 : vector<16x16xf32>
    %339 = arith.addf %335, %338 : vector<16x16xf32>
    %340 = vector.shape_cast %144 : vector<16x16xf32> to vector<1x16x16xf32>
    %cst_159 = arith.constant dense<0.000000e+00> : vector<1xf32>
    %341 = vector.multi_reduction <add>, %340, %cst_159 [1, 2] : vector<1x16x16xf32> to vector<1xf32>
    %342 = vector.shape_cast %341 : vector<1xf32> to vector<1x1x1xf32>
    %343 = vector.extract %342[0, 0, 0] : f32 from vector<1x1x1xf32>
    %344 = vector.shape_cast %209 : vector<16x16xf32> to vector<1x16x16xf32>
    %cst_160 = arith.constant dense<0.000000e+00> : vector<1xf32>
    %345 = vector.multi_reduction <add>, %344, %cst_160 [1, 2] : vector<1x16x16xf32> to vector<1xf32>
    %346 = vector.shape_cast %345 : vector<1xf32> to vector<1x1x1xf32>
    %347 = vector.extract %346[0, 0, 0] : f32 from vector<1x1x1xf32>
    %348 = arith.addf %343, %347 : f32
    %349 = vector.shape_cast %274 : vector<16x16xf32> to vector<1x16x16xf32>
    %cst_161 = arith.constant dense<0.000000e+00> : vector<1xf32>
    %350 = vector.multi_reduction <add>, %349, %cst_161 [1, 2] : vector<1x16x16xf32> to vector<1xf32>
    %351 = vector.shape_cast %350 : vector<1xf32> to vector<1x1x1xf32>
    %352 = vector.extract %351[0, 0, 0] : f32 from vector<1x1x1xf32>
    %353 = arith.addf %348, %352 : f32
    %354 = vector.shape_cast %339 : vector<16x16xf32> to vector<1x16x16xf32>
    %cst_162 = arith.constant dense<0.000000e+00> : vector<1xf32>
    %355 = vector.multi_reduction <add>, %354, %cst_162 [1, 2] : vector<1x16x16xf32> to vector<1xf32>
    %356 = vector.shape_cast %355 : vector<1xf32> to vector<1x1x1xf32>
    %357 = vector.extract %356[0, 0, 0] : f32 from vector<1x1x1xf32>
    %358 = arith.addf %353, %357 : f32
    %cst_163 = arith.constant 9.765625E-4 : f32
    %359 = arith.mulf %358, %cst_163 : f32
    %360 = vector.broadcast %359 : f32 to vector<16x16xf32>
    %361 = arith.subf %144, %360 : vector<16x16xf32>
    %362 = vector.broadcast %359 : f32 to vector<16x16xf32>
    %363 = arith.subf %209, %362 : vector<16x16xf32>
    %364 = vector.broadcast %359 : f32 to vector<16x16xf32>
    %365 = arith.subf %274, %364 : vector<16x16xf32>
    %366 = vector.broadcast %359 : f32 to vector<16x16xf32>
    %367 = arith.subf %339, %366 : vector<16x16xf32>
    %368 = arith.mulf %361, %361 : vector<16x16xf32>
    %369 = vector.shape_cast %368 : vector<16x16xf32> to vector<1x16x16xf32>
    %cst_164 = arith.constant dense<0.000000e+00> : vector<1xf32>
    %370 = vector.multi_reduction <add>, %369, %cst_164 [1, 2] : vector<1x16x16xf32> to vector<1xf32>
    %371 = vector.shape_cast %370 : vector<1xf32> to vector<1x1x1xf32>
    %372 = vector.extract %371[0, 0, 0] : f32 from vector<1x1x1xf32>
    %373 = arith.mulf %363, %363 : vector<16x16xf32>
    %374 = vector.shape_cast %373 : vector<16x16xf32> to vector<1x16x16xf32>
    %cst_165 = arith.constant dense<0.000000e+00> : vector<1xf32>
    %375 = vector.multi_reduction <add>, %374, %cst_165 [1, 2] : vector<1x16x16xf32> to vector<1xf32>
    %376 = vector.shape_cast %375 : vector<1xf32> to vector<1x1x1xf32>
    %377 = vector.extract %376[0, 0, 0] : f32 from vector<1x1x1xf32>
    %378 = arith.addf %372, %377 : f32
    %379 = arith.mulf %365, %365 : vector<16x16xf32>
    %380 = vector.shape_cast %379 : vector<16x16xf32> to vector<1x16x16xf32>
    %cst_166 = arith.constant dense<0.000000e+00> : vector<1xf32>
    %381 = vector.multi_reduction <add>, %380, %cst_166 [1, 2] : vector<1x16x16xf32> to vector<1xf32>
    %382 = vector.shape_cast %381 : vector<1xf32> to vector<1x1x1xf32>
    %383 = vector.extract %382[0, 0, 0] : f32 from vector<1x1x1xf32>
    %384 = arith.addf %378, %383 : f32
    %385 = arith.mulf %367, %367 : vector<16x16xf32>
    %386 = vector.shape_cast %385 : vector<16x16xf32> to vector<1x16x16xf32>
    %cst_167 = arith.constant dense<0.000000e+00> : vector<1xf32>
    %387 = vector.multi_reduction <add>, %386, %cst_167 [1, 2] : vector<1x16x16xf32> to vector<1xf32>
    %388 = vector.shape_cast %387 : vector<1xf32> to vector<1x1x1xf32>
    %389 = vector.extract %388[0, 0, 0] : f32 from vector<1x1x1xf32>
    %390 = arith.addf %384, %389 : f32
    %cst_168 = arith.constant 9.765625E-4 : f32
    %391 = arith.mulf %390, %cst_168 : f32
    %cst_169 = arith.constant 9.99999974E-6 : f32
    %392 = arith.addf %391, %cst_169 : f32
    %393 = math.rsqrt %392 : f32
    %394 = vector.broadcast %393 : f32 to vector<16x16xf32>
    %395 = arith.mulf %361, %394 : vector<16x16xf32>
    %cst_170 = arith.constant 0.000000e+00 : f32
    %396 = vector.broadcast %cst_170 : f32 to vector<16x16xf32>
    %397 = arith.maximumf %395, %396 : vector<16x16xf32>
    %398 = vector.broadcast %393 : f32 to vector<16x16xf32>
    %399 = arith.mulf %363, %398 : vector<16x16xf32>
    %cst_171 = arith.constant 0.000000e+00 : f32
    %400 = vector.broadcast %cst_171 : f32 to vector<16x16xf32>
    %401 = arith.maximumf %399, %400 : vector<16x16xf32>
    %cst_172 = arith.constant dense<0.000000e+00> : vector<16x32xf32>
    %402 = tpu.matmul %397, %73, %cst_172 {dimension_numbers = #tpu.dot_dimension_numbers<[1], [0], [0], [1], [0, 0, 1, 1], [], []>} : vector<16x16xf32>, vector<16x32xf32>, vector<16x32xf32> -> vector<16x32xf32>
    %cst_173 = arith.constant dense<0.000000e+00> : vector<16x32xf32>
    %403 = tpu.matmul %401, %75, %cst_173 {dimension_numbers = #tpu.dot_dimension_numbers<[1], [0], [0], [1], [0, 0, 1, 1], [], []>} : vector<16x16xf32>, vector<16x32xf32>, vector<16x32xf32> -> vector<16x32xf32>
    %404 = arith.addf %402, %403 : vector<16x32xf32>
    %405 = vector.broadcast %393 : f32 to vector<16x16xf32>
    %406 = arith.mulf %365, %405 : vector<16x16xf32>
    %cst_174 = arith.constant 0.000000e+00 : f32
    %407 = vector.broadcast %cst_174 : f32 to vector<16x16xf32>
    %408 = arith.maximumf %406, %407 : vector<16x16xf32>
    %409 = vector.broadcast %393 : f32 to vector<16x16xf32>
    %410 = arith.mulf %367, %409 : vector<16x16xf32>
    %cst_175 = arith.constant 0.000000e+00 : f32
    %411 = vector.broadcast %cst_175 : f32 to vector<16x16xf32>
    %412 = arith.maximumf %410, %411 : vector<16x16xf32>
    %cst_176 = arith.constant dense<0.000000e+00> : vector<16x32xf32>
    %413 = tpu.matmul %408, %73, %cst_176 {dimension_numbers = #tpu.dot_dimension_numbers<[1], [0], [0], [1], [0, 0, 1, 1], [], []>} : vector<16x16xf32>, vector<16x32xf32>, vector<16x32xf32> -> vector<16x32xf32>
    %cst_177 = arith.constant dense<0.000000e+00> : vector<16x32xf32>
    %414 = tpu.matmul %412, %75, %cst_177 {dimension_numbers = #tpu.dot_dimension_numbers<[1], [0], [0], [1], [0, 0, 1, 1], [], []>} : vector<16x16xf32>, vector<16x32xf32>, vector<16x32xf32> -> vector<16x32xf32>
    %415 = arith.addf %413, %414 : vector<16x32xf32>
    %cst_178 = arith.constant dense<0.000000e+00> : vector<32x32xf32>
    %416 = tpu.matmul %77, %404, %cst_178 {dimension_numbers = #tpu.dot_dimension_numbers<[1], [0], [0], [1], [0, 0, 1, 1], [], []>} : vector<32x16xf32>, vector<16x32xf32>, vector<32x32xf32> -> vector<32x32xf32>
    %cst_179 = arith.constant dense<0.000000e+00> : vector<32x32xf32>
    %417 = tpu.matmul %79, %415, %cst_179 {dimension_numbers = #tpu.dot_dimension_numbers<[1], [0], [0], [1], [0, 0, 1, 1], [], []>} : vector<32x16xf32>, vector<16x32xf32>, vector<32x32xf32> -> vector<32x32xf32>
    %418 = arith.addf %416, %417 : vector<32x32xf32>
    %c0_180 = arith.constant 0 : index
    %c0_181 = arith.constant 0 : index
    %c0_182 = arith.constant 0 : index
    %c0_183 = arith.constant 0 : index
    %419 = vector.load %arg5[%c0_180, %c0_181, %c0_182, %c0_183] : memref<1x4x32x32xf32, #tpu.memory_space<vmem>>, vector<1x1x32x32xf32>
    %420 = vector.shape_cast %419 : vector<1x1x32x32xf32> to vector<32x32xf32>
    %421 = vector.shape_cast %418 : vector<32x32xf32> to vector<1x1x32x32xf32>
    tpu.vector_store %arg5[%c0_180, %c0_181, %c0_182, %c0_183], %421 {strides = array<i32>} : memref<1x4x32x32xf32, #tpu.memory_space<vmem>>, vector<1x1x32x32xf32>,
    %cst_184 = arith.constant 0.000000e+00 : f32
    %422 = vector.broadcast %cst_184 : f32 to vector<16x16xf32>
    %c31 = arith.constant 31 : index
    %423 = memref.load %arg1[%c31] : memref<256xf32, #tpu.memory_space<smem>>
    %424 = vector.broadcast %423 : f32 to vector<16x16xf32>
    %425 = arith.mulf %1, %424 : vector<16x16xf32>
    %426 = arith.addf %422, %425 : vector<16x16xf32>
    %c29 = arith.constant 29 : index
    %427 = memref.load %arg1[%c29] : memref<256xf32, #tpu.memory_space<smem>>
    %428 = vector.broadcast %427 : f32 to vector<16x16xf32>
    %429 = arith.mulf %3, %428 : vector<16x16xf32>
    %430 = arith.addf %426, %429 : vector<16x16xf32>
    %c23 = arith.constant 23 : index
    %431 = memref.load %arg1[%c23] : memref<256xf32, #tpu.memory_space<smem>>
    %432 = vector.broadcast %431 : f32 to vector<16x16xf32>
    %433 = arith.mulf %7, %432 : vector<16x16xf32>
    %434 = arith.addf %430, %433 : vector<16x16xf32>
    %c21 = arith.constant 21 : index
    %435 = memref.load %arg1[%c21] : memref<256xf32, #tpu.memory_space<smem>>
    %436 = vector.broadcast %435 : f32 to vector<16x16xf32>
    %437 = arith.mulf %9, %436 : vector<16x16xf32>
    %438 = arith.addf %434, %437 : vector<16x16xf32>
    %c95 = arith.constant 95 : index
    %439 = memref.load %arg1[%c95] : memref<256xf32, #tpu.memory_space<smem>>
    %440 = vector.broadcast %439 : f32 to vector<16x16xf32>
    %441 = arith.mulf %19, %440 : vector<16x16xf32>
    %442 = arith.addf %438, %441 : vector<16x16xf32>
    %c93 = arith.constant 93 : index
    %443 = memref.load %arg1[%c93] : memref<256xf32, #tpu.memory_space<smem>>
    %444 = vector.broadcast %443 : f32 to vector<16x16xf32>
    %445 = arith.mulf %21, %444 : vector<16x16xf32>
    %446 = arith.addf %442, %445 : vector<16x16xf32>
    %c87 = arith.constant 87 : index
    %447 = memref.load %arg1[%c87] : memref<256xf32, #tpu.memory_space<smem>>
    %448 = vector.broadcast %447 : f32 to vector<16x16xf32>
    %449 = arith.mulf %25, %448 : vector<16x16xf32>
    %450 = arith.addf %446, %449 : vector<16x16xf32>
    %c85 = arith.constant 85 : index
    %451 = memref.load %arg1[%c85] : memref<256xf32, #tpu.memory_space<smem>>
    %452 = vector.broadcast %451 : f32 to vector<16x16xf32>
    %453 = arith.mulf %27, %452 : vector<16x16xf32>
    %454 = arith.addf %450, %453 : vector<16x16xf32>
    %c159 = arith.constant 159 : index
    %455 = memref.load %arg1[%c159] : memref<256xf32, #tpu.memory_space<smem>>
    %456 = vector.broadcast %455 : f32 to vector<16x16xf32>
    %457 = arith.mulf %37, %456 : vector<16x16xf32>
    %458 = arith.addf %454, %457 : vector<16x16xf32>
    %c157 = arith.constant 157 : index
    %459 = memref.load %arg1[%c157] : memref<256xf32, #tpu.memory_space<smem>>
    %460 = vector.broadcast %459 : f32 to vector<16x16xf32>
    %461 = arith.mulf %39, %460 : vector<16x16xf32>
    %462 = arith.addf %458, %461 : vector<16x16xf32>
    %c151 = arith.constant 151 : index
    %463 = memref.load %arg1[%c151] : memref<256xf32, #tpu.memory_space<smem>>
    %464 = vector.broadcast %463 : f32 to vector<16x16xf32>
    %465 = arith.mulf %43, %464 : vector<16x16xf32>
    %466 = arith.addf %462, %465 : vector<16x16xf32>
    %c149 = arith.constant 149 : index
    %467 = memref.load %arg1[%c149] : memref<256xf32, #tpu.memory_space<smem>>
    %468 = vector.broadcast %467 : f32 to vector<16x16xf32>
    %469 = arith.mulf %45, %468 : vector<16x16xf32>
    %470 = arith.addf %466, %469 : vector<16x16xf32>
    %c223 = arith.constant 223 : index
    %471 = memref.load %arg1[%c223] : memref<256xf32, #tpu.memory_space<smem>>
    %472 = vector.broadcast %471 : f32 to vector<16x16xf32>
    %473 = arith.mulf %55, %472 : vector<16x16xf32>
    %474 = arith.addf %470, %473 : vector<16x16xf32>
    %c221 = arith.constant 221 : index
    %475 = memref.load %arg1[%c221] : memref<256xf32, #tpu.memory_space<smem>>
    %476 = vector.broadcast %475 : f32 to vector<16x16xf32>
    %477 = arith.mulf %57, %476 : vector<16x16xf32>
    %478 = arith.addf %474, %477 : vector<16x16xf32>
    %c215 = arith.constant 215 : index
    %479 = memref.load %arg1[%c215] : memref<256xf32, #tpu.memory_space<smem>>
    %480 = vector.broadcast %479 : f32 to vector<16x16xf32>
    %481 = arith.mulf %61, %480 : vector<16x16xf32>
    %482 = arith.addf %478, %481 : vector<16x16xf32>
    %c213 = arith.constant 213 : index
    %483 = memref.load %arg1[%c213] : memref<256xf32, #tpu.memory_space<smem>>
    %484 = vector.broadcast %483 : f32 to vector<16x16xf32>
    %485 = arith.mulf %63, %484 : vector<16x16xf32>
    %486 = arith.addf %482, %485 : vector<16x16xf32>
    %cst_185 = arith.constant 0.000000e+00 : f32
    %487 = vector.broadcast %cst_185 : f32 to vector<16x16xf32>
    %c30 = arith.constant 30 : index
    %488 = memref.load %arg1[%c30] : memref<256xf32, #tpu.memory_space<smem>>
    %489 = vector.broadcast %488 : f32 to vector<16x16xf32>
    %490 = arith.mulf %3, %489 : vector<16x16xf32>
    %491 = arith.addf %487, %490 : vector<16x16xf32>
    %c28 = arith.constant 28 : index
    %492 = memref.load %arg1[%c28] : memref<256xf32, #tpu.memory_space<smem>>
    %493 = vector.broadcast %492 : f32 to vector<16x16xf32>
    %494 = arith.mulf %5, %493 : vector<16x16xf32>
    %495 = arith.addf %491, %494 : vector<16x16xf32>
    %c22 = arith.constant 22 : index
    %496 = memref.load %arg1[%c22] : memref<256xf32, #tpu.memory_space<smem>>
    %497 = vector.broadcast %496 : f32 to vector<16x16xf32>
    %498 = arith.mulf %9, %497 : vector<16x16xf32>
    %499 = arith.addf %495, %498 : vector<16x16xf32>
    %c20 = arith.constant 20 : index
    %500 = memref.load %arg1[%c20] : memref<256xf32, #tpu.memory_space<smem>>
    %501 = vector.broadcast %500 : f32 to vector<16x16xf32>
    %502 = arith.mulf %11, %501 : vector<16x16xf32>
    %503 = arith.addf %499, %502 : vector<16x16xf32>
    %c94 = arith.constant 94 : index
    %504 = memref.load %arg1[%c94] : memref<256xf32, #tpu.memory_space<smem>>
    %505 = vector.broadcast %504 : f32 to vector<16x16xf32>
    %506 = arith.mulf %21, %505 : vector<16x16xf32>
    %507 = arith.addf %503, %506 : vector<16x16xf32>
    %c92 = arith.constant 92 : index
    %508 = memref.load %arg1[%c92] : memref<256xf32, #tpu.memory_space<smem>>
    %509 = vector.broadcast %508 : f32 to vector<16x16xf32>
    %510 = arith.mulf %23, %509 : vector<16x16xf32>
    %511 = arith.addf %507, %510 : vector<16x16xf32>
    %c86 = arith.constant 86 : index
    %512 = memref.load %arg1[%c86] : memref<256xf32, #tpu.memory_space<smem>>
    %513 = vector.broadcast %512 : f32 to vector<16x16xf32>
    %514 = arith.mulf %27, %513 : vector<16x16xf32>
    %515 = arith.addf %511, %514 : vector<16x16xf32>
    %c84 = arith.constant 84 : index
    %516 = memref.load %arg1[%c84] : memref<256xf32, #tpu.memory_space<smem>>
    %517 = vector.broadcast %516 : f32 to vector<16x16xf32>
    %518 = arith.mulf %29, %517 : vector<16x16xf32>
    %519 = arith.addf %515, %518 : vector<16x16xf32>
    %c158 = arith.constant 158 : index
    %520 = memref.load %arg1[%c158] : memref<256xf32, #tpu.memory_space<smem>>
    %521 = vector.broadcast %520 : f32 to vector<16x16xf32>
    %522 = arith.mulf %39, %521 : vector<16x16xf32>
    %523 = arith.addf %519, %522 : vector<16x16xf32>
    %c156 = arith.constant 156 : index
    %524 = memref.load %arg1[%c156] : memref<256xf32, #tpu.memory_space<smem>>
    %525 = vector.broadcast %524 : f32 to vector<16x16xf32>
    %526 = arith.mulf %41, %525 : vector<16x16xf32>
    %527 = arith.addf %523, %526 : vector<16x16xf32>
    %c150 = arith.constant 150 : index
    %528 = memref.load %arg1[%c150] : memref<256xf32, #tpu.memory_space<smem>>
    %529 = vector.broadcast %528 : f32 to vector<16x16xf32>
    %530 = arith.mulf %45, %529 : vector<16x16xf32>
    %531 = arith.addf %527, %530 : vector<16x16xf32>
    %c148 = arith.constant 148 : index
    %532 = memref.load %arg1[%c148] : memref<256xf32, #tpu.memory_space<smem>>
    %533 = vector.broadcast %532 : f32 to vector<16x16xf32>
    %534 = arith.mulf %47, %533 : vector<16x16xf32>
    %535 = arith.addf %531, %534 : vector<16x16xf32>
    %c222 = arith.constant 222 : index
    %536 = memref.load %arg1[%c222] : memref<256xf32, #tpu.memory_space<smem>>
    %537 = vector.broadcast %536 : f32 to vector<16x16xf32>
    %538 = arith.mulf %57, %537 : vector<16x16xf32>
    %539 = arith.addf %535, %538 : vector<16x16xf32>
    %c220 = arith.constant 220 : index
    %540 = memref.load %arg1[%c220] : memref<256xf32, #tpu.memory_space<smem>>
    %541 = vector.broadcast %540 : f32 to vector<16x16xf32>
    %542 = arith.mulf %59, %541 : vector<16x16xf32>
    %543 = arith.addf %539, %542 : vector<16x16xf32>
    %c214 = arith.constant 214 : index
    %544 = memref.load %arg1[%c214] : memref<256xf32, #tpu.memory_space<smem>>
    %545 = vector.broadcast %544 : f32 to vector<16x16xf32>
    %546 = arith.mulf %63, %545 : vector<16x16xf32>
    %547 = arith.addf %543, %546 : vector<16x16xf32>
    %c212 = arith.constant 212 : index
    %548 = memref.load %arg1[%c212] : memref<256xf32, #tpu.memory_space<smem>>
    %549 = vector.broadcast %548 : f32 to vector<16x16xf32>
    %550 = arith.mulf %65, %549 : vector<16x16xf32>
    %551 = arith.addf %547, %550 : vector<16x16xf32>
    %cst_186 = arith.constant 0.000000e+00 : f32
    %552 = vector.broadcast %cst_186 : f32 to vector<16x16xf32>
    %c27 = arith.constant 27 : index
    %553 = memref.load %arg1[%c27] : memref<256xf32, #tpu.memory_space<smem>>
    %554 = vector.broadcast %553 : f32 to vector<16x16xf32>
    %555 = arith.mulf %7, %554 : vector<16x16xf32>
    %556 = arith.addf %552, %555 : vector<16x16xf32>
    %c25 = arith.constant 25 : index
    %557 = memref.load %arg1[%c25] : memref<256xf32, #tpu.memory_space<smem>>
    %558 = vector.broadcast %557 : f32 to vector<16x16xf32>
    %559 = arith.mulf %9, %558 : vector<16x16xf32>
    %560 = arith.addf %556, %559 : vector<16x16xf32>
    %c19 = arith.constant 19 : index
    %561 = memref.load %arg1[%c19] : memref<256xf32, #tpu.memory_space<smem>>
    %562 = vector.broadcast %561 : f32 to vector<16x16xf32>
    %563 = arith.mulf %13, %562 : vector<16x16xf32>
    %564 = arith.addf %560, %563 : vector<16x16xf32>
    %c17 = arith.constant 17 : index
    %565 = memref.load %arg1[%c17] : memref<256xf32, #tpu.memory_space<smem>>
    %566 = vector.broadcast %565 : f32 to vector<16x16xf32>
    %567 = arith.mulf %15, %566 : vector<16x16xf32>
    %568 = arith.addf %564, %567 : vector<16x16xf32>
    %c91 = arith.constant 91 : index
    %569 = memref.load %arg1[%c91] : memref<256xf32, #tpu.memory_space<smem>>
    %570 = vector.broadcast %569 : f32 to vector<16x16xf32>
    %571 = arith.mulf %25, %570 : vector<16x16xf32>
    %572 = arith.addf %568, %571 : vector<16x16xf32>
    %c89 = arith.constant 89 : index
    %573 = memref.load %arg1[%c89] : memref<256xf32, #tpu.memory_space<smem>>
    %574 = vector.broadcast %573 : f32 to vector<16x16xf32>
    %575 = arith.mulf %27, %574 : vector<16x16xf32>
    %576 = arith.addf %572, %575 : vector<16x16xf32>
    %c83 = arith.constant 83 : index
    %577 = memref.load %arg1[%c83] : memref<256xf32, #tpu.memory_space<smem>>
    %578 = vector.broadcast %577 : f32 to vector<16x16xf32>
    %579 = arith.mulf %31, %578 : vector<16x16xf32>
    %580 = arith.addf %576, %579 : vector<16x16xf32>
    %c81 = arith.constant 81 : index
    %581 = memref.load %arg1[%c81] : memref<256xf32, #tpu.memory_space<smem>>
    %582 = vector.broadcast %581 : f32 to vector<16x16xf32>
    %583 = arith.mulf %33, %582 : vector<16x16xf32>
    %584 = arith.addf %580, %583 : vector<16x16xf32>
    %c155 = arith.constant 155 : index
    %585 = memref.load %arg1[%c155] : memref<256xf32, #tpu.memory_space<smem>>
    %586 = vector.broadcast %585 : f32 to vector<16x16xf32>
    %587 = arith.mulf %43, %586 : vector<16x16xf32>
    %588 = arith.addf %584, %587 : vector<16x16xf32>
    %c153 = arith.constant 153 : index
    %589 = memref.load %arg1[%c153] : memref<256xf32, #tpu.memory_space<smem>>
    %590 = vector.broadcast %589 : f32 to vector<16x16xf32>
    %591 = arith.mulf %45, %590 : vector<16x16xf32>
    %592 = arith.addf %588, %591 : vector<16x16xf32>
    %c147 = arith.constant 147 : index
    %593 = memref.load %arg1[%c147] : memref<256xf32, #tpu.memory_space<smem>>
    %594 = vector.broadcast %593 : f32 to vector<16x16xf32>
    %595 = arith.mulf %49, %594 : vector<16x16xf32>
    %596 = arith.addf %592, %595 : vector<16x16xf32>
    %c145 = arith.constant 145 : index
    %597 = memref.load %arg1[%c145] : memref<256xf32, #tpu.memory_space<smem>>
    %598 = vector.broadcast %597 : f32 to vector<16x16xf32>
    %599 = arith.mulf %51, %598 : vector<16x16xf32>
    %600 = arith.addf %596, %599 : vector<16x16xf32>
    %c219 = arith.constant 219 : index
    %601 = memref.load %arg1[%c219] : memref<256xf32, #tpu.memory_space<smem>>
    %602 = vector.broadcast %601 : f32 to vector<16x16xf32>
    %603 = arith.mulf %61, %602 : vector<16x16xf32>
    %604 = arith.addf %600, %603 : vector<16x16xf32>
    %c217 = arith.constant 217 : index
    %605 = memref.load %arg1[%c217] : memref<256xf32, #tpu.memory_space<smem>>
    %606 = vector.broadcast %605 : f32 to vector<16x16xf32>
    %607 = arith.mulf %63, %606 : vector<16x16xf32>
    %608 = arith.addf %604, %607 : vector<16x16xf32>
    %c211 = arith.constant 211 : index
    %609 = memref.load %arg1[%c211] : memref<256xf32, #tpu.memory_space<smem>>
    %610 = vector.broadcast %609 : f32 to vector<16x16xf32>
    %611 = arith.mulf %67, %610 : vector<16x16xf32>
    %612 = arith.addf %608, %611 : vector<16x16xf32>
    %c209 = arith.constant 209 : index
    %613 = memref.load %arg1[%c209] : memref<256xf32, #tpu.memory_space<smem>>
    %614 = vector.broadcast %613 : f32 to vector<16x16xf32>
    %615 = arith.mulf %69, %614 : vector<16x16xf32>
    %616 = arith.addf %612, %615 : vector<16x16xf32>
    %cst_187 = arith.constant 0.000000e+00 : f32
    %617 = vector.broadcast %cst_187 : f32 to vector<16x16xf32>
    %c26 = arith.constant 26 : index
    %618 = memref.load %arg1[%c26] : memref<256xf32, #tpu.memory_space<smem>>
    %619 = vector.broadcast %618 : f32 to vector<16x16xf32>
    %620 = arith.mulf %9, %619 : vector<16x16xf32>
    %621 = arith.addf %617, %620 : vector<16x16xf32>
    %c24 = arith.constant 24 : index
    %622 = memref.load %arg1[%c24] : memref<256xf32, #tpu.memory_space<smem>>
    %623 = vector.broadcast %622 : f32 to vector<16x16xf32>
    %624 = arith.mulf %11, %623 : vector<16x16xf32>
    %625 = arith.addf %621, %624 : vector<16x16xf32>
    %c18 = arith.constant 18 : index
    %626 = memref.load %arg1[%c18] : memref<256xf32, #tpu.memory_space<smem>>
    %627 = vector.broadcast %626 : f32 to vector<16x16xf32>
    %628 = arith.mulf %15, %627 : vector<16x16xf32>
    %629 = arith.addf %625, %628 : vector<16x16xf32>
    %c16 = arith.constant 16 : index
    %630 = memref.load %arg1[%c16] : memref<256xf32, #tpu.memory_space<smem>>
    %631 = vector.broadcast %630 : f32 to vector<16x16xf32>
    %632 = arith.mulf %17, %631 : vector<16x16xf32>
    %633 = arith.addf %629, %632 : vector<16x16xf32>
    %c90 = arith.constant 90 : index
    %634 = memref.load %arg1[%c90] : memref<256xf32, #tpu.memory_space<smem>>
    %635 = vector.broadcast %634 : f32 to vector<16x16xf32>
    %636 = arith.mulf %27, %635 : vector<16x16xf32>
    %637 = arith.addf %633, %636 : vector<16x16xf32>
    %c88 = arith.constant 88 : index
    %638 = memref.load %arg1[%c88] : memref<256xf32, #tpu.memory_space<smem>>
    %639 = vector.broadcast %638 : f32 to vector<16x16xf32>
    %640 = arith.mulf %29, %639 : vector<16x16xf32>
    %641 = arith.addf %637, %640 : vector<16x16xf32>
    %c82 = arith.constant 82 : index
    %642 = memref.load %arg1[%c82] : memref<256xf32, #tpu.memory_space<smem>>
    %643 = vector.broadcast %642 : f32 to vector<16x16xf32>
    %644 = arith.mulf %33, %643 : vector<16x16xf32>
    %645 = arith.addf %641, %644 : vector<16x16xf32>
    %c80 = arith.constant 80 : index
    %646 = memref.load %arg1[%c80] : memref<256xf32, #tpu.memory_space<smem>>
    %647 = vector.broadcast %646 : f32 to vector<16x16xf32>
    %648 = arith.mulf %35, %647 : vector<16x16xf32>
    %649 = arith.addf %645, %648 : vector<16x16xf32>
    %c154 = arith.constant 154 : index
    %650 = memref.load %arg1[%c154] : memref<256xf32, #tpu.memory_space<smem>>
    %651 = vector.broadcast %650 : f32 to vector<16x16xf32>
    %652 = arith.mulf %45, %651 : vector<16x16xf32>
    %653 = arith.addf %649, %652 : vector<16x16xf32>
    %c152 = arith.constant 152 : index
    %654 = memref.load %arg1[%c152] : memref<256xf32, #tpu.memory_space<smem>>
    %655 = vector.broadcast %654 : f32 to vector<16x16xf32>
    %656 = arith.mulf %47, %655 : vector<16x16xf32>
    %657 = arith.addf %653, %656 : vector<16x16xf32>
    %c146 = arith.constant 146 : index
    %658 = memref.load %arg1[%c146] : memref<256xf32, #tpu.memory_space<smem>>
    %659 = vector.broadcast %658 : f32 to vector<16x16xf32>
    %660 = arith.mulf %51, %659 : vector<16x16xf32>
    %661 = arith.addf %657, %660 : vector<16x16xf32>
    %c144 = arith.constant 144 : index
    %662 = memref.load %arg1[%c144] : memref<256xf32, #tpu.memory_space<smem>>
    %663 = vector.broadcast %662 : f32 to vector<16x16xf32>
    %664 = arith.mulf %53, %663 : vector<16x16xf32>
    %665 = arith.addf %661, %664 : vector<16x16xf32>
    %c218 = arith.constant 218 : index
    %666 = memref.load %arg1[%c218] : memref<256xf32, #tpu.memory_space<smem>>
    %667 = vector.broadcast %666 : f32 to vector<16x16xf32>
    %668 = arith.mulf %63, %667 : vector<16x16xf32>
    %669 = arith.addf %665, %668 : vector<16x16xf32>
    %c216 = arith.constant 216 : index
    %670 = memref.load %arg1[%c216] : memref<256xf32, #tpu.memory_space<smem>>
    %671 = vector.broadcast %670 : f32 to vector<16x16xf32>
    %672 = arith.mulf %65, %671 : vector<16x16xf32>
    %673 = arith.addf %669, %672 : vector<16x16xf32>
    %c210 = arith.constant 210 : index
    %674 = memref.load %arg1[%c210] : memref<256xf32, #tpu.memory_space<smem>>
    %675 = vector.broadcast %674 : f32 to vector<16x16xf32>
    %676 = arith.mulf %69, %675 : vector<16x16xf32>
    %677 = arith.addf %673, %676 : vector<16x16xf32>
    %c208 = arith.constant 208 : index
    %678 = memref.load %arg1[%c208] : memref<256xf32, #tpu.memory_space<smem>>
    %679 = vector.broadcast %678 : f32 to vector<16x16xf32>
    %680 = arith.mulf %71, %679 : vector<16x16xf32>
    %681 = arith.addf %677, %680 : vector<16x16xf32>
    %682 = vector.shape_cast %486 : vector<16x16xf32> to vector<1x16x16xf32>
    %cst_188 = arith.constant dense<0.000000e+00> : vector<1xf32>
    %683 = vector.multi_reduction <add>, %682, %cst_188 [1, 2] : vector<1x16x16xf32> to vector<1xf32>
    %684 = vector.shape_cast %683 : vector<1xf32> to vector<1x1x1xf32>
    %685 = vector.extract %684[0, 0, 0] : f32 from vector<1x1x1xf32>
    %686 = vector.shape_cast %551 : vector<16x16xf32> to vector<1x16x16xf32>
    %cst_189 = arith.constant dense<0.000000e+00> : vector<1xf32>
    %687 = vector.multi_reduction <add>, %686, %cst_189 [1, 2] : vector<1x16x16xf32> to vector<1xf32>
    %688 = vector.shape_cast %687 : vector<1xf32> to vector<1x1x1xf32>
    %689 = vector.extract %688[0, 0, 0] : f32 from vector<1x1x1xf32>
    %690 = arith.addf %685, %689 : f32
    %691 = vector.shape_cast %616 : vector<16x16xf32> to vector<1x16x16xf32>
    %cst_190 = arith.constant dense<0.000000e+00> : vector<1xf32>
    %692 = vector.multi_reduction <add>, %691, %cst_190 [1, 2] : vector<1x16x16xf32> to vector<1xf32>
    %693 = vector.shape_cast %692 : vector<1xf32> to vector<1x1x1xf32>
    %694 = vector.extract %693[0, 0, 0] : f32 from vector<1x1x1xf32>
    %695 = arith.addf %690, %694 : f32
    %696 = vector.shape_cast %681 : vector<16x16xf32> to vector<1x16x16xf32>
    %cst_191 = arith.constant dense<0.000000e+00> : vector<1xf32>
    %697 = vector.multi_reduction <add>, %696, %cst_191 [1, 2] : vector<1x16x16xf32> to vector<1xf32>
    %698 = vector.shape_cast %697 : vector<1xf32> to vector<1x1x1xf32>
    %699 = vector.extract %698[0, 0, 0] : f32 from vector<1x1x1xf32>
    %700 = arith.addf %695, %699 : f32
    %cst_192 = arith.constant 9.765625E-4 : f32
    %701 = arith.mulf %700, %cst_192 : f32
    %702 = vector.broadcast %701 : f32 to vector<16x16xf32>
    %703 = arith.subf %486, %702 : vector<16x16xf32>
    %704 = vector.broadcast %701 : f32 to vector<16x16xf32>
    %705 = arith.subf %551, %704 : vector<16x16xf32>
    %706 = vector.broadcast %701 : f32 to vector<16x16xf32>
    %707 = arith.subf %616, %706 : vector<16x16xf32>
    %708 = vector.broadcast %701 : f32 to vector<16x16xf32>
    %709 = arith.subf %681, %708 : vector<16x16xf32>
    %710 = arith.mulf %703, %703 : vector<16x16xf32>
    %711 = vector.shape_cast %710 : vector<16x16xf32> to vector<1x16x16xf32>
    %cst_193 = arith.constant dense<0.000000e+00> : vector<1xf32>
    %712 = vector.multi_reduction <add>, %711, %cst_193 [1, 2] : vector<1x16x16xf32> to vector<1xf32>
    %713 = vector.shape_cast %712 : vector<1xf32> to vector<1x1x1xf32>
    %714 = vector.extract %713[0, 0, 0] : f32 from vector<1x1x1xf32>
    %715 = arith.mulf %705, %705 : vector<16x16xf32>
    %716 = vector.shape_cast %715 : vector<16x16xf32> to vector<1x16x16xf32>
    %cst_194 = arith.constant dense<0.000000e+00> : vector<1xf32>
    %717 = vector.multi_reduction <add>, %716, %cst_194 [1, 2] : vector<1x16x16xf32> to vector<1xf32>
    %718 = vector.shape_cast %717 : vector<1xf32> to vector<1x1x1xf32>
    %719 = vector.extract %718[0, 0, 0] : f32 from vector<1x1x1xf32>
    %720 = arith.addf %714, %719 : f32
    %721 = arith.mulf %707, %707 : vector<16x16xf32>
    %722 = vector.shape_cast %721 : vector<16x16xf32> to vector<1x16x16xf32>
    %cst_195 = arith.constant dense<0.000000e+00> : vector<1xf32>
    %723 = vector.multi_reduction <add>, %722, %cst_195 [1, 2] : vector<1x16x16xf32> to vector<1xf32>
    %724 = vector.shape_cast %723 : vector<1xf32> to vector<1x1x1xf32>
    %725 = vector.extract %724[0, 0, 0] : f32 from vector<1x1x1xf32>
    %726 = arith.addf %720, %725 : f32
    %727 = arith.mulf %709, %709 : vector<16x16xf32>
    %728 = vector.shape_cast %727 : vector<16x16xf32> to vector<1x16x16xf32>
    %cst_196 = arith.constant dense<0.000000e+00> : vector<1xf32>
    %729 = vector.multi_reduction <add>, %728, %cst_196 [1, 2] : vector<1x16x16xf32> to vector<1xf32>
    %730 = vector.shape_cast %729 : vector<1xf32> to vector<1x1x1xf32>
    %731 = vector.extract %730[0, 0, 0] : f32 from vector<1x1x1xf32>
    %732 = arith.addf %726, %731 : f32
    %cst_197 = arith.constant 9.765625E-4 : f32
    %733 = arith.mulf %732, %cst_197 : f32
    %cst_198 = arith.constant 9.99999974E-6 : f32
    %734 = arith.addf %733, %cst_198 : f32
    %735 = math.rsqrt %734 : f32
    %736 = vector.broadcast %735 : f32 to vector<16x16xf32>
    %737 = arith.mulf %703, %736 : vector<16x16xf32>
    %cst_199 = arith.constant 0.000000e+00 : f32
    %738 = vector.broadcast %cst_199 : f32 to vector<16x16xf32>
    %739 = arith.maximumf %737, %738 : vector<16x16xf32>
    %740 = vector.broadcast %735 : f32 to vector<16x16xf32>
    %741 = arith.mulf %705, %740 : vector<16x16xf32>
    %cst_200 = arith.constant 0.000000e+00 : f32
    %742 = vector.broadcast %cst_200 : f32 to vector<16x16xf32>
    %743 = arith.maximumf %741, %742 : vector<16x16xf32>
    %cst_201 = arith.constant dense<0.000000e+00> : vector<16x32xf32>
    %744 = tpu.matmul %739, %73, %cst_201 {dimension_numbers = #tpu.dot_dimension_numbers<[1], [0], [0], [1], [0, 0, 1, 1], [], []>} : vector<16x16xf32>, vector<16x32xf32>, vector<16x32xf32> -> vector<16x32xf32>
    %cst_202 = arith.constant dense<0.000000e+00> : vector<16x32xf32>
    %745 = tpu.matmul %743, %75, %cst_202 {dimension_numbers = #tpu.dot_dimension_numbers<[1], [0], [0], [1], [0, 0, 1, 1], [], []>} : vector<16x16xf32>, vector<16x32xf32>, vector<16x32xf32> -> vector<16x32xf32>
    %746 = arith.addf %744, %745 : vector<16x32xf32>
    %747 = vector.broadcast %735 : f32 to vector<16x16xf32>
    %748 = arith.mulf %707, %747 : vector<16x16xf32>
    %cst_203 = arith.constant 0.000000e+00 : f32
    %749 = vector.broadcast %cst_203 : f32 to vector<16x16xf32>
    %750 = arith.maximumf %748, %749 : vector<16x16xf32>
    %751 = vector.broadcast %735 : f32 to vector<16x16xf32>
    %752 = arith.mulf %709, %751 : vector<16x16xf32>
    %cst_204 = arith.constant 0.000000e+00 : f32
    %753 = vector.broadcast %cst_204 : f32 to vector<16x16xf32>
    %754 = arith.maximumf %752, %753 : vector<16x16xf32>
    %cst_205 = arith.constant dense<0.000000e+00> : vector<16x32xf32>
    %755 = tpu.matmul %750, %73, %cst_205 {dimension_numbers = #tpu.dot_dimension_numbers<[1], [0], [0], [1], [0, 0, 1, 1], [], []>} : vector<16x16xf32>, vector<16x32xf32>, vector<16x32xf32> -> vector<16x32xf32>
    %cst_206 = arith.constant dense<0.000000e+00> : vector<16x32xf32>
    %756 = tpu.matmul %754, %75, %cst_206 {dimension_numbers = #tpu.dot_dimension_numbers<[1], [0], [0], [1], [0, 0, 1, 1], [], []>} : vector<16x16xf32>, vector<16x32xf32>, vector<16x32xf32> -> vector<16x32xf32>
    %757 = arith.addf %755, %756 : vector<16x32xf32>
    %cst_207 = arith.constant dense<0.000000e+00> : vector<32x32xf32>
    %758 = tpu.matmul %77, %746, %cst_207 {dimension_numbers = #tpu.dot_dimension_numbers<[1], [0], [0], [1], [0, 0, 1, 1], [], []>} : vector<32x16xf32>, vector<16x32xf32>, vector<32x32xf32> -> vector<32x32xf32>
    %cst_208 = arith.constant dense<0.000000e+00> : vector<32x32xf32>
    %759 = tpu.matmul %79, %757, %cst_208 {dimension_numbers = #tpu.dot_dimension_numbers<[1], [0], [0], [1], [0, 0, 1, 1], [], []>} : vector<32x16xf32>, vector<16x32xf32>, vector<32x32xf32> -> vector<32x32xf32>
    %760 = arith.addf %758, %759 : vector<32x32xf32>
    %c0_209 = arith.constant 0 : index
    %c1_210 = arith.constant 1 : index
    %c0_211 = arith.constant 0 : index
    %c0_212 = arith.constant 0 : index
    %761 = vector.load %arg5[%c0_209, %c1_210, %c0_211, %c0_212] : memref<1x4x32x32xf32, #tpu.memory_space<vmem>>, vector<1x1x32x32xf32>
    %762 = vector.shape_cast %761 : vector<1x1x32x32xf32> to vector<32x32xf32>
    %763 = vector.shape_cast %760 : vector<32x32xf32> to vector<1x1x32x32xf32>
    tpu.vector_store %arg5[%c0_209, %c1_210, %c0_211, %c0_212], %763 {strides = array<i32>} : memref<1x4x32x32xf32, #tpu.memory_space<vmem>>, vector<1x1x32x32xf32>,
    %cst_213 = arith.constant 0.000000e+00 : f32
    %764 = vector.broadcast %cst_213 : f32 to vector<16x16xf32>
    %c47 = arith.constant 47 : index
    %765 = memref.load %arg1[%c47] : memref<256xf32, #tpu.memory_space<smem>>
    %766 = vector.broadcast %765 : f32 to vector<16x16xf32>
    %767 = arith.mulf %1, %766 : vector<16x16xf32>
    %768 = arith.addf %764, %767 : vector<16x16xf32>
    %c45 = arith.constant 45 : index
    %769 = memref.load %arg1[%c45] : memref<256xf32, #tpu.memory_space<smem>>
    %770 = vector.broadcast %769 : f32 to vector<16x16xf32>
    %771 = arith.mulf %3, %770 : vector<16x16xf32>
    %772 = arith.addf %768, %771 : vector<16x16xf32>
    %c39 = arith.constant 39 : index
    %773 = memref.load %arg1[%c39] : memref<256xf32, #tpu.memory_space<smem>>
    %774 = vector.broadcast %773 : f32 to vector<16x16xf32>
    %775 = arith.mulf %7, %774 : vector<16x16xf32>
    %776 = arith.addf %772, %775 : vector<16x16xf32>
    %c37 = arith.constant 37 : index
    %777 = memref.load %arg1[%c37] : memref<256xf32, #tpu.memory_space<smem>>
    %778 = vector.broadcast %777 : f32 to vector<16x16xf32>
    %779 = arith.mulf %9, %778 : vector<16x16xf32>
    %780 = arith.addf %776, %779 : vector<16x16xf32>
    %c111 = arith.constant 111 : index
    %781 = memref.load %arg1[%c111] : memref<256xf32, #tpu.memory_space<smem>>
    %782 = vector.broadcast %781 : f32 to vector<16x16xf32>
    %783 = arith.mulf %19, %782 : vector<16x16xf32>
    %784 = arith.addf %780, %783 : vector<16x16xf32>
    %c109 = arith.constant 109 : index
    %785 = memref.load %arg1[%c109] : memref<256xf32, #tpu.memory_space<smem>>
    %786 = vector.broadcast %785 : f32 to vector<16x16xf32>
    %787 = arith.mulf %21, %786 : vector<16x16xf32>
    %788 = arith.addf %784, %787 : vector<16x16xf32>
    %c103 = arith.constant 103 : index
    %789 = memref.load %arg1[%c103] : memref<256xf32, #tpu.memory_space<smem>>
    %790 = vector.broadcast %789 : f32 to vector<16x16xf32>
    %791 = arith.mulf %25, %790 : vector<16x16xf32>
    %792 = arith.addf %788, %791 : vector<16x16xf32>
    %c101 = arith.constant 101 : index
    %793 = memref.load %arg1[%c101] : memref<256xf32, #tpu.memory_space<smem>>
    %794 = vector.broadcast %793 : f32 to vector<16x16xf32>
    %795 = arith.mulf %27, %794 : vector<16x16xf32>
    %796 = arith.addf %792, %795 : vector<16x16xf32>
    %c175 = arith.constant 175 : index
    %797 = memref.load %arg1[%c175] : memref<256xf32, #tpu.memory_space<smem>>
    %798 = vector.broadcast %797 : f32 to vector<16x16xf32>
    %799 = arith.mulf %37, %798 : vector<16x16xf32>
    %800 = arith.addf %796, %799 : vector<16x16xf32>
    %c173 = arith.constant 173 : index
    %801 = memref.load %arg1[%c173] : memref<256xf32, #tpu.memory_space<smem>>
    %802 = vector.broadcast %801 : f32 to vector<16x16xf32>
    %803 = arith.mulf %39, %802 : vector<16x16xf32>
    %804 = arith.addf %800, %803 : vector<16x16xf32>
    %c167 = arith.constant 167 : index
    %805 = memref.load %arg1[%c167] : memref<256xf32, #tpu.memory_space<smem>>
    %806 = vector.broadcast %805 : f32 to vector<16x16xf32>
    %807 = arith.mulf %43, %806 : vector<16x16xf32>
    %808 = arith.addf %804, %807 : vector<16x16xf32>
    %c165 = arith.constant 165 : index
    %809 = memref.load %arg1[%c165] : memref<256xf32, #tpu.memory_space<smem>>
    %810 = vector.broadcast %809 : f32 to vector<16x16xf32>
    %811 = arith.mulf %45, %810 : vector<16x16xf32>
    %812 = arith.addf %808, %811 : vector<16x16xf32>
    %c239 = arith.constant 239 : index
    %813 = memref.load %arg1[%c239] : memref<256xf32, #tpu.memory_space<smem>>
    %814 = vector.broadcast %813 : f32 to vector<16x16xf32>
    %815 = arith.mulf %55, %814 : vector<16x16xf32>
    %816 = arith.addf %812, %815 : vector<16x16xf32>
    %c237 = arith.constant 237 : index
    %817 = memref.load %arg1[%c237] : memref<256xf32, #tpu.memory_space<smem>>
    %818 = vector.broadcast %817 : f32 to vector<16x16xf32>
    %819 = arith.mulf %57, %818 : vector<16x16xf32>
    %820 = arith.addf %816, %819 : vector<16x16xf32>
    %c231 = arith.constant 231 : index
    %821 = memref.load %arg1[%c231] : memref<256xf32, #tpu.memory_space<smem>>
    %822 = vector.broadcast %821 : f32 to vector<16x16xf32>
    %823 = arith.mulf %61, %822 : vector<16x16xf32>
    %824 = arith.addf %820, %823 : vector<16x16xf32>
    %c229 = arith.constant 229 : index
    %825 = memref.load %arg1[%c229] : memref<256xf32, #tpu.memory_space<smem>>
    %826 = vector.broadcast %825 : f32 to vector<16x16xf32>
    %827 = arith.mulf %63, %826 : vector<16x16xf32>
    %828 = arith.addf %824, %827 : vector<16x16xf32>
    %cst_214 = arith.constant 0.000000e+00 : f32
    %829 = vector.broadcast %cst_214 : f32 to vector<16x16xf32>
    %c46 = arith.constant 46 : index
    %830 = memref.load %arg1[%c46] : memref<256xf32, #tpu.memory_space<smem>>
    %831 = vector.broadcast %830 : f32 to vector<16x16xf32>
    %832 = arith.mulf %3, %831 : vector<16x16xf32>
    %833 = arith.addf %829, %832 : vector<16x16xf32>
    %c44 = arith.constant 44 : index
    %834 = memref.load %arg1[%c44] : memref<256xf32, #tpu.memory_space<smem>>
    %835 = vector.broadcast %834 : f32 to vector<16x16xf32>
    %836 = arith.mulf %5, %835 : vector<16x16xf32>
    %837 = arith.addf %833, %836 : vector<16x16xf32>
    %c38 = arith.constant 38 : index
    %838 = memref.load %arg1[%c38] : memref<256xf32, #tpu.memory_space<smem>>
    %839 = vector.broadcast %838 : f32 to vector<16x16xf32>
    %840 = arith.mulf %9, %839 : vector<16x16xf32>
    %841 = arith.addf %837, %840 : vector<16x16xf32>
    %c36 = arith.constant 36 : index
    %842 = memref.load %arg1[%c36] : memref<256xf32, #tpu.memory_space<smem>>
    %843 = vector.broadcast %842 : f32 to vector<16x16xf32>
    %844 = arith.mulf %11, %843 : vector<16x16xf32>
    %845 = arith.addf %841, %844 : vector<16x16xf32>
    %c110 = arith.constant 110 : index
    %846 = memref.load %arg1[%c110] : memref<256xf32, #tpu.memory_space<smem>>
    %847 = vector.broadcast %846 : f32 to vector<16x16xf32>
    %848 = arith.mulf %21, %847 : vector<16x16xf32>
    %849 = arith.addf %845, %848 : vector<16x16xf32>
    %c108 = arith.constant 108 : index
    %850 = memref.load %arg1[%c108] : memref<256xf32, #tpu.memory_space<smem>>
    %851 = vector.broadcast %850 : f32 to vector<16x16xf32>
    %852 = arith.mulf %23, %851 : vector<16x16xf32>
    %853 = arith.addf %849, %852 : vector<16x16xf32>
    %c102 = arith.constant 102 : index
    %854 = memref.load %arg1[%c102] : memref<256xf32, #tpu.memory_space<smem>>
    %855 = vector.broadcast %854 : f32 to vector<16x16xf32>
    %856 = arith.mulf %27, %855 : vector<16x16xf32>
    %857 = arith.addf %853, %856 : vector<16x16xf32>
    %c100 = arith.constant 100 : index
    %858 = memref.load %arg1[%c100] : memref<256xf32, #tpu.memory_space<smem>>
    %859 = vector.broadcast %858 : f32 to vector<16x16xf32>
    %860 = arith.mulf %29, %859 : vector<16x16xf32>
    %861 = arith.addf %857, %860 : vector<16x16xf32>
    %c174 = arith.constant 174 : index
    %862 = memref.load %arg1[%c174] : memref<256xf32, #tpu.memory_space<smem>>
    %863 = vector.broadcast %862 : f32 to vector<16x16xf32>
    %864 = arith.mulf %39, %863 : vector<16x16xf32>
    %865 = arith.addf %861, %864 : vector<16x16xf32>
    %c172 = arith.constant 172 : index
    %866 = memref.load %arg1[%c172] : memref<256xf32, #tpu.memory_space<smem>>
    %867 = vector.broadcast %866 : f32 to vector<16x16xf32>
    %868 = arith.mulf %41, %867 : vector<16x16xf32>
    %869 = arith.addf %865, %868 : vector<16x16xf32>
    %c166 = arith.constant 166 : index
    %870 = memref.load %arg1[%c166] : memref<256xf32, #tpu.memory_space<smem>>
    %871 = vector.broadcast %870 : f32 to vector<16x16xf32>
    %872 = arith.mulf %45, %871 : vector<16x16xf32>
    %873 = arith.addf %869, %872 : vector<16x16xf32>
    %c164 = arith.constant 164 : index
    %874 = memref.load %arg1[%c164] : memref<256xf32, #tpu.memory_space<smem>>
    %875 = vector.broadcast %874 : f32 to vector<16x16xf32>
    %876 = arith.mulf %47, %875 : vector<16x16xf32>
    %877 = arith.addf %873, %876 : vector<16x16xf32>
    %c238 = arith.constant 238 : index
    %878 = memref.load %arg1[%c238] : memref<256xf32, #tpu.memory_space<smem>>
    %879 = vector.broadcast %878 : f32 to vector<16x16xf32>
    %880 = arith.mulf %57, %879 : vector<16x16xf32>
    %881 = arith.addf %877, %880 : vector<16x16xf32>
    %c236 = arith.constant 236 : index
    %882 = memref.load %arg1[%c236] : memref<256xf32, #tpu.memory_space<smem>>
    %883 = vector.broadcast %882 : f32 to vector<16x16xf32>
    %884 = arith.mulf %59, %883 : vector<16x16xf32>
    %885 = arith.addf %881, %884 : vector<16x16xf32>
    %c230 = arith.constant 230 : index
    %886 = memref.load %arg1[%c230] : memref<256xf32, #tpu.memory_space<smem>>
    %887 = vector.broadcast %886 : f32 to vector<16x16xf32>
    %888 = arith.mulf %63, %887 : vector<16x16xf32>
    %889 = arith.addf %885, %888 : vector<16x16xf32>
    %c228 = arith.constant 228 : index
    %890 = memref.load %arg1[%c228] : memref<256xf32, #tpu.memory_space<smem>>
    %891 = vector.broadcast %890 : f32 to vector<16x16xf32>
    %892 = arith.mulf %65, %891 : vector<16x16xf32>
    %893 = arith.addf %889, %892 : vector<16x16xf32>
    %cst_215 = arith.constant 0.000000e+00 : f32
    %894 = vector.broadcast %cst_215 : f32 to vector<16x16xf32>
    %c43 = arith.constant 43 : index
    %895 = memref.load %arg1[%c43] : memref<256xf32, #tpu.memory_space<smem>>
    %896 = vector.broadcast %895 : f32 to vector<16x16xf32>
    %897 = arith.mulf %7, %896 : vector<16x16xf32>
    %898 = arith.addf %894, %897 : vector<16x16xf32>
    %c41 = arith.constant 41 : index
    %899 = memref.load %arg1[%c41] : memref<256xf32, #tpu.memory_space<smem>>
    %900 = vector.broadcast %899 : f32 to vector<16x16xf32>
    %901 = arith.mulf %9, %900 : vector<16x16xf32>
    %902 = arith.addf %898, %901 : vector<16x16xf32>
    %c35 = arith.constant 35 : index
    %903 = memref.load %arg1[%c35] : memref<256xf32, #tpu.memory_space<smem>>
    %904 = vector.broadcast %903 : f32 to vector<16x16xf32>
    %905 = arith.mulf %13, %904 : vector<16x16xf32>
    %906 = arith.addf %902, %905 : vector<16x16xf32>
    %c33 = arith.constant 33 : index
    %907 = memref.load %arg1[%c33] : memref<256xf32, #tpu.memory_space<smem>>
    %908 = vector.broadcast %907 : f32 to vector<16x16xf32>
    %909 = arith.mulf %15, %908 : vector<16x16xf32>
    %910 = arith.addf %906, %909 : vector<16x16xf32>
    %c107 = arith.constant 107 : index
    %911 = memref.load %arg1[%c107] : memref<256xf32, #tpu.memory_space<smem>>
    %912 = vector.broadcast %911 : f32 to vector<16x16xf32>
    %913 = arith.mulf %25, %912 : vector<16x16xf32>
    %914 = arith.addf %910, %913 : vector<16x16xf32>
    %c105 = arith.constant 105 : index
    %915 = memref.load %arg1[%c105] : memref<256xf32, #tpu.memory_space<smem>>
    %916 = vector.broadcast %915 : f32 to vector<16x16xf32>
    %917 = arith.mulf %27, %916 : vector<16x16xf32>
    %918 = arith.addf %914, %917 : vector<16x16xf32>
    %c99 = arith.constant 99 : index
    %919 = memref.load %arg1[%c99] : memref<256xf32, #tpu.memory_space<smem>>
    %920 = vector.broadcast %919 : f32 to vector<16x16xf32>
    %921 = arith.mulf %31, %920 : vector<16x16xf32>
    %922 = arith.addf %918, %921 : vector<16x16xf32>
    %c97 = arith.constant 97 : index
    %923 = memref.load %arg1[%c97] : memref<256xf32, #tpu.memory_space<smem>>
    %924 = vector.broadcast %923 : f32 to vector<16x16xf32>
    %925 = arith.mulf %33, %924 : vector<16x16xf32>
    %926 = arith.addf %922, %925 : vector<16x16xf32>
    %c171 = arith.constant 171 : index
    %927 = memref.load %arg1[%c171] : memref<256xf32, #tpu.memory_space<smem>>
    %928 = vector.broadcast %927 : f32 to vector<16x16xf32>
    %929 = arith.mulf %43, %928 : vector<16x16xf32>
    %930 = arith.addf %926, %929 : vector<16x16xf32>
    %c169 = arith.constant 169 : index
    %931 = memref.load %arg1[%c169] : memref<256xf32, #tpu.memory_space<smem>>
    %932 = vector.broadcast %931 : f32 to vector<16x16xf32>
    %933 = arith.mulf %45, %932 : vector<16x16xf32>
    %934 = arith.addf %930, %933 : vector<16x16xf32>
    %c163 = arith.constant 163 : index
    %935 = memref.load %arg1[%c163] : memref<256xf32, #tpu.memory_space<smem>>
    %936 = vector.broadcast %935 : f32 to vector<16x16xf32>
    %937 = arith.mulf %49, %936 : vector<16x16xf32>
    %938 = arith.addf %934, %937 : vector<16x16xf32>
    %c161 = arith.constant 161 : index
    %939 = memref.load %arg1[%c161] : memref<256xf32, #tpu.memory_space<smem>>
    %940 = vector.broadcast %939 : f32 to vector<16x16xf32>
    %941 = arith.mulf %51, %940 : vector<16x16xf32>
    %942 = arith.addf %938, %941 : vector<16x16xf32>
    %c235 = arith.constant 235 : index
    %943 = memref.load %arg1[%c235] : memref<256xf32, #tpu.memory_space<smem>>
    %944 = vector.broadcast %943 : f32 to vector<16x16xf32>
    %945 = arith.mulf %61, %944 : vector<16x16xf32>
    %946 = arith.addf %942, %945 : vector<16x16xf32>
    %c233 = arith.constant 233 : index
    %947 = memref.load %arg1[%c233] : memref<256xf32, #tpu.memory_space<smem>>
    %948 = vector.broadcast %947 : f32 to vector<16x16xf32>
    %949 = arith.mulf %63, %948 : vector<16x16xf32>
    %950 = arith.addf %946, %949 : vector<16x16xf32>
    %c227 = arith.constant 227 : index
    %951 = memref.load %arg1[%c227] : memref<256xf32, #tpu.memory_space<smem>>
    %952 = vector.broadcast %951 : f32 to vector<16x16xf32>
    %953 = arith.mulf %67, %952 : vector<16x16xf32>
    %954 = arith.addf %950, %953 : vector<16x16xf32>
    %c225 = arith.constant 225 : index
    %955 = memref.load %arg1[%c225] : memref<256xf32, #tpu.memory_space<smem>>
    %956 = vector.broadcast %955 : f32 to vector<16x16xf32>
    %957 = arith.mulf %69, %956 : vector<16x16xf32>
    %958 = arith.addf %954, %957 : vector<16x16xf32>
    %cst_216 = arith.constant 0.000000e+00 : f32
    %959 = vector.broadcast %cst_216 : f32 to vector<16x16xf32>
    %c42 = arith.constant 42 : index
    %960 = memref.load %arg1[%c42] : memref<256xf32, #tpu.memory_space<smem>>
    %961 = vector.broadcast %960 : f32 to vector<16x16xf32>
    %962 = arith.mulf %9, %961 : vector<16x16xf32>
    %963 = arith.addf %959, %962 : vector<16x16xf32>
    %c40 = arith.constant 40 : index
    %964 = memref.load %arg1[%c40] : memref<256xf32, #tpu.memory_space<smem>>
    %965 = vector.broadcast %964 : f32 to vector<16x16xf32>
    %966 = arith.mulf %11, %965 : vector<16x16xf32>
    %967 = arith.addf %963, %966 : vector<16x16xf32>
    %c34 = arith.constant 34 : index
    %968 = memref.load %arg1[%c34] : memref<256xf32, #tpu.memory_space<smem>>
    %969 = vector.broadcast %968 : f32 to vector<16x16xf32>
    %970 = arith.mulf %15, %969 : vector<16x16xf32>
    %971 = arith.addf %967, %970 : vector<16x16xf32>
    %c32 = arith.constant 32 : index
    %972 = memref.load %arg1[%c32] : memref<256xf32, #tpu.memory_space<smem>>
    %973 = vector.broadcast %972 : f32 to vector<16x16xf32>
    %974 = arith.mulf %17, %973 : vector<16x16xf32>
    %975 = arith.addf %971, %974 : vector<16x16xf32>
    %c106 = arith.constant 106 : index
    %976 = memref.load %arg1[%c106] : memref<256xf32, #tpu.memory_space<smem>>
    %977 = vector.broadcast %976 : f32 to vector<16x16xf32>
    %978 = arith.mulf %27, %977 : vector<16x16xf32>
    %979 = arith.addf %975, %978 : vector<16x16xf32>
    %c104 = arith.constant 104 : index
    %980 = memref.load %arg1[%c104] : memref<256xf32, #tpu.memory_space<smem>>
    %981 = vector.broadcast %980 : f32 to vector<16x16xf32>
    %982 = arith.mulf %29, %981 : vector<16x16xf32>
    %983 = arith.addf %979, %982 : vector<16x16xf32>
    %c98 = arith.constant 98 : index
    %984 = memref.load %arg1[%c98] : memref<256xf32, #tpu.memory_space<smem>>
    %985 = vector.broadcast %984 : f32 to vector<16x16xf32>
    %986 = arith.mulf %33, %985 : vector<16x16xf32>
    %987 = arith.addf %983, %986 : vector<16x16xf32>
    %c96 = arith.constant 96 : index
    %988 = memref.load %arg1[%c96] : memref<256xf32, #tpu.memory_space<smem>>
    %989 = vector.broadcast %988 : f32 to vector<16x16xf32>
    %990 = arith.mulf %35, %989 : vector<16x16xf32>
    %991 = arith.addf %987, %990 : vector<16x16xf32>
    %c170 = arith.constant 170 : index
    %992 = memref.load %arg1[%c170] : memref<256xf32, #tpu.memory_space<smem>>
    %993 = vector.broadcast %992 : f32 to vector<16x16xf32>
    %994 = arith.mulf %45, %993 : vector<16x16xf32>
    %995 = arith.addf %991, %994 : vector<16x16xf32>
    %c168 = arith.constant 168 : index
    %996 = memref.load %arg1[%c168] : memref<256xf32, #tpu.memory_space<smem>>
    %997 = vector.broadcast %996 : f32 to vector<16x16xf32>
    %998 = arith.mulf %47, %997 : vector<16x16xf32>
    %999 = arith.addf %995, %998 : vector<16x16xf32>
    %c162 = arith.constant 162 : index
    %1000 = memref.load %arg1[%c162] : memref<256xf32, #tpu.memory_space<smem>>
    %1001 = vector.broadcast %1000 : f32 to vector<16x16xf32>
    %1002 = arith.mulf %51, %1001 : vector<16x16xf32>
    %1003 = arith.addf %999, %1002 : vector<16x16xf32>
    %c160 = arith.constant 160 : index
    %1004 = memref.load %arg1[%c160] : memref<256xf32, #tpu.memory_space<smem>>
    %1005 = vector.broadcast %1004 : f32 to vector<16x16xf32>
    %1006 = arith.mulf %53, %1005 : vector<16x16xf32>
    %1007 = arith.addf %1003, %1006 : vector<16x16xf32>
    %c234 = arith.constant 234 : index
    %1008 = memref.load %arg1[%c234] : memref<256xf32, #tpu.memory_space<smem>>
    %1009 = vector.broadcast %1008 : f32 to vector<16x16xf32>
    %1010 = arith.mulf %63, %1009 : vector<16x16xf32>
    %1011 = arith.addf %1007, %1010 : vector<16x16xf32>
    %c232 = arith.constant 232 : index
    %1012 = memref.load %arg1[%c232] : memref<256xf32, #tpu.memory_space<smem>>
    %1013 = vector.broadcast %1012 : f32 to vector<16x16xf32>
    %1014 = arith.mulf %65, %1013 : vector<16x16xf32>
    %1015 = arith.addf %1011, %1014 : vector<16x16xf32>
    %c226 = arith.constant 226 : index
    %1016 = memref.load %arg1[%c226] : memref<256xf32, #tpu.memory_space<smem>>
    %1017 = vector.broadcast %1016 : f32 to vector<16x16xf32>
    %1018 = arith.mulf %69, %1017 : vector<16x16xf32>
    %1019 = arith.addf %1015, %1018 : vector<16x16xf32>
    %c224 = arith.constant 224 : index
    %1020 = memref.load %arg1[%c224] : memref<256xf32, #tpu.memory_space<smem>>
    %1021 = vector.broadcast %1020 : f32 to vector<16x16xf32>
    %1022 = arith.mulf %71, %1021 : vector<16x16xf32>
    %1023 = arith.addf %1019, %1022 : vector<16x16xf32>
    %1024 = vector.shape_cast %828 : vector<16x16xf32> to vector<1x16x16xf32>
    %cst_217 = arith.constant dense<0.000000e+00> : vector<1xf32>
    %1025 = vector.multi_reduction <add>, %1024, %cst_217 [1, 2] : vector<1x16x16xf32> to vector<1xf32>
    %1026 = vector.shape_cast %1025 : vector<1xf32> to vector<1x1x1xf32>
    %1027 = vector.extract %1026[0, 0, 0] : f32 from vector<1x1x1xf32>
    %1028 = vector.shape_cast %893 : vector<16x16xf32> to vector<1x16x16xf32>
    %cst_218 = arith.constant dense<0.000000e+00> : vector<1xf32>
    %1029 = vector.multi_reduction <add>, %1028, %cst_218 [1, 2] : vector<1x16x16xf32> to vector<1xf32>
    %1030 = vector.shape_cast %1029 : vector<1xf32> to vector<1x1x1xf32>
    %1031 = vector.extract %1030[0, 0, 0] : f32 from vector<1x1x1xf32>
    %1032 = arith.addf %1027, %1031 : f32
    %1033 = vector.shape_cast %958 : vector<16x16xf32> to vector<1x16x16xf32>
    %cst_219 = arith.constant dense<0.000000e+00> : vector<1xf32>
    %1034 = vector.multi_reduction <add>, %1033, %cst_219 [1, 2] : vector<1x16x16xf32> to vector<1xf32>
    %1035 = vector.shape_cast %1034 : vector<1xf32> to vector<1x1x1xf32>
    %1036 = vector.extract %1035[0, 0, 0] : f32 from vector<1x1x1xf32>
    %1037 = arith.addf %1032, %1036 : f32
    %1038 = vector.shape_cast %1023 : vector<16x16xf32> to vector<1x16x16xf32>
    %cst_220 = arith.constant dense<0.000000e+00> : vector<1xf32>
    %1039 = vector.multi_reduction <add>, %1038, %cst_220 [1, 2] : vector<1x16x16xf32> to vector<1xf32>
    %1040 = vector.shape_cast %1039 : vector<1xf32> to vector<1x1x1xf32>
    %1041 = vector.extract %1040[0, 0, 0] : f32 from vector<1x1x1xf32>
    %1042 = arith.addf %1037, %1041 : f32
    %cst_221 = arith.constant 9.765625E-4 : f32
    %1043 = arith.mulf %1042, %cst_221 : f32
    %1044 = vector.broadcast %1043 : f32 to vector<16x16xf32>
    %1045 = arith.subf %828, %1044 : vector<16x16xf32>
    %1046 = vector.broadcast %1043 : f32 to vector<16x16xf32>
    %1047 = arith.subf %893, %1046 : vector<16x16xf32>
    %1048 = vector.broadcast %1043 : f32 to vector<16x16xf32>
    %1049 = arith.subf %958, %1048 : vector<16x16xf32>
    %1050 = vector.broadcast %1043 : f32 to vector<16x16xf32>
    %1051 = arith.subf %1023, %1050 : vector<16x16xf32>
    %1052 = arith.mulf %1045, %1045 : vector<16x16xf32>
    %1053 = vector.shape_cast %1052 : vector<16x16xf32> to vector<1x16x16xf32>
    %cst_222 = arith.constant dense<0.000000e+00> : vector<1xf32>
    %1054 = vector.multi_reduction <add>, %1053, %cst_222 [1, 2] : vector<1x16x16xf32> to vector<1xf32>
    %1055 = vector.shape_cast %1054 : vector<1xf32> to vector<1x1x1xf32>
    %1056 = vector.extract %1055[0, 0, 0] : f32 from vector<1x1x1xf32>
    %1057 = arith.mulf %1047, %1047 : vector<16x16xf32>
    %1058 = vector.shape_cast %1057 : vector<16x16xf32> to vector<1x16x16xf32>
    %cst_223 = arith.constant dense<0.000000e+00> : vector<1xf32>
    %1059 = vector.multi_reduction <add>, %1058, %cst_223 [1, 2] : vector<1x16x16xf32> to vector<1xf32>
    %1060 = vector.shape_cast %1059 : vector<1xf32> to vector<1x1x1xf32>
    %1061 = vector.extract %1060[0, 0, 0] : f32 from vector<1x1x1xf32>
    %1062 = arith.addf %1056, %1061 : f32
    %1063 = arith.mulf %1049, %1049 : vector<16x16xf32>
    %1064 = vector.shape_cast %1063 : vector<16x16xf32> to vector<1x16x16xf32>
    %cst_224 = arith.constant dense<0.000000e+00> : vector<1xf32>
    %1065 = vector.multi_reduction <add>, %1064, %cst_224 [1, 2] : vector<1x16x16xf32> to vector<1xf32>
    %1066 = vector.shape_cast %1065 : vector<1xf32> to vector<1x1x1xf32>
    %1067 = vector.extract %1066[0, 0, 0] : f32 from vector<1x1x1xf32>
    %1068 = arith.addf %1062, %1067 : f32
    %1069 = arith.mulf %1051, %1051 : vector<16x16xf32>
    %1070 = vector.shape_cast %1069 : vector<16x16xf32> to vector<1x16x16xf32>
    %cst_225 = arith.constant dense<0.000000e+00> : vector<1xf32>
    %1071 = vector.multi_reduction <add>, %1070, %cst_225 [1, 2] : vector<1x16x16xf32> to vector<1xf32>
    %1072 = vector.shape_cast %1071 : vector<1xf32> to vector<1x1x1xf32>
    %1073 = vector.extract %1072[0, 0, 0] : f32 from vector<1x1x1xf32>
    %1074 = arith.addf %1068, %1073 : f32
    %cst_226 = arith.constant 9.765625E-4 : f32
    %1075 = arith.mulf %1074, %cst_226 : f32
    %cst_227 = arith.constant 9.99999974E-6 : f32
    %1076 = arith.addf %1075, %cst_227 : f32
    %1077 = math.rsqrt %1076 : f32
    %1078 = vector.broadcast %1077 : f32 to vector<16x16xf32>
    %1079 = arith.mulf %1045, %1078 : vector<16x16xf32>
    %cst_228 = arith.constant 0.000000e+00 : f32
    %1080 = vector.broadcast %cst_228 : f32 to vector<16x16xf32>
    %1081 = arith.maximumf %1079, %1080 : vector<16x16xf32>
    %1082 = vector.broadcast %1077 : f32 to vector<16x16xf32>
    %1083 = arith.mulf %1047, %1082 : vector<16x16xf32>
    %cst_229 = arith.constant 0.000000e+00 : f32
    %1084 = vector.broadcast %cst_229 : f32 to vector<16x16xf32>
    %1085 = arith.maximumf %1083, %1084 : vector<16x16xf32>
    %cst_230 = arith.constant dense<0.000000e+00> : vector<16x32xf32>
    %1086 = tpu.matmul %1081, %73, %cst_230 {dimension_numbers = #tpu.dot_dimension_numbers<[1], [0], [0], [1], [0, 0, 1, 1], [], []>} : vector<16x16xf32>, vector<16x32xf32>, vector<16x32xf32> -> vector<16x32xf32>
    %cst_231 = arith.constant dense<0.000000e+00> : vector<16x32xf32>
    %1087 = tpu.matmul %1085, %75, %cst_231 {dimension_numbers = #tpu.dot_dimension_numbers<[1], [0], [0], [1], [0, 0, 1, 1], [], []>} : vector<16x16xf32>, vector<16x32xf32>, vector<16x32xf32> -> vector<16x32xf32>
    %1088 = arith.addf %1086, %1087 : vector<16x32xf32>
    %1089 = vector.broadcast %1077 : f32 to vector<16x16xf32>
    %1090 = arith.mulf %1049, %1089 : vector<16x16xf32>
    %cst_232 = arith.constant 0.000000e+00 : f32
    %1091 = vector.broadcast %cst_232 : f32 to vector<16x16xf32>
    %1092 = arith.maximumf %1090, %1091 : vector<16x16xf32>
    %1093 = vector.broadcast %1077 : f32 to vector<16x16xf32>
    %1094 = arith.mulf %1051, %1093 : vector<16x16xf32>
    %cst_233 = arith.constant 0.000000e+00 : f32
    %1095 = vector.broadcast %cst_233 : f32 to vector<16x16xf32>
    %1096 = arith.maximumf %1094, %1095 : vector<16x16xf32>
    %cst_234 = arith.constant dense<0.000000e+00> : vector<16x32xf32>
    %1097 = tpu.matmul %1092, %73, %cst_234 {dimension_numbers = #tpu.dot_dimension_numbers<[1], [0], [0], [1], [0, 0, 1, 1], [], []>} : vector<16x16xf32>, vector<16x32xf32>, vector<16x32xf32> -> vector<16x32xf32>
    %cst_235 = arith.constant dense<0.000000e+00> : vector<16x32xf32>
    %1098 = tpu.matmul %1096, %75, %cst_235 {dimension_numbers = #tpu.dot_dimension_numbers<[1], [0], [0], [1], [0, 0, 1, 1], [], []>} : vector<16x16xf32>, vector<16x32xf32>, vector<16x32xf32> -> vector<16x32xf32>
    %1099 = arith.addf %1097, %1098 : vector<16x32xf32>
    %cst_236 = arith.constant dense<0.000000e+00> : vector<32x32xf32>
    %1100 = tpu.matmul %77, %1088, %cst_236 {dimension_numbers = #tpu.dot_dimension_numbers<[1], [0], [0], [1], [0, 0, 1, 1], [], []>} : vector<32x16xf32>, vector<16x32xf32>, vector<32x32xf32> -> vector<32x32xf32>
    %cst_237 = arith.constant dense<0.000000e+00> : vector<32x32xf32>
    %1101 = tpu.matmul %79, %1099, %cst_237 {dimension_numbers = #tpu.dot_dimension_numbers<[1], [0], [0], [1], [0, 0, 1, 1], [], []>} : vector<32x16xf32>, vector<16x32xf32>, vector<32x32xf32> -> vector<32x32xf32>
    %1102 = arith.addf %1100, %1101 : vector<32x32xf32>
    %c0_238 = arith.constant 0 : index
    %c2_239 = arith.constant 2 : index
    %c0_240 = arith.constant 0 : index
    %c0_241 = arith.constant 0 : index
    %1103 = vector.load %arg5[%c0_238, %c2_239, %c0_240, %c0_241] : memref<1x4x32x32xf32, #tpu.memory_space<vmem>>, vector<1x1x32x32xf32>
    %1104 = vector.shape_cast %1103 : vector<1x1x32x32xf32> to vector<32x32xf32>
    %1105 = vector.shape_cast %1102 : vector<32x32xf32> to vector<1x1x32x32xf32>
    tpu.vector_store %arg5[%c0_238, %c2_239, %c0_240, %c0_241], %1105 {strides = array<i32>} : memref<1x4x32x32xf32, #tpu.memory_space<vmem>>, vector<1x1x32x32xf32>,
    %cst_242 = arith.constant 0.000000e+00 : f32
    %1106 = vector.broadcast %cst_242 : f32 to vector<16x16xf32>
    %c63 = arith.constant 63 : index
    %1107 = memref.load %arg1[%c63] : memref<256xf32, #tpu.memory_space<smem>>
    %1108 = vector.broadcast %1107 : f32 to vector<16x16xf32>
    %1109 = arith.mulf %1, %1108 : vector<16x16xf32>
    %1110 = arith.addf %1106, %1109 : vector<16x16xf32>
    %c61 = arith.constant 61 : index
    %1111 = memref.load %arg1[%c61] : memref<256xf32, #tpu.memory_space<smem>>
    %1112 = vector.broadcast %1111 : f32 to vector<16x16xf32>
    %1113 = arith.mulf %3, %1112 : vector<16x16xf32>
    %1114 = arith.addf %1110, %1113 : vector<16x16xf32>
    %c55 = arith.constant 55 : index
    %1115 = memref.load %arg1[%c55] : memref<256xf32, #tpu.memory_space<smem>>
    %1116 = vector.broadcast %1115 : f32 to vector<16x16xf32>
    %1117 = arith.mulf %7, %1116 : vector<16x16xf32>
    %1118 = arith.addf %1114, %1117 : vector<16x16xf32>
    %c53 = arith.constant 53 : index
    %1119 = memref.load %arg1[%c53] : memref<256xf32, #tpu.memory_space<smem>>
    %1120 = vector.broadcast %1119 : f32 to vector<16x16xf32>
    %1121 = arith.mulf %9, %1120 : vector<16x16xf32>
    %1122 = arith.addf %1118, %1121 : vector<16x16xf32>
    %c127 = arith.constant 127 : index
    %1123 = memref.load %arg1[%c127] : memref<256xf32, #tpu.memory_space<smem>>
    %1124 = vector.broadcast %1123 : f32 to vector<16x16xf32>
    %1125 = arith.mulf %19, %1124 : vector<16x16xf32>
    %1126 = arith.addf %1122, %1125 : vector<16x16xf32>
    %c125 = arith.constant 125 : index
    %1127 = memref.load %arg1[%c125] : memref<256xf32, #tpu.memory_space<smem>>
    %1128 = vector.broadcast %1127 : f32 to vector<16x16xf32>
    %1129 = arith.mulf %21, %1128 : vector<16x16xf32>
    %1130 = arith.addf %1126, %1129 : vector<16x16xf32>
    %c119 = arith.constant 119 : index
    %1131 = memref.load %arg1[%c119] : memref<256xf32, #tpu.memory_space<smem>>
    %1132 = vector.broadcast %1131 : f32 to vector<16x16xf32>
    %1133 = arith.mulf %25, %1132 : vector<16x16xf32>
    %1134 = arith.addf %1130, %1133 : vector<16x16xf32>
    %c117 = arith.constant 117 : index
    %1135 = memref.load %arg1[%c117] : memref<256xf32, #tpu.memory_space<smem>>
    %1136 = vector.broadcast %1135 : f32 to vector<16x16xf32>
    %1137 = arith.mulf %27, %1136 : vector<16x16xf32>
    %1138 = arith.addf %1134, %1137 : vector<16x16xf32>
    %c191 = arith.constant 191 : index
    %1139 = memref.load %arg1[%c191] : memref<256xf32, #tpu.memory_space<smem>>
    %1140 = vector.broadcast %1139 : f32 to vector<16x16xf32>
    %1141 = arith.mulf %37, %1140 : vector<16x16xf32>
    %1142 = arith.addf %1138, %1141 : vector<16x16xf32>
    %c189 = arith.constant 189 : index
    %1143 = memref.load %arg1[%c189] : memref<256xf32, #tpu.memory_space<smem>>
    %1144 = vector.broadcast %1143 : f32 to vector<16x16xf32>
    %1145 = arith.mulf %39, %1144 : vector<16x16xf32>
    %1146 = arith.addf %1142, %1145 : vector<16x16xf32>
    %c183 = arith.constant 183 : index
    %1147 = memref.load %arg1[%c183] : memref<256xf32, #tpu.memory_space<smem>>
    %1148 = vector.broadcast %1147 : f32 to vector<16x16xf32>
    %1149 = arith.mulf %43, %1148 : vector<16x16xf32>
    %1150 = arith.addf %1146, %1149 : vector<16x16xf32>
    %c181 = arith.constant 181 : index
    %1151 = memref.load %arg1[%c181] : memref<256xf32, #tpu.memory_space<smem>>
    %1152 = vector.broadcast %1151 : f32 to vector<16x16xf32>
    %1153 = arith.mulf %45, %1152 : vector<16x16xf32>
    %1154 = arith.addf %1150, %1153 : vector<16x16xf32>
    %c255 = arith.constant 255 : index
    %1155 = memref.load %arg1[%c255] : memref<256xf32, #tpu.memory_space<smem>>
    %1156 = vector.broadcast %1155 : f32 to vector<16x16xf32>
    %1157 = arith.mulf %55, %1156 : vector<16x16xf32>
    %1158 = arith.addf %1154, %1157 : vector<16x16xf32>
    %c253 = arith.constant 253 : index
    %1159 = memref.load %arg1[%c253] : memref<256xf32, #tpu.memory_space<smem>>
    %1160 = vector.broadcast %1159 : f32 to vector<16x16xf32>
    %1161 = arith.mulf %57, %1160 : vector<16x16xf32>
    %1162 = arith.addf %1158, %1161 : vector<16x16xf32>
    %c247 = arith.constant 247 : index
    %1163 = memref.load %arg1[%c247] : memref<256xf32, #tpu.memory_space<smem>>
    %1164 = vector.broadcast %1163 : f32 to vector<16x16xf32>
    %1165 = arith.mulf %61, %1164 : vector<16x16xf32>
    %1166 = arith.addf %1162, %1165 : vector<16x16xf32>
    %c245 = arith.constant 245 : index
    %1167 = memref.load %arg1[%c245] : memref<256xf32, #tpu.memory_space<smem>>
    %1168 = vector.broadcast %1167 : f32 to vector<16x16xf32>
    %1169 = arith.mulf %63, %1168 : vector<16x16xf32>
    %1170 = arith.addf %1166, %1169 : vector<16x16xf32>
    %cst_243 = arith.constant 0.000000e+00 : f32
    %1171 = vector.broadcast %cst_243 : f32 to vector<16x16xf32>
    %c62 = arith.constant 62 : index
    %1172 = memref.load %arg1[%c62] : memref<256xf32, #tpu.memory_space<smem>>
    %1173 = vector.broadcast %1172 : f32 to vector<16x16xf32>
    %1174 = arith.mulf %3, %1173 : vector<16x16xf32>
    %1175 = arith.addf %1171, %1174 : vector<16x16xf32>
    %c60 = arith.constant 60 : index
    %1176 = memref.load %arg1[%c60] : memref<256xf32, #tpu.memory_space<smem>>
    %1177 = vector.broadcast %1176 : f32 to vector<16x16xf32>
    %1178 = arith.mulf %5, %1177 : vector<16x16xf32>
    %1179 = arith.addf %1175, %1178 : vector<16x16xf32>
    %c54 = arith.constant 54 : index
    %1180 = memref.load %arg1[%c54] : memref<256xf32, #tpu.memory_space<smem>>
    %1181 = vector.broadcast %1180 : f32 to vector<16x16xf32>
    %1182 = arith.mulf %9, %1181 : vector<16x16xf32>
    %1183 = arith.addf %1179, %1182 : vector<16x16xf32>
    %c52 = arith.constant 52 : index
    %1184 = memref.load %arg1[%c52] : memref<256xf32, #tpu.memory_space<smem>>
    %1185 = vector.broadcast %1184 : f32 to vector<16x16xf32>
    %1186 = arith.mulf %11, %1185 : vector<16x16xf32>
    %1187 = arith.addf %1183, %1186 : vector<16x16xf32>
    %c126 = arith.constant 126 : index
    %1188 = memref.load %arg1[%c126] : memref<256xf32, #tpu.memory_space<smem>>
    %1189 = vector.broadcast %1188 : f32 to vector<16x16xf32>
    %1190 = arith.mulf %21, %1189 : vector<16x16xf32>
    %1191 = arith.addf %1187, %1190 : vector<16x16xf32>
    %c124 = arith.constant 124 : index
    %1192 = memref.load %arg1[%c124] : memref<256xf32, #tpu.memory_space<smem>>
    %1193 = vector.broadcast %1192 : f32 to vector<16x16xf32>
    %1194 = arith.mulf %23, %1193 : vector<16x16xf32>
    %1195 = arith.addf %1191, %1194 : vector<16x16xf32>
    %c118 = arith.constant 118 : index
    %1196 = memref.load %arg1[%c118] : memref<256xf32, #tpu.memory_space<smem>>
    %1197 = vector.broadcast %1196 : f32 to vector<16x16xf32>
    %1198 = arith.mulf %27, %1197 : vector<16x16xf32>
    %1199 = arith.addf %1195, %1198 : vector<16x16xf32>
    %c116 = arith.constant 116 : index
    %1200 = memref.load %arg1[%c116] : memref<256xf32, #tpu.memory_space<smem>>
    %1201 = vector.broadcast %1200 : f32 to vector<16x16xf32>
    %1202 = arith.mulf %29, %1201 : vector<16x16xf32>
    %1203 = arith.addf %1199, %1202 : vector<16x16xf32>
    %c190 = arith.constant 190 : index
    %1204 = memref.load %arg1[%c190] : memref<256xf32, #tpu.memory_space<smem>>
    %1205 = vector.broadcast %1204 : f32 to vector<16x16xf32>
    %1206 = arith.mulf %39, %1205 : vector<16x16xf32>
    %1207 = arith.addf %1203, %1206 : vector<16x16xf32>
    %c188 = arith.constant 188 : index
    %1208 = memref.load %arg1[%c188] : memref<256xf32, #tpu.memory_space<smem>>
    %1209 = vector.broadcast %1208 : f32 to vector<16x16xf32>
    %1210 = arith.mulf %41, %1209 : vector<16x16xf32>
    %1211 = arith.addf %1207, %1210 : vector<16x16xf32>
    %c182 = arith.constant 182 : index
    %1212 = memref.load %arg1[%c182] : memref<256xf32, #tpu.memory_space<smem>>
    %1213 = vector.broadcast %1212 : f32 to vector<16x16xf32>
    %1214 = arith.mulf %45, %1213 : vector<16x16xf32>
    %1215 = arith.addf %1211, %1214 : vector<16x16xf32>
    %c180 = arith.constant 180 : index
    %1216 = memref.load %arg1[%c180] : memref<256xf32, #tpu.memory_space<smem>>
    %1217 = vector.broadcast %1216 : f32 to vector<16x16xf32>
    %1218 = arith.mulf %47, %1217 : vector<16x16xf32>
    %1219 = arith.addf %1215, %1218 : vector<16x16xf32>
    %c254 = arith.constant 254 : index
    %1220 = memref.load %arg1[%c254] : memref<256xf32, #tpu.memory_space<smem>>
    %1221 = vector.broadcast %1220 : f32 to vector<16x16xf32>
    %1222 = arith.mulf %57, %1221 : vector<16x16xf32>
    %1223 = arith.addf %1219, %1222 : vector<16x16xf32>
    %c252 = arith.constant 252 : index
    %1224 = memref.load %arg1[%c252] : memref<256xf32, #tpu.memory_space<smem>>
    %1225 = vector.broadcast %1224 : f32 to vector<16x16xf32>
    %1226 = arith.mulf %59, %1225 : vector<16x16xf32>
    %1227 = arith.addf %1223, %1226 : vector<16x16xf32>
    %c246 = arith.constant 246 : index
    %1228 = memref.load %arg1[%c246] : memref<256xf32, #tpu.memory_space<smem>>
    %1229 = vector.broadcast %1228 : f32 to vector<16x16xf32>
    %1230 = arith.mulf %63, %1229 : vector<16x16xf32>
    %1231 = arith.addf %1227, %1230 : vector<16x16xf32>
    %c244 = arith.constant 244 : index
    %1232 = memref.load %arg1[%c244] : memref<256xf32, #tpu.memory_space<smem>>
    %1233 = vector.broadcast %1232 : f32 to vector<16x16xf32>
    %1234 = arith.mulf %65, %1233 : vector<16x16xf32>
    %1235 = arith.addf %1231, %1234 : vector<16x16xf32>
    %cst_244 = arith.constant 0.000000e+00 : f32
    %1236 = vector.broadcast %cst_244 : f32 to vector<16x16xf32>
    %c59 = arith.constant 59 : index
    %1237 = memref.load %arg1[%c59] : memref<256xf32, #tpu.memory_space<smem>>
    %1238 = vector.broadcast %1237 : f32 to vector<16x16xf32>
    %1239 = arith.mulf %7, %1238 : vector<16x16xf32>
    %1240 = arith.addf %1236, %1239 : vector<16x16xf32>
    %c57 = arith.constant 57 : index
    %1241 = memref.load %arg1[%c57] : memref<256xf32, #tpu.memory_space<smem>>
    %1242 = vector.broadcast %1241 : f32 to vector<16x16xf32>
    %1243 = arith.mulf %9, %1242 : vector<16x16xf32>
    %1244 = arith.addf %1240, %1243 : vector<16x16xf32>
    %c51 = arith.constant 51 : index
    %1245 = memref.load %arg1[%c51] : memref<256xf32, #tpu.memory_space<smem>>
    %1246 = vector.broadcast %1245 : f32 to vector<16x16xf32>
    %1247 = arith.mulf %13, %1246 : vector<16x16xf32>
    %1248 = arith.addf %1244, %1247 : vector<16x16xf32>
    %c49 = arith.constant 49 : index
    %1249 = memref.load %arg1[%c49] : memref<256xf32, #tpu.memory_space<smem>>
    %1250 = vector.broadcast %1249 : f32 to vector<16x16xf32>
    %1251 = arith.mulf %15, %1250 : vector<16x16xf32>
    %1252 = arith.addf %1248, %1251 : vector<16x16xf32>
    %c123 = arith.constant 123 : index
    %1253 = memref.load %arg1[%c123] : memref<256xf32, #tpu.memory_space<smem>>
    %1254 = vector.broadcast %1253 : f32 to vector<16x16xf32>
    %1255 = arith.mulf %25, %1254 : vector<16x16xf32>
    %1256 = arith.addf %1252, %1255 : vector<16x16xf32>
    %c121 = arith.constant 121 : index
    %1257 = memref.load %arg1[%c121] : memref<256xf32, #tpu.memory_space<smem>>
    %1258 = vector.broadcast %1257 : f32 to vector<16x16xf32>
    %1259 = arith.mulf %27, %1258 : vector<16x16xf32>
    %1260 = arith.addf %1256, %1259 : vector<16x16xf32>
    %c115 = arith.constant 115 : index
    %1261 = memref.load %arg1[%c115] : memref<256xf32, #tpu.memory_space<smem>>
    %1262 = vector.broadcast %1261 : f32 to vector<16x16xf32>
    %1263 = arith.mulf %31, %1262 : vector<16x16xf32>
    %1264 = arith.addf %1260, %1263 : vector<16x16xf32>
    %c113 = arith.constant 113 : index
    %1265 = memref.load %arg1[%c113] : memref<256xf32, #tpu.memory_space<smem>>
    %1266 = vector.broadcast %1265 : f32 to vector<16x16xf32>
    %1267 = arith.mulf %33, %1266 : vector<16x16xf32>
    %1268 = arith.addf %1264, %1267 : vector<16x16xf32>
    %c187 = arith.constant 187 : index
    %1269 = memref.load %arg1[%c187] : memref<256xf32, #tpu.memory_space<smem>>
    %1270 = vector.broadcast %1269 : f32 to vector<16x16xf32>
    %1271 = arith.mulf %43, %1270 : vector<16x16xf32>
    %1272 = arith.addf %1268, %1271 : vector<16x16xf32>
    %c185 = arith.constant 185 : index
    %1273 = memref.load %arg1[%c185] : memref<256xf32, #tpu.memory_space<smem>>
    %1274 = vector.broadcast %1273 : f32 to vector<16x16xf32>
    %1275 = arith.mulf %45, %1274 : vector<16x16xf32>
    %1276 = arith.addf %1272, %1275 : vector<16x16xf32>
    %c179 = arith.constant 179 : index
    %1277 = memref.load %arg1[%c179] : memref<256xf32, #tpu.memory_space<smem>>
    %1278 = vector.broadcast %1277 : f32 to vector<16x16xf32>
    %1279 = arith.mulf %49, %1278 : vector<16x16xf32>
    %1280 = arith.addf %1276, %1279 : vector<16x16xf32>
    %c177 = arith.constant 177 : index
    %1281 = memref.load %arg1[%c177] : memref<256xf32, #tpu.memory_space<smem>>
    %1282 = vector.broadcast %1281 : f32 to vector<16x16xf32>
    %1283 = arith.mulf %51, %1282 : vector<16x16xf32>
    %1284 = arith.addf %1280, %1283 : vector<16x16xf32>
    %c251 = arith.constant 251 : index
    %1285 = memref.load %arg1[%c251] : memref<256xf32, #tpu.memory_space<smem>>
    %1286 = vector.broadcast %1285 : f32 to vector<16x16xf32>
    %1287 = arith.mulf %61, %1286 : vector<16x16xf32>
    %1288 = arith.addf %1284, %1287 : vector<16x16xf32>
    %c249 = arith.constant 249 : index
    %1289 = memref.load %arg1[%c249] : memref<256xf32, #tpu.memory_space<smem>>
    %1290 = vector.broadcast %1289 : f32 to vector<16x16xf32>
    %1291 = arith.mulf %63, %1290 : vector<16x16xf32>
    %1292 = arith.addf %1288, %1291 : vector<16x16xf32>
    %c243 = arith.constant 243 : index
    %1293 = memref.load %arg1[%c243] : memref<256xf32, #tpu.memory_space<smem>>
    %1294 = vector.broadcast %1293 : f32 to vector<16x16xf32>
    %1295 = arith.mulf %67, %1294 : vector<16x16xf32>
    %1296 = arith.addf %1292, %1295 : vector<16x16xf32>
    %c241 = arith.constant 241 : index
    %1297 = memref.load %arg1[%c241] : memref<256xf32, #tpu.memory_space<smem>>
    %1298 = vector.broadcast %1297 : f32 to vector<16x16xf32>
    %1299 = arith.mulf %69, %1298 : vector<16x16xf32>
    %1300 = arith.addf %1296, %1299 : vector<16x16xf32>
    %cst_245 = arith.constant 0.000000e+00 : f32
    %1301 = vector.broadcast %cst_245 : f32 to vector<16x16xf32>
    %c58 = arith.constant 58 : index
    %1302 = memref.load %arg1[%c58] : memref<256xf32, #tpu.memory_space<smem>>
    %1303 = vector.broadcast %1302 : f32 to vector<16x16xf32>
    %1304 = arith.mulf %9, %1303 : vector<16x16xf32>
    %1305 = arith.addf %1301, %1304 : vector<16x16xf32>
    %c56 = arith.constant 56 : index
    %1306 = memref.load %arg1[%c56] : memref<256xf32, #tpu.memory_space<smem>>
    %1307 = vector.broadcast %1306 : f32 to vector<16x16xf32>
    %1308 = arith.mulf %11, %1307 : vector<16x16xf32>
    %1309 = arith.addf %1305, %1308 : vector<16x16xf32>
    %c50 = arith.constant 50 : index
    %1310 = memref.load %arg1[%c50] : memref<256xf32, #tpu.memory_space<smem>>
    %1311 = vector.broadcast %1310 : f32 to vector<16x16xf32>
    %1312 = arith.mulf %15, %1311 : vector<16x16xf32>
    %1313 = arith.addf %1309, %1312 : vector<16x16xf32>
    %c48 = arith.constant 48 : index
    %1314 = memref.load %arg1[%c48] : memref<256xf32, #tpu.memory_space<smem>>
    %1315 = vector.broadcast %1314 : f32 to vector<16x16xf32>
    %1316 = arith.mulf %17, %1315 : vector<16x16xf32>
    %1317 = arith.addf %1313, %1316 : vector<16x16xf32>
    %c122 = arith.constant 122 : index
    %1318 = memref.load %arg1[%c122] : memref<256xf32, #tpu.memory_space<smem>>
    %1319 = vector.broadcast %1318 : f32 to vector<16x16xf32>
    %1320 = arith.mulf %27, %1319 : vector<16x16xf32>
    %1321 = arith.addf %1317, %1320 : vector<16x16xf32>
    %c120 = arith.constant 120 : index
    %1322 = memref.load %arg1[%c120] : memref<256xf32, #tpu.memory_space<smem>>
    %1323 = vector.broadcast %1322 : f32 to vector<16x16xf32>
    %1324 = arith.mulf %29, %1323 : vector<16x16xf32>
    %1325 = arith.addf %1321, %1324 : vector<16x16xf32>
    %c114 = arith.constant 114 : index
    %1326 = memref.load %arg1[%c114] : memref<256xf32, #tpu.memory_space<smem>>
    %1327 = vector.broadcast %1326 : f32 to vector<16x16xf32>
    %1328 = arith.mulf %33, %1327 : vector<16x16xf32>
    %1329 = arith.addf %1325, %1328 : vector<16x16xf32>
    %c112 = arith.constant 112 : index
    %1330 = memref.load %arg1[%c112] : memref<256xf32, #tpu.memory_space<smem>>
    %1331 = vector.broadcast %1330 : f32 to vector<16x16xf32>
    %1332 = arith.mulf %35, %1331 : vector<16x16xf32>
    %1333 = arith.addf %1329, %1332 : vector<16x16xf32>
    %c186 = arith.constant 186 : index
    %1334 = memref.load %arg1[%c186] : memref<256xf32, #tpu.memory_space<smem>>
    %1335 = vector.broadcast %1334 : f32 to vector<16x16xf32>
    %1336 = arith.mulf %45, %1335 : vector<16x16xf32>
    %1337 = arith.addf %1333, %1336 : vector<16x16xf32>
    %c184 = arith.constant 184 : index
    %1338 = memref.load %arg1[%c184] : memref<256xf32, #tpu.memory_space<smem>>
    %1339 = vector.broadcast %1338 : f32 to vector<16x16xf32>
    %1340 = arith.mulf %47, %1339 : vector<16x16xf32>
    %1341 = arith.addf %1337, %1340 : vector<16x16xf32>
    %c178 = arith.constant 178 : index
    %1342 = memref.load %arg1[%c178] : memref<256xf32, #tpu.memory_space<smem>>
    %1343 = vector.broadcast %1342 : f32 to vector<16x16xf32>
    %1344 = arith.mulf %51, %1343 : vector<16x16xf32>
    %1345 = arith.addf %1341, %1344 : vector<16x16xf32>
    %c176 = arith.constant 176 : index
    %1346 = memref.load %arg1[%c176] : memref<256xf32, #tpu.memory_space<smem>>
    %1347 = vector.broadcast %1346 : f32 to vector<16x16xf32>
    %1348 = arith.mulf %53, %1347 : vector<16x16xf32>
    %1349 = arith.addf %1345, %1348 : vector<16x16xf32>
    %c250 = arith.constant 250 : index
    %1350 = memref.load %arg1[%c250] : memref<256xf32, #tpu.memory_space<smem>>
    %1351 = vector.broadcast %1350 : f32 to vector<16x16xf32>
    %1352 = arith.mulf %63, %1351 : vector<16x16xf32>
    %1353 = arith.addf %1349, %1352 : vector<16x16xf32>
    %c248 = arith.constant 248 : index
    %1354 = memref.load %arg1[%c248] : memref<256xf32, #tpu.memory_space<smem>>
    %1355 = vector.broadcast %1354 : f32 to vector<16x16xf32>
    %1356 = arith.mulf %65, %1355 : vector<16x16xf32>
    %1357 = arith.addf %1353, %1356 : vector<16x16xf32>
    %c242 = arith.constant 242 : index
    %1358 = memref.load %arg1[%c242] : memref<256xf32, #tpu.memory_space<smem>>
    %1359 = vector.broadcast %1358 : f32 to vector<16x16xf32>
    %1360 = arith.mulf %69, %1359 : vector<16x16xf32>
    %1361 = arith.addf %1357, %1360 : vector<16x16xf32>
    %c240 = arith.constant 240 : index
    %1362 = memref.load %arg1[%c240] : memref<256xf32, #tpu.memory_space<smem>>
    %1363 = vector.broadcast %1362 : f32 to vector<16x16xf32>
    %1364 = arith.mulf %71, %1363 : vector<16x16xf32>
    %1365 = arith.addf %1361, %1364 : vector<16x16xf32>
    %1366 = vector.shape_cast %1170 : vector<16x16xf32> to vector<1x16x16xf32>
    %cst_246 = arith.constant dense<0.000000e+00> : vector<1xf32>
    %1367 = vector.multi_reduction <add>, %1366, %cst_246 [1, 2] : vector<1x16x16xf32> to vector<1xf32>
    %1368 = vector.shape_cast %1367 : vector<1xf32> to vector<1x1x1xf32>
    %1369 = vector.extract %1368[0, 0, 0] : f32 from vector<1x1x1xf32>
    %1370 = vector.shape_cast %1235 : vector<16x16xf32> to vector<1x16x16xf32>
    %cst_247 = arith.constant dense<0.000000e+00> : vector<1xf32>
    %1371 = vector.multi_reduction <add>, %1370, %cst_247 [1, 2] : vector<1x16x16xf32> to vector<1xf32>
    %1372 = vector.shape_cast %1371 : vector<1xf32> to vector<1x1x1xf32>
    %1373 = vector.extract %1372[0, 0, 0] : f32 from vector<1x1x1xf32>
    %1374 = arith.addf %1369, %1373 : f32
    %1375 = vector.shape_cast %1300 : vector<16x16xf32> to vector<1x16x16xf32>
    %cst_248 = arith.constant dense<0.000000e+00> : vector<1xf32>
    %1376 = vector.multi_reduction <add>, %1375, %cst_248 [1, 2] : vector<1x16x16xf32> to vector<1xf32>
    %1377 = vector.shape_cast %1376 : vector<1xf32> to vector<1x1x1xf32>
    %1378 = vector.extract %1377[0, 0, 0] : f32 from vector<1x1x1xf32>
    %1379 = arith.addf %1374, %1378 : f32
    %1380 = vector.shape_cast %1365 : vector<16x16xf32> to vector<1x16x16xf32>
    %cst_249 = arith.constant dense<0.000000e+00> : vector<1xf32>
    %1381 = vector.multi_reduction <add>, %1380, %cst_249 [1, 2] : vector<1x16x16xf32> to vector<1xf32>
    %1382 = vector.shape_cast %1381 : vector<1xf32> to vector<1x1x1xf32>
    %1383 = vector.extract %1382[0, 0, 0] : f32 from vector<1x1x1xf32>
    %1384 = arith.addf %1379, %1383 : f32
    %cst_250 = arith.constant 9.765625E-4 : f32
    %1385 = arith.mulf %1384, %cst_250 : f32
    %1386 = vector.broadcast %1385 : f32 to vector<16x16xf32>
    %1387 = arith.subf %1170, %1386 : vector<16x16xf32>
    %1388 = vector.broadcast %1385 : f32 to vector<16x16xf32>
    %1389 = arith.subf %1235, %1388 : vector<16x16xf32>
    %1390 = vector.broadcast %1385 : f32 to vector<16x16xf32>
    %1391 = arith.subf %1300, %1390 : vector<16x16xf32>
    %1392 = vector.broadcast %1385 : f32 to vector<16x16xf32>
    %1393 = arith.subf %1365, %1392 : vector<16x16xf32>
    %1394 = arith.mulf %1387, %1387 : vector<16x16xf32>
    %1395 = vector.shape_cast %1394 : vector<16x16xf32> to vector<1x16x16xf32>
    %cst_251 = arith.constant dense<0.000000e+00> : vector<1xf32>
    %1396 = vector.multi_reduction <add>, %1395, %cst_251 [1, 2] : vector<1x16x16xf32> to vector<1xf32>
    %1397 = vector.shape_cast %1396 : vector<1xf32> to vector<1x1x1xf32>
    %1398 = vector.extract %1397[0, 0, 0] : f32 from vector<1x1x1xf32>
    %1399 = arith.mulf %1389, %1389 : vector<16x16xf32>
    %1400 = vector.shape_cast %1399 : vector<16x16xf32> to vector<1x16x16xf32>
    %cst_252 = arith.constant dense<0.000000e+00> : vector<1xf32>
    %1401 = vector.multi_reduction <add>, %1400, %cst_252 [1, 2] : vector<1x16x16xf32> to vector<1xf32>
    %1402 = vector.shape_cast %1401 : vector<1xf32> to vector<1x1x1xf32>
    %1403 = vector.extract %1402[0, 0, 0] : f32 from vector<1x1x1xf32>
    %1404 = arith.addf %1398, %1403 : f32
    %1405 = arith.mulf %1391, %1391 : vector<16x16xf32>
    %1406 = vector.shape_cast %1405 : vector<16x16xf32> to vector<1x16x16xf32>
    %cst_253 = arith.constant dense<0.000000e+00> : vector<1xf32>
    %1407 = vector.multi_reduction <add>, %1406, %cst_253 [1, 2] : vector<1x16x16xf32> to vector<1xf32>
    %1408 = vector.shape_cast %1407 : vector<1xf32> to vector<1x1x1xf32>
    %1409 = vector.extract %1408[0, 0, 0] : f32 from vector<1x1x1xf32>
    %1410 = arith.addf %1404, %1409 : f32
    %1411 = arith.mulf %1393, %1393 : vector<16x16xf32>
    %1412 = vector.shape_cast %1411 : vector<16x16xf32> to vector<1x16x16xf32>
    %cst_254 = arith.constant dense<0.000000e+00> : vector<1xf32>
    %1413 = vector.multi_reduction <add>, %1412, %cst_254 [1, 2] : vector<1x16x16xf32> to vector<1xf32>
    %1414 = vector.shape_cast %1413 : vector<1xf32> to vector<1x1x1xf32>
    %1415 = vector.extract %1414[0, 0, 0] : f32 from vector<1x1x1xf32>
    %1416 = arith.addf %1410, %1415 : f32
    %cst_255 = arith.constant 9.765625E-4 : f32
    %1417 = arith.mulf %1416, %cst_255 : f32
    %cst_256 = arith.constant 9.99999974E-6 : f32
    %1418 = arith.addf %1417, %cst_256 : f32
    %1419 = math.rsqrt %1418 : f32
    %1420 = vector.broadcast %1419 : f32 to vector<16x16xf32>
    %1421 = arith.mulf %1387, %1420 : vector<16x16xf32>
    %cst_257 = arith.constant 0.000000e+00 : f32
    %1422 = vector.broadcast %cst_257 : f32 to vector<16x16xf32>
    %1423 = arith.maximumf %1421, %1422 : vector<16x16xf32>
    %1424 = vector.broadcast %1419 : f32 to vector<16x16xf32>
    %1425 = arith.mulf %1389, %1424 : vector<16x16xf32>
    %cst_258 = arith.constant 0.000000e+00 : f32
    %1426 = vector.broadcast %cst_258 : f32 to vector<16x16xf32>
    %1427 = arith.maximumf %1425, %1426 : vector<16x16xf32>
    %cst_259 = arith.constant dense<0.000000e+00> : vector<16x32xf32>
    %1428 = tpu.matmul %1423, %73, %cst_259 {dimension_numbers = #tpu.dot_dimension_numbers<[1], [0], [0], [1], [0, 0, 1, 1], [], []>} : vector<16x16xf32>, vector<16x32xf32>, vector<16x32xf32> -> vector<16x32xf32>
    %cst_260 = arith.constant dense<0.000000e+00> : vector<16x32xf32>
    %1429 = tpu.matmul %1427, %75, %cst_260 {dimension_numbers = #tpu.dot_dimension_numbers<[1], [0], [0], [1], [0, 0, 1, 1], [], []>} : vector<16x16xf32>, vector<16x32xf32>, vector<16x32xf32> -> vector<16x32xf32>
    %1430 = arith.addf %1428, %1429 : vector<16x32xf32>
    %1431 = vector.broadcast %1419 : f32 to vector<16x16xf32>
    %1432 = arith.mulf %1391, %1431 : vector<16x16xf32>
    %cst_261 = arith.constant 0.000000e+00 : f32
    %1433 = vector.broadcast %cst_261 : f32 to vector<16x16xf32>
    %1434 = arith.maximumf %1432, %1433 : vector<16x16xf32>
    %1435 = vector.broadcast %1419 : f32 to vector<16x16xf32>
    %1436 = arith.mulf %1393, %1435 : vector<16x16xf32>
    %cst_262 = arith.constant 0.000000e+00 : f32
    %1437 = vector.broadcast %cst_262 : f32 to vector<16x16xf32>
    %1438 = arith.maximumf %1436, %1437 : vector<16x16xf32>
    %cst_263 = arith.constant dense<0.000000e+00> : vector<16x32xf32>
    %1439 = tpu.matmul %1434, %73, %cst_263 {dimension_numbers = #tpu.dot_dimension_numbers<[1], [0], [0], [1], [0, 0, 1, 1], [], []>} : vector<16x16xf32>, vector<16x32xf32>, vector<16x32xf32> -> vector<16x32xf32>
    %cst_264 = arith.constant dense<0.000000e+00> : vector<16x32xf32>
    %1440 = tpu.matmul %1438, %75, %cst_264 {dimension_numbers = #tpu.dot_dimension_numbers<[1], [0], [0], [1], [0, 0, 1, 1], [], []>} : vector<16x16xf32>, vector<16x32xf32>, vector<16x32xf32> -> vector<16x32xf32>
    %1441 = arith.addf %1439, %1440 : vector<16x32xf32>
    %cst_265 = arith.constant dense<0.000000e+00> : vector<32x32xf32>
    %1442 = tpu.matmul %77, %1430, %cst_265 {dimension_numbers = #tpu.dot_dimension_numbers<[1], [0], [0], [1], [0, 0, 1, 1], [], []>} : vector<32x16xf32>, vector<16x32xf32>, vector<32x32xf32> -> vector<32x32xf32>
    %cst_266 = arith.constant dense<0.000000e+00> : vector<32x32xf32>
    %1443 = tpu.matmul %79, %1441, %cst_266 {dimension_numbers = #tpu.dot_dimension_numbers<[1], [0], [0], [1], [0, 0, 1, 1], [], []>} : vector<32x16xf32>, vector<16x32xf32>, vector<32x32xf32> -> vector<32x32xf32>
    %1444 = arith.addf %1442, %1443 : vector<32x32xf32>
    %c0_267 = arith.constant 0 : index
    %c3_268 = arith.constant 3 : index
    %c0_269 = arith.constant 0 : index
    %c0_270 = arith.constant 0 : index
    %1445 = vector.load %arg5[%c0_267, %c3_268, %c0_269, %c0_270] : memref<1x4x32x32xf32, #tpu.memory_space<vmem>>, vector<1x1x32x32xf32>
    %1446 = vector.shape_cast %1445 : vector<1x1x32x32xf32> to vector<32x32xf32>
    %1447 = vector.shape_cast %1444 : vector<32x32xf32> to vector<1x1x32x32xf32>
    tpu.vector_store %arg5[%c0_267, %c3_268, %c0_269, %c0_270], %1447 {strides = array<i32>} : memref<1x4x32x32xf32, #tpu.memory_space<vmem>>, vector<1x1x32x32xf32>,
    return
  }
  func.func @transform_0(%arg0: i32) -> i32 {
    %c0_i32 = arith.constant 0 : i32
    %c0_i32_0 = arith.constant 0 : i32
    return %c0_i32 : i32
  }
  func.func @transform_1(%arg0: i32) -> (i32, i32, i32, i32) {
    %c0_i32 = arith.constant 0 : i32
    %c0_i32_0 = arith.constant 0 : i32
    %c0_i32_1 = arith.constant 0 : i32
    %c0_i32_2 = arith.constant 0 : i32
    return %arg0, %c0_i32, %c0_i32_0, %c0_i32_1 : i32, i32, i32, i32
  }
  func.func @transform_2(%arg0: i32) -> (i32, i32, i32) {
    %c0_i32 = arith.constant 0 : i32
    %c0_i32_0 = arith.constant 0 : i32
    %c0_i32_1 = arith.constant 0 : i32
    %c0_i32_2 = arith.constant 0 : i32
    return %c0_i32, %c0_i32_0, %c0_i32_1 : i32, i32, i32
  }
  func.func @transform_3(%arg0: i32) -> (i32, i32, i32) {
    %c0_i32 = arith.constant 0 : i32
    %c0_i32_0 = arith.constant 0 : i32
    %c0_i32_1 = arith.constant 0 : i32
    %c0_i32_2 = arith.constant 0 : i32
    return %c0_i32, %c0_i32_0, %c0_i32_1 : i32, i32, i32
  }
  func.func @transform_4(%arg0: i32) -> (i32, i32, i32, i32) {
    %c0_i32 = arith.constant 0 : i32
    %c0_i32_0 = arith.constant 0 : i32
    %c0_i32_1 = arith.constant 0 : i32
    %c0_i32_2 = arith.constant 0 : i32
    return %arg0, %c0_i32, %c0_i32_0, %c0_i32_1 : i32, i32, i32, i32
  }
}

</mosaic_0001>

<bundles_post_ra>
// kernel: upsample_forward.1
= control target key start
LH: loop header
LB: loop body
LE: loop exit
PB: predicated region body
PF: predicated region fallthrough
CT: control target
= control target key end

     0   :  { %9 = vsyncpa [#allocation3], 0  ;;  %s4998_s15 = smov 0   ;;  %s7829_s0 = inlined_call_operand.vmem [shape: f32[256], index: 0, kind: input, shape index: {}]   ;;  %s7830_s1 = inlined_call_operand.vmem [shape: f32[2,4,18,18], index: 1, kind: input, shape index: {}]   ;;  %s7831_s2 = inlined_call_operand.vmem [shape: f32[2,16,32], index: 2, kind: input, shape index: {}]   ;;  %s7832_s3 = inlined_call_operand.vmem [shape: f32[2,32,16], index: 3, kind: input, shape index: {}]   ;;  %s7833_s4 = inlined_call_operand.vmem [shape: f32[2,4,32,32], index: 4, kind: output, shape index: {}]  }
   0x1 LB: > { %s4385_s16 = sadd.s32 4294967295, %s4969_s15   ;;  %p4387_p0 = scmp.ge.s32.totalorder %s4969_s15, 1  ;;  %s4969_s15 = sphi %s4998_s15, %s15_s15  }
   0x2   : > { %p135_p1 = scmp.lt.s32.totalorder %s4969_s15, 3  ;;  %s147_s19 = sshll.u32 %s7829_s0, 4  ;;  %s148_s19 = int_to_ptr.vmem [resolvable:$true] %s147_s19 }
   0x3   : > { %p4834_p3 = scmp.eq.s32.totalorder %s4385_s16, 0  ;;  %s4971_s20 = smov [#allocation2]  }
   0x4   : > { %p136_p2 = pnand %p4387_p0, %p135_p1 }
   0x6   : > { %p4830_p4 = pneg %p136_p2  ;;  %174 = sbr.rel (%p136_p2) target bundleno = 2838 (0xb16), region = 36 }
   0x8   : > { %p4831_p5 = pnand %p4834_p3, %p4830_p4 }
   0xa   : > { %4833 = dma.vmem_to_smem (!%p4831_p5), %s148_s19, 32, %s4971_s20, [#allocation3]  }
   0xb   : > { %4964 = dma.done.wait (%p4834_p3), [#allocation3], 32  }
   0xc   : > { %4966 = vsyncadd (%p4834_p3), [#allocation3], 4294967264 }
   0xd   : > { %181 = sfence }
   0xe   : > { %p202_p6 = scmp.lt.s32.totalorder %s4385_s16, 1  ;;  %s4438_s21 = sld [smem:[#allocation2 + $0x4]]  ;;  %vm893_vm0 = vcmask 130048   ;;  %vm1283_vm13 = vcmask 261120  }
   0xf   : > { %s4436_s22 = sld [smem:[#allocation2 + $0xc]]  ;;  %s4972_s28 = smov 127  }
  0x10   : > { %s7979_s16 = smov (!%p202_p6, %s4385_s16), 1  ;;  %s4468_s24 = sld [smem:[#allocation2 + $0x8]] }
  0x11   : > { %s4753_s23 = smul.u32 96, %s7979_s16  ;;  %s4440_s29 = sld [smem:[#allocation2 + $0x4c]] }
  0x12   : > { %s759_s30 = sld [smem:[#allocation2]] }
  0x13   : > { %s5015_s27 = scalar_lea.vmem %s7830_s1, %s4753_s23  ;;  %s4442_s5 = sld [smem:[#allocation2 + $0x44]] }
  0x14   : > { %v5018_v0 = vld [vmem:[%s5015_s27 + $0x1] sm:$0xff]  ;;  %v440_v1 = vstv %s4438_s21  ;;  %v5027_v6 = vld [vmem:[%s5015_s27 + $0x9] sm:$0xff]  ;;  %v5044_v15 = vld [vmem:[%s5015_s27 + $0x18] sm:$0xff]  ;;  %s4471_s6 = sld [smem:[#allocation2 + $0x48]] }
  0x15   : > { %v5021_v2 = vld [vmem:[%s5015_s27] sm:$0xff]  ;;  %v441_v3 = vmul.f32 %v440_v1, %v5018_v0  ;;  %v420_v4 = vstv %s4436_s22  ;;  %v5032_v9 = vld [vmem:[%s5015_s27 + $0x8] sm:$0xff]  ;;  %v442_v10 = vmul.f32 %v440_v1, %v5027_v6  ;;  %s4444_s7 = sld [smem:[#allocation2 + $0x8c]]  ;;  %v5073_v30 = vld [vmem:[%s5015_s27 + $0x30] sm:$0xff] }
  0x16   : > { %v421_v5 = vmul.f32 %v420_v4, %v5021_v2  ;;  %v740_v7 = vstv %s4468_s24  ;;  %v422_v11 = vmul.f32 %v420_v4, %v5032_v9  ;;  %v5040_v13 = vld [vmem:[%s5015_s27 + $0x20] sm:$0xff]  ;;  %v5059_v23 = vld [vmem:[%s5015_s27 + $0xa] sm:$0xff]  ;;  %s4473_s8 = sld [smem:[#allocation2 + $0x40]]  ;;  %v5083_v36 = vld [vmem:[%s5015_s27 + $0x38] sm:$0xff] }
  0x17   : > { %445 = vrot.lane.b32.xlu1 %v441_v3, %s4972_s28  ;;  %v741_v8 = vmul.f32 %v740_v7, %v5018_v0  ;;  %v742_v12 = vmul.f32 %v740_v7, %v5027_v6  ;;  %v460_v14 = vstv %s4440_s29  ;;  %v5049_v17 = vld [vmem:[%s5015_s27 + $0x2] sm:$0xff]  ;;  %v5055_v21 = vld [vmem:[%s5015_s27 + $0x19] sm:$0xff]  ;;  %s4446_s9 = sld [smem:[#allocation2 + $0x84]] }
  0x18   : > { %425 = vrot.lane.b32.xlu0 %v421_v5, %s4972_s28  ;;  %v462_v16 = vmul.f32 %v5040_v13, %v460_v14  ;;  %v461_v18 = vmul.f32 %v5044_v15, %v460_v14  ;;  %v760_v19 = vstv %s759_s30  ;;  %v5065_v26 = vld [vmem:[%s5015_s27 + $0x21] sm:$0xff]  ;;  %s4475_s10 = sld [smem:[#allocation2 + $0x88]]  ;;  %v5094_v41 = vld [vmem:[%s5015_s27 + $0x39] sm:$0xff] }
  0x19   : > { %745 = vrot.lane.b32.xlu2 %v741_v8, %s4972_s28  ;;  %v761_v20 = vmul.f32 %v760_v19, %v5049_v17  ;;  %v480_v22 = vstv %s4442_s5  ;;  %v762_v25 = vmul.f32 %v760_v19, %v5059_v23  ;;  %v5079_v34 = vld [vmem:[%s5015_s27 + $0x1a] sm:$0xff]  ;;  %v5088_v38 = vld [vmem:[%s5015_s27 + $0x22] sm:$0xff]  ;;  %s4448_s11 = sld [smem:[#allocation2 + $0xcc]] }
  0x1a   : > { %v481_v24 = vmul.f32 %v5055_v21, %v480_v22  ;;  %v482_v27 = vmul.f32 %v5065_v26, %v480_v22  ;;  %v780_v28 = vstv %s4471_s6  ;;  %v5098_v43 = vld [vmem:[%s5015_s27 + $0x31] sm:$0xff]  ;;  %v5106_v48 = vld [vmem:[%s5015_s27 + $0x48] sm:$0xff]  ;;  %s4477_s12 = sld [smem:[#allocation2 + $0x80]]  ;;  %v5118_v54 = vld [vmem:[%s5015_s27 + $0x3a] sm:$0xff] }
  0x1b   : > { %v782_v29 = vmul.f32 %v5065_v26, %v780_v28  ;;  %v781_v31 = vmul.f32 %v5055_v21, %v780_v28  ;;  %v500_v32 = vstv %s4444_s7  ;;  %v5112_v51 = vld [vmem:[%s5015_s27 + $0x50] sm:$0xff]  ;;  %s4450_s13 = sld [smem:[#allocation2 + $0xc4]] }
  0x1c   : > { %v501_v33 = vmul.f32 %v5073_v30, %v500_v32  ;;  %v800_v35 = vstv %s4473_s8  ;;  %v502_v39 = vmul.f32 %v5083_v36, %v500_v32  ;;  %s4479_s14 = sld [smem:[#allocation2 + $0xc8]]  ;;  %v5122_v56 = vld [vmem:[%s5015_s27 + $0x32] sm:$0xff]  ;;  %v5128_v59 = vld [vmem:[%s5015_s27 + $0x49] sm:$0xff] }
  0x1d   : > { %v801_v37 = vmul.f32 %v5079_v34, %v800_v35  ;;  %v802_v40 = vmul.f32 %v5088_v38, %v800_v35  ;;  %v520_v42 = vstv %s4446_s9  ;;  %s4481_s17 = sld [smem:[#allocation2 + $0xc0]]  ;;  %v5134_v63 = vld [vmem:[%s5015_s27 + $0x51] sm:$0xff] }
  0x1e   : > { %v522_v44 = vmul.f32 %v5094_v41, %v520_v42  ;;  %v521_v45 = vmul.f32 %v5098_v43, %v520_v42  ;;  %v820_v46 = vstv %s4475_s10  ;;  %s4420_s18 = sld [smem:[#allocation2 + $0xd]]  ;;  %v5142_v5 = vld [vmem:[%s5015_s27 + $0x52] sm:$0xff]  ;;  %v5146_v8 = vld [vmem:[%s5015_s27 + $0x4a] sm:$0xff] }
  0x1f   : > { %447 = vrot.lane.b32.xlu1 %v442_v10, %s4972_s28  ;;  %v821_v47 = vmul.f32 %v5098_v43, %v820_v46  ;;  %v540_v49 = vstv %s4448_s11  ;;  %v822_v52 = vmul.f32 %v5094_v41, %v820_v46  ;;  %s4452_s19 = sld [smem:[#allocation2 + $0x9]] }
  0x20   : > { %427 = vrot.lane.b32.xlu0 %v422_v11, %s4972_s28  ;;  %v541_v50 = vmul.f32 %v5106_v48, %v540_v49  ;;  %v542_v53 = vmul.f32 %v5112_v51, %v540_v49  ;;  %v840_v55 = vstv %s4477_s12  ;;  %s4422_s20 = sld [smem:[#allocation2 + $0x5]] }
  0x21   : > { %747 = vrot.lane.b32.xlu2 %v742_v12, %s4972_s28  ;;  %v842_v57 = vmul.f32 %v5118_v54, %v840_v55  ;;  %v841_v58 = vmul.f32 %v5122_v56, %v840_v55  ;;  %v560_v60 = vstv %s4450_s13  ;;  %s4454_s21 = sld [smem:[#allocation2 + $0x1]] }
  0x22   : > { %v561_v61 = vmul.f32 %v5128_v59, %v560_v60  ;;  %v860_v62 = vstv %s4479_s14  ;;  %v562_v3 = vmul.f32 %v5134_v63, %v560_v60  ;;  %s4424_s22 = sld [smem:[#allocation2 + $0x4d]] }
  0x23   : > { %v861_v1 = vmul.f32 %v5128_v59, %v860_v62  ;;  %v862_v4 = vmul.f32 %v5134_v63, %v860_v62  ;;  %v880_v7 = vstv %s4481_s17  ;;  %s4456_s23 = sld [smem:[#allocation2 + $0x49]] }
  0x24   : > { %v882_v10 = vmul.f32 %v5142_v5, %v880_v7  ;;  %v881_v11 = vmul.f32 %v5146_v8, %v880_v7  ;;  %v260_v12 = vstv %s4420_s18  ;;  %s4426_s24 = sld [smem:[#allocation2 + $0x45]] }
  0x25   : > { %v261_v14 = vmul.f32 %v260_v12, %v5021_v2  ;;  %v262_v19 = vmul.f32 %v260_v12, %v5032_v9  ;;  %s4458_s25 = sld [smem:[#allocation2 + $0x41]] }
  0x26   : > { %v280_v22 = vstv %s4422_s20  ;;  %s4428_s26 = sld [smem:[#allocation2 + $0x8d]] }
  0x27   : > { %467 = vrot.lane.b32.xlu1 %v462_v16, %s4972_s28  ;;  %v580_v16 = vstv %s4452_s19  ;;  %v600_v28 = vstv %s4454_s21  ;;  %s5184_s29 = sld [smem:[#allocation2 + $0xe]] }
  0x28   : > { %465 = vrot.lane.b32.xlu0 %v461_v18, %s4972_s28  ;;  %v581_v18 = vmul.f32 %v580_v16, %v5018_v0  ;;  %s5191_s30 = sld [smem:[#allocation2 + $0x89]] }
  0x29   : > { %765 = vrot.lane.b32.xlu2 %v761_v20, %s4972_s28  ;;  %v582_v20 = vmul.f32 %v580_v16, %v5027_v6  ;;  %s5193_s5 = sld [smem:[#allocation2 + $0x6]] }
  0x2a   : > { %s5197_s6 = sld [smem:[#allocation2 + $0x85]] }
  0x2b   : > { %s5212_s7 = sld [smem:[#allocation2 + $0x4e]] }
  0x2c   : > { %s5216_s8 = sld [smem:[#allocation2 + $0x81]] }
  0x2d   : > { %s5224_s9 = sld [smem:[#allocation2 + $0xa]] }
  0x2e   : > { %s5226_s10 = sld [smem:[#allocation2 + $0x46]] }
  0x2f   : > { %485 = vrot.lane.b32.xlu1 %v481_v24, %s4972_s28  ;;  %v282_v24 = vmul.f32 %v280_v22, %v5027_v6  ;;  %s5232_s11 = sld [smem:[#allocation2 + $0xcd]] }
  0x30   : > { %767 = vrot.lane.b32.xlu0 %v762_v25, %s4972_s28  ;;  %v281_v25 = vmul.f32 %v280_v22, %v5018_v0  ;;  %s5238_s12 = sld [smem:[#allocation2 + $0xc9]] }
  0x31   : > { %487 = vrot.lane.b32.xlu2 %v482_v27, %s4972_s28  ;;  %s5240_s13 = sld [smem:[#allocation2 + $0x2]] }
  0x32   : > { %s5249_s14 = sld [smem:[#allocation2 + $0x8e]] }
  0x33   : > { %s5257_s17 = sld [smem:[#allocation2 + $0x4a]] }
  0x34   : > { %s5262_s18 = sld [smem:[#allocation2 + $0xc5]] }
  0x35   : > { %s5271_s19 = sld [smem:[#allocation2 + $0x86]] }
  0x36   : > { %s5278_s20 = sld [smem:[#allocation2 + $0x42]] }
  0x37   : > { %787 = vrot.lane.b32.xlu1 %v782_v29, %s4972_s28  ;;  %v601_v29 = vmul.f32 %v600_v28, %v5049_v17  ;;  %s5284_s21 = sld [smem:[#allocation2 + $0xc1]] }
  0x38   : > { %785 = vrot.lane.b32.xlu0 %v781_v31, %s4972_s28  ;;  %v300_v31 = vstv %s4424_s22  ;;  %s5293_s22 = sld [smem:[#allocation2 + $0xce]] }
  0x39   : > { %505 = vrot.lane.b32.xlu2 %v501_v33, %s4972_s28  ;;  %v301_v32 = vmul.f32 %v5044_v15, %v300_v31  ;;  %v602_v33 = vmul.f32 %v600_v28, %v5059_v23 }
  0x3f   : > { %805 = vrot.lane.b32.xlu1 %v801_v37, %s4972_s28  ;;  %v302_v37 = vmul.f32 %v5040_v13, %v300_v31  ;;  %v454_v31 = vstv %s5212_s7  ;;  %s4419_s7 = sld [smem:[#allocation2 + $0xf]] }
  0x40   : > { %507 = vrot.lane.b32.xlu0 %v502_v39, %s4972_s28  ;;  %v620_v39 = vstv %s4456_s23  ;;  %s5297_s23 = sld [smem:[#allocation2 + $0x8a]] }
  0x41   : > { %807 = vrot.lane.b32.xlu2 %v802_v40, %s4972_s28  ;;  %v622_v40 = vmul.f32 %v5065_v26, %v620_v39  ;;  %v621_v42 = vmul.f32 %v5055_v21, %v620_v39 }
  0x47   : > { %527 = vrot.lane.b32.xlu1 %v522_v44, %s4972_s28 }
  0x48   : > { %525 = vrot.lane.b32.xlu0 %v521_v45, %s4972_s28  ;;  %v320_v45 = vstv %s4426_s24  ;;  %s5308_s24 = sld [smem:[#allocation2 + $0xc6]] }
  0x49   : > { %825 = vrot.lane.b32.xlu2 %v821_v47, %s4972_s28  ;;  %v321_v46 = vmul.f32 %v5055_v21, %v320_v45  ;;  %v640_v47 = vstv %s4458_s25  ;;  %s5321_s25 = sld [smem:[#allocation2 + $0x82]] }
  0x4f   : > { %545 = vrot.lane.b32.xlu1 %v541_v50, %s4972_s28 }
  0x50   : > { %827 = vrot.lane.b32.xlu0 %v822_v52, %s4972_s28  ;;  %v641_v52 = vmul.f32 %v5079_v34, %v640_v47 }
  0x51   : > { %547 = vrot.lane.b32.xlu2 %v542_v53, %s4972_s28  ;;  %v322_v53 = vmul.f32 %v5065_v26, %v320_v45 }
  0x57   : > { %847 = vrot.lane.b32.xlu1 %v842_v57, %s4972_s28  ;;  %v642_v57 = vmul.f32 %v5088_v38, %v640_v47 }
  0x58   : > { %845 = vrot.lane.b32.xlu0 %v841_v58, %s4972_s28  ;;  %v340_v58 = vstv %s4428_s26  ;;  %s5330_s26 = sld [smem:[#allocation2 + $0xca]] }
  0x59   : > { %565 = vrot.lane.b32.xlu2 %v561_v61, %s4972_s28  ;;  %v414_v61 = vstv %s5184_s29  ;;  %s4480_s29 = sld [smem:[#allocation2 + $0xc2]] }
  0x5a   : > { %v415_v7 = vmul.f32 %v414_v61, %v5021_v2 }
  0x5f   : > { %865 = vrot.lane.b32.xlu1 %v861_v1, %s4972_s28  ;;  %v342_v1 = vmul.f32 %v5083_v36, %v340_v58 }
  0x60   : > { %567 = vrot.lane.b32.xlu0 %v562_v3, %s4972_s28  ;;  %v341_v3 = vmul.f32 %v5073_v30, %v340_v58 }
  0x61   : > { %867 = vrot.lane.b32.xlu2 %v862_v4, %s4972_s28 }
  0x67   : > { %887 = vrot.lane.b32.xlu1 %v882_v10, %s4972_s28  ;;  %v660_v10 = vstv %s5191_s30  ;;  %s5357_s30 = sld [smem:[#allocation2 + $0x14]] }
  0x68   : > { %885 = vrot.lane.b32.xlu0 %v881_v11, %s4972_s28  ;;  %v434_v11 = vstv %s5193_s5  ;;  %v661_v12 = vmul.f32 %v5098_v43, %v660_v10  ;;  %s5370_s5 = sld [smem:[#allocation2 + $0x18]] }
  0x69   : > { %265 = vrot.lane.b32.xlu2 %v261_v14, %s4972_s28  ;;  %v360_v14 = vstv %s5197_s6  ;;  %v436_v39 = vmul.f32 %v434_v11, %v5027_v6  ;;  %s5377_s6 = sld [smem:[#allocation2 + $0x10]] }
  0x6a   : > { %v361_v22 = vmul.f32 %v5098_v43, %v360_v14 }
  0x6f   : > { %585 = vrot.lane.b32.xlu1 %v581_v18, %s4972_s28  ;;  %v435_v18 = vmul.f32 %v434_v11, %v5018_v0 }
  0x70   : > { %267 = vrot.lane.b32.xlu0 %v262_v19, %s4972_s28 }
  0x71   : > { %587 = vrot.lane.b32.xlu2 %v582_v20, %s4972_s28 }
  0x73   : > { %v5163_v27 = vpop.permute.xlu2 %745 }
  0x77   : > { %287 = vrot.lane.b32.xlu1 %v282_v24, %s4972_s28  ;;  %v662_v24 = vmul.f32 %v5094_v41, %v660_v10  ;;  %v700_v10 = vstv %s5238_s12  ;;  %s5395_s12 = sld [smem:[#allocation2 + $0x4f]] }
  0x78   : > { %285 = vrot.lane.b32.xlu0 %v281_v25, %s4972_s28 }
  0x79   : > { %605 = vrot.lane.b32.xlu2 %v601_v29, %s4972_s28  ;;  %v416_v29 = vmul.f32 %v414_v61, %v5032_v9 }
  0x7b   : > { %v5171_v35 = vpop.permute.xlu2 %747 }
  0x7f   : > { %305 = vrot.lane.b32.xlu1 %v301_v32, %s4972_s28  ;;  %v362_v32 = vmul.f32 %v5094_v41, %v360_v14 }
  0x80   : > { %607 = vrot.lane.b32.xlu0 %v602_v33, %s4972_s28  ;;  %v680_v33 = vstv %s5216_s8  ;;  %s5386_s8 = sld [smem:[#allocation2 + $0x54]] }
  0x81   : > { %307 = vrot.lane.b32.xlu2 %v302_v37, %s4972_s28  ;;  %v682_v47 = vmul.f32 %v5118_v54, %v680_v33 }
  0x83   : > { %v5179_v44 = vpop.permute.xlu2 %765 }
  0x87   : > { %627 = vrot.lane.b32.xlu1 %v622_v40, %s4972_s28 }
  0x88   : > { %625 = vrot.lane.b32.xlu0 %v621_v42, %s4972_s28  ;;  %v455_v42 = vmul.f32 %v5044_v15, %v454_v31 }
  0x89   : > { %v446_v49 = vpop.permute.xlu1 %445  ;;  %325 = vrot.lane.b32.xlu2 %v321_v46, %s4972_s28 }
  0x8a   : > { %v426_v50 = vpop.permute.xlu0 %425 }
  0x8b   : > { %v5189_v55 = vpop.permute.xlu2 %487  ;;  %v431_v19 = vadd.f32 %v426_v50, %v415_v7  ;;  %v734_v50 = vstv %s5224_s9  ;;  %s4421_s9 = sld [smem:[#allocation2 + $0x7]] }
  0x8c   : > { %v736_v58 = vmul.f32 %v734_v50, %v5027_v6  ;;  %v735_v11 = vmul.f32 %v734_v50, %v5018_v0  ;;  %v400_v50 = vstv %s5262_s18  ;;  %s5422_s18 = sld [smem:[#allocation2 + $0x50]] }
  0x8d   : > { %v437_v28 = vadd.f32 %v435_v18, %v431_v19  ;;  %v456_v19 = vmul.f32 %v5040_v13, %v454_v31 }
  0x8e   : > { %v752_v18 = vadd.f32 %v5171_v35, %v736_v58 }
  0x8f   : > { %645 = vrot.lane.b32.xlu1 %v641_v52, %s4972_s28  ;;  %v451_v45 = vadd.f32 %v446_v49, %v437_v28  ;;  %v474_v52 = vstv %s5226_s10  ;;  %v380_v49 = vstv %s5232_s11  ;;  %v701_v28 = vmul.f32 %v5128_v59, %v700_v10  ;;  %s4451_s10 = sld [smem:[#allocation2 + $0xb]] }
  0x90   : > { %327 = vrot.lane.b32.xlu0 %v322_v53, %s4972_s28  ;;  %v681_v53 = vmul.f32 %v5122_v56, %v680_v33  ;;  %v475_v7 = vmul.f32 %v5055_v21, %v474_v52  ;;  %v494_v33 = vstv %s5249_s14  ;;  %v476_v58 = vmul.f32 %v5065_v26, %v474_v52  ;;  %s5393_s11 = sld [smem:[#allocation2 + $0x3]] }
  0x91   : > { %v5200_v60 = vpop.permute.xlu1 %447  ;;  %647 = vrot.lane.b32.xlu2 %v642_v57, %s4972_s28  ;;  %s5413_s14 = sld [smem:[#allocation2 + $0x4b]] }
  0x92   : > { %v428_v62 = vpop.permute.xlu0 %427 }
  0x93   : > { %v5206_v4 = vpop.permute.xlu2 %505  ;;  %v432_v40 = vadd.f32 %v428_v62, %v416_v29  ;;  %v457_v62 = vadd.f32 %v455_v42, %v451_v45  ;;  %v495_v45 = vmul.f32 %v5073_v30, %v494_v33 }
  0x95   : > { %v438_v61 = vadd.f32 %v436_v39, %v432_v40 }
  0x97   : > { %347 = vrot.lane.b32.xlu1 %v342_v1, %s4972_s28  ;;  %v381_v1 = vmul.f32 %v5106_v48, %v380_v49 }
  0x98   : > { %345 = vrot.lane.b32.xlu0 %v341_v3, %s4972_s28 }
  0x99   : > { %v5219_v16 = vpop.permute.xlu1 %467  ;;  %665 = vrot.lane.b32.xlu2 %v661_v12, %s4972_s28  ;;  %v754_v12 = vstv %s5240_s13  ;;  %s5399_s13 = sld [smem:[#allocation2 + $0x9c]] }
  0x9a   : > { %v466_v20 = vpop.permute.xlu0 %465  ;;  %v755_v35 = vmul.f32 %v754_v12, %v5049_v17 }
  0x9b   : > { %v5229_v25 = vpop.permute.xlu2 %807  ;;  %v471_v3 = vadd.f32 %v466_v20, %v457_v62  ;;  %v756_v20 = vmul.f32 %v754_v12, %v5059_v23  ;;  %v794_v12 = vstv %s5278_s20  ;;  %s4427_s20 = sld [smem:[#allocation2 + $0x8f]] }
  0x9d   : > { %v477_v29 = vadd.f32 %v475_v7, %v471_v3  ;;  %v758_v42 = vadd.f32 %v756_v20, %v752_v18  ;;  %v514_v3 = vstv %s5271_s19  ;;  %v401_v18 = vmul.f32 %v5128_v59, %v400_v50  ;;  %s5433_s19 = sld [smem:[#allocation2 + $0x43]] }
  0x9e   : > { %v720_v20 = vstv %s5284_s21  ;;  %s5446_s21 = sld [smem:[#allocation2 + $0x87]] }
  0x9f   : > { %365 = vrot.lane.b32.xlu1 %v361_v22, %s4972_s28  ;;  %v452_v22 = vadd.f32 %v5200_v60, %v438_v61  ;;  %v382_v60 = vmul.f32 %v5112_v51, %v380_v49 }
  0xa0   : > { %667 = vrot.lane.b32.xlu0 %v662_v24, %s4972_s28 }
  0xa1   : > { %v486_v37 = vpop.permute.xlu1 %485  ;;  %367 = vrot.lane.b32.xlu2 %v362_v32, %s4972_s28  ;;  %v751_v32 = vadd.f32 %v5163_v27, %v735_v11  ;;  %v458_v39 = vadd.f32 %v456_v19, %v452_v22  ;;  %v702_v27 = vmul.f32 %v5134_v63, %v700_v10  ;;  %v402_v10 = vmul.f32 %v5134_v63, %v400_v50 }
  0xa2   : > { %v768_v46 = vpop.permute.xlu0 %767  ;;  %v491_v40 = vadd.f32 %v486_v37, %v477_v29  ;;  %v721_v29 = vmul.f32 %v5146_v8, %v720_v20 }
  0xa3   : > { %v5252_v57 = vpop.permute.xlu2 %825  ;;  %v472_v62 = vadd.f32 %v5219_v16, %v458_v39  ;;  %v772_v49 = vadd.f32 %v768_v46, %v758_v42  ;;  %v515_v16 = vmul.f32 %v5098_v43, %v514_v3 }
  0xa5   : > { %v478_v46 = vadd.f32 %v476_v58, %v472_v62  ;;  %v554_v62 = vstv %s5308_s24  ;;  %s4431_s24 = sld [smem:[#allocation2 + $0xcf]] }
  0xa7   : > { %687 = vrot.lane.b32.xlu1 %v682_v47, %s4972_s28  ;;  %v774_v47 = vstv %s5257_s17  ;;  %s5417_s17 = sld [smem:[#allocation2 + $0x47]] }
  0xa8   : > { %685 = vrot.lane.b32.xlu0 %v681_v53, %s4972_s28  ;;  %v757_v53 = vadd.f32 %v755_v35, %v751_v32  ;;  %v776_v61 = vmul.f32 %v5065_v26, %v774_v47  ;;  %v775_v52 = vmul.f32 %v5055_v21, %v774_v47  ;;  %v796_v32 = vmul.f32 %v5088_v38, %v794_v12 }
  0xa9   : > { %v788_v14 = vpop.permute.xlu1 %787  ;;  %385 = vrot.lane.b32.xlu2 %v381_v1, %s4972_s28  ;;  %v497_v1 = vadd.f32 %v495_v45, %v491_v40  ;;  %v496_v40 = vmul.f32 %v5083_v36, %v494_v33  ;;  %v795_v45 = vmul.f32 %v5079_v34, %v794_v12  ;;  %v516_v33 = vmul.f32 %v5094_v41, %v514_v3 }
  0xaa   : > { %v786_v24 = vpop.permute.xlu0 %785  ;;  %v771_v11 = vadd.f32 %v5179_v44, %v757_v53  ;;  %v778_v22 = vadd.f32 %v776_v61, %v772_v49  ;;  %v722_v61 = vmul.f32 %v5142_v5, %v720_v20 }
  0xab   : > { %v5281_v31 = vpop.permute.xlu2 %547  ;;  %v511_v19 = vadd.f32 %v5206_v4, %v497_v1  ;;  %v492_v4 = vadd.f32 %v5189_v55, %v478_v46  ;;  %v555_v1 = vmul.f32 %v5128_v59, %v554_v62 }
  0xac   : > { %v792_v44 = vadd.f32 %v788_v14, %v778_v22  ;;  %v777_v39 = vadd.f32 %v775_v52, %v771_v11 }
  0xad   : > { %v517_v42 = vadd.f32 %v515_v16, %v511_v19  ;;  %v498_v55 = vadd.f32 %v496_v40, %v492_v4 }
  0xae   : > { %v791_v14 = vadd.f32 %v786_v24, %v777_v39  ;;  %v798_v50 = vadd.f32 %v796_v32, %v792_v44  ;;  %v834_v44 = vstv %s5321_s25  ;;  %s5469_s25 = sld [smem:[#allocation2 + $0xcb]] }
  0xaf   : > { %705 = vrot.lane.b32.xlu1 %v701_v28, %s4972_s28 }
  0xb0   : > { %387 = vrot.lane.b32.xlu0 %v382_v60, %s4972_s28  ;;  %v534_v60 = vstv %s5293_s22  ;;  %v797_v24 = vadd.f32 %v795_v45, %v791_v14  ;;  %v835_v14 = vmul.f32 %v5122_v56, %v834_v44  ;;  %s5453_s22 = sld [smem:[#allocation2 + $0x8b]] }
  0xb1   : > { %v806_v37 = vpop.permute.xlu1 %805  ;;  %707 = vrot.lane.b32.xlu2 %v702_v27, %s4972_s28  ;;  %v814_v27 = vstv %s5297_s23  ;;  %v535_v58 = vmul.f32 %v5106_v48, %v534_v60  ;;  %s5459_s23 = sld [smem:[#allocation2 + $0x83]] }
  0xb2   : > { %v508_v7 = vpop.permute.xlu0 %507  ;;  %v816_v49 = vmul.f32 %v5094_v41, %v814_v27  ;;  %v811_v16 = vadd.f32 %v806_v37, %v797_v24  ;;  %v815_v3 = vmul.f32 %v5098_v43, %v814_v27 }
  0xb3   : > { %v566_v28 = vpop.permute.xlu2 %565  ;;  %v512_v52 = vadd.f32 %v508_v7, %v498_v55  ;;  %v836_v7 = vmul.f32 %v5118_v54, %v834_v44 }
  0xb4   : > { %v817_v32 = vadd.f32 %v815_v3, %v811_v16 }
  0xb5   : > { %v518_v22 = vadd.f32 %v516_v33, %v512_v52 }
  0xb6   : > { %v831_v45 = vadd.f32 %v5252_v57, %v817_v32 }
  0xb7   : > { %407 = vrot.lane.b32.xlu1 %v402_v10, %s4972_s28  ;;  %v812_v10 = vadd.f32 %v5229_v25, %v798_v50  ;;  %v536_v25 = vmul.f32 %v5112_v51, %v534_v60 }
  0xb8   : > { %405 = vrot.lane.b32.xlu0 %v401_v18, %s4972_s28 }
  0xb9   : > { %v528_v35 = vpop.permute.xlu1 %527  ;;  %725 = vrot.lane.b32.xlu2 %v721_v29, %s4972_s28  ;;  %v818_v20 = vadd.f32 %v816_v49, %v812_v10 }
  0xba   : > { %v526_v47 = vpop.permute.xlu0 %525  ;;  %v532_v4 = vadd.f32 %v528_v35, %v518_v22 }
  0xbb   : > { %v531_v53 = vadd.f32 %v526_v47, %v517_v42  ;;  %v868_v12 = vpop.permute.xlu2 %867  ;;  %v854_v42 = vstv %s5330_s26  ;;  %s4433_s26 = sld [smem:[#allocation2 + $0xc7]] }
  0xbc   : > { %v538_v27 = vadd.f32 %v536_v25, %v532_v4  ;;  %v856_v35 = vmul.f32 %v5134_v63, %v854_v42  ;;  %v855_v49 = vmul.f32 %v5128_v59, %v854_v42  ;;  %v1475_v25 = vstv %s5357_s30  ;;  %s5537_s30 = sld [smem:[#allocation2 + $0x58]] }
  0xbd   : > { %v537_v11 = vadd.f32 %v535_v58, %v531_v53  ;;  %v837_v58 = vadd.f32 %v835_v14, %v831_v45  ;;  %v1476_v32 = vmul.f32 %v1475_v25, %v5018_v0 }
  0xc0   : > { %727 = vrot.lane.b32.xlu0 %v722_v61, %s4972_s28  ;;  %v556_v61 = vmul.f32 %v5134_v63, %v554_v62 }
  0xc1   : > { %v546_v18 = vpop.permute.xlu1 %545 }
  0xc2   : > { %v551_v46 = vadd.f32 %v546_v18, %v537_v11  ;;  %v828_v19 = vpop.permute.xlu0 %827 }
  0xc3   : > { %v832_v39 = vadd.f32 %v828_v19, %v818_v20  ;;  %v5343_v60 = vpop.permute.xlu2 %265 }
  0xc4   : > { %v557_v29 = vadd.f32 %v555_v1, %v551_v46  ;;  %v874_v1 = vstv %s4480_s29  ;;  %s5480_s29 = sld [smem:[#allocation2 + $0xc3]] }
  0xc5   : > { %v838_v47 = vadd.f32 %v836_v7, %v832_v39  ;;  %v876_v16 = vmul.f32 %v5142_v5, %v874_v1  ;;  %v875_v62 = vmul.f32 %v5146_v8, %v874_v1  ;;  %v1775_v39 = vstv %s5370_s5  ;;  %s5564_s5 = sld [smem:[#allocation2 + $0xd4]] }
  0xc6   : > { %v5336_v40 = vadd.f32 %v566_v28, %v557_v29  ;;  %v552_v28 = vadd.f32 %v5281_v31, %v538_v27  ;;  %v1777_v45 = vmul.f32 %v1775_v39, %v5027_v6  ;;  %v574_v1 = vstv %s4451_s10  ;;  %s5524_s10 = sld [smem:[#allocation2 + $0x98]] }
  0xc8   : > { %908 = vrot.lane.b32.xlu1 %v5336_v40, %s4972_s28  ;;  %v558_v10 = vadd.f32 %v556_v61, %v552_v28  ;;  %v254_v28 = vstv %s4419_s7  ;;  %s4515_s7 = sld [smem:[#allocation2 + $0x1c]] }
  0xc9   : > { %v848_v37 = vpop.permute.xlu1 %847  ;;  %v255_v61 = vmul.f32 %v254_v28, %v5021_v2 }
  0xca   : > { %v846_v50 = vpop.permute.xlu0 %845  ;;  %v852_v53 = vadd.f32 %v848_v37, %v838_v47  ;;  %v1795_v47 = vstv %s5377_s6  ;;  %s4525_s6 = sld [smem:[#allocation2 + $0x94]] }
  0xcb   : > { %v851_v55 = vadd.f32 %v846_v50, %v837_v58  ;;  %v5352_v3 = vpop.permute.xlu2 %587  ;;  %v1515_v58 = vstv %s5386_s8  ;;  %s4559_s8 = sld [smem:[#allocation2 + $0xd8]] }
  0xcc   : > { %v858_v33 = vadd.f32 %v856_v35, %v852_v53  ;;  %v1796_v53 = vmul.f32 %v1795_v47, %v5049_v17 }
  0xcd   : > { %v857_v11 = vadd.f32 %v855_v49, %v851_v55  ;;  %v256_v55 = vmul.f32 %v254_v28, %v5032_v9  ;;  %v575_v9 = vmul.f32 %v574_v1, %v5018_v0 }
  0xce   : > { %v872_v52 = vadd.f32 %v868_v12, %v858_v33  ;;  %v274_v33 = vstv %s4421_s9  ;;  %s4519_s9 = sld [smem:[#allocation2 + $0x5c]] }
  0xd0   : > { %v878_v46 = vadd.f32 %v876_v16, %v872_v52  ;;  %v275_v16 = vmul.f32 %v274_v33, %v5018_v0 }
  0xd1   : > { %v866_v57 = vpop.permute.xlu1 %865 }
  0xd2   : > { %v568_v24 = vpop.permute.xlu0 %567  ;;  %v871_v31 = vadd.f32 %v866_v57, %v857_v11  ;;  %v1517_v57 = vmul.f32 %v5065_v26, %v1515_v58  ;;  %v276_v11 = vmul.f32 %v274_v33, %v5027_v6 }
  0xd3   : > { %v5349_v18 = vadd.f32 %v568_v24, %v558_v10  ;;  %v5367_v44 = vpop.permute.xlu2 %605  ;;  %v271_v24 = vadd.f32 %v5343_v60, %v255_v61  ;;  %v576_v60 = vmul.f32 %v574_v1, %v5027_v6 }
  0xd4   : > { %v877_v22 = vadd.f32 %v875_v62, %v871_v31  ;;  %v594_v31 = vstv %s5393_s11  ;;  %v294_v62 = vstv %s5395_s12  ;;  %s5541_s11 = sld [smem:[#allocation2 + $0xdc]] }
  0xd5   : > { %910 = vrot.lane.b32.xlu2 %v5349_v18, %s4972_s28  ;;  %v592_v61 = vadd.f32 %v5352_v3, %v576_v60  ;;  %v295_v6 = vmul.f32 %v5044_v15, %v294_v62  ;;  %v596_v33 = vmul.f32 %v594_v31, %v5059_v23  ;;  %s5615_s12 = sld [smem:[#allocation2 + $0x90]] }
  0xd9   : > { %v888_v19 = vpop.permute.xlu1 %887 }
  0xda   : > { %v5359_v12 = vadd.f32 %v888_v19, %v878_v46  ;;  %v886_v20 = vpop.permute.xlu0 %885  ;;  %v1535_v46 = vstv %s5399_s13  ;;  %s4561_s13 = sld [smem:[#allocation2 + $0xd0]] }
  0xdb   : > { %v5361_v29 = vadd.f32 %v886_v20, %v877_v22  ;;  %v5379_v37 = vpop.permute.xlu2 %307  ;;  %v277_v22 = vadd.f32 %v275_v16, %v271_v24  ;;  %v595_v20 = vmul.f32 %v594_v31, %v5049_v17 }
  0xdc   : > { %944 = vrot.lane.b32.xlu1 %v5359_v12, %s4972_s28 }
  0xdd   : > { %942 = vrot.lane.b32.xlu0 %v5361_v29, %s4972_s28 }
  0xe1   : > { %v586_v7 = vpop.permute.xlu1 %585 }
  0xe2   : > { %v268_v4 = vpop.permute.xlu0 %267 }
  0xe3   : > { %v5388_v50 = vpop.permute.xlu2 %325  ;;  %v272_v52 = vadd.f32 %v268_v4, %v256_v55  ;;  %v591_v4 = vadd.f32 %v586_v7, %v575_v9  ;;  %v314_v7 = vstv %s5417_s17  ;;  %s4531_s17 = sld [smem:[#allocation2 + $0x19]] }
  0xe4   : > { %v315_v15 = vmul.f32 %v5055_v21, %v314_v7  ;;  %v316_v24 = vmul.f32 %v5065_v26, %v314_v7 }
  0xe5   : > { %1480 = vrot.lane.b32.xlu0 %v1476_v32, %s4972_s28  ;;  %v278_v19 = vadd.f32 %v276_v11, %v272_v52  ;;  %v597_v17 = vadd.f32 %v595_v20, %v591_v4 }
  0xe7   : > { %v611_v11 = vadd.f32 %v5367_v44, %v597_v17  ;;  %v334_v44 = vstv %s4427_s20  ;;  %v354_v17 = vstv %s5446_s21  ;;  %s4535_s20 = sld [smem:[#allocation2 + $0x59]] }
  0xe8   : > { %s5684_s21 = sld [smem:[#allocation2 + $0x5d]] }
  0xe9   : > { %v288_v42 = vpop.permute.xlu1 %287 }
  0xea   : > { %v286_v27 = vpop.permute.xlu0 %285  ;;  %v292_v0 = vadd.f32 %v288_v42, %v278_v19  ;;  %v614_v42 = vstv %s5413_s14  ;;  %s4499_s14 = sld [smem:[#allocation2 + $0x1d]] }
  0xeb   : > { %v5411_v2 = vpop.permute.xlu2 %647  ;;  %v291_v55 = vadd.f32 %v286_v27, %v277_v22  ;;  %v598_v27 = vadd.f32 %v596_v33, %v592_v61  ;;  %v615_v23 = vmul.f32 %v5055_v21, %v614_v42  ;;  %v616_v19 = vmul.f32 %v5065_v26, %v614_v42 }
  0xec   : > { %v634_v22 = vstv %s5433_s19  ;;  %v335_v26 = vmul.f32 %v5073_v30, %v334_v44  ;;  %s4501_s19 = sld [smem:[#allocation2 + $0x15]] }
  0xed   : > { %1782 = vrot.lane.b32.xlu0 %v1777_v45, %s4972_s28  ;;  %v296_v45 = vmul.f32 %v5040_v13, %v294_v62  ;;  %v1835_v13 = vstv %s5422_s18  ;;  %v297_v3 = vadd.f32 %v295_v6, %v291_v55  ;;  %v617_v20 = vadd.f32 %v615_v23, %v611_v11  ;;  %s5673_s18 = sld [smem:[#allocation2 + $0x11]] }
  0xee   : > { %v1837_v31 = vmul.f32 %v5088_v38, %v1835_v13  ;;  %v636_v33 = vmul.f32 %v5088_v38, %v634_v22 }
  0xf1   : > { %v306_v14 = vpop.permute.xlu1 %305 }
  0xf2   : > { %v608_v35 = vpop.permute.xlu0 %607  ;;  %v311_v9 = vadd.f32 %v306_v14, %v297_v3 }
  0xf3   : > { %v5437_v1 = vpop.permute.xlu2 %665  ;;  %v612_v60 = vadd.f32 %v608_v35, %v598_v27  ;;  %v336_v35 = vmul.f32 %v5083_v36, %v334_v44 }
  0xf4   : > { %v317_v21 = vadd.f32 %v315_v15, %v311_v9  ;;  %v674_v15 = vstv %s5459_s23  ;;  %v374_v9 = vstv %s4431_s24  ;;  %s4507_s23 = sld [smem:[#allocation2 + $0x9d]] }
  0xf5   : > { %1800 = vrot.lane.b32.xlu0 %v1796_v53, %s4972_s28  ;;  %v1536_v53 = vmul.f32 %v5073_v30, %v1535_v46  ;;  %v618_v14 = vadd.f32 %v616_v19, %v612_v60  ;;  %v356_v30 = vmul.f32 %v5094_v41, %v354_v17  ;;  %s5703_s24 = sld [smem:[#allocation2 + $0x51]] }
  0xf6   : > { %v331_v55 = vadd.f32 %v5388_v50, %v317_v21 }
  0xf8   : > { %v337_v27 = vadd.f32 %v335_v26, %v331_v55 }
  0xf9   : > { %v5403_v49 = vpop.permute.xlu1 %627 }
  0xfa   : > { %v626_v10 = vpop.permute.xlu0 %625  ;;  %v632_v6 = vadd.f32 %v5403_v49, %v618_v14  ;;  %v355_v49 = vmul.f32 %v5098_v43, %v354_v17  ;;  %v714_v17 = vstv %s5480_s29  ;;  %s5734_s29 = sld [smem:[#allocation2 + $0x95]] }
  0xfc   : > { %v638_v7 = vadd.f32 %v636_v33, %v632_v6 }
  0xfd   : > { %1522 = vrot.lane.b32.xlu0 %v1517_v57, %s4972_s28  ;;  %v298_v57 = vadd.f32 %v296_v45, %v292_v0  ;;  %v631_v0 = vadd.f32 %v626_v10, %v617_v20  ;;  %v676_v20 = vmul.f32 %v5118_v54, %v674_v15 }
  0xff   : > { %v312_v16 = vadd.f32 %v5379_v37, %v298_v57  ;;  %v635_v37 = vmul.f32 %v5079_v34, %v634_v22 }
 0x101   : > { %v646_v32 = vpop.permute.xlu1 %645  ;;  %v318_v4 = vadd.f32 %v316_v24, %v312_v16  ;;  %v637_v10 = vadd.f32 %v635_v37, %v631_v0  ;;  %v652_v24 = vadd.f32 %v5411_v2, %v638_v7 }
 0x102   : > { %v328_v28 = vpop.permute.xlu0 %327 }
 0x103   : > { %v332_v45 = vadd.f32 %v328_v28, %v318_v4  ;;  %v654_v28 = vstv %s5453_s22  ;;  %v651_v42 = vadd.f32 %v646_v32, %v637_v10  ;;  %v694_v4 = vstv %s5469_s25  ;;  %s5686_s22 = sld [smem:[#allocation2 + $0x55]] }
 0x104   : > { %v655_v36 = vmul.f32 %v5098_v43, %v654_v28  ;;  %v656_v38 = vmul.f32 %v5094_v41, %v654_v28  ;;  %v675_v43 = vmul.f32 %v5122_v56, %v674_v15  ;;  %v695_v56 = vmul.f32 %v5128_v59, %v694_v4  ;;  %s5715_s25 = sld [smem:[#allocation2 + $0x99]] }
 0x105   : > { %1540 = vrot.lane.b32.xlu0 %v1536_v53, %s4972_s28  ;;  %v368_v53 = vpop.permute.xlu2 %367  ;;  %v338_v57 = vadd.f32 %v336_v35, %v332_v45  ;;  %v696_v55 = vmul.f32 %v5134_v63, %v694_v4  ;;  %v715_v10 = vmul.f32 %v5146_v8, %v714_v17  ;;  %v716_v8 = vmul.f32 %v5142_v5, %v714_v17 }
 0x106   : > { %v657_v11 = vadd.f32 %v655_v36, %v651_v42  ;;  %v658_v21 = vadd.f32 %v656_v38, %v652_v24 }
 0x108   : > { %v671_v41 = vadd.f32 %v5437_v1, %v657_v11 }
 0x109   : > { %v348_v52 = vpop.permute.xlu1 %347 }
 0x10a   : > { %v346_v62 = vpop.permute.xlu0 %345  ;;  %v352_v3 = vadd.f32 %v348_v52, %v338_v57  ;;  %v375_v52 = vmul.f32 %v5106_v48, %v374_v9  ;;  %v677_v14 = vadd.f32 %v675_v43, %v671_v41  ;;  %v1455_v41 = vstv %s4515_s7  ;;  %s5738_s7 = sld [smem:[#allocation2 + $0xdd]] }
 0x10b   : > { %v351_v50 = vadd.f32 %v346_v62, %v337_v27  ;;  %v376_v62 = vmul.f32 %v5112_v51, %v374_v9  ;;  %v394_v51 = vstv %s4433_s26  ;;  %s4541_s26 = sld [smem:[#allocation2 + $0x91]] }
 0x10c   : > { %v358_v16 = vadd.f32 %v356_v30, %v352_v3  ;;  %v396_v26 = vmul.f32 %v5134_v63, %v394_v51  ;;  %v395_v6 = vmul.f32 %v5128_v59, %v394_v51 }
 0x10d   : > { %1842 = vrot.lane.b32.xlu0 %v1837_v31, %s4972_s28  ;;  %v386_v31 = vpop.permute.xlu2 %385  ;;  %v357_v32 = vadd.f32 %v355_v49, %v351_v50 }
 0x10e   : > { %v372_v19 = vadd.f32 %v368_v53, %v358_v16 }
 0x110   : > { %v378_v48 = vadd.f32 %v376_v62, %v372_v19  ;;  %v5508_v19 = vld [vmem:[%s5015_s27] sm:$0xff] }
 0x111   : > { %v366_v61 = vpop.permute.xlu1 %365 }
 0x112   : > { %v668_v34 = vpop.permute.xlu0 %667  ;;  %v371_v22 = vadd.f32 %v366_v61, %v357_v32 }
 0x113   : > { %v672_v2 = vadd.f32 %v668_v34, %v658_v21  ;;  %v5513_v21 = vld [vmem:[%s5015_s27 + $0x9] sm:$0xff] }
 0x114   : > { %v377_v37 = vadd.f32 %v375_v52, %v371_v22  ;;  %v1456_v22 = vmul.f32 %v5508_v19, %v1455_v41 }
 0x115   : > { %v678_v45 = vadd.f32 %v676_v20, %v672_v2  ;;  %v708_v35 = vpop.permute.xlu2 %707  ;;  %v1477_v2 = vmul.f32 %v5513_v21, %v1475_v25  ;;  %v5519_v20 = vld [vmem:[%s5015_s27 + $0x8] sm:$0xff] }
 0x116   : > { %v391_v61 = vadd.f32 %v386_v31, %v377_v37  ;;  %v1457_v4 = vmul.f32 %v5519_v20, %v1455_v41  ;;  %v5527_v37 = vld [vmem:[%s5015_s27 + $0x18] sm:$0xff]  ;;  %v5647_v41 = vld [vmem:[%s5015_s27 + $0x49] sm:$0xff] }
 0x118   : > { %v397_v7 = vadd.f32 %v395_v6, %v391_v61 }
 0x119   : > { %v688_v23 = vpop.permute.xlu1 %687 }
 0x11a   : > { %v686_v60 = vpop.permute.xlu0 %685  ;;  %v692_v54 = vadd.f32 %v688_v23, %v678_v45 }
 0x11b   : > { %v691_v1 = vadd.f32 %v686_v60, %v677_v14  ;;  %v5531_v14 = vld [vmem:[%s5015_s27 + $0x1] sm:$0xff] }
 0x11c   : > { %v698_v57 = vadd.f32 %v696_v55, %v692_v54  ;;  %v5571_v54 = vld [vmem:[%s5015_s27 + $0x19] sm:$0xff] }
 0x11d   : > { %v697_v33 = vadd.f32 %v695_v56, %v691_v1  ;;  %v726_v49 = vpop.permute.xlu2 %725  ;;  %v1855_v56 = vstv %s5524_s10  ;;  %v5557_v1 = vld [vmem:[%s5015_s27 + $0x20] sm:$0xff]  ;;  %v1516_v6 = vmul.f32 %v5571_v54, %v1515_v58  ;;  %s5775_s10 = sld [smem:[#allocation2 + $0x1e]] }
 0x11e   : > { %v712_v27 = vadd.f32 %v708_v35, %v698_v57  ;;  %v5592_v58 = vld [vmem:[%s5015_s27 + $0x21] sm:$0xff] }
 0x120   : > { %v718_v24 = vadd.f32 %v716_v8, %v712_v27  ;;  %v5622_v8 = vld [vmem:[%s5015_s27 + $0x48] sm:$0xff] }
 0x121   : > { %v706_v44 = vpop.permute.xlu1 %705 }
 0x122   : > { %v388_v0 = vpop.permute.xlu0 %387  ;;  %v711_v36 = vadd.f32 %v706_v44, %v697_v33  ;;  %v1495_v44 = vstv %s4519_s9  ;;  %v1595_v33 = vstv %s5564_s5  ;;  %s4543_s9 = sld [smem:[#allocation2 + $0xd9]] }
 0x123   : > { %v392_v53 = vadd.f32 %v388_v0, %v378_v48  ;;  %v1496_v25 = vmul.f32 %v5527_v37, %v1495_v44  ;;  %v1776_v48 = vmul.f32 %v5531_v14, %v1775_v39  ;;  %v5544_v0 = vld [vmem:[%s5015_s27 + $0x31] sm:$0xff]  ;;  %v1497_v35 = vmul.f32 %v5557_v1, %v1495_v44  ;;  %s5787_s5 = sld [smem:[#allocation2 + $0x12]] }
 0x124   : > { %v717_v50 = vadd.f32 %v715_v10, %v711_v36  ;;  %v1856_v51 = vmul.f32 %v5544_v0, %v1855_v56  ;;  %v5550_v39 = vld [vmem:[%s5015_s27 + $0xa] sm:$0xff]  ;;  %v1596_v17 = vmul.f32 %v5128_v59, %v1595_v33  ;;  %v5585_v10 = vld [vmem:[%s5015_s27 + $0x38] sm:$0xff]  ;;  %v1555_v36 = vstv %s4525_s6  ;;  %s5790_s6 = sld [smem:[#allocation2 + $0x5e]] }
 0x125   : > { %v398_v34 = vadd.f32 %v396_v26, %v392_v53  ;;  %v1797_v45 = vmul.f32 %v5550_v39, %v1795_v47  ;;  %v1815_v53 = vstv %s5537_s30  ;;  %v1575_v26 = vstv %s5541_s11  ;;  %v5567_v47 = vld [vmem:[%s5015_s27 + $0x50] sm:$0xff]  ;;  %s5778_s30 = sld [smem:[#allocation2 + $0x16]] }
 0x126   : > { %v5497_v23 = vadd.f32 %v726_v49, %v717_v50  ;;  %v1577_v61 = vmul.f32 %v5567_v47, %v1575_v26  ;;  %v1816_v55 = vmul.f32 %v5571_v54, %v1815_v53  ;;  %v1817_v57 = vmul.f32 %v5592_v58, %v1815_v53  ;;  %s5781_s11 = sld [smem:[#allocation2 + $0x1a]] }
 0x127   : > { %v1556_v59 = vmul.f32 %v5544_v0, %v1555_v36  ;;  %v1895_v49 = vstv %s4559_s8  ;;  %s5800_s8 = sld [smem:[#allocation2 + $0x56]] }
 0x128   : > { %v927_v9 = vsel %vm893_vm0, %v5497_v23, 0.0 }
 0x129   : > { %v408_v28 = vpop.permute.xlu1 %407 }
 0x12a   : > { %v5488_v30 = vadd.f32 %v408_v28, %v398_v34  ;;  %v406_v42 = vpop.permute.xlu0 %405  ;;  %v1537_v28 = vmul.f32 %v5585_v10, %v1535_v46 }
 0x12b   : > { %v5490_v3 = vadd.f32 %v406_v42, %v397_v7  ;;  %v5601_v42 = vld [vmem:[%s5015_s27 + $0x1a] sm:$0xff] }
 0x12c   : > { %v895_v63 = vsel %vm893_vm0, %v5488_v30, 0.0  ;;  %v1836_v46 = vmul.f32 %v5601_v42, %v1835_v13  ;;  %v5618_v13 = vld [vmem:[%s5015_s27 + $0x51] sm:$0xff] }
 0x12d   : > { %v894_v38 = vsel %vm893_vm0, %v5490_v3, 0.0 }
 0x12e   : > { %v896_v15 = vadd.f32 %v895_v63, %v894_v38  ;;  %v5609_v63 = vld [vmem:[%s5015_s27 + $0x39] sm:$0xff]  ;;  %v1897_v38 = vmul.f32 %v5618_v13, %v1895_v49 }
 0x12f   : > { %v911_v5 = vpop.permute.xlu2 %910  ;;  %v1557_v27 = vmul.f32 %v5609_v63, %v1555_v36 }
 0x130   : > { %897 = vadd.xlane.f32.xlu2 %v896_v15  ;;  %v915_v52 = vsel %vm893_vm0, %v911_v5, 0.0  ;;  %v1576_v15 = vmul.f32 %v5622_v8, %v1575_v26  ;;  %v5635_v5 = vld [vmem:[%s5015_s27 + $0x3a] sm:$0xff] }
 0x132   : > { %v728_v11 = vpop.permute.xlu0 %727 }
 0x133   : > { %v5499_v16 = vadd.f32 %v728_v11, %v718_v24  ;;  %v1875_v11 = vstv %s5615_s12  ;;  %s5803_s12 = sld [smem:[#allocation2 + $0x5a]] }
 0x135   : > { %v928_v31 = vsel %vm893_vm0, %v5499_v16, 0.0 }
 0x136   : > { %v929_v60 = vadd.f32 %v928_v31, %v927_v9  ;;  %v1915_v9 = vstv %s4561_s13  ;;  %v5631_v31 = vld [vmem:[%s5015_s27 + $0x4a] sm:$0xff]  ;;  %s5817_s13 = sld [smem:[#allocation2 + $0x9e]] }
 0x138   : > { %930 = vadd.xlane.f32.xlu1 %v929_v60  ;;  %v1916_v60 = vmul.f32 %v5631_v31, %v1915_v9 }
 0x13a   : > { %v909_v32 = vpop.permute.xlu1 %908 }
 0x13b   : > { %v914_v43 = vsel %vm893_vm0, %v909_v32, 0.0  ;;  %v1877_v32 = vmul.f32 %v5635_v5, %v1875_v11 }
 0x13c   : > { %v916_v62 = vadd.f32 %v915_v52, %v914_v43  ;;  %v5643_v43 = vld [vmem:[%s5015_s27 + $0x52] sm:$0xff] }
 0x13e   : > { %917 = vadd.xlane.f32.xlu0 %v916_v62  ;;  %v1917_v62 = vmul.f32 %v5643_v43, %v1915_v9 }
 0x148   : > { %1460 = vrot.lane.b32.xlu2 %v1456_v22, %s4972_s28  ;;  %v1896_v22 = vmul.f32 %v5647_v41, %v1895_v49 }
 0x14f   : > { %v943_v34 = vpop.permute.xlu0 %942 }
 0x150   : > { %1482 = vrot.lane.b32.xlu2 %v1477_v2, %s4972_s28  ;;  %v945_v2 = vpop.permute.xlu1 %944 }
 0x151   : > { %1462 = vrot.lane.b32.xlu1 %v1457_v4, %s4972_s28  ;;  %v948_v4 = vsel %vm893_vm0, %v943_v34, 0.0  ;;  %v949_v44 = vsel %vm893_vm0, %v945_v2, 0.0 }
 0x152   : > { %1860 = vrot.lane.b32.xlu0 %v1856_v51, %s4972_s28 }
 0x157   : > { %v5598_v7 = vpop.permute.xlu0 %1480 }
 0x158   : > { %1500 = vrot.lane.b32.xlu2 %v1496_v25, %s4972_s28 }
 0x159   : > { %1780 = vrot.lane.b32.xlu1 %v1776_v48, %s4972_s28  ;;  %v950_v48 = vadd.f32 %v949_v44, %v948_v4  ;;  %v1597_v4 = vmul.f32 %v5618_v13, %v1595_v33 }
 0x15a   : > { %1582 = vrot.lane.b32.xlu0 %v1577_v61, %s4972_s28 }
 0x15f   : > { %v5612_v50 = vpop.permute.xlu0 %1782 }
 0x160   : > { %1802 = vrot.lane.b32.xlu2 %v1797_v45, %s4972_s28 }
 0x161   : > { %1502 = vrot.lane.b32.xlu1 %v1497_v35, %s4972_s28 }
 0x162   : > { %1600 = vrot.lane.b32.xlu0 %v1596_v17, %s4972_s28 }
 0x167   : > { %v5626_v24 = vpop.permute.xlu0 %1800 }
 0x168   : > { %1820 = vrot.lane.b32.xlu2 %v1816_v55, %s4972_s28 }
 0x169   : > { %1520 = vrot.lane.b32.xlu1 %v1516_v6, %s4972_s28 }
 0x16a   : > { %1902 = vrot.lane.b32.xlu0 %v1897_v38, %s4972_s28  ;;  %v1857_v38 = vmul.f32 %v5609_v63, %v1855_v56  ;;  %v1295_v56 = vstv %s4499_s14  ;;  %s5820_s14 = sld [smem:[#allocation2 + $0x52]] }
 0x16b   : > { %v1296_v44 = vmul.f32 %v5508_v19, %v1295_v56 }
 0x16f   : > { %v5640_v52 = vpop.permute.xlu0 %1522 }
 0x170   : > { %1542 = vrot.lane.b32.xlu2 %v1537_v28, %s4972_s28 }
 0x171   : > { %1822 = vrot.lane.b32.xlu1 %v1817_v57, %s4972_s28 }
 0x172   : > { %1920 = vrot.lane.b32.xlu0 %v1916_v60, %s4972_s28 }
 0x177   : > { %v5654_v25 = vpop.permute.xlu0 %1540 }
 0x178   : > { %1560 = vrot.lane.b32.xlu2 %v1556_v59, %s4972_s28 }
 0x179   : > { %1840 = vrot.lane.b32.xlu1 %v1836_v46, %s4972_s28 }
 0x17a   : > { %1922 = vrot.lane.b32.xlu0 %v1917_v62, %s4972_s28 }
 0x17f   : > { %v5656_v53 = vpop.permute.xlu0 %1842 }
 0x181   : > { %1562 = vrot.lane.b32.xlu1 %v1557_v27, %s4972_s28 }
 0x189   : > { %1580 = vrot.lane.b32.xlu1 %v1576_v15, %s4972_s28 }
 0x191   : > { %1882 = vrot.lane.b32.xlu1 %v1877_v32, %s4972_s28 }
 0x199   : > { %1900 = vrot.lane.b32.xlu1 %v1896_v22, %s4972_s28  ;;  %v5663_v22 = vld [vmem:[%s5015_s27 + $0x32] sm:$0xff] }
 0x19a   : > { %v1876_v2 = vmul.f32 %v5663_v22, %v1875_v11 }
 0x1a1   : > { %951 = vadd.xlane.f32.xlu2 %v950_v48  ;;  %1300 = vrot.lane.b32.xlu1 %v1296_v44, %s4972_s28  ;;  %v1615_v48 = vstv %s4531_s17 }
 0x1a2   : > { %v1616_v11 = vmul.f32 %v5531_v14, %v1615_v48  ;;  %v1617_v33 = vmul.f32 %v5513_v21, %v1615_v48 }
 0x1a3   : > { %v898_v51 = vpop.xlane.xlu2 %897 }
 0x1a4   : > { %v899_v45 = vrot.slane %v898_v51, 4  ;;  %1620 = vrot.lane.b32.xlu0 %v1616_v11, %s4972_s28 }
 0x1a6   : > { %v900_v35 = vadd.f32 %v899_v45, %v898_v51  ;;  %v1635_v45 = vstv %s5673_s18  ;;  %s5832_s18 = sld [smem:[#allocation2 + $0x9a]] }
 0x1a8   : > { %v901_v26 = vrot.slane %v900_v35, 2 }
 0x1a9   : > { %1622 = vrot.lane.b32.xlu1 %v1617_v33, %s4972_s28 }
 0x1aa   : > { %v902_v61 = vadd.f32 %v901_v26, %v900_v35  ;;  %v1637_v35 = vmul.f32 %v5550_v39, %v1635_v45  ;;  %v1315_v26 = vstv %s4501_s19  ;;  %s5837_s19 = sld [smem:[#allocation2 + $0x96]] }
 0x1ab   : > { %v931_v55 = vpop.xlane.xlu1 %930  ;;  %v5676_v51 = vpop.permute.xlu2 %1460 }
 0x1ac   : > { %v932_v6 = vrot.slane %v931_v55, 4  ;;  %v903_v17 = vrot.slane %v902_v61, 1  ;;  %1642 = vrot.lane.b32.xlu0 %v1637_v35, %s4972_s28 }
 0x1ae   : > { %v933_v28 = vadd.f32 %v932_v6, %v931_v55  ;;  %v904_v57 = vadd.f32 %v903_v17, %v902_v61  ;;  %v1317_v55 = vmul.f32 %v5513_v21, %v1315_v26  ;;  %v1655_v6 = vstv %s4535_s20 }
 0x1af   : > { %v1656_v17 = vmul.f32 %v5571_v54, %v1655_v6 }
 0x1b0   : > { %4754 = vpush %v904_v57  ;;  %v934_v36 = vrot.slane %v933_v28, 2  ;;  %v1297_v57 = vmul.f32 %v5519_v20, %v1295_v56  ;;  %v1695_v56 = vstv %s5715_s25 }
 0x1b1   : > { %v918_v34 = vpop.xlane.xlu0 %917  ;;  %1322 = vrot.lane.b32.xlu1 %v1317_v55, %s4972_s28  ;;  %v1697_v44 = vmul.f32 %v5609_v63, %v1695_v56 }
 0x1b2   : > { %v919_v59 = vrot.slane %v918_v34, 4  ;;  %v935_v27 = vadd.f32 %v934_v36, %v933_v28  ;;  %v1335_v28 = vstv %s5684_s21  ;;  %v1355_v36 = vstv %s5686_s22  ;;  %s5848_s22 = sld [smem:[#allocation2 + $0x92]] }
 0x1b3   : > { %v5688_v61 = vpop.permute.xlu2 %1482  ;;  %v1337_v48 = vmul.f32 %v5557_v1, %v1335_v28 }
 0x1b4   : > { %v920_v46 = vadd.f32 %v919_v59, %v918_v34  ;;  %v936_v9 = vrot.slane %v935_v27, 1  ;;  %1660 = vrot.lane.b32.xlu0 %v1656_v17, %s4972_s28  ;;  %v1336_v34 = vmul.f32 %v5527_v37, %v1335_v28  ;;  %v1356_v17 = vmul.f32 %v5571_v54, %v1355_v36 }
 0x1b5   : > { %v1415_v28 = vstv %s5738_s7 }
 0x1b6   : > { %v921_v49 = vrot.slane %v920_v46, 2  ;;  %v937_v62 = vadd.f32 %v936_v9, %v935_v27  ;;  %v1316_v27 = vmul.f32 %v5531_v14, %v1315_v26  ;;  %v1395_v26 = vstv %s5734_s29 }
 0x1b8   : > { %v922_v15 = vadd.f32 %v921_v49, %v920_v46  ;;  %v1357_v46 = vmul.f32 %v5592_v58, %v1355_v36  ;;  %v1657_v49 = vmul.f32 %v5592_v58, %v1655_v6  ;;  %v1396_v6 = vmul.f32 %v5544_v0, %v1395_v26 }
 0x1b9   : > { %1862 = vrot.lane.b32.xlu2 %v1857_v38, %s4972_s28  ;;  %1340 = vrot.lane.b32.xlu1 %v1336_v34, %s4972_s28  ;;  %v1375_v38 = vstv %s4507_s23  ;;  %v1735_v36 = vstv %s4543_s9  ;;  %s5862_s9 = sld [smem:[#allocation2 + $0xd5]] }
 0x1ba   : > { %v923_v60 = vrot.slane %v922_v15, 1  ;;  %v1377_v33 = vmul.f32 %v5585_v10, %v1375_v38 }
 0x1bb   : > { %v5699_v59 = vpop.permute.xlu2 %1500 }
 0x1bc   : > { %v924_v32 = vadd.f32 %v923_v60, %v922_v15  ;;  %1362 = vrot.lane.b32.xlu0 %v1357_v46, %s4972_s28  ;;  %v5711_v15 = vld [vmem:[%s5015_s27 + $0x30] sm:$0xff]  ;;  %v1675_v60 = vstv %s5703_s24  ;;  %v5754_v46 = vld [vmem:[%s5015_s27 + $0x22] sm:$0xff]  ;;  %s5850_s24 = sld [smem:[#allocation2 + $0xde]] }
 0x1bd   : > { %v1376_v9 = vmul.f32 %v5711_v15, %v1375_v38  ;;  %v1736_v38 = vmul.f32 %v5647_v41, %v1735_v36 }
 0x1be   : > { %4756 = vpush %v924_v32 }
 0x1bf   : > { %4758 = vpush %v937_v62  ;;  %v5720_v62 = vld [vmem:[%s5015_s27 + $0x2] sm:$0xff] }
 0x1c1   : > { %1880 = vrot.lane.b32.xlu2 %v1876_v2, %s4972_s28  ;;  %1662 = vrot.lane.b32.xlu1 %v1657_v49, %s4972_s28  ;;  %v1636_v2 = vmul.f32 %v5720_v62, %v1635_v45  ;;  %v1715_v45 = vstv %s4541_s26 }
 0x1c2   : > { %v1716_v35 = vmul.f32 %v5663_v22, %v1715_v45  ;;  %v1717_v34 = vmul.f32 %v5635_v5, %v1715_v45 }
 0x1c3   : > { %v5717_v32 = vpop.permute.xlu2 %1802 }
 0x1c4   : > { %1380 = vrot.lane.b32.xlu0 %v1376_v9, %s4972_s28  ;;  %v1696_v9 = vmul.f32 %v5544_v0, %v1695_v56  ;;  %v1416_v56 = vmul.f32 %v5622_v8, %v1415_v28 }
 0x1c9   : > { %1602 = vrot.lane.b32.xlu2 %v1597_v4, %s4972_s28  ;;  %v1676_v4 = vmul.f32 %v5601_v42, %v1675_v60 }
 0x1cb   : > { %1680 = vrot.lane.b32.xlu1 %v1676_v4, %s4972_s28  ;;  %v5730_v11 = vpop.permute.xlu2 %1820 }
 0x1cc   : > { %1702 = vrot.lane.b32.xlu0 %v1697_v44, %s4972_s28 }
 0x1d1   : > { %1302 = vrot.lane.b32.xlu2 %v1297_v57, %s4972_s28  ;;  %v1417_v57 = vmul.f32 %v5567_v47, %v1415_v28 }
 0x1d3   : > { %1382 = vrot.lane.b32.xlu1 %v1377_v33, %s4972_s28  ;;  %v5743_v55 = vpop.permute.xlu2 %1542 }
 0x1d4   : > { %1720 = vrot.lane.b32.xlu0 %v1716_v35, %s4972_s28 }
 0x1d9   : > { %1320 = vrot.lane.b32.xlu2 %v1316_v27, %s4972_s28  ;;  %v1677_v27 = vmul.f32 %v5754_v46, %v1675_v60 }
 0x1db   : > { %1400 = vrot.lane.b32.xlu1 %v1396_v6, %s4972_s28  ;;  %v5757_v49 = vpop.permute.xlu2 %1560 }
 0x1dc   : > { %1422 = vrot.lane.b32.xlu0 %v1417_v57, %s4972_s28 }
 0x1e1   : > { %1640 = vrot.lane.b32.xlu2 %v1636_v2, %s4972_s28  ;;  %v5763_v2 = vpop.permute.xlu1 %1462  ;;  %s4755_s17 = spop %4754 }
 0x1e3   : > { %1722 = vrot.lane.b32.xlu1 %v1717_v34, %s4972_s28  ;;  %v1449_v34 = vstv %s5775_s10  ;;  %s5998_s10 = sld [smem:[#allocation2 + $0xd1]] }
 0x1e9   : > { %1342 = vrot.lane.b32.xlu2 %v1337_v48, %s4972_s28  ;;  %v1397_v48 = vmul.f32 %v5609_v63, %v1395_v26  ;;  %v5768_v45 = vpop.permute.xlu1 %1780  ;;  %v1737_v26 = vmul.f32 %v5618_v13, %v1735_v36  ;;  %v7844_v36 = vstv %s5778_s30 }
 0x1eb   : > { %1740 = vrot.lane.b32.xlu1 %v1736_v38, %s4972_s28  ;;  %v7834_v38 = vstv %s5781_s11 }
 0x1ef   : > { %s4757_s20 = spop %4756 }
 0x1f0   : > { %s926_s21 = sadd.f32 %s4757_s20, %s4755_s17  ;;  %s4759_s23 = spop %4758 }
 0x1f1   : > { %1360 = vrot.lane.b32.xlu2 %v1356_v17, %s4972_s28  ;;  %v5773_v57 = vpop.permute.xlu1 %1502  ;;  %s5865_s17 = sld [smem:[#allocation2 + $0xda]] }
 0x1f2   : > { %s939_s25 = sadd.f32 %s4759_s23, %s926_s21 }
 0x1f3   : > { %s5869_s20 = sld [smem:[#allocation2 + $0xd6]] }
 0x1f4   : > { %s5906_s21 = sld [smem:[#allocation2 + $0xd2]] }
 0x1f5   : > { %s6131_s23 = sld [smem:[#allocation2 + $0x93]] }
 0x1f9   : > { %1682 = vrot.lane.b32.xlu2 %v1677_v27, %s4972_s28  ;;  %v1521_v28 = vpop.permute.xlu1 %1520  ;;  %v1450_v27 = vmul.f32 %v5508_v19, %v1449_v34 }
 0x201   : > { %1700 = vrot.lane.b32.xlu2 %v1696_v9, %s4972_s28  ;;  %v1470_v9 = vmul.f32 %v5531_v14, %v7844_v36 }
 0x209   : > { %1402 = vrot.lane.b32.xlu2 %v1397_v48, %s4972_s28 }
 0x211   : > { %1420 = vrot.lane.b32.xlu2 %v1416_v56, %s4972_s28 }
 0x214   : > { %v952_v4 = vpop.xlane.xlu2 %951 }
 0x215   : > { %v953_v44 = vrot.slane %v952_v4, 4 }
 0x217   : > { %v954_v60 = vadd.f32 %v953_v44, %v952_v4  ;;  %v1466_v4 = vadd.f32 %v5676_v51, %v1450_v27  ;;  %v1823_v44 = vpop.permute.xlu1 %1822 }
 0x219   : > { %v955_v33 = vrot.slane %v954_v60, 2  ;;  %1742 = vrot.lane.b32.xlu2 %v1737_v26, %s4972_s28  ;;  %v1472_v48 = vadd.f32 %v1470_v9, %v1466_v4  ;;  %v5814_v26 = vpop.permute.xlu0 %1860  ;;  %v7842_v9 = vstv %s5800_s8 }
 0x21b   : > { %v956_v35 = vadd.f32 %v955_v33, %v954_v60  ;;  %v1771_v60 = vmul.f32 %v5513_v21, %v7834_v38  ;;  %v7835_v33 = vstv %s5787_s5  ;;  %v7836_v38 = vstv %s5803_s12 }
 0x21c   : > { %v1791_v51 = vmul.f32 %v5550_v39, %v7835_v33 }
 0x21d   : > { %v957_v6 = vrot.slane %v956_v35, 1 }
 0x21f   : > { %v958_v17 = vadd.f32 %v957_v6, %v956_v35  ;;  %v7843_v35 = vstv %s5790_s6  ;;  %v1787_v6 = vadd.f32 %v5612_v50, %v1771_v60  ;;  %v5822_v50 = vpop.permute.xlu1 %1840  ;;  %v1510_v60 = vmul.f32 %v5571_v54, %v7842_v9 }
 0x220   : > { %v1490_v56 = vmul.f32 %v5527_v37, %v7843_v35  ;;  %v7847_v35 = vstv %s5865_s17 }
 0x221   : > { %4760 = vpush %v958_v17  ;;  %v1486_v17 = vadd.f32 %v5598_v7, %v1472_v48  ;;  %v1793_v27 = vadd.f32 %v1791_v51, %v1787_v6  ;;  %v1811_v6 = vmul.f32 %v5592_v58, %v7836_v38 }
 0x223   : > { %v1492_v4 = vadd.f32 %v1490_v56, %v1486_v17  ;;  %v1807_v48 = vadd.f32 %v5717_v32, %v1793_v27  ;;  %v5834_v17 = vpop.permute.xlu0 %1582  ;;  %v7838_v56 = vstv %s5817_s13  ;;  %v7837_v27 = vstv %s5820_s14 }
 0x225   : > { %v1506_v7 = vadd.f32 %v5699_v59, %v1492_v4  ;;  %v1813_v33 = vadd.f32 %v1811_v6, %v1807_v48  ;;  %v1530_v59 = vmul.f32 %v5711_v15, %v7838_v56  ;;  %v1831_v4 = vmul.f32 %v5754_v46, %v7837_v27  ;;  %v1863_v27 = vpop.permute.xlu2 %1862 }
 0x226   : > { %v7839_v6 = vstv %s5832_s18  ;;  %v7841_v56 = vstv %s5848_s22 }
 0x227   : > { %v1512_v51 = vadd.f32 %v1510_v60, %v1506_v7  ;;  %v1827_v7 = vadd.f32 %v1823_v44, %v1813_v33  ;;  %v5846_v60 = vpop.permute.xlu1 %1562 }
 0x229   : > { %v1526_v32 = vadd.f32 %v1521_v28, %v1512_v51  ;;  %v1833_v48 = vadd.f32 %v1831_v4, %v1827_v7  ;;  %v7840_v28 = vstv %s5837_s19 }
 0x22a   : > { %v1550_v44 = vmul.f32 %v5544_v0, %v7840_v28 }
 0x22b   : > { %v1532_v38 = vadd.f32 %v1530_v59, %v1526_v32  ;;  %v1601_v33 = vpop.permute.xlu0 %1600  ;;  %v1847_v59 = vadd.f32 %v5656_v53, %v1833_v48  ;;  %v1851_v32 = vmul.f32 %v5609_v63, %v7839_v6  ;;  %v1871_v6 = vmul.f32 %v5635_v5, %v7841_v56 }
 0x22d   : > { %v1546_v51 = vadd.f32 %v5654_v25, %v1532_v38  ;;  %v1853_v38 = vadd.f32 %v1851_v32, %v1847_v59 }
 0x22f   : > { %v1552_v4 = vadd.f32 %v1550_v44, %v1546_v51  ;;  %v1581_v7 = vpop.permute.xlu1 %1580  ;;  %v7846_v44 = vstv %s5850_s24  ;;  %v1867_v28 = vadd.f32 %v1863_v27, %v1853_v38  ;;  %v7845_v27 = vstv %s5862_s9 }
 0x230   : > { %v1570_v56 = vmul.f32 %v5622_v8, %v7846_v44  ;;  %v1909_v44 = vstv %s5906_s21  ;;  %s4601_s21 = sld [smem:[#allocation2 + $0x24]] }
 0x231   : > { %v1566_v32 = vadd.f32 %v5757_v49, %v1552_v4  ;;  %v1873_v38 = vadd.f32 %v1871_v6, %v1867_v28  ;;  %v1589_v4 = vstv %s5869_s20  ;;  %s6218_s20 = sld [smem:[#allocation2 + $0x64]] }
 0x233   : > { %v1572_v49 = vadd.f32 %v1570_v56, %v1566_v32 }
 0x235   : > { %v1586_v6 = vadd.f32 %v1581_v7, %v1572_v49  ;;  %v1911_v49 = vmul.f32 %v5643_v43, %v1909_v44 }
 0x237   : > { %v1883_v36 = vpop.permute.xlu1 %1882 }
 0x238   : > { %v1887_v28 = vadd.f32 %v1883_v36, %v1873_v38  ;;  %v1451_v38 = vmul.f32 %v5519_v20, %v1449_v34 }
 0x252   : > { %s4761_s26 = spop %4760 }
 0x253   : > { %s960_s29 = sadd.f32 %s4761_s26, %s939_s25 }
 0x254   : > { %s6147_s25 = sld [smem:[#allocation2 + $0xd7]] }
 0x255   : > { %s961_s7 = smul.f32 0.0009765625, %s960_s29  ;;  %s6151_s26 = sld [smem:[#allocation2 + $0xdb]] }
 0x256   : > { %s4544_s29 = sld [smem:[#allocation2 + $0xd3]] }
 0x257   : > { %v5867_v25 = vstv %s961_s7  ;;  %s6177_s7 = sld [smem:[#allocation2 + $0x2c]] }
 0x258   : > { %v5873_v53 = vsub.f32 %v5361_v29, %v5867_v25  ;;  %v5877_v48 = vsub.f32 %v5349_v18, %v5867_v25  ;;  %v5881_v51 = vsub.f32 %v5336_v40, %v5867_v25  ;;  %v1903_v40 = vpop.permute.xlu0 %1902  ;;  %v5903_v9 = vsub.f32 %v5359_v12, %v5867_v25 }
 0x259   : > { %v1891_v12 = vmul.f32 %v5618_v13, %v7847_v35  ;;  %v7896_v35 = vstv %s5778_s30  ;;  %v5948_v34 = vsub.f32 %v5490_v3, %v5867_v25  ;;  %s4498_s30 = sld [smem:[#allocation2 + $0x1f]] }
 0x25a   : > { %7891 = vst [vmem:[#allocation5_spill] sm:$0xff] %v5873_v53  ;;  %v1023_v59 = vmul.f32 %v5873_v53, %v5873_v53  ;;  %v986_v29 = vmul.f32 %v5877_v48, %v5877_v48  ;;  %v985_v18 = vmul.f32 %v5881_v51, %v5881_v51 }
 0x25b   : > { %7892 = vst [vmem:[#allocation6_spill] sm:$0xff] %v5877_v48 }
 0x25c   : > { %7893 = vst [vmem:[#allocation7_spill] sm:$0xff] %v5881_v51  ;;  %1027 = vrot.lane.b32.xlu1 %v1023_v59, %s4972_s28  ;;  %991 = vrot.lane.b32.xlu0 %v986_v29, %s4972_s28  ;;  %v1437_v59 = vmul.f32 %v5618_v13, %v7845_v27  ;;  %v1590_v29 = vmul.f32 %v5647_v41, %v1589_v4 }
 0x25d   : > { %989 = vrot.lane.b32.xlu2 %v985_v18, %s4972_s28  ;;  %7894 = vst [vmem:[#allocation8_spill] sm:$0xff] %v5903_v9  ;;  %v1024_v18 = vmul.f32 %v5903_v9, %v5903_v9  ;;  %v1893_v27 = vadd.f32 %v1891_v12, %v1887_v28  ;;  %v5952_v28 = vsub.f32 %v5488_v30, %v5867_v25  ;;  %v1881_v30 = vpop.permute.xlu2 %1880 }
 0x25e   : > { %v1592_v32 = vadd.f32 %v1590_v29, %v1586_v6  ;;  %v1471_v29 = vmul.f32 %v5513_v21, %v7896_v35  ;;  %v1467_v6 = vadd.f32 %v5763_v2, %v1451_v38  ;;  %7899 = vst [vmem:[#allocation11_spill] sm:$0xff] %v5948_v34  ;;  %v7901_v35 = vstv %s5790_s6  ;;  %s4532_s6 = sld [smem:[#allocation2 + $0x13]] }
 0x25f   : > { %v1907_v36 = vadd.f32 %v1903_v40, %v1893_v27  ;;  %v7898_v27 = vstv %s5781_s11  ;;  %7900 = vst [vmem:[#allocation12_spill] sm:$0xff] %v5952_v28  ;;  %v1491_v2 = vmul.f32 %v5557_v1, %v7901_v35  ;;  %v972_v3 = vmul.f32 %v5952_v28, %v5952_v28  ;;  %s4500_s11 = sld [smem:[#allocation2 + $0x17]] }
 0x260   : > { %v5922_v56 = vpop.permute.xlu0 %1920  ;;  %v5925_v7 = vadd.f32 %v1601_v33, %v1592_v32  ;;  %v1473_v40 = vadd.f32 %v1471_v29, %v1467_v6  ;;  %v1770_v12 = vmul.f32 %v5531_v14, %v7898_v27  ;;  %v7903_v6 = vstv %s5800_s8  ;;  %s4502_s8 = sld [smem:[#allocation2 + $0x5f]] }
 0x261   : > { %v1511_v27 = vmul.f32 %v5592_v58, %v7903_v6  ;;  %v974_v35 = vsel %vm893_vm0, %v972_v3, 0.0  ;;  %v1901_v3 = vpop.permute.xlu1 %1900 }
 0x262   : > { %7895 = vst [vmem:[#allocation9_spill] sm:$0xff] %v5925_v7  ;;  %v1487_v32 = vadd.f32 %v5688_v61, %v1473_v40  ;;  %v1786_v38 = vadd.f32 %v5768_v45, %v1770_v12  ;;  %v5974_v45 = vsub.f32 %v5497_v23, %v5867_v25  ;;  %v5978_v12 = vsub.f32 %v5499_v16, %v5867_v25 }
 0x263   : > { %v7907_v25 = vstv %s5817_s13  ;;  %s4504_s13 = sld [smem:[#allocation2 + $0x57]] }
 0x264   : > { %1442 = vrot.lane.b32.xlu1 %v1437_v59, %s4972_s28  ;;  %1029 = vrot.lane.b32.xlu0 %v1024_v18, %s4972_s28  ;;  %v1913_v59 = vadd.f32 %v1911_v49, %v1907_v36  ;;  %v7902_v49 = vstv %s5787_s5  ;;  %7904 = vst [vmem:[#allocation13_spill] sm:$0xff] %v5974_v45  ;;  %s4530_s5 = sld [smem:[#allocation2 + $0x1b]] }
 0x265   : > { %v1790_v36 = vmul.f32 %v5720_v62, %v7902_v49  ;;  %7905 = vst [vmem:[#allocation14_spill] sm:$0xff] %v5978_v12 }
 0x267   : > { %v1792_v29 = vadd.f32 %v1790_v36, %v1786_v38  ;;  %v1008_v38 = vmul.f32 %v5974_v45, %v5974_v45 }
 0x268   : > { %v1923_v18 = vpop.permute.xlu0 %1922 }
 0x269   : > { %v5939_v33 = vadd.f32 %v1923_v18, %v1913_v59  ;;  %v971_v59 = vmul.f32 %v5948_v34, %v5948_v34  ;;  %v1493_v18 = vadd.f32 %v1491_v2, %v1487_v32  ;;  %v1806_v2 = vadd.f32 %v5626_v24, %v1792_v29 }
 0x26a   : > { %v7906_v32 = vstv %s5803_s12  ;;  %v1531_v24 = vmul.f32 %v5585_v10, %v7907_v25  ;;  %v1010_v29 = vsel %vm893_vm0, %v1008_v38, 0.0  ;;  %s6084_s12 = sld [smem:[#allocation2 + $0x5b]] }
 0x26b   : > { %7897 = vst [vmem:[#allocation10_spill] sm:$0xff] %v5939_v33  ;;  %v1507_v61 = vadd.f32 %v5773_v57, %v1493_v18  ;;  %v973_v40 = vsel %vm893_vm0, %v971_v59, 0.0  ;;  %v1810_v49 = vmul.f32 %v5571_v54, %v7906_v32  ;;  %v1009_v59 = vmul.f32 %v5978_v12, %v5978_v12  ;;  %v1603_v18 = vpop.permute.xlu2 %1602 }
 0x26c   : > { %1942 = vrot.lane.b32.xlu1 %v5925_v7, %s4972_s28  ;;  %v975_v57 = vadd.f32 %v974_v35, %v973_v40  ;;  %v7908_v40 = vstv %s5820_s14  ;;  %s6099_s14 = sld [smem:[#allocation2 + $0x9f]] }
 0x26d   : > { %v1513_v36 = vadd.f32 %v1511_v27, %v1507_v61  ;;  %v1812_v23 = vadd.f32 %v1810_v49, %v1806_v2  ;;  %v1011_v6 = vsel %vm893_vm0, %v1009_v59, 0.0  ;;  %v1830_v35 = vmul.f32 %v5601_v42, %v7908_v40 }
 0x26e   : > { %v1012_v2 = vadd.f32 %v1011_v6, %v1010_v29  ;;  %v7909_v49 = vstv %s5837_s19  ;;  %v7910_v59 = vstv %s5832_s18  ;;  %v1755_v6 = vstv %s5998_s10  ;;  %s4536_s18 = sld [smem:[#allocation2 + $0x53]] }
 0x26f   : > { %v1527_v16 = vadd.f32 %v5640_v52, %v1513_v36  ;;  %v1826_v27 = vadd.f32 %v5730_v11, %v1812_v23  ;;  %v1551_v36 = vmul.f32 %v5609_v63, %v7909_v49  ;;  %v1850_v23 = vmul.f32 %v5544_v0, %v7910_v59  ;;  %s6112_s19 = sld [smem:[#allocation2 + $0x9b]] }
 0x270   : > { %v7912_v40 = vstv %s5848_s22  ;;  %v1591_v49 = vmul.f32 %v5618_v13, %v1589_v4  ;;  %v7914_v59 = vstv %s5865_s17  ;;  %v1757_v4 = vmul.f32 %v5643_v43, %v1755_v6  ;;  %s6117_s22 = sld [smem:[#allocation2 + $0x97]] }
 0x271   : > { %v1533_v61 = vadd.f32 %v1531_v24, %v1527_v16  ;;  %v1832_v32 = vadd.f32 %v1830_v35, %v1826_v27  ;;  %v1870_v35 = vmul.f32 %v5663_v22, %v7912_v40  ;;  %s6208_s17 = sld [smem:[#allocation2 + $0x6c]] }
 0x272   : > { %s6226_s10 = sld [smem:[#allocation2 + $0x68]] }
 0x273   : > { %v1547_v52 = vadd.f32 %v5743_v55, %v1533_v61  ;;  %v1303_v11 = vpop.permute.xlu2 %1302  ;;  %v1846_v38 = vadd.f32 %v5822_v50, %v1832_v32  ;;  %v7911_v55 = vstv %s5850_s24  ;;  %v1756_v50 = vmul.f32 %v5631_v31, %v1755_v6  ;;  %s6135_s24 = sld [smem:[#allocation2 + $0xdf]] }
 0x274   : > { %1978 = vrot.lane.b32.xlu1 %v5939_v33, %s4972_s28  ;;  %v1571_v29 = vmul.f32 %v5567_v47, %v7911_v55 }
 0x275   : > { %v1553_v16 = vadd.f32 %v1551_v36, %v1547_v52  ;;  %v1852_v25 = vadd.f32 %v1850_v23, %v1846_v38  ;;  %v1890_v23 = vmul.f32 %v5647_v41, %v7914_v59 }
 0x277   : > { %v1567_v24 = vadd.f32 %v5846_v60, %v1553_v16  ;;  %v1866_v27 = vadd.f32 %v5814_v26, %v1852_v25  ;;  %v7913_v26 = vstv %s5862_s9  ;;  %s6192_s9 = sld [smem:[#allocation2 + $0x28]] }
 0x278   : > { %v1436_v36 = vmul.f32 %v5647_v41, %v7913_v26 }
 0x279   : > { %v1573_v61 = vadd.f32 %v1571_v29, %v1567_v24  ;;  %v1872_v60 = vadd.f32 %v1870_v35, %v1866_v27 }
 0x27b   : > { %v6022_v32 = vpop.permute.xlu2 %1320  ;;  %v1587_v52 = vadd.f32 %v5834_v17, %v1573_v61  ;;  %v1886_v38 = vadd.f32 %v1881_v30, %v1872_v60  ;;  %v1910_v30 = vmul.f32 %v5631_v31, %v1909_v44  ;;  %v1621_v61 = vpop.permute.xlu0 %1620 }
 0x27d   : > { %v1593_v16 = vadd.f32 %v1591_v49, %v1587_v52  ;;  %v1892_v25 = vadd.f32 %v1890_v23, %v1886_v38  ;;  %v1289_v38 = vstv %s4498_s30  ;;  %s6238_s30 = sld [smem:[#allocation2 + $0x60]] }
 0x27f   : > { %v6036_v24 = vadd.f32 %v1603_v18, %v1593_v16  ;;  %v1906_v29 = vadd.f32 %v1901_v3, %v1892_v25  ;;  %v1291_v16 = vmul.f32 %v5519_v20, %v1289_v38  ;;  %v1309_v25 = vstv %s4500_s11  ;;  %s4633_s11 = sld [smem:[#allocation2 + $0x20]] }
 0x280   : > { %v1310_v9 = vmul.f32 %v5531_v14, %v1309_v25 }
 0x281   : > { %7915 = vst [vmem:[#allocation15_spill] sm:$0xff] %v6036_v24  ;;  %v1912_v27 = vadd.f32 %v1910_v30, %v1906_v29  ;;  %v1307_v30 = vadd.f32 %v1303_v11, %v1291_v16  ;;  %v1311_v29 = vmul.f32 %v5513_v21, %v1309_v25  ;;  %v1329_v11 = vstv %s4502_s8  ;;  %s6294_s8 = sld [smem:[#allocation2 + $0xec]] }
 0x282   : > { %v1330_v7 = vmul.f32 %v5527_v37, %v1329_v11 }
 0x283   : > { %v6038_v55 = vpop.permute.xlu2 %1640  ;;  %v6050_v35 = vadd.f32 %v5922_v56, %v1912_v27  ;;  %v1609_v27 = vstv %s4530_s5  ;;  %v1313_v12 = vadd.f32 %v1311_v29, %v1307_v30  ;;  %s6253_s5 = sld [smem:[#allocation2 + $0xa4]] }
 0x284   : > { %v1610_v48 = vmul.f32 %v5531_v14, %v1609_v27  ;;  %v1331_v14 = vmul.f32 %v5557_v1, %v1329_v11 }
 0x285   : > { %7916 = vst [vmem:[#allocation16_spill] sm:$0xff] %v6050_v35 }
 0x286   : > { %976 = vadd.xlane.f32.xlu2 %v975_v57  ;;  %v6004_v57 = vpop.permute.xlu1 %1300  ;;  %v1626_v45 = vadd.f32 %v1621_v61, %v1610_v48  ;;  %v1349_v48 = vstv %s4504_s13  ;;  %s6305_s13 = sld [smem:[#allocation2 + $0xe8]] }
 0x28b   : > { %v1343_v18 = vpop.permute.xlu2 %1342 }
 0x28e   : > { %1013 = vadd.xlane.f32.xlu0 %v1012_v2  ;;  %v6020_v2 = vpop.permute.xlu1 %1622 }
 0x293   : > { %v6056_v6 = vpop.permute.xlu2 %1360 }
 0x296   : > { %v1323_v17 = vpop.permute.xlu1 %1322 }
 0x29b   : > { %v6062_v60 = vpop.permute.xlu2 %1682 }
 0x29e   : > { %1760 = vrot.lane.b32.xlu2 %v1756_v50, %s4972_s28  ;;  %v6047_v40 = vpop.permute.xlu1 %1340  ;;  %v1643_v50 = vpop.permute.xlu0 %1642 }
 0x2a2   : > { %1440 = vrot.lane.b32.xlu0 %v1436_v36, %s4972_s28 }
 0x2a3   : > { %v6068_v56 = vpop.permute.xlu2 %1700 }
 0x2a6   : > { %1944 = vrot.lane.b32.xlu2 %v6036_v24, %s4972_s28  ;;  %v6054_v52 = vpop.permute.xlu1 %1662  ;;  %v6058_v44 = vpop.permute.xlu0 %1660 }
 0x2aa   : > { %1762 = vrot.lane.b32.xlu0 %v1757_v4, %s4972_s28  ;;  %v1290_v4 = vmul.f32 %v5508_v19, %v1289_v38  ;;  %v1629_v19 = vstv %s4532_s6  ;;  %v1611_v38 = vmul.f32 %v5513_v21, %v1609_v27  ;;  %v1350_v27 = vmul.f32 %v5571_v54, %v1349_v48  ;;  %s4607_s6 = sld [smem:[#allocation2 + $0xac]] }
 0x2ab   : > { %v6074_v23 = vpop.permute.xlu2 %1402  ;;  %v1630_v25 = vmul.f32 %v5720_v62, %v1629_v19  ;;  %v1631_v29 = vmul.f32 %v5550_v39, %v1629_v19 }
 0x2ac   : > { %v1306_v51 = vadd.f32 %v6004_v57, %v1290_v4  ;;  %v1327_v57 = vadd.f32 %v1323_v17, %v1313_v12  ;;  %v1627_v4 = vadd.f32 %v6020_v2, %v1611_v38  ;;  %v1369_v38 = vstv %s6099_s14  ;;  %s6319_s14 = sld [smem:[#allocation2 + $0x2d]] }
 0x2ad   : > { %v1632_v24 = vadd.f32 %v1630_v25, %v1626_v45  ;;  %v1351_v45 = vmul.f32 %v5592_v58, %v1349_v48  ;;  %v1389_v48 = vstv %s6117_s22  ;;  %s4639_s22 = sld [smem:[#allocation2 + $0xa8]] }
 0x2ae   : > { %v6060_v3 = vpop.permute.xlu1 %1680  ;;  %v6064_v49 = vpop.permute.xlu0 %1362  ;;  %v1312_v16 = vadd.f32 %v1310_v9, %v1306_v51  ;;  %v1333_v28 = vadd.f32 %v1331_v14, %v1327_v57  ;;  %v1649_v9 = vstv %s6084_s12  ;;  %v1633_v1 = vadd.f32 %v1631_v29, %v1627_v4  ;;  %s6296_s12 = sld [smem:[#allocation2 + $0xa0]] }
 0x2af   : > { %v1646_v39 = vadd.f32 %v6038_v55, %v1632_v24  ;;  %v1650_v37 = vmul.f32 %v5571_v54, %v1649_v9  ;;  %v1651_v61 = vmul.f32 %v5592_v58, %v1649_v9  ;;  %v1669_v24 = vstv %s4536_s18  ;;  %s6330_s18 = sld [smem:[#allocation2 + $0x29]] }
 0x2b0   : > { %v1326_v30 = vadd.f32 %v6022_v32, %v1312_v16  ;;  %v1347_v2 = vadd.f32 %v1343_v18, %v1333_v28  ;;  %v1647_v32 = vadd.f32 %v1643_v50, %v1633_v1  ;;  %v1670_v50 = vmul.f32 %v5601_v42, %v1669_v24 }
 0x2b1   : > { %v1652_v19 = vadd.f32 %v1650_v37, %v1646_v39  ;;  %v1371_v16 = vmul.f32 %v5585_v10, %v1369_v38  ;;  %v1370_v14 = vmul.f32 %v5711_v15, %v1369_v38  ;;  %v1671_v4 = vmul.f32 %v5754_v46, %v1669_v24 }
 0x2b2   : > { %1976 = vrot.lane.b32.xlu0 %v6050_v35, %s4972_s28  ;;  %v1332_v51 = vadd.f32 %v1330_v7, %v1326_v30  ;;  %v1353_v11 = vadd.f32 %v1351_v45, %v1347_v2  ;;  %v1653_v55 = vadd.f32 %v1651_v61, %v1647_v32  ;;  %v1391_v37 = vmul.f32 %v5609_v63, %v1389_v48 }
 0x2b3   : > { %v6088_v33 = vpop.permute.xlu2 %1420  ;;  %v1666_v54 = vadd.f32 %v6058_v44, %v1652_v19  ;;  %v1689_v44 = vstv %s6112_s19  ;;  %v1709_v38 = vstv %s6131_s23  ;;  %v1409_v24 = vstv %s6135_s24  ;;  %s6336_s19 = sld [smem:[#allocation2 + $0x25]] }
 0x2b4   : > { %v1346_v17 = vadd.f32 %v6047_v40, %v1332_v51  ;;  %v1367_v58 = vadd.f32 %v6064_v49, %v1353_v11  ;;  %v1667_v57 = vadd.f32 %v6054_v52, %v1653_v55  ;;  %v1690_v39 = vmul.f32 %v5544_v0, %v1689_v44  ;;  %s6343_s23 = sld [smem:[#allocation2 + $0x21]] }
 0x2b5   : > { %v1672_v30 = vadd.f32 %v1670_v50, %v1666_v54  ;;  %v1691_v61 = vmul.f32 %v5609_v63, %v1689_v44  ;;  %v1411_v50 = vmul.f32 %v5567_v47, %v1409_v24  ;;  %v1429_v44 = vstv %s6147_s25  ;;  %s6356_s24 = sld [smem:[#allocation2 + $0x6d]] }
 0x2b6   : > { %v6066_v26 = vpop.permute.xlu1 %1382  ;;  %v6070_v36 = vpop.permute.xlu0 %1380  ;;  %v1352_v40 = vadd.f32 %v1350_v27, %v1346_v17  ;;  %v1373_v29 = vadd.f32 %v1371_v16, %v1367_v58  ;;  %v1673_v52 = vadd.f32 %v1671_v4, %v1667_v57  ;;  %v1390_v27 = vmul.f32 %v5544_v0, %v1389_v48  ;;  %s4613_s25 = sld [smem:[#allocation2 + $0xe4]] }
 0x2b8   : > { %v1366_v25 = vadd.f32 %v6056_v6, %v1352_v40  ;;  %v1686_v6 = vadd.f32 %v6060_v3, %v1672_v30  ;;  %v1387_v51 = vadd.f32 %v6066_v26, %v1373_v29  ;;  %v1687_v17 = vadd.f32 %v6062_v60, %v1673_v52 }
 0x2b9   : > { %v1710_v60 = vmul.f32 %v5663_v22, %v1709_v38 }
 0x2ba   : > { %v1372_v49 = vadd.f32 %v1370_v14, %v1366_v25  ;;  %v1692_v11 = vadd.f32 %v1690_v39, %v1686_v6  ;;  %v1393_v3 = vadd.f32 %v1391_v37, %v1387_v51  ;;  %v1693_v40 = vadd.f32 %v1691_v61, %v1687_v17 }
 0x2bb   : > { %v6101_v21 = vpop.permute.xlu2 %1742  ;;  %v1711_v25 = vmul.f32 %v5635_v5, %v1709_v38  ;;  %v1410_v14 = vmul.f32 %v5622_v8, %v1409_v24  ;;  %v1430_v51 = vmul.f32 %v5647_v41, %v1429_v44  ;;  %v6199_v24 = vld [vmem:[%s5015_s27 + $0x8] sm:$0xff] }
 0x2bc   : > { %v1386_v32 = vadd.f32 %v6070_v36, %v1372_v49  ;;  %v1706_v0 = vadd.f32 %v6068_v56, %v1692_v11  ;;  %v1407_v58 = vadd.f32 %v6074_v23, %v1393_v3  ;;  %v1729_v56 = vstv %s6151_s26  ;;  %7921 = vst [vmem:[#allocation21_spill] sm:$0xff] %v6199_v24  ;;  %s6375_s26 = sld [smem:[#allocation2 + $0x65]] }
 0x2bd   : > { %v1431_v49 = vmul.f32 %v5618_v13, %v1429_v44  ;;  %v1731_v6 = vmul.f32 %v5618_v13, %v1729_v56  ;;  %v2465_v3 = vstv %s6177_s7  ;;  %s4645_s7 = sld [smem:[#allocation2 + $0xe0]] }
 0x2be   : > { %v6072_v59 = vpop.permute.xlu1 %1400  ;;  %v6079_v53 = vpop.permute.xlu0 %1702  ;;  %v1392_v54 = vadd.f32 %v1390_v27, %v1386_v32  ;;  %v1712_v30 = vadd.f32 %v1710_v60, %v1706_v0  ;;  %v1413_v29 = vadd.f32 %v1411_v50, %v1407_v58  ;;  %v6213_v50 = vld [vmem:[%s5015_s27 + $0x1] sm:$0xff] }
 0x2bf   : > { %v1707_v16 = vadd.f32 %v6079_v53, %v1693_v40 }
 0x2c0   : > { %v1406_v57 = vadd.f32 %v6072_v59, %v1392_v54  ;;  %v1730_v59 = vmul.f32 %v5647_v41, %v1729_v56  ;;  %v6233_v56 = vld [vmem:[%s5015_s27] sm:$0xff] }
 0x2c1   : > { %v1713_v23 = vadd.f32 %v1711_v25, %v1707_v16  ;;  %v2505_v25 = vstv %s6208_s17  ;;  %7923 = vst [vmem:[#allocation23_spill] sm:$0xff] %v6233_v56  ;;  %v2466_v44 = vmul.f32 %v6233_v56, %v2465_v3  ;;  %s6436_s17 = sld [smem:[#allocation2 + $0xa5]] }
 0x2c2   : > { %v1412_v48 = vadd.f32 %v1410_v14, %v1406_v57  ;;  %v6221_v14 = vld [vmem:[%s5015_s27 + $0x20] sm:$0xff] }
 0x2c3   : > { %v6114_v7 = vpop.permute.xlu2 %989  ;;  %7922 = vst [vmem:[#allocation22_spill] sm:$0xff] %v6221_v14 }
 0x2c6   : > { %v6086_v20 = vpop.permute.xlu1 %1722  ;;  %v6097_v35 = vpop.permute.xlu0 %1720 }
 0x2c7   : > { %v1726_v5 = vadd.f32 %v6097_v35, %v1712_v30  ;;  %v1727_v52 = vadd.f32 %v6086_v20, %v1713_v23  ;;  %v2525_v30 = vstv %s6218_s20  ;;  %s6456_s20 = sld [smem:[#allocation2 + $0xed]] }
 0x2c9   : > { %v1732_v39 = vadd.f32 %v1730_v59, %v1726_v5  ;;  %v1733_v35 = vadd.f32 %v1731_v6, %v1727_v52  ;;  %v6247_v5 = vld [vmem:[%s5015_s27 + $0x9] sm:$0xff]  ;;  %v2845_v59 = vstv %s6238_s30  ;;  %v6258_v52 = vld [vmem:[%s5015_s27 + $0x1a] sm:$0xff]  ;;  %s6493_s30 = sld [smem:[#allocation2 + $0xad]] }
 0x2ca   : > { %v6262_v6 = vld [vmem:[%s5015_s27 + $0x18] sm:$0xff] }
 0x2cb   : > { %v1747_v13 = vadd.f32 %v6101_v21, %v1733_v35  ;;  %7924 = vst [vmem:[#allocation24_spill] sm:$0xff] %v6262_v6  ;;  %v6271_v35 = vld [vmem:[%s5015_s27 + $0x39] sm:$0xff] }
 0x2ce   : > { %v6104_v12 = vpop.permute.xlu1 %1740  ;;  %v6119_v28 = vpop.permute.xlu0 %1422 }
 0x2cf   : > { %v1427_v8 = vadd.f32 %v6119_v28, %v1413_v29  ;;  %v1746_v61 = vadd.f32 %v6104_v12, %v1732_v39  ;;  %v6229_v29 = vld [vmem:[%s5015_s27 + $0x19] sm:$0xff]  ;;  %v2805_v39 = vstv %s4633_s11  ;;  %s6499_s11 = sld [smem:[#allocation2 + $0xe1]] }
 0x2d1   : > { %v1433_v37 = vadd.f32 %v1431_v49, %v1427_v8 }
 0x2d6   : > { %v6121_v18 = vpop.permute.xlu1 %1027  ;;  %v6137_v42 = vpop.permute.xlu0 %991 }
 0x2de   : > { %v1443_v2 = vpop.permute.xlu1 %1442  ;;  %v6153_v36 = vpop.permute.xlu0 %1029 }
 0x2df   : > { %v6179_v28 = vadd.f32 %v1443_v2, %v1433_v37  ;;  %v2565_v37 = vstv %s6253_s5  ;;  %s6511_s5 = sld [smem:[#allocation2 + $0x2e]] }
 0x2e1   : > { %7917 = vst [vmem:[#allocation17_spill] sm:$0xff] %v6179_v28  ;;  %v1929_v27 = vsel %vm893_vm0, %v6179_v28, 0.0 }
 0x2e6   : > { %v1943_v4 = vpop.permute.xlu1 %1942 }
 0x2e7   : > { %v1948_v22 = vsel %vm893_vm0, %v1943_v4, 0.0  ;;  %v2507_v4 = vmul.f32 %v6221_v14, %v2505_v25 }
 0x2f9   : > { %v977_v9 = vpop.xlane.xlu2 %976 }
 0x2fa   : > { %v978_v10 = vrot.slane %v977_v9, 4 }
 0x2fc   : > { %v979_v1 = vadd.f32 %v978_v10, %v977_v9 }
 0x2fe   : > { %v980_v45 = vrot.slane %v979_v1, 2 }
 0x300   : > { %v981_v19 = vadd.f32 %v980_v45, %v979_v1  ;;  %v1426_v1 = vadd.f32 %v6088_v33, %v1412_v48  ;;  %v1749_v45 = vstv %s4544_s29  ;;  %v6243_v48 = vld [vmem:[%s5015_s27 + $0x21] sm:$0xff]  ;;  %s6391_s29 = sld [smem:[#allocation2 + $0x61]] }
 0x301   : > { %v1761_v26 = vpop.permute.xlu2 %1760  ;;  %v6167_v10 = vpop.xlane.xlu0 %1013  ;;  %v1750_v33 = vmul.f32 %v5631_v31, %v1749_v45  ;;  %v1751_v2 = vmul.f32 %v5643_v43, %v1749_v45  ;;  %v2806_v45 = vmul.f32 %v5720_v62, %v2805_v39 }
 0x302   : > { %v982_v55 = vrot.slane %v981_v19, 1  ;;  %v1432_v32 = vadd.f32 %v1430_v51, %v1426_v1  ;;  %v2846_v1 = vmul.f32 %v6258_v52, %v2845_v59  ;;  %v2506_v51 = vmul.f32 %v6262_v6, %v2505_v25  ;;  %v6349_v25 = vld [vmem:[%s5015_s27 + $0x31] sm:$0xff] }
 0x303   : > { %v1752_v11 = vadd.f32 %v1750_v33, %v1746_v61  ;;  %v1753_v12 = vadd.f32 %v1751_v2, %v1747_v13  ;;  %v2527_v33 = vmul.f32 %v6243_v48, %v2525_v30  ;;  %v2545_v13 = vstv %s4607_s6  ;;  %s6522_s6 = sld [smem:[#allocation2 + $0x26]] }
 0x304   : > { %v983_v63 = vadd.f32 %v982_v55, %v981_v19  ;;  %v2467_v55 = vmul.f32 %v6199_v24, %v2465_v3 }
 0x305   : > { %v6194_v31 = vadd.f32 %v1761_v26, %v1752_v11  ;;  %v1979_v26 = vpop.permute.xlu1 %1978  ;;  %v6300_v11 = vld [vmem:[%s5015_s27 + $0x48] sm:$0xff] }
 0x306   : > { %4762 = vpush %v983_v63  ;;  %v2785_v63 = vstv %s6192_s9  ;;  %v1983_v60 = vsel %vm893_vm0, %v1979_v26, 0.0  ;;  %v995_v26 = vsel %vm893_vm0, %v6114_v7, 0.0  ;;  %v2625_v7 = vstv %s6330_s18  ;;  %s6413_s9 = sld [smem:[#allocation2 + $0xa9]] }
 0x307   : > { %7919 = vst [vmem:[#allocation19_spill] sm:$0xff] %v6194_v31  ;;  %v1961_v43 = vsel %vm893_vm0, %v6194_v31, 0.0  ;;  %v2786_v16 = vmul.f32 %v6213_v50, %v2785_v63  ;;  %v2787_v49 = vmul.f32 %v6247_v5, %v2785_v63  ;;  %s6565_s18 = sld [smem:[#allocation2 + $0x66]] }
 0x309   : > { %v1945_v9 = vpop.permute.xlu2 %1944 }
 0x30a   : > { %v1949_v47 = vsel %vm893_vm0, %v1945_v9, 0.0  ;;  %v2526_v9 = vmul.f32 %v6229_v29, %v2525_v30  ;;  %v2865_v30 = vstv %s4639_s22  ;;  %s6584_s22 = sld [smem:[#allocation2 + $0x6a]] }
 0x30b   : > { %v1950_v53 = vadd.f32 %v1949_v47, %v1948_v22  ;;  %v2485_v22 = vstv %s4601_s21  ;;  %v2825_v47 = vstv %s6226_s10  ;;  %s4619_s21 = sld [smem:[#allocation2 + $0x69]] }
 0x30c   : > { %v2486_v23 = vmul.f32 %v6213_v50, %v2485_v22  ;;  %v2487_v8 = vmul.f32 %v6247_v5, %v2485_v22  ;;  %v2826_v62 = vmul.f32 %v6229_v29, %v2825_v47  ;;  %v6359_v22 = vld [vmem:[%s5015_s27 + $0x2] sm:$0xff]  ;;  %s6477_s10 = sld [smem:[#allocation2 + $0xe9]] }
 0x30d   : > { %1951 = vadd.xlane.f32.xlu0 %v1950_v53  ;;  %v2827_v53 = vmul.f32 %v6243_v48, %v2825_v47 }
 0x314   : > { %v1441_v17 = vpop.permute.xlu0 %1440 }
 0x315   : > { %v6183_v20 = vadd.f32 %v1441_v17, %v1432_v32  ;;  %v2567_v32 = vmul.f32 %v6271_v35, %v2565_v37  ;;  %v6275_v17 = vld [vmem:[%s5015_s27 + $0xa] sm:$0xff] }
 0x316   : > { %v2807_v61 = vmul.f32 %v6275_v17, %v2805_v39  ;;  %v6384_v39 = vld [vmem:[%s5015_s27 + $0x32] sm:$0xff] }
 0x317   : > { %7918 = vst [vmem:[#allocation18_spill] sm:$0xff] %v6183_v20  ;;  %v1928_v41 = vsel %vm893_vm0, %v6183_v20, 0.0 }
 0x318   : > { %v1930_v19 = vadd.f32 %v1929_v27, %v1928_v41  ;;  %v2546_v41 = vmul.f32 %v5711_v15, %v2545_v13  ;;  %v6287_v27 = vld [vmem:[%s5015_s27 + $0x38] sm:$0xff]  ;;  %v2585_v15 = vstv %s6294_s8  ;;  %s6538_s8 = sld [smem:[#allocation2 + $0xa1]] }
 0x319   : > { %v2547_v2 = vmul.f32 %v6287_v27, %v2545_v13  ;;  %v2586_v3 = vmul.f32 %v6300_v11, %v2585_v15 }
 0x31a   : > { %1931 = vadd.xlane.f32.xlu2 %v1930_v19  ;;  %v2847_v19 = vmul.f32 %v5754_v46, %v2845_v59  ;;  %v6308_v46 = vld [vmem:[%s5015_s27 + $0x3a] sm:$0xff] }
 0x31c   : > { %v1763_v21 = vpop.permute.xlu0 %1762 }
 0x31d   : > { %v6196_v38 = vadd.f32 %v1763_v21, %v1753_v12  ;;  %v2885_v12 = vstv %s6296_s12  ;;  %s6543_s12 = sld [smem:[#allocation2 + $0x6e]] }
 0x31e   : > { %v2887_v21 = vmul.f32 %v6308_v46, %v2885_v12 }
 0x31f   : > { %7920 = vst [vmem:[#allocation20_spill] sm:$0xff] %v6196_v38  ;;  %v1962_v40 = vsel %vm893_vm0, %v6196_v38, 0.0  ;;  %v7929_v38 = vstv %s6436_s17 }
 0x320   : > { %v1963_v54 = vadd.f32 %v1962_v40, %v1961_v43  ;;  %v6314_v43 = vld [vmem:[%s5015_s27 + $0x49] sm:$0xff] }
 0x321   : > { %2472 = vrot.lane.b32.xlu0 %v2467_v55, %s4972_s28  ;;  %v2905_v55 = vstv %s6305_s13  ;;  %s4630_s13 = sld [smem:[#allocation2 + $0x2a]] }
 0x322   : > { %1964 = vadd.xlane.f32.xlu1 %v1963_v54  ;;  %v2906_v40 = vmul.f32 %v6314_v43, %v2905_v55  ;;  %v996_v54 = vsel %vm893_vm0, %v6137_v42, 0.0  ;;  %v2305_v42 = vstv %s6319_s14  ;;  %s6560_s14 = sld [smem:[#allocation2 + $0x22]] }
 0x323   : > { %v997_v63 = vadd.f32 %v996_v54, %v995_v26  ;;  %v2307_v54 = vmul.f32 %v6199_v24, %v2305_v42  ;;  %v2925_v26 = vstv %s4645_s7  ;;  %v2499_v20 = vstv %s6543_s12  ;;  %s6644_s7 = sld [smem:[#allocation2 + $0xe6]] }
 0x324   : > { %v1977_v0 = vpop.permute.xlu0 %1976 }
 0x325   : > { %v1982_v58 = vsel %vm893_vm0, %v1977_v0, 0.0  ;;  %v1034_v0 = vsel %vm893_vm0, %v6153_v36, 0.0  ;;  %v2325_v36 = vstv %s6336_s19  ;;  %s6581_s19 = sld [smem:[#allocation2 + $0xe5]] }
 0x326   : > { %v1984_v57 = vadd.f32 %v1983_v60, %v1982_v58  ;;  %v1033_v60 = vsel %vm893_vm0, %v6121_v18, 0.0  ;;  %v2627_v18 = vmul.f32 %v6247_v5, %v2625_v7 }
 0x327   : > { %v1035_v58 = vadd.f32 %v1034_v0, %v1033_v60  ;;  %v2779_v31 = vstv %s4630_s13  ;;  %s6714_s13 = sld [smem:[#allocation2 + $0x63]] }
 0x328   : > { %1985 = vadd.xlane.f32.xlu2 %v1984_v57  ;;  %v2326_v57 = vmul.f32 %v6213_v50, %v2325_v36 }
 0x329   : > { %2790 = vrot.lane.b32.xlu0 %v2786_v16, %s4972_s28  ;;  %v2306_v16 = vmul.f32 %v6233_v56, %v2305_v42 }
 0x331   : > { %2512 = vrot.lane.b32.xlu0 %v2507_v4, %s4972_s28  ;;  %v2566_v4 = vmul.f32 %v6349_v25, %v2565_v37  ;;  %v2886_v37 = vmul.f32 %v6384_v39, %v2885_v12  ;;  %v6416_v12 = vld [vmem:[%s5015_s27 + $0x22] sm:$0xff] }
 0x339   : > { %2530 = vrot.lane.b32.xlu0 %v2526_v9, %s4972_s28  ;;  %v2866_v9 = vmul.f32 %v6349_v25, %v2865_v30 }
 0x33b   : > { %2470 = vrot.lane.b32.xlu1 %v2466_v44, %s4972_s28  ;;  %v2645_v44 = vstv %s6343_s23  ;;  %s6588_s23 = sld [smem:[#allocation2 + $0xae]] }
 0x33c   : > { %v2646_v47 = vmul.f32 %v6359_v22, %v2645_v44 }
 0x340   : > { %2490 = vrot.lane.b32.xlu2 %v2486_v23, %s4972_s28 }
 0x341   : > { %2832 = vrot.lane.b32.xlu0 %v2827_v53, %s4972_s28  ;;  %v2867_v53 = vmul.f32 %v6271_v35, %v2865_v30 }
 0x343   : > { %2492 = vrot.lane.b32.xlu1 %v2487_v8, %s4972_s28  ;;  %v6370_v8 = vld [vmem:[%s5015_s27 + $0x50] sm:$0xff] }
 0x344   : > { %v2587_v59 = vmul.f32 %v6370_v8, %v2585_v15 }
 0x348   : > { %2792 = vrot.lane.b32.xlu2 %v2787_v49, %s4972_s28  ;;  %v2345_v49 = vstv %s6356_s24  ;;  %s6601_s24 = sld [smem:[#allocation2 + $0xa6]] }
 0x349   : > { %2850 = vrot.lane.b32.xlu0 %v2846_v1, %s4972_s28  ;;  %v2347_v1 = vmul.f32 %v6221_v14, %v2345_v49 }
 0x34b   : > { %2510 = vrot.lane.b32.xlu1 %v2506_v51, %s4972_s28 }
 0x350   : > { %2810 = vrot.lane.b32.xlu2 %v2806_v45, %s4972_s28  ;;  %v2605_v45 = vstv %s4613_s25  ;;  %s6606_s25 = sld [smem:[#allocation2 + $0x62]] }
 0x351   : > { %2572 = vrot.lane.b32.xlu0 %v2567_v32, %s4972_s28  ;;  %v2606_v32 = vmul.f32 %v6314_v43, %v2605_v45 }
 0x353   : > { %2812 = vrot.lane.b32.xlu1 %v2807_v61, %s4972_s28  ;;  %v2365_v61 = vstv %s6375_s26  ;;  %s6623_s26 = sld [smem:[#allocation2 + $0xaa]] }
 0x358   : > { %2532 = vrot.lane.b32.xlu2 %v2527_v33, %s4972_s28  ;;  %v2366_v33 = vmul.f32 %v6229_v29, %v2365_v61 }
 0x359   : > { %2590 = vrot.lane.b32.xlu0 %v2586_v3, %s4972_s28  ;;  %v2685_v3 = vstv %s6391_s29  ;;  %s6633_s29 = sld [smem:[#allocation2 + $0xee]] }
 0x35b   : > { %2830 = vrot.lane.b32.xlu1 %v2826_v62, %s4972_s28 }
 0x360   : > { %2550 = vrot.lane.b32.xlu2 %v2546_v41, %s4972_s28  ;;  %v6402_v41 = vld [vmem:[%s5015_s27 + $0x51] sm:$0xff] }
 0x361   : > { %2892 = vrot.lane.b32.xlu0 %v2887_v21, %s4972_s28  ;;  %v2687_v21 = vmul.f32 %v6416_v12, %v2685_v3 }
 0x363   : > { %2552 = vrot.lane.b32.xlu1 %v2547_v2, %s4972_s28  ;;  %v2607_v2 = vmul.f32 %v6402_v41, %v2605_v45  ;;  %v7861_v45 = vstv %s6456_s20 }
 0x368   : > { %2852 = vrot.lane.b32.xlu2 %v2847_v19, %s4972_s28  ;;  %v2907_v19 = vmul.f32 %v6402_v41, %v2905_v55 }
 0x369   : > { %2910 = vrot.lane.b32.xlu0 %v2906_v40, %s4972_s28 }
 0x371   : > { %2310 = vrot.lane.b32.xlu0 %v2306_v16, %s4972_s28 }
 0x379   : > { %2632 = vrot.lane.b32.xlu0 %v2627_v18, %s4972_s28  ;;  %v2327_v18 = vmul.f32 %v6247_v5, %v2325_v36 }
 0x380   : > { %v6364_v23 = vpop.xlane.xlu0 %1951 }
 0x381   : > { %2330 = vrot.lane.b32.xlu0 %v2326_v57, %s4972_s28  ;;  %7925 = vst [vmem:[#allocation25_spill] sm:$0xff] %v6364_v23 }
 0x389   : > { %2650 = vrot.lane.b32.xlu0 %v2646_v47, %s4972_s28 }
 0x38d   : > { %998 = vadd.xlane.f32.xlu1 %v997_v63  ;;  %v6396_v62 = vpop.xlane.xlu2 %1931  ;;  %v6429_v63 = vld [vmem:[%s5015_s27 + $0x4a] sm:$0xff] }
 0x38e   : > { %7926 = vst [vmem:[#allocation26_spill] sm:$0xff] %v6396_v62  ;;  %v2926_v0 = vmul.f32 %v6429_v63, %v2925_v26 }
 0x391   : > { %1036 = vadd.xlane.f32.xlu2 %v1035_v58  ;;  %2352 = vrot.lane.b32.xlu0 %v2347_v1, %s4972_s28  ;;  %v2705_v58 = vstv %s6413_s9  ;;  %v2626_v1 = vmul.f32 %v6213_v50, %v2625_v7  ;;  %s6655_s9 = sld [smem:[#allocation2 + $0xa2]] }
 0x392   : > { %v2706_v42 = vmul.f32 %v6349_v25, %v2705_v58 }
 0x393   : > { %v6380_v51 = vpop.permute.xlu0 %2472 }
 0x395   : > { %v6409_v15 = vpop.xlane.xlu1 %1964 }
 0x396   : > { %7927 = vst [vmem:[#allocation27_spill] sm:$0xff] %v6409_v15 }
 0x399   : > { %2370 = vrot.lane.b32.xlu0 %v2366_v33, %s4972_s28 }
 0x39b   : > { %v6399_v13 = vpop.permute.xlu0 %2790  ;;  %v6421_v40 = vpop.xlane.xlu2 %1985 }
 0x39c   : > { %7928 = vst [vmem:[#allocation28_spill] sm:$0xff] %v6421_v40 }
 0x3a1   : > { %2692 = vrot.lane.b32.xlu0 %v2687_v21, %s4972_s28  ;;  %v7860_v21 = vstv %s6477_s10 }
 0x3a3   : > { %v6424_v55 = vpop.permute.xlu0 %2512  ;;  %v6442_v16 = vpop.permute.xlu2 %2490 }
 0x3a6   : > { %2570 = vrot.lane.b32.xlu1 %v2566_v4, %s4972_s28  ;;  %v6451_v4 = vld [vmem:[%s5015_s27 + $0x52] sm:$0xff] }
 0x3a7   : > { %v2927_v30 = vmul.f32 %v6451_v4, %v2925_v26 }
 0x3a9   : > { %2870 = vrot.lane.b32.xlu2 %v2866_v9, %s4972_s28  ;;  %2710 = vrot.lane.b32.xlu0 %v2706_v42, %s4972_s28  ;;  %v7862_v9 = vstv %s6436_s17  ;;  %s4642_s17 = sld [smem:[#allocation2 + $0xea]] }
 0x3aa   : > { %v2407_v47 = vmul.f32 %v6271_v35, %v7862_v9 }
 0x3ab   : > { %v6448_v57 = vpop.permute.xlu0 %2530 }
 0x3ad   : > { %v6432_v60 = vpop.permute.xlu1 %2470 }
 0x3ae   : > { %2872 = vrot.lane.b32.xlu1 %v2867_v53, %s4972_s28  ;;  %v2647_v53 = vmul.f32 %v6275_v17, %v2645_v44  ;;  %v2426_v44 = vmul.f32 %v6300_v11, %v7861_v45  ;;  %v1015_v45 = vrot.slane %v6167_v10, 4 }
 0x3b1   : > { %2592 = vrot.lane.b32.xlu2 %v2587_v59, %s4972_s28  ;;  %2412 = vrot.lane.b32.xlu0 %v2407_v47, %s4972_s28  ;;  %v6468_v59 = vpop.permute.xlu2 %2792 }
 0x3b5   : > { %v6461_v36 = vpop.permute.xlu1 %2492 }
 0x3b6   : > { %2890 = vrot.lane.b32.xlu1 %v2886_v37, %s4972_s28  ;;  %v6473_v37 = vpop.permute.xlu0 %2832 }
 0x3b9   : > { %2610 = vrot.lane.b32.xlu2 %v2606_v32, %s4972_s28  ;;  %v2665_v32 = vstv %s4619_s21  ;;  %2430 = vrot.lane.b32.xlu0 %v2426_v44, %s4972_s28  ;;  %v2686_v44 = vmul.f32 %v6258_v52, %v2685_v3  ;;  %v2707_v3 = vmul.f32 %v6271_v35, %v2705_v58  ;;  %s4614_s21 = sld [smem:[#allocation2 + $0x2b]] }
 0x3ba   : > { %v2666_v7 = vmul.f32 %v6229_v29, %v2665_v32  ;;  %v2667_v42 = vmul.f32 %v6243_v48, %v2665_v32 }
 0x3bd   : > { %v6483_v33 = vpop.permute.xlu1 %2510 }
 0x3be   : > { %2612 = vrot.lane.b32.xlu1 %v2607_v2, %s4972_s28  ;;  %v2346_v2 = vmul.f32 %v6262_v6, %v2345_v49  ;;  %v6501_v26 = vpop.permute.xlu0 %2850  ;;  %v2367_v49 = vmul.f32 %v6243_v48, %v2365_v61 }
 0x3c1   : > { %2912 = vrot.lane.b32.xlu2 %v2907_v19, %s4972_s28  ;;  %v6490_v19 = vpop.permute.xlu2 %2810 }
 0x3c6   : > { %2312 = vrot.lane.b32.xlu1 %v2307_v54, %s4972_s28  ;;  %v2747_v54 = vmul.f32 %v6402_v41, %v7860_v21  ;;  %v6524_v61 = vpop.permute.xlu0 %2572 }
 0x3c8   : > { %2752 = vrot.lane.b32.xlu0 %v2747_v54, %s4972_s28 }
 0x3c9   : > { %2930 = vrot.lane.b32.xlu2 %v2926_v0, %s4972_s28  ;;  %v6508_v0 = vpop.permute.xlu1 %2812  ;;  %v6516_v47 = vpop.permute.xlu2 %2532 }
 0x3ce   : > { %2332 = vrot.lane.b32.xlu1 %v2327_v18, %s4972_s28  ;;  %v2385_v18 = vstv %s6493_s30  ;;  %s4763_s30 = spop %4762 }
 0x3cf   : > { %v2387_v21 = vmul.f32 %v6287_v27, %v2385_v18 }
 0x3d1   : > { %2932 = vrot.lane.b32.xlu2 %v2927_v30, %s4972_s28  ;;  %v7859_v30 = vstv %s6499_s11 }
 0x3d6   : > { %2652 = vrot.lane.b32.xlu1 %v2647_v53, %s4972_s28  ;;  %v2766_v53 = vmul.f32 %v6429_v63, %v7859_v30 }
 0x3d8   : > { %2770 = vrot.lane.b32.xlu0 %v2766_v53, %s4972_s28  ;;  %v6550_v53 = vpop.permute.xlu0 %2590 }
 0x3d9   : > { %2630 = vrot.lane.b32.xlu2 %v2626_v1, %s4972_s28  ;;  %v6527_v1 = vld [vmem:[%s5015_s27 + $0x30] sm:$0xff] }
 0x3da   : > { %v2386_v32 = vmul.f32 %v6527_v1, %v2385_v18  ;;  %v1016_v18 = vadd.f32 %v1015_v45, %v6167_v10  ;;  %v2780_v10 = vmul.f32 %v6213_v50, %v2779_v31 }
 0x3dc   : > { %v2796_v23 = vadd.f32 %v6399_v13, %v2780_v10  ;;  %v2501_v13 = vmul.f32 %v6221_v14, %v2499_v20 }
 0x3de   : > { %2670 = vrot.lane.b32.xlu1 %v2666_v7, %s4972_s28  ;;  %v2459_v7 = vstv %s6511_s5 }
 0x3df   : > { %v2460_v54 = vmul.f32 %v6233_v56, %v2459_v7  ;;  %v2461_v58 = vmul.f32 %v6199_v24, %v2459_v7 }
 0x3e1   : > { %2350 = vrot.lane.b32.xlu2 %v2346_v2, %s4972_s28  ;;  %v6535_v2 = vpop.permute.xlu1 %2830  ;;  %v2476_v30 = vadd.f32 %v6432_v60, %v2460_v54  ;;  %v2477_v7 = vadd.f32 %v6380_v51, %v2461_v58  ;;  %v2519_v58 = vstv %s6565_s18  ;;  %s6716_s18 = sld [smem:[#allocation2 + $0x27]] }
 0x3e2   : > { %v2520_v40 = vmul.f32 %v6229_v29, %v2519_v58 }
 0x3e6   : > { %2372 = vrot.lane.b32.xlu1 %v2367_v49, %s4972_s28  ;;  %v2479_v49 = vstv %s6522_s6  ;;  %s6708_s6 = sld [smem:[#allocation2 + $0x6b]] }
 0x3e7   : > { %v2481_v34 = vmul.f32 %v6247_v5, %v2479_v49 }
 0x3e9   : > { %2672 = vrot.lane.b32.xlu2 %v2667_v42, %s4972_s28  ;;  %v6545_v42 = vpop.permute.xlu2 %2550  ;;  %v6558_v9 = vpop.permute.xlu1 %2552 }
 0x3ee   : > { %2390 = vrot.lane.b32.xlu1 %v2386_v32, %s4972_s28  ;;  %v2480_v32 = vmul.f32 %v6213_v50, %v2479_v49  ;;  %v2483_v49 = vadd.f32 %v2481_v34, %v2477_v7 }
 0x3f0   : > { %v2482_v28 = vadd.f32 %v2480_v32, %v2476_v30  ;;  %v2500_v30 = vmul.f32 %v6262_v6, %v2499_v20  ;;  %v2497_v7 = vadd.f32 %v6461_v36, %v2483_v49 }
 0x3f1   : > { %2690 = vrot.lane.b32.xlu2 %v2686_v44, %s4972_s28  ;;  %v2725_v44 = vstv %s6538_s8  ;;  %v6569_v54 = vpop.permute.xlu2 %2852 }
 0x3f2   : > { %v2726_v60 = vmul.f32 %v6384_v39, %v2725_v44  ;;  %v2496_v32 = vadd.f32 %v6442_v16, %v2482_v28  ;;  %v1017_v28 = vrot.slane %v1016_v18, 2  ;;  %v2781_v16 = vmul.f32 %v6247_v5, %v2779_v31 }
 0x3f3   : > { %v2503_v49 = vadd.f32 %v2501_v13, %v2497_v7  ;;  %v2559_v13 = vstv %s6601_s24 }
 0x3f4   : > { %v2502_v6 = vadd.f32 %v2500_v30, %v2496_v32  ;;  %v1018_v62 = vadd.f32 %v1017_v28, %v1016_v18  ;;  %v2797_v34 = vadd.f32 %v6468_v59, %v2781_v16  ;;  %v2445_v28 = vstv %s6581_s19 }
 0x3f6   : > { %2712 = vrot.lane.b32.xlu1 %v2707_v3, %s4972_s28  ;;  %v6571_v3 = vpop.permute.xlu0 %2892  ;;  %v2516_v56 = vadd.f32 %v6483_v33, %v2502_v6  ;;  %v2727_v6 = vmul.f32 %v6308_v46, %v2725_v44 }
 0x3f8   : > { %v2522_v18 = vadd.f32 %v2520_v40, %v2516_v56  ;;  %v2446_v56 = vmul.f32 %v6314_v43, %v2445_v28 }
 0x3f9   : > { %2392 = vrot.lane.b32.xlu2 %v2387_v21, %s4972_s28  ;;  %v2406_v21 = vmul.f32 %v6349_v25, %v7929_v38  ;;  %v2799_v38 = vstv %s6560_s14 }
 0x3fa   : > { %v2800_v31 = vmul.f32 %v6359_v22, %v2799_v38  ;;  %v2801_v30 = vmul.f32 %v6275_v17, %v2799_v38  ;;  %v2819_v38 = vstv %s6584_s22 }
 0x3fc   : > { %v2802_v16 = vadd.f32 %v2800_v31, %v2796_v23  ;;  %v2803_v44 = vadd.f32 %v2801_v30, %v2797_v34  ;;  %v2536_v23 = vadd.f32 %v6448_v57, %v2522_v18  ;;  %v2820_v34 = vmul.f32 %v6229_v29, %v2819_v38 }
 0x3fd   : > { %v2521_v57 = vmul.f32 %v6243_v48, %v2519_v58  ;;  %v7932_v58 = vstv %s6499_s11  ;;  %s6706_s11 = sld [smem:[#allocation2 + $0x2f]] }
 0x3fe   : > { %2730 = vrot.lane.b32.xlu1 %v2726_v60, %s4972_s28  ;;  %v7930_v60 = vstv %s6456_s20  ;;  %v6609_v10 = vpop.permute.xlu0 %2910  ;;  %v2816_v7 = vadd.f32 %v6490_v19, %v2802_v16  ;;  %v2767_v16 = vmul.f32 %v6451_v4, %v7932_v58  ;;  %v2879_v58 = vstv %s6655_s9  ;;  %s4644_s20 = sld [smem:[#allocation2 + $0xe2]] }
 0x3ff   : > { %v2427_v24 = vmul.f32 %v6370_v8, %v7930_v60  ;;  %v2539_v60 = vstv %s6588_s23  ;;  %s4624_s9 = sld [smem:[#allocation2 + $0xa3]] }
 0x400   : > { %v999_v45 = vpop.xlane.xlu1 %998  ;;  %v2540_v14 = vmul.f32 %v6527_v1, %v2539_v60 }
 0x401   : > { %v1000_v51 = vrot.slane %v999_v45, 4  ;;  %2410 = vrot.lane.b32.xlu2 %v2406_v21, %s4972_s28 }
 0x402   : > { %v2542_v18 = vadd.f32 %v2540_v14, %v2536_v23  ;;  %v2541_v23 = vmul.f32 %v6287_v27, %v2539_v60 }
 0x403   : > { %v1001_v15 = vadd.f32 %v1000_v51, %v999_v45  ;;  %v1019_v51 = vrot.slane %v1018_v62, 1 }
 0x404   : > { %v1037_v32 = vpop.xlane.xlu2 %1036  ;;  %v2556_v14 = vadd.f32 %v6545_v42, %v2542_v18 }
 0x405   : > { %v1038_v21 = vrot.slane %v1037_v32, 4  ;;  %v1002_v33 = vrot.slane %v1001_v15, 2 }
 0x406   : > { %2432 = vrot.lane.b32.xlu1 %v2427_v24, %s4972_s28  ;;  %v2821_v24 = vmul.f32 %v6243_v48, %v2819_v38  ;;  %v6636_v38 = vpop.permute.xlu0 %2310 }
 0x407   : > { %v1039_v45 = vadd.f32 %v1038_v21, %v1037_v32  ;;  %v1003_v59 = vadd.f32 %v1002_v33, %v1001_v15  ;;  %v2817_v15 = vadd.f32 %v6508_v0, %v2803_v44  ;;  %v1020_v32 = vadd.f32 %v1019_v51, %v1018_v62 }
 0x408   : > { %v2839_v0 = vstv %s6606_s25  ;;  %v2517_v62 = vadd.f32 %v6424_v55, %v2503_v49  ;;  %v2560_v51 = vmul.f32 %v6349_v25, %v2559_v13  ;;  %s6740_s25 = sld [smem:[#allocation2 + $0xab]] }
 0x409   : > { %2732 = vrot.lane.b32.xlu2 %v2727_v6, %s4972_s28  ;;  %v1004_v36 = vrot.slane %v1003_v59, 1  ;;  %v1040_v20 = vrot.slane %v1039_v45, 2  ;;  %v7931_v6 = vstv %s6477_s10  ;;  %v2841_v19 = vmul.f32 %v6416_v12, %v2839_v0  ;;  %s4616_s10 = sld [smem:[#allocation2 + $0x23]] }
 0x40a   : > { %v2746_v33 = vmul.f32 %v6314_v43, %v7931_v6  ;;  %v2523_v55 = vadd.f32 %v2521_v57, %v2517_v62 }
 0x40b   : > { %v1005_v40 = vadd.f32 %v1004_v36, %v1003_v59  ;;  %v1041_v31 = vadd.f32 %v1040_v20, %v1039_v45  ;;  %v2823_v45 = vadd.f32 %v2821_v24, %v2817_v15  ;;  %v2822_v36 = vadd.f32 %v2820_v34, %v2816_v7 }
 0x40c   : > { %v6620_v30 = vpop.permute.xlu2 %2870  ;;  %v2840_v24 = vmul.f32 %v6258_v52, %v2839_v0  ;;  %v2859_v15 = vstv %s6623_s26  ;;  %v2537_v42 = vadd.f32 %v6516_v47, %v2523_v55  ;;  %v2561_v0 = vmul.f32 %v6271_v35, %v2559_v13  ;;  %s6747_s26 = sld [smem:[#allocation2 + $0x6f]] }
 0x40d   : > { %4764 = vpush %v1005_v40  ;;  %v1042_v21 = vrot.slane %v1041_v31, 1  ;;  %v2837_v44 = vadd.f32 %v6473_v37, %v2823_v45  ;;  %v2836_v49 = vadd.f32 %v6535_v2, %v2822_v36  ;;  %v2579_v40 = vstv %s6633_s29  ;;  %s6757_s29 = sld [smem:[#allocation2 + $0x67]] }
 0x40e   : > { %4766 = vpush %v1020_v32  ;;  %2450 = vrot.lane.b32.xlu1 %v2446_v56, %s4972_s28  ;;  %v2447_v56 = vmul.f32 %v6402_v41, %v2445_v28  ;;  %v2562_v32 = vadd.f32 %v2560_v51, %v2556_v14  ;;  %v2599_v28 = vstv %s6644_s7  ;;  %v2861_v60 = vmul.f32 %v6271_v35, %v2859_v15  ;;  %v6662_v6 = vpop.permute.xlu0 %2632  ;;  %s4590_s7 = sld [smem:[#allocation2 + $0xaf]] }
 0x40f   : > { %v1043_v59 = vadd.f32 %v1042_v21, %v1041_v31  ;;  %v2843_v37 = vadd.f32 %v2841_v19, %v2837_v44  ;;  %v2580_v31 = vmul.f32 %v6300_v11, %v2579_v40  ;;  %v2842_v34 = vadd.f32 %v2840_v24, %v2836_v49 }
 0x410   : > { %v2543_v7 = vadd.f32 %v2541_v23, %v2537_v42  ;;  %v2600_v47 = vmul.f32 %v6314_v43, %v2599_v28 }
 0x411   : > { %4768 = vpush %v1043_v59  ;;  %2750 = vrot.lane.b32.xlu2 %v2746_v33, %s4972_s28  ;;  %v2857_v33 = vadd.f32 %v6569_v54, %v2843_v37  ;;  %v2856_v18 = vadd.f32 %v6501_v26, %v2842_v34  ;;  %v2860_v59 = vmul.f32 %v6349_v25, %v2859_v15 }
 0x412   : > { %v2557_v45 = vadd.f32 %v6558_v9, %v2543_v7  ;;  %v2881_v54 = vmul.f32 %v6308_v46, %v2879_v58  ;;  %v2880_v9 = vmul.f32 %v6384_v39, %v2879_v58  ;;  %v2581_v15 = vmul.f32 %v6370_v8, %v2579_v40 }
 0x413   : > { %v2863_v51 = vadd.f32 %v2861_v60, %v2857_v33  ;;  %v2862_v44 = vadd.f32 %v2860_v59, %v2856_v18  ;;  %v2601_v60 = vmul.f32 %v6402_v41, %v2599_v28 }
 0x414   : > { %v2593_v20 = vpop.permute.xlu2 %2592  ;;  %v2563_v14 = vadd.f32 %v2561_v0, %v2557_v45 }
 0x415   : > { %v2876_v26 = vadd.f32 %v6620_v30, %v2862_v44 }
 0x416   : > { %2772 = vrot.lane.b32.xlu1 %v2767_v16, %s4972_s28  ;;  %v2577_v23 = vadd.f32 %v6524_v61, %v2563_v14 }
 0x418   : > { %v2571_v2 = vpop.permute.xlu1 %2570 }
 0x419   : > { %v2576_v21 = vadd.f32 %v2571_v2, %v2562_v32  ;;  %2452 = vrot.lane.b32.xlu2 %v2447_v56, %s4972_s28  ;;  %v6679_v56 = vpop.permute.xlu0 %2330  ;;  %v2583_v2 = vadd.f32 %v2581_v15, %v2577_v23 }
 0x41b   : > { %v2582_v57 = vadd.f32 %v2580_v31, %v2576_v21  ;;  %v2882_v31 = vadd.f32 %v2880_v9, %v2876_v26  ;;  %v2919_v21 = vstv %s4644_s20  ;;  %v2597_v33 = vadd.f32 %v2593_v20, %v2583_v2  ;;  %s6776_s20 = sld [smem:[#allocation2 + $0xef]] }
 0x41c   : > { %v2611_v62 = vpop.permute.xlu2 %2610  ;;  %v2920_v61 = vmul.f32 %v6429_v63, %v2919_v21  ;;  %v2921_v45 = vmul.f32 %v6451_v4, %v2919_v21  ;;  %v7935_v21 = vld [vmem:[#allocation27_spill] sm:$0xff] }
 0x41d   : > { %v2596_v19 = vadd.f32 %v6550_v53, %v2582_v57  ;;  %v2899_v53 = vstv %s4642_s17  ;;  %v2603_v18 = vadd.f32 %v2601_v60, %v2597_v33  ;;  %v1966_v60 = vrot.slane %v7935_v21, 4  ;;  %s4592_s17 = sld [smem:[#allocation2 + $0xa7]] }
 0x41e   : > { %v2901_v37 = vmul.f32 %v6402_v41, %v2899_v53  ;;  %v2900_v30 = vmul.f32 %v6314_v43, %v2899_v53 }
 0x41f   : > { %v2602_v16 = vadd.f32 %v2600_v47, %v2596_v19 }
 0x420   : > { %v2873_v55 = vpop.permute.xlu1 %2872 }
 0x421   : > { %v6673_v36 = vadd.f32 %v2611_v62, %v2602_v16  ;;  %v2877_v13 = vadd.f32 %v2873_v55, %v2863_v51  ;;  %v2619_v51 = vstv %s4614_s21  ;;  %s6778_s21 = sld [smem:[#allocation2 + $0xeb]] }
 0x422   : > { %v2621_v14 = vmul.f32 %v6247_v5, %v2619_v51  ;;  %v2620_v44 = vmul.f32 %v6213_v50, %v2619_v51 }
 0x423   : > { %v2883_v49 = vadd.f32 %v2881_v54, %v2877_v13  ;;  %2952 = vrot.lane.b32.xlu2 %v6673_v36, %s4972_s28  ;;  %v2639_v13 = vstv %s4616_s10  ;;  %s4596_s10 = sld [smem:[#allocation2 + $0xe7]] }
 0x424   : > { %v2913_v24 = vpop.permute.xlu2 %2912  ;;  %v2637_v9 = vadd.f32 %v6662_v6, %v2621_v14  ;;  %v2640_v53 = vmul.f32 %v6359_v22, %v2639_v13  ;;  %v2641_v23 = vmul.f32 %v6275_v17, %v2639_v13 }
 0x425   : > { %v2897_v42 = vadd.f32 %v6571_v3, %v2883_v49  ;;  %v6689_v3 = vpop.permute.xlu0 %2650 }
 0x426   : > { %v2643_v2 = vadd.f32 %v2641_v23, %v2637_v9 }
 0x427   : > { %v2903_v7 = vadd.f32 %v2901_v37, %v2897_v42  ;;  %v7933_v42 = vld [vmem:[#allocation26_spill] sm:$0xff] }
 0x428   : > { %v2891_v32 = vpop.permute.xlu1 %2890  ;;  %v1933_v37 = vrot.slane %v7933_v42, 4 }
 0x429   : > { %v2896_v34 = vadd.f32 %v2891_v32, %v2882_v31  ;;  %v2917_v0 = vadd.f32 %v2913_v24, %v2903_v7  ;;  %v2299_v31 = vstv %s6706_s11  ;;  %v2679_v7 = vstv %s6714_s13  ;;  %s6976_s11 = sld [smem:[#allocation2 + $0xb4]] }
 0x42a   : > { %v1934_v17 = vadd.f32 %v1933_v37, %v7933_v42 }
 0x42b   : > { %v2902_v57 = vadd.f32 %v2900_v30, %v2896_v34  ;;  %v2923_v20 = vadd.f32 %v2921_v45, %v2917_v0  ;;  %v2659_v30 = vstv %s6708_s6  ;;  %v7934_v34 = vld [vmem:[#allocation25_spill] sm:$0xff]  ;;  %v7937_v0 = vld [vmem:[#allocation23_spill] sm:$0xff]  ;;  %s4682_s6 = sld [smem:[#allocation2 + $0x3e]] }
 0x42c   : > { %v2931_v47 = vpop.permute.xlu2 %2930  ;;  %v2661_v6 = vmul.f32 %v6243_v48, %v2659_v30  ;;  %v1953_v22 = vrot.slane %v7934_v34, 4  ;;  %v7938_v45 = vld [vmem:[#allocation21_spill] sm:$0xff] }
 0x42d   : > { %v2916_v40 = vadd.f32 %v6609_v10, %v2902_v57  ;;  %v6704_v54 = vpop.permute.xlu0 %2352  ;;  %v7936_v57 = vld [vmem:[#allocation28_spill] sm:$0xff] }
 0x42e   : > { %v1954_v14 = vadd.f32 %v1953_v22, %v7934_v34 }
 0x42f   : > { %v2922_v62 = vadd.f32 %v2920_v61, %v2916_v40  ;;  %v1987_v61 = vrot.slane %v7936_v57, 4 }
 0x430   : > { %v2613_v59 = vpop.permute.xlu1 %2612  ;;  %v1955_v34 = vrot.slane %v1954_v14, 2 }
 0x431   : > { %v6692_v19 = vadd.f32 %v2931_v47, %v2922_v62  ;;  %v6694_v58 = vadd.f32 %v2613_v59, %v2603_v18  ;;  %v2300_v62 = vmul.f32 %v7937_v0, %v2299_v31  ;;  %v2319_v18 = vstv %s6716_s18 }
 0x432   : > { %v2301_v59 = vmul.f32 %v7938_v45, %v2299_v31  ;;  %v1988_v23 = vadd.f32 %v1987_v61, %v7936_v57  ;;  %v2320_v37 = vmul.f32 %v6213_v50, %v2319_v18  ;;  %v2699_v50 = vstv %s6740_s25  ;;  %v7939_v45 = vld [vmem:[#allocation22_spill] sm:$0xff]  ;;  %s4628_s25 = sld [smem:[#allocation2 + $0xe3]] }
 0x433   : > { %2954 = vrot.lane.b32.xlu0 %v6694_v58, %s4972_s28  ;;  %2986 = vrot.lane.b32.xlu1 %v6692_v19, %s4972_s28  ;;  %v2316_v42 = vadd.f32 %v6636_v38, %v2300_v62  ;;  %v1956_v62 = vadd.f32 %v1955_v34, %v1954_v14 }
 0x434   : > { %v2933_v10 = vpop.permute.xlu2 %2932 }
 0x435   : > { %v6700_v28 = vadd.f32 %v2933_v10, %v2923_v20  ;;  %v6718_v49 = vpop.permute.xlu0 %2370  ;;  %v2660_v10 = vmul.f32 %v6229_v29, %v2659_v30  ;;  %v2322_v38 = vadd.f32 %v2320_v37, %v2316_v42  ;;  %v1957_v14 = vrot.slane %v1956_v62, 1 }
 0x437   : > { %2988 = vrot.lane.b32.xlu2 %v6700_v28, %s4972_s28  ;;  %v1958_v34 = vadd.f32 %v1957_v14, %v1956_v62 }
 0x438   : > { %v2313_v16 = vpop.permute.xlu1 %2312 }
 0x43c   : > { %v2631_v55 = vpop.permute.xlu2 %2630 }
 0x43d   : > { %v2636_v24 = vadd.f32 %v2631_v55, %v2620_v44  ;;  %v2681_v55 = vmul.f32 %v6416_v12, %v2679_v7  ;;  %v1967_v44 = vadd.f32 %v1966_v60, %v7935_v21  ;;  %v2693_v9 = vpop.permute.xlu0 %2692  ;;  %v2317_v12 = vadd.f32 %v2313_v16, %v2301_v59 }
 0x43e   : > { %s4765_s5 = spop %4764  ;;  %v1989_v16 = vrot.slane %v1988_v23, 2 }
 0x43f   : > { %s1007_s8 = sadd.f32 %s4765_s5, %s4763_s30  ;;  %s4767_s12 = spop %4766  ;;  %v2642_v32 = vadd.f32 %v2640_v53, %v2636_v24  ;;  %v1935_v24 = vrot.slane %v1934_v17, 2  ;;  %v1968_v22 = vrot.slane %v1967_v44, 2 }
 0x440   : > { %v6712_v26 = vpop.permute.xlu1 %2332  ;;  %s6968_s30 = sld [smem:[#allocation2 + $0x70]] }
 0x441   : > { %s1022_s14 = sadd.f32 %s4767_s12, %s1007_s8  ;;  %v2656_v51 = vadd.f32 %v6689_v3, %v2642_v32  ;;  %v2321_v3 = vmul.f32 %v6247_v5, %v2319_v18  ;;  %v2680_v32 = vmul.f32 %v6258_v52, %v2679_v7  ;;  %v1936_v5 = vadd.f32 %v1935_v24, %v1934_v17 }
 0x442   : > { %s4769_s19 = spop %4768  ;;  %v2700_v52 = vmul.f32 %v6349_v25, %v2699_v50  ;;  %v2339_v7 = vstv %s6747_s26  ;;  %v1969_v18 = vadd.f32 %v1968_v22, %v1967_v44  ;;  %s6875_s26 = sld [smem:[#allocation2 + $0x34]] }
 0x443   : > { %s1045_s22 = sadd.f32 %s4769_s19, %s1022_s14  ;;  %v2662_v30 = vadd.f32 %v2660_v10, %v2656_v51  ;;  %v2323_v57 = vadd.f32 %v2321_v3, %v2317_v12  ;;  %v2341_v59 = vmul.f32 %v7939_v45, %v2339_v7 }
 0x444   : > { %v6723_v15 = vpop.permute.xlu2 %2350  ;;  %v1970_v44 = vrot.slane %v1969_v18, 1  ;;  %s6984_s5 = sld [smem:[#allocation2 + $0xb8]] }
 0x445   : > { %s1046_s23 = smul.f32 0.0009765625, %s1045_s22  ;;  %v2711_v17 = vpop.permute.xlu0 %2710 }
 0x446   : > { %v1971_v22 = vadd.f32 %v1970_v44, %v1969_v18  ;;  %v2399_v18 = vstv %s4592_s17  ;;  %s4717_s17 = sld [smem:[#allocation2 + $0x30]] }
 0x447   : > { %s1047_s24 = sadd.f32 1e-05, %s1046_s23 }
 0x448   : > { %v2653_v33 = vpop.permute.xlu1 %2652 }
 0x449   : > { %v6734_v47 = vstv %s1047_s24  ;;  %v2657_v40 = vadd.f32 %v2653_v33, %v2643_v2 }
 0x44a   : > { %4846 = vrsqrt.f32 %v6734_v47  ;;  %vm1055_vm2 = vweird.f32 %v6734_v47 }
 0x44b   : > { %v2663_v20 = vadd.f32 %v2661_v6, %v2657_v40 }
 0x44c   : > { %v2673_v13 = vpop.permute.xlu2 %2672 }
 0x44d   : > { %v2677_v53 = vadd.f32 %v2673_v13, %v2663_v20  ;;  %v2337_v20 = vadd.f32 %v6712_v26, %v2323_v57  ;;  %v1937_v13 = vrot.slane %v1936_v5, 1  ;;  %v2359_v26 = vstv %s6757_s29  ;;  %s4683_s29 = sld [smem:[#allocation2 + $0x3c]] }
 0x44e   : > { %v2361_v57 = vmul.f32 %v6243_v48, %v2359_v26 }
 0x44f   : > { %v2683_v31 = vadd.f32 %v2681_v55, %v2677_v53  ;;  %v2336_v55 = vadd.f32 %v6679_v56, %v2322_v38  ;;  %v7940_v53 = vld [vmem:[#allocation24_spill] sm:$0xff]  ;;  %v2343_v12 = vadd.f32 %v2341_v59, %v2337_v20 }
 0x450   : > { %v4847_v2 = vpop.eup %4846  ;;  %v2671_v6 = vpop.permute.xlu1 %2670  ;;  %v2340_v24 = vmul.f32 %v7940_v53, %v2339_v7 }
 0x451   : > { %v1050_v21 = vmul.f32 %v4847_v2, %v6734_v47  ;;  %v2676_v60 = vadd.f32 %v2671_v6, %v2662_v30  ;;  %v6755_v33 = vadd.f32 %v2693_v9, %v2683_v31  ;;  %v1990_v9 = vadd.f32 %v1989_v16, %v1988_v23  ;;  %v2413_v53 = vpop.permute.xlu0 %2412 }
 0x452   : > { %vm1056_vm1 = vweird.f32 %v4847_v2  ;;  %v2342_v56 = vadd.f32 %v2340_v24, %v2336_v55  ;;  %v1938_v23 = vadd.f32 %v1937_v13, %v1936_v5  ;;  %v2360_v16 = vmul.f32 %v6229_v29, %v2359_v26  ;;  %v240_v26 = vld [vmem:[%s7831_s2 + $0x8] sm:$0xff] }
 0x453   : > { %v1051_v61 = vmul.f32 %v4847_v2, %v1050_v21  ;;  %v2682_v40 = vadd.f32 %v2680_v32, %v2676_v60  ;;  %vm1057_vm3 = vmor %vm1055_vm2, %vm1056_vm1  ;;  %v1991_v32 = vrot.slane %v1990_v9, 1  ;;  %v2357_v60 = vadd.f32 %v6704_v54, %v2343_v12  ;;  %1122 = vmatpush.msra.mxu3 %v240_v26 }
 0x454   : > { %v2691_v0 = vpop.permute.xlu2 %2690  ;;  %v2356_v38 = vadd.f32 %v6723_v15, %v2342_v56  ;;  %v2701_v15 = vmul.f32 %v6271_v35, %v2699_v50  ;;  %v2400_v55 = vmul.f32 %v6349_v25, %v2399_v18  ;;  %v2739_v24 = vstv %s6778_s21  ;;  %s6944_s21 = sld [smem:[#allocation2 + $0x78]] }
 0x455   : > { %v1052_v10 = vmul.f32 0.5, %v1051_v61  ;;  %v2696_v51 = vadd.f32 %v2691_v0, %v2682_v40  ;;  %v1992_v47 = vadd.f32 %v1991_v32, %v1990_v9  ;;  %v2363_v61 = vadd.f32 %v2361_v57, %v2357_v60 }
 0x456   : > { %v2362_v5 = vadd.f32 %v2360_v16, %v2356_v38  ;;  %v2379_v40 = vstv %s4590_s7  ;;  %v2719_v0 = vstv %s4624_s9  ;;  %v2703_v45 = vadd.f32 %v2701_v15, %v6755_v33  ;;  %s4715_s7 = sld [smem:[#allocation2 + $0x38]] }
 0x457   : > { %v2702_v42 = vadd.f32 %v2700_v52, %v2696_v51  ;;  %v1053_v37 = vsub.f32 1.5, %v1052_v10  ;;  %v2381_v54 = vmul.f32 %v6287_v27, %v2379_v40  ;;  %v2380_v48 = vmul.f32 %v6527_v1, %v2379_v40  ;;  %s4687_s9 = sld [smem:[#allocation2 + $0x7c]] }
 0x458   : > { %v2373_v3 = vpop.permute.xlu1 %2372  ;;  %v2376_v29 = vadd.f32 %v6718_v49, %v2362_v5  ;;  %v2721_v27 = vmul.f32 %v6308_v46, %v2719_v0  ;;  %v2401_v49 = vmul.f32 %v6271_v35, %v2399_v18  ;;  %v2720_v1 = vmul.f32 %v6384_v39, %v2719_v0 }
 0x459   : > { %v2716_v30 = vadd.f32 %v2711_v17, %v2702_v42  ;;  %v1054_v31 = vmul.f32 %v4847_v2, %v1053_v37  ;;  %v2377_v52 = vadd.f32 %v2373_v3, %v2363_v61  ;;  %v2419_v33 = vstv %s6776_s20  ;;  %s4689_s20 = sld [smem:[#allocation2 + $0x74]] }
 0x45a   : > { %v2382_v50 = vadd.f32 %v2380_v48, %v2376_v29  ;;  %v2740_v35 = vmul.f32 %v6314_v43, %v2739_v24  ;;  %v2421_v14 = vmul.f32 %v6370_v8, %v2419_v33  ;;  %v2420_v12 = vmul.f32 %v6300_v11, %v2419_v33  ;;  %v2431_v11 = vpop.permute.xlu0 %2430  ;;  %v7943_v48 = vld [vmem:[#allocation12_spill] sm:$0xff] }
 0x45b   : > { %v1058_v6 = vsel %vm1057_vm3, %v4847_v2, %v1054_v31  ;;  %v2383_v62 = vadd.f32 %v2381_v54, %v2377_v52  ;;  %v2722_v37 = vadd.f32 %v2720_v1, %v2716_v30  ;;  %v239_v30 = vld [vmem:[%s7831_s2] sm:$0xff] }
 0x45c   : > { %4770 = vpush %v1058_v6  ;;  %v2393_v21 = vpop.permute.xlu2 %2392  ;;  %v2439_v6 = vstv %s4596_s10  ;;  %1123 = vmatpush.msra.mxu3 %v239_v30  ;;  %s4691_s10 = sld [smem:[#allocation2 + $0xbc]] }
 0x45d   : > { %4772 = vpush %v1938_v23  ;;  %v2397_v10 = vadd.f32 %v2393_v21, %v2383_v62  ;;  %v2440_v16 = vmul.f32 %v6314_v43, %v2439_v6  ;;  %v7942_v43 = vld [vmem:[#allocation11_spill] sm:$0xff] }
 0x45e   : > { %4774 = vpush %v1958_v34  ;;  %v2441_v34 = vmul.f32 %v6402_v41, %v2439_v6  ;;  %1192 = vmatpush.msrb.mxu3 %v240_v26 }
 0x45f   : > { %4776 = vpush %v1971_v22  ;;  %v2403_v46 = vadd.f32 %v2401_v49, %v2397_v10 }
 0x460   : > { %4778 = vpush %v1992_v47  ;;  %v2391_v2 = vpop.permute.xlu1 %2390  ;;  %1193 = vmatpush.msrb.mxu3 %v239_v30 }
 0x461   : > { %v2396_v51 = vadd.f32 %v2391_v2, %v2382_v50  ;;  %v2417_v44 = vadd.f32 %v2413_v53, %v2403_v46 }
 0x463   : > { %v2402_v42 = vadd.f32 %v2400_v55, %v2396_v51  ;;  %v2423_v23 = vadd.f32 %v2421_v14, %v2417_v44  ;;  %v7950_v55 = vld [vmem:[#allocation13_spill] sm:$0xff]  ;;  %v2759_v44 = vstv %s4628_s25  ;;  %s7088_s25 = sld [smem:[#allocation2 + $0xf0]] }
 0x464   : > { %v2411_v7 = vpop.permute.xlu2 %2410 }
 0x465   : > { %v2416_v25 = vadd.f32 %v2411_v7, %v2402_v42  ;;  %v7953_v42 = vld [vmem:[#allocation14_spill] sm:$0xff] }
 0x467   : > { %v2422_v8 = vadd.f32 %v2420_v12, %v2416_v25  ;;  %v2760_v12 = vmul.f32 %v6429_v63, %v2759_v44 }
 0x468   : > { %v2713_v59 = vpop.permute.xlu1 %2712 }
 0x469   : > { %v2717_v20 = vadd.f32 %v2713_v59, %v2703_v45  ;;  %v2436_v60 = vadd.f32 %v2431_v11, %v2422_v8  ;;  %v7944_v45 = vld [vmem:[#allocation15_spill] sm:$0xff]  ;;  %v7946_v59 = vld [vmem:[#allocation16_spill] sm:$0xff] }
 0x46b   : > { %v2723_v17 = vadd.f32 %v2721_v27, %v2717_v20  ;;  %v2442_v2 = vadd.f32 %v2440_v16, %v2436_v60  ;;  %v7948_v20 = vld [vmem:[#allocation9_spill] sm:$0xff] }
 0x46c   : > { %v2733_v13 = vpop.permute.xlu2 %2732 }
 0x46d   : > { %v6785_v9 = vadd.f32 %v2733_v13, %v2723_v17  ;;  %v7951_v13 = vld [vmem:[#allocation10_spill] sm:$0xff] }
 0x470   : > { %v2731_v3 = vpop.permute.xlu1 %2730 }
 0x471   : > { %v2736_v39 = vadd.f32 %v2731_v3, %v2722_v37  ;;  %v2753_v3 = vpop.permute.xlu0 %2752 }
 0x473   : > { %v2742_v31 = vadd.f32 %v2740_v35, %v2736_v39  ;;  %v2741_v39 = vmul.f32 %v6402_v41, %v2739_v24 }
 0x474   : > { %v2751_v32 = vpop.permute.xlu2 %2750 }
 0x475   : > { %v6797_v56 = vadd.f32 %v2751_v32, %v2742_v31  ;;  %v2743_v14 = vadd.f32 %v2741_v39, %v6785_v9 }
 0x477   : > { %v2757_v25 = vadd.f32 %v2753_v3, %v2743_v14 }
 0x478   : > { %v2433_v22 = vpop.permute.xlu1 %2432 }
 0x479   : > { %v2437_v21 = vadd.f32 %v2433_v22, %v2423_v23  ;;  %v2771_v31 = vpop.permute.xlu0 %2770 }
 0x47b   : > { %v2443_v38 = vadd.f32 %v2441_v34, %v2437_v21 }
 0x47c   : > { %v2453_v57 = vpop.permute.xlu2 %2452 }
 0x47d   : > { %v6804_v47 = vadd.f32 %v2453_v57, %v2443_v38  ;;  %v3495_v57 = vstv %s6875_s26  ;;  %s7090_s26 = sld [smem:[#allocation2 + $0x3a]] }
 0x47f   : > { %v2939_v40 = vsel %vm893_vm0, %v6804_v47, 0.0 }
 0x480   : > { %v2451_v5 = vpop.permute.xlu1 %2450 }
 0x481   : > { %v6806_v61 = vadd.f32 %v2451_v5, %v2442_v2  ;;  %v3475_v2 = vstv %s4683_s29  ;;  %v6879_v5 = vld [vmem:[%s5015_s27 + $0x1] sm:$0xff]  ;;  %s4701_s29 = sld [smem:[#allocation2 + $0x31]] }
 0x483   : > { %v2938_v52 = vsel %vm893_vm0, %v6806_v61, 0.0 }
 0x484   : > { %v2940_v54 = vadd.f32 %v2939_v40, %v2938_v52  ;;  %v2953_v11 = vpop.permute.xlu2 %2952  ;;  %v3496_v40 = vmul.f32 %v6879_v5, %v3495_v57  ;;  %v6883_v52 = vld [vmem:[%s5015_s27 + $0x8] sm:$0xff] }
 0x486   : > { %2941 = vadd.xlane.f32.xlu0 %v2940_v54  ;;  %v3477_v54 = vmul.f32 %v6883_v52, %v3475_v2 }
 0x488   : > { %v2773_v32 = vpop.permute.xlu1 %2772 }
 0x48d   : > { %s4771_s8 = spop %4770 }
 0x48e   : > { %v6812_v15 = vstv %s4771_s8  ;;  %s4773_s12 = spop %4772  ;;  %s6988_s8 = sld [smem:[#allocation2 + $0x36]] }
 0x48f   : > { %7941 = vst [vmem:[#allocation26_spill] sm:$0xff] %v6812_v15  ;;  %s4775_s13 = spop %4774  ;;  %v1061_v7 = vmul.f32 %v6812_v15, %v7942_v43  ;;  %v1062_v0 = vmul.f32 %v6812_v15, %v7943_v48  ;;  %v1131_v17 = vmul.f32 %v6812_v15, %v7950_v55  ;;  %v1132_v37 = vmul.f32 %v6812_v15, %v7953_v42  ;;  %v6889_v43 = vld [vmem:[%s5015_s27] sm:$0xff] }
 0x490   : > { %s1960_s14 = sadd.f32 %s4775_s13, %s4773_s12  ;;  %s4777_s18 = spop %4776 }
 0x491   : > { %v1063_v29 = vmax.f32 %v1061_v7, 0.0  ;;  %s4779_s22 = spop %4778  ;;  %v1064_v18 = vmax.f32 %v1062_v0, 0.0  ;;  %v1133_v33 = vmax.f32 %v1131_v17, 0.0  ;;  %v1134_v35 = vmax.f32 %v1132_v37, 0.0  ;;  %v2989_v21 = vpop.permute.xlu2 %2988  ;;  %v7955_v0 = vld [vmem:[#allocation20_spill] sm:$0xff]  ;;  %s7005_s12 = sld [smem:[#allocation2 + $0xfc]] }
 0x492   : > { %s1973_s19 = sadd.f32 %s4777_s18, %s1960_s14  ;;  %v2993_v38 = vsel %vm893_vm0, %v2989_v21, 0.0  ;;  %v3476_v7 = vmul.f32 %v6889_v43, %v3475_v2 }
 0x493   : > { %4484 = vmatmul.msk.f32.vlgmr.msra.gmra.mxu3 %vm893_vm0, %v1063_v29  ;;  %v7954_v29 = vld [vmem:[#allocation19_spill] sm:$0xff]  ;;  %s7017_s13 = sld [smem:[#allocation2 + $0xb0]] }
 0x494   : > { %s1994_s23 = sadd.f32 %s4779_s22, %s1973_s19  ;;  %2156 = vmatpush.msra.mxu3 %v240_v26 }
 0x495   : > { %s4697_s14 = sld [smem:[#allocation2 + $0xf4]] }
 0x496   : > { %s1995_s24 = smul.f32 0.0009765625, %s1994_s23  ;;  %2157 = vmatpush.msra.mxu3 %v239_v30  ;;  %s7064_s18 = sld [smem:[#allocation2 + $0xf8]] }
 0x497   : > { %s4667_s19 = sld [smem:[#allocation2 + $0x3d]] }
 0x498   : > { %v6819_v62 = vstv %s1995_s24  ;;  %s7074_s22 = sld [smem:[#allocation2 + $0x39]] }
 0x499   : > { %v6823_v27 = vsub.f32 %v7944_v45, %v6819_v62  ;;  %v6827_v50 = vsub.f32 %v7946_v59, %v6819_v62  ;;  %v6831_v49 = vsub.f32 %v7948_v20, %v6819_v62  ;;  %v6847_v53 = vsub.f32 %v7951_v13, %v6819_v62  ;;  %v7956_v45 = vld [vmem:[#allocation18_spill] sm:$0xff]  ;;  %v7957_v20 = vld [vmem:[#allocation17_spill] sm:$0xff]  ;;  %s7078_s23 = sld [smem:[#allocation2 + $0x7e]] }
 0x49a   : > { %v6895_v48 = vsub.f32 %v7954_v29, %v6819_v62  ;;  %v6903_v59 = vsub.f32 %v7956_v45, %v6819_v62  ;;  %v6964_v29 = vld [vmem:[%s5015_s27 + $0x19] sm:$0xff]  ;;  %v3555_v45 = vstv %s4691_s10  ;;  %s4669_s24 = sld [smem:[#allocation2 + $0x35]] }
 0x49b   : > { %7945 = vst [vmem:[#allocation25_spill] sm:$0xff] %v6823_v27  ;;  %4485 = vmatmul.msk.f32.gmra.mxu3 %vm893_vm0, %v1064_v18  ;;  %v2020_v1 = vmul.f32 %v6823_v27, %v6823_v27  ;;  %v2057_v10 = vmul.f32 %v6827_v50, %v6827_v50  ;;  %v2019_v51 = vmul.f32 %v6831_v49, %v6831_v49  ;;  %s7131_s10 = sld [smem:[#allocation2 + $0xbe]] }
 0x49c   : > { %7947 = vst [vmem:[#allocation27_spill] sm:$0xff] %v6827_v50  ;;  %v2058_v46 = vmul.f32 %v6847_v53, %v6847_v53  ;;  %v6899_v18 = vsub.f32 %v7955_v0, %v6819_v62  ;;  %v2005_v55 = vmul.f32 %v6903_v59, %v6903_v59 }
 0x49d   : > { %7949 = vst [vmem:[#allocation28_spill] sm:$0xff] %v6831_v49  ;;  %2025 = vrot.lane.b32.xlu1 %v2020_v1, %s4972_s28  ;;  %2061 = vrot.lane.b32.xlu2 %v2057_v10, %s4972_s28  ;;  %v6907_v1 = vsub.f32 %v7957_v20, %v6819_v62  ;;  %v2042_v10 = vmul.f32 %v6895_v48, %v6895_v48  ;;  %v6972_v20 = vld [vmem:[%s5015_s27 + $0x30] sm:$0xff] }
 0x49e   : > { %2023 = vrot.lane.b32.xlu0 %v2019_v51, %s4972_s28  ;;  %7952 = vst [vmem:[#allocation23_spill] sm:$0xff] %v6847_v53  ;;  %v2043_v51 = vmul.f32 %v6899_v18, %v6899_v18  ;;  %v2007_v62 = vsel %vm893_vm0, %v2005_v55, 0.0  ;;  %v6980_v55 = vld [vmem:[%s5015_s27 + $0x38] sm:$0xff] }
 0x49f   : > { %v2006_v17 = vmul.f32 %v6907_v1, %v6907_v1  ;;  %v2044_v13 = vsel %vm893_vm0, %v2042_v10, 0.0  ;;  %v3556_v10 = vmul.f32 %v6972_v20, %v3555_v45 }
 0x4a1   : > { %v2008_v42 = vsel %vm893_vm0, %v2006_v17, 0.0  ;;  %v3557_v17 = vmul.f32 %v6980_v55, %v3555_v45 }
 0x4a3   : > { %4488 = vmatmul.msk.f32.vlgmr.msrb.gmra.mxu3 %vm893_vm0, %v1133_v33  ;;  %v2045_v33 = vsel %vm893_vm0, %v2043_v51, 0.0 }
 0x4a4   : > { %2226 = vmatpush.msrb.mxu3 %v240_v26  ;;  %v2761_v26 = vmul.f32 %v6451_v4, %v2759_v44  ;;  %v2958_v4 = vsel %vm893_vm0, %v2953_v11, 0.0  ;;  %v3795_v11 = vstv %s4715_s7  ;;  %s4716_s7 = sld [smem:[#allocation2 + $0x32]] }
 0x4a5   : > { %v2955_v34 = vpop.permute.xlu0 %2954  ;;  %v2987_v22 = vpop.permute.xlu1 %2986  ;;  %v3796_v21 = vmul.f32 %v6879_v5, %v3795_v11 }
 0x4a6   : > { %2063 = vrot.lane.b32.xlu0 %v2058_v46, %s4972_s28  ;;  %2227 = vmatpush.msrb.mxu3 %v239_v30  ;;  %v2762_v30 = vadd.f32 %v2760_v12, %v6797_v56  ;;  %v2763_v6 = vadd.f32 %v2761_v26, %v2757_v25  ;;  %v2959_v9 = vsel %vm893_vm0, %v2955_v34, 0.0  ;;  %v2992_v60 = vsel %vm893_vm0, %v2987_v22, 0.0 }
 0x4a7   : > { %v2960_v56 = vadd.f32 %v2959_v9, %v2958_v4  ;;  %v2994_v16 = vadd.f32 %v2993_v38, %v2992_v60  ;;  %v2046_v46 = vadd.f32 %v2045_v33, %v2044_v13  ;;  %v3515_v9 = vstv %s4687_s9  ;;  %v6948_v60 = vld [vmem:[%s5015_s27 + $0xa] sm:$0xff]  ;;  %v6991_v33 = vld [vmem:[%s5015_s27 + $0x22] sm:$0xff]  ;;  %s7109_s9 = sld [smem:[#allocation2 + $0x7a]] }
 0x4a8   : > { %v6863_v8 = vadd.f32 %v2773_v32, %v2763_v6  ;;  %v6865_v23 = vadd.f32 %v2771_v31, %v2762_v30  ;;  %v6928_v6 = vld [vmem:[%s5015_s27 + $0x9] sm:$0xff]  ;;  %v3855_v13 = vstv %s6968_s30  ;;  %s7138_s30 = sld [smem:[#allocation2 + $0x75]] }
 0x4a9   : > { %v3497_v34 = vmul.f32 %v6928_v6, %v3495_v57  ;;  %v6954_v57 = vld [vmem:[%s5015_s27 + $0x21] sm:$0xff] }
 0x4aa   : > { %v2972_v41 = vsel %vm893_vm0, %v6863_v8, 0.0  ;;  %v2971_v63 = vsel %vm893_vm0, %v6865_v23, 0.0 }
 0x4ab   : > { %4489 = vmatmul.msk.f32.gmra.mxu3 %vm893_vm0, %v1134_v35  ;;  %v2973_v24 = vadd.f32 %v2972_v41, %v2971_v63  ;;  %v2009_v35 = vadd.f32 %v2008_v42, %v2007_v62  ;;  %v3797_v41 = vmul.f32 %v6928_v6, %v3795_v11  ;;  %v6935_v63 = vld [vmem:[%s5015_s27 + $0x18] sm:$0xff]  ;;  %v3575_v42 = vstv %s6976_s11  ;;  %s7148_s11 = sld [smem:[#allocation2 + $0xb6]] }
 0x4ac   : > { %v3516_v4 = vmul.f32 %v6935_v63, %v3515_v9 }
 0x4c6   : > { %2974 = vadd.xlane.f32.xlu2 %v2973_v24  ;;  %v3815_v24 = vstv %s4717_s17  ;;  %s7112_s17 = sld [smem:[#allocation2 + $0x7d]] }
 0x4c7   : > { %2961 = vadd.xlane.f32.xlu1 %v2960_v56  ;;  %v6940_v56 = vld [vmem:[%s5015_s27 + $0x2] sm:$0xff]  ;;  %v3817_v38 = vmul.f32 %v6948_v60, %v3815_v24 }
 0x4c8   : > { %v3816_v22 = vmul.f32 %v6940_v56, %v3815_v24  ;;  %v7025_v24 = vld [vmem:[%s5015_s27 + $0x39] sm:$0xff] }
 0x4d0   : > { %2995 = vadd.xlane.f32.xlu0 %v2994_v16  ;;  %v3535_v16 = vstv %s4689_s20  ;;  %s7115_s20 = sld [smem:[#allocation2 + $0x79]] }
 0x4d1   : > { %v3537_v2 = vmul.f32 %v6954_v57, %v3535_v16  ;;  %v3536_v51 = vmul.f32 %v6964_v29, %v3535_v16 }
 0x4de   : > { %3500 = vrot.lane.b32.xlu2 %v3496_v40, %s4972_s28  ;;  %v6958_v40 = vld [vmem:[%s5015_s27 + $0x20] sm:$0xff] }
 0x4e0   : > { %3482 = vrot.lane.b32.xlu1 %v3477_v54, %s4972_s28  ;;  %v3517_v54 = vmul.f32 %v6958_v40, %v3515_v9 }
 0x4e4   : > { %3480 = vrot.lane.b32.xlu0 %v3476_v7, %s4972_s28  ;;  %v3835_v7 = vstv %s6944_s21  ;;  %s7124_s21 = sld [smem:[#allocation2 + $0x76]] }
 0x4e5   : > { %v3836_v0 = vmul.f32 %v6964_v29, %v3835_v7  ;;  %v3837_v62 = vmul.f32 %v6954_v57, %v3835_v7 }
 0x4f7   : > { %v2062_v12 = vpop.permute.xlu2 %2061 }
 0x4f8   : > { %v2067_v26 = vsel %vm893_vm0, %v2062_v12, 0.0 }
 0x4f9   : > { %v6921_v37 = vpop.xlane.xlu0 %2941 }
 0x507   : > { %2047 = vadd.xlane.f32.xlu2 %v2046_v46  ;;  %v3857_v46 = vmul.f32 %v6991_v33, %v3855_v13 }
 0x50a   : > { %2010 = vadd.xlane.f32.xlu1 %v2009_v35 }
 0x50f   : > { %v2026_v3 = vpop.permute.xlu1 %2025 }
 0x510   : > { %v2030_v39 = vsel %vm893_vm0, %v2026_v3, 0.0  ;;  %v2024_v14 = vpop.permute.xlu0 %2023  ;;  %v7000_v3 = vld [vmem:[%s5015_s27 + $0x31] sm:$0xff] }
 0x511   : > { %v2029_v44 = vsel %vm893_vm0, %v2024_v14, 0.0  ;;  %v3875_v14 = vstv %s6984_s5  ;;  %s7151_s5 = sld [smem:[#allocation2 + $0x71]] }
 0x512   : > { %v2031_v25 = vadd.f32 %v2030_v39, %v2029_v44  ;;  %v3576_v39 = vmul.f32 %v7000_v3, %v3575_v42  ;;  %v3876_v12 = vmul.f32 %v7000_v3, %v3875_v14 }
 0x514   : > { %2032 = vadd.xlane.f32.xlu0 %v2031_v25  ;;  %v3469_v25 = vstv %s4682_s6  ;;  %s7155_s6 = sld [smem:[#allocation2 + $0xbd]] }
 0x515   : > { %v3470_v9 = vmul.f32 %v6889_v43, %v3469_v25 }
 0x518   : > { %v2064_v31 = vpop.permute.xlu0 %2063 }
 0x519   : > { %v2068_v32 = vsel %vm893_vm0, %v2064_v31, 0.0  ;;  %v3471_v31 = vmul.f32 %v6883_v52, %v3469_v25  ;;  %v7054_v25 = vld [vmem:[%s5015_s27 + $0x48] sm:$0xff] }
 0x51a   : > { %v2069_v30 = vadd.f32 %v2068_v32, %v2067_v26  ;;  %v3489_v26 = vstv %s6988_s8  ;;  %v7014_v32 = vld [vmem:[%s5015_s27 + $0x1a] sm:$0xff]  ;;  %s4720_s8 = sld [smem:[#allocation2 + $0x72]] }
 0x51c   : > { %2070 = vadd.xlane.f32.xlu1 %v2069_v30  ;;  %v3856_v30 = vmul.f32 %v7014_v32, %v3855_v13 }
 0x51f   : > { %3802 = vrot.lane.b32.xlu2 %v3797_v41, %s4972_s28 }
 0x527   : > { %3820 = vrot.lane.b32.xlu2 %v3816_v22, %s4972_s28  ;;  %v3877_v22 = vmul.f32 %v7025_v24, %v3875_v14  ;;  %v7050_v14 = vld [vmem:[%s5015_s27 + $0x49] sm:$0xff] }
 0x528   : > { %3502 = vrot.lane.b32.xlu0 %v3497_v34, %s4972_s28  ;;  %v3491_v34 = vmul.f32 %v6928_v6, %v3489_v26 }
 0x52f   : > { %3542 = vrot.lane.b32.xlu2 %v3537_v2, %s4972_s28 }
 0x530   : > { %3520 = vrot.lane.b32.xlu0 %v3516_v4, %s4972_s28 }
 0x535   : > { %3800 = vrot.lane.b32.xlu1 %v3796_v21, %s4972_s28  ;;  %v3490_v21 = vmul.f32 %v6879_v5, %v3489_v26 }
 0x537   : > { %3560 = vrot.lane.b32.xlu2 %v3556_v10, %s4972_s28  ;;  %v3577_v10 = vmul.f32 %v7025_v24, %v3575_v42 }
 0x538   : > { %3822 = vrot.lane.b32.xlu0 %v3817_v38, %s4972_s28  ;;  %v3595_v38 = vstv %s7005_s12  ;;  %s7174_s12 = sld [smem:[#allocation2 + $0xb9]] }
 0x539   : > { %v7020_v11 = vpop.xlane.xlu2 %2974 }
 0x53a   : > { %v6996_v35 = vpop.xlane.xlu1 %2961 }
 0x53d   : > { %3522 = vrot.lane.b32.xlu1 %v3517_v54, %s4972_s28  ;;  %v7034_v54 = vld [vmem:[%s5015_s27 + $0x50] sm:$0xff] }
 0x53e   : > { %v3597_v7 = vmul.f32 %v7034_v54, %v3595_v38 }
 0x53f   : > { %3862 = vrot.lane.b32.xlu2 %v3857_v46, %s4972_s28  ;;  %v7044_v46 = vld [vmem:[%s5015_s27 + $0x32] sm:$0xff] }
 0x540   : > { %3840 = vrot.lane.b32.xlu0 %v3836_v0, %s4972_s28 }
 0x543   : > { %v7007_v44 = vpop.xlane.xlu0 %2995 }
 0x545   : > { %3540 = vrot.lane.b32.xlu1 %v3536_v51, %s4972_s28  ;;  %v3895_v51 = vstv %s7017_s13  ;;  %s7181_s13 = sld [smem:[#allocation2 + $0xba]] }
 0x547   : > { %3880 = vrot.lane.b32.xlu2 %v3876_v12, %s4972_s28  ;;  %v3596_v12 = vmul.f32 %v7054_v25, %v3595_v38  ;;  %v3915_v38 = vstv %s7064_s18  ;;  %s7198_s18 = sld [smem:[#allocation2 + $0xb5]] }
 0x548   : > { %3562 = vrot.lane.b32.xlu0 %v3557_v17, %s4972_s28  ;;  %v3501_v17 = vpop.permute.xlu2 %3500 }
 0x54d   : > { %3842 = vrot.lane.b32.xlu1 %v3837_v62, %s4972_s28  ;;  %v3896_v62 = vmul.f32 %v7044_v46, %v3895_v51 }
 0x54f   : > { %3602 = vrot.lane.b32.xlu2 %v3597_v7, %s4972_s28  ;;  %v3916_v7 = vmul.f32 %v7050_v14, %v3915_v38 }
 0x550   : > { %3580 = vrot.lane.b32.xlu0 %v3576_v39, %s4972_s28  ;;  %v3615_v39 = vstv %s4697_s14  ;;  %s7188_s14 = sld [smem:[#allocation2 + $0xb2]] }
 0x551   : > { %v3616_v42 = vmul.f32 %v7050_v14, %v3615_v39 }
 0x552   : > { %v3483_v41 = vpop.permute.xlu1 %3482 }
 0x553   : > { %v3487_v4 = vadd.f32 %v3483_v41, %v3471_v31  ;;  %v7059_v31 = vld [vmem:[%s5015_s27 + $0x51] sm:$0xff] }
 0x554   : > { %v3617_v26 = vmul.f32 %v7059_v31, %v3615_v39 }
 0x555   : > { %3860 = vrot.lane.b32.xlu1 %v3856_v30, %s4972_s28  ;;  %v7031_v16 = vadd.f32 %v3491_v34, %v3487_v4  ;;  %v7067_v30 = vld [vmem:[%s5015_s27 + $0x3a] sm:$0xff] }
 0x556   : > { %v3481_v2 = vpop.permute.xlu0 %3480  ;;  %v3897_v34 = vmul.f32 %v7067_v30, %v3895_v51 }
 0x557   : > { %v3486_v0 = vadd.f32 %v3481_v2, %v3470_v9  ;;  %3620 = vrot.lane.b32.xlu2 %v3616_v42, %s4972_s28  ;;  %v3315_v42 = vstv %s4667_s19  ;;  %s7203_s19 = sld [smem:[#allocation2 + $0xb1]] }
 0x558   : > { %3882 = vrot.lane.b32.xlu0 %v3877_v22, %s4972_s28 }
 0x559   : > { %v3492_v45 = vadd.f32 %v3490_v21, %v3486_v0 }
 0x55b   : > { %v7041_v13 = vadd.f32 %v3501_v17, %v3492_v45 }
 0x55d   : > { %3582 = vrot.lane.b32.xlu1 %v3577_v10, %s4972_s28 }
 0x560   : > { %3900 = vrot.lane.b32.xlu0 %v3896_v62, %s4972_s28 }
 0x565   : > { %3600 = vrot.lane.b32.xlu1 %v3596_v12, %s4972_s28 }
 0x568   : > { %3622 = vrot.lane.b32.xlu0 %v3617_v26, %s4972_s28  ;;  %v3316_v26 = vmul.f32 %v6889_v43, %v3315_v42 }
 0x56d   : > { %3902 = vrot.lane.b32.xlu1 %v3897_v34, %s4972_s28 }
 0x575   : > { %3920 = vrot.lane.b32.xlu1 %v3916_v7, %s4972_s28  ;;  %v3317_v7 = vmul.f32 %v6883_v52, %v3315_v42 }
 0x577   : > { %3322 = vrot.lane.b32.xlu0 %v3317_v7, %s4972_s28  ;;  %v7104_v7 = vld [vmem:[%s5015_s27 + $0x4a] sm:$0xff] }
 0x57a   : > { %v2048_v41 = vpop.xlane.xlu2 %2047 }
 0x57b   : > { %v2049_v22 = vrot.slane %v2048_v41, 4 }
 0x57d   : > { %v2011_v9 = vpop.xlane.xlu1 %2010  ;;  %v2050_v0 = vadd.f32 %v2049_v22, %v2048_v41  ;;  %3320 = vrot.lane.b32.xlu1 %v3316_v26, %s4972_s28  ;;  %v3335_v26 = vstv %s4669_s24 }
 0x57e   : > { %v2012_v4 = vrot.slane %v2011_v9, 4 }
 0x57f   : > { %v2051_v17 = vrot.slane %v2050_v0, 2 }
 0x580   : > { %v2013_v21 = vadd.f32 %v2012_v4, %v2011_v9 }
 0x581   : > { %v2052_v34 = vadd.f32 %v2051_v17, %v2050_v0 }
 0x582   : > { %v2014_v2 = vrot.slane %v2013_v21, 2  ;;  %v3803_v52 = vpop.permute.xlu2 %3802 }
 0x583   : > { %v2053_v22 = vrot.slane %v2052_v34, 1 }
 0x584   : > { %v2015_v45 = vadd.f32 %v2014_v2, %v2013_v21 }
 0x585   : > { %v2054_v0 = vadd.f32 %v2053_v22, %v2052_v34 }
 0x586   : > { %v2016_v10 = vrot.slane %v2015_v45, 1 }
 0x587   : > { %v2033_v62 = vpop.xlane.xlu0 %2032 }
 0x588   : > { %v2034_v51 = vrot.slane %v2033_v62, 4  ;;  %v2017_v39 = vadd.f32 %v2016_v10, %v2015_v45  ;;  %v7877_v45 = vstv %s7074_s22 }
 0x589   : > { %v3637_v43 = vmul.f32 %v6928_v6, %v7877_v45 }
 0x58a   : > { %v2035_v12 = vadd.f32 %v2034_v51, %v2033_v62  ;;  %4780 = vpush %v2017_v39  ;;  %v3917_v51 = vmul.f32 %v7059_v31, %v3915_v38  ;;  %v3336_v38 = vmul.f32 %v6879_v5, %v3335_v26 }
 0x58b   : > { %3642 = vrot.lane.b32.xlu1 %v3637_v43, %s4972_s28 }
 0x58c   : > { %v2036_v9 = vrot.slane %v2035_v12, 2  ;;  %3922 = vrot.lane.b32.xlu2 %v3917_v51, %s4972_s28  ;;  %3340 = vrot.lane.b32.xlu0 %v3336_v38, %s4972_s28 }
 0x58e   : > { %v2037_v41 = vadd.f32 %v2036_v9, %v2035_v12  ;;  %v7876_v12 = vstv %s7078_s23 }
 0x58f   : > { %v2071_v4 = vpop.xlane.xlu1 %2070  ;;  %v3511_v34 = vmul.f32 %v6958_v40, %v7876_v12 }
 0x590   : > { %v2072_v21 = vrot.slane %v2071_v4, 4  ;;  %v2038_v2 = vrot.slane %v2037_v41, 1 }
 0x592   : > { %v2073_v10 = vadd.f32 %v2072_v21, %v2071_v4  ;;  %v2039_v62 = vadd.f32 %v2038_v2, %v2037_v41  ;;  %v3337_v4 = vmul.f32 %v6928_v6, %v3335_v26  ;;  %v3935_v21 = vstv %s7088_s25  ;;  %s7206_s25 = sld [smem:[#allocation2 + $0xfe]] }
 0x594   : > { %v2074_v17 = vrot.slane %v2073_v10, 2  ;;  %4782 = vpush %v2039_v62  ;;  %3342 = vrot.lane.b32.xlu1 %v3337_v4, %s4972_s28  ;;  %v3789_v62 = vstv %s7090_s26  ;;  %s7209_s26 = sld [smem:[#allocation2 + $0xf6]] }
 0x595   : > { %4784 = vpush %v2054_v0  ;;  %v3791_v43 = vmul.f32 %v6928_v6, %v3789_v62  ;;  %v3821_v0 = vpop.permute.xlu2 %3820  ;;  %v3790_v38 = vmul.f32 %v6879_v5, %v3789_v62  ;;  %v3355_v62 = vstv %s7112_s17 }
 0x596   : > { %v2075_v39 = vadd.f32 %v2074_v17, %v2073_v10  ;;  %v3936_v10 = vmul.f32 %v7104_v7, %v3935_v21 }
 0x597   : > { %v3807_v26 = vadd.f32 %v3803_v52, %v3791_v43  ;;  %v3829_v43 = vstv %s7109_s9 }
 0x598   : > { %v2076_v42 = vrot.slane %v2075_v39, 1  ;;  %3940 = vrot.lane.b32.xlu2 %v3936_v10, %s4972_s28 }
 0x59a   : > { %v3503_v9 = vpop.permute.xlu0 %3502  ;;  %v2077_v41 = vadd.f32 %v2076_v42, %v2075_v39  ;;  %v3809_v39 = vstv %s4716_s7 }
 0x59b   : > { %v3507_v22 = vadd.f32 %v3503_v9, %v7031_v16  ;;  %v3655_v16 = vstv %s4701_s29  ;;  %v3810_v9 = vmul.f32 %v6940_v56, %v3809_v39  ;;  %s7213_s29 = sld [smem:[#allocation2 + $0xfd]] }
 0x59c   : > { %4786 = vpush %v2077_v41  ;;  %v3656_v17 = vmul.f32 %v6940_v56, %v3655_v16  ;;  %v3657_v42 = vmul.f32 %v6948_v60, %v3655_v16  ;;  %v7128_v41 = vld [vmem:[%s5015_s27 + $0x52] sm:$0xff] }
 0x59d   : > { %v3513_v2 = vadd.f32 %v3511_v34, %v3507_v22  ;;  %v3811_v34 = vmul.f32 %v6948_v60, %v3809_v39  ;;  %v3937_v4 = vmul.f32 %v7128_v41, %v3935_v21  ;;  %v3543_v16 = vpop.permute.xlu2 %3542  ;;  %v3675_v39 = vstv %s7115_s20 }
 0x59e   : > { %3660 = vrot.lane.b32.xlu0 %v3656_v17, %s4972_s28  ;;  %3662 = vrot.lane.b32.xlu1 %v3657_v42, %s4972_s28  ;;  %v3356_v17 = vmul.f32 %v6935_v63, %v3355_v62 }
 0x59f   : > { %v3813_v10 = vadd.f32 %v3811_v34, %v3807_v26  ;;  %v3676_v26 = vmul.f32 %v6964_v29, %v3675_v39 }
 0x5a0   : > { %3942 = vrot.lane.b32.xlu2 %v3937_v4, %s4972_s28 }
 0x5a2   : > { %v7117_v51 = vpop.permute.xlu0 %3520 }
 0x5a6   : > { %3360 = vrot.lane.b32.xlu0 %v3356_v17, %s4972_s28  ;;  %3680 = vrot.lane.b32.xlu1 %v3676_v26, %s4972_s28  ;;  %v3375_v17 = vstv %s7138_s30 }
 0x5a7   : > { %v3801_v22 = vpop.permute.xlu1 %3800  ;;  %v3377_v26 = vmul.f32 %v6954_v57, %v3375_v17 }
 0x5a8   : > { %v3806_v52 = vadd.f32 %v3801_v22, %v3790_v38  ;;  %v3830_v38 = vmul.f32 %v6964_v29, %v3829_v43  ;;  %v7879_v22 = vstv %s7124_s21 }
 0x5a9   : > { %v3531_v12 = vmul.f32 %v6954_v57, %v7879_v22 }
 0x5aa   : > { %v3823_v42 = vpop.permute.xlu0 %3822  ;;  %v3812_v21 = vadd.f32 %v3810_v9, %v3806_v52  ;;  %v7880_v52 = vstv %s7131_s10 }
 0x5ab   : > { %v3827_v34 = vadd.f32 %v3823_v42, %v3813_v10  ;;  %v3677_v10 = vmul.f32 %v6954_v57, %v3675_v39  ;;  %v7958_v39 = vstv %s7074_s22 }
 0x5ac   : > { %v3826_v4 = vadd.f32 %v3821_v0, %v3812_v21  ;;  %v3551_v21 = vmul.f32 %v6980_v55, %v7880_v52 }
 0x5ae   : > { %v3832_v9 = vadd.f32 %v3830_v38, %v3826_v4  ;;  %3682 = vrot.lane.b32.xlu0 %v3677_v10, %s4972_s28  ;;  %3382 = vrot.lane.b32.xlu1 %v3377_v26, %s4972_s28  ;;  %v3636_v4 = vmul.f32 %v6879_v5, %v7958_v39 }
 0x5af   : > { %v3523_v45 = vpop.permute.xlu1 %3522 }
 0x5b0   : > { %v3527_v50 = vadd.f32 %v3523_v45, %v3513_v2  ;;  %v7161_v45 = vpop.permute.xlu2 %3560  ;;  %3640 = vrot.lane.b32.xlu2 %v3636_v4, %s4972_s28 }
 0x5b2   : > { %v3841_v0 = vpop.permute.xlu0 %3840  ;;  %v3533_v42 = vadd.f32 %v3531_v12, %v3527_v50  ;;  %v7881_v12 = vstv %s7148_s11 }
 0x5b3   : > { %v3846_v38 = vadd.f32 %v3841_v0, %v3832_v9  ;;  %v3831_v9 = vmul.f32 %v6954_v57, %v3829_v43  ;;  %v3695_v0 = vstv %s7151_s5  ;;  %v3849_v43 = vstv %s4720_s8  ;;  %s7234_s5 = sld [smem:[#allocation2 + $0xf9]] }
 0x5b4   : > { %v3547_v2 = vadd.f32 %v3543_v16, %v3533_v42  ;;  %v3571_v16 = vmul.f32 %v7025_v24, %v7881_v12  ;;  %v3696_v10 = vmul.f32 %v7014_v32, %v3695_v0  ;;  %v3395_v42 = vstv %s7155_s6 }
 0x5b5   : > { %v3833_v39 = vadd.f32 %v3831_v9, %v3827_v34  ;;  %v3357_v12 = vmul.f32 %v6958_v40, %v3355_v62  ;;  %v3851_v53 = vmul.f32 %v6991_v33, %v3849_v43  ;;  %v3397_v34 = vmul.f32 %v6980_v55, %v3395_v42 }
 0x5b6   : > { %v3553_v50 = vadd.f32 %v3551_v21, %v3547_v2  ;;  %v3396_v21 = vmul.f32 %v6972_v20, %v3395_v42  ;;  %3700 = vrot.lane.b32.xlu0 %v3696_v10, %s4972_s28  ;;  %v3715_v9 = vstv %s7174_s12  ;;  %v7886_v42 = vstv %s7188_s14  ;;  %s4726_s12 = sld [smem:[#allocation2 + $0xfa]] }
 0x5b7   : > { %v7169_v22 = vpop.permute.xlu1 %3540  ;;  %v3717_v10 = vmul.f32 %v7025_v24, %v3715_v9 }
 0x5b8   : > { %3400 = vrot.lane.b32.xlu1 %v3396_v21, %s4972_s28  ;;  %v3863_v4 = vpop.permute.xlu2 %3862  ;;  %3362 = vrot.lane.b32.xlu2 %v3357_v12, %s4972_s28  ;;  %v3869_v21 = vstv %s7181_s13  ;;  %s4728_s13 = sld [smem:[#allocation2 + $0xf2]] }
 0x5b9   : > { %v3871_v40 = vmul.f32 %v7025_v24, %v3869_v21 }
 0x5ba   : > { %v3563_v26 = vpop.permute.xlu0 %3562 }
 0x5bb   : > { %v3567_v2 = vadd.f32 %v3563_v26, %v3553_v50  ;;  %v3850_v50 = vmul.f32 %v7014_v32, %v3849_v43  ;;  %s4781_s22 = spop %4780  ;;  %v3890_v43 = vmul.f32 %v7044_v46, %v7886_v42 }
 0x5bd   : > { %v3573_v52 = vadd.f32 %v3571_v16, %v3567_v2  ;;  %v3852_v62 = vadd.f32 %v3850_v50, %v3846_v38  ;;  %v3415_v50 = vstv %s7198_s18  ;;  %s4700_s18 = sld [smem:[#allocation2 + $0x33]] }
 0x5be   : > { %3402 = vrot.lane.b32.xlu0 %v3397_v34, %s4972_s28  ;;  %v3735_v34 = vstv %s7203_s19 }
 0x5bf   : > { %v3843_v49 = vpop.permute.xlu1 %3842 }
 0x5c0   : > { %v3847_v27 = vadd.f32 %v3843_v49, %v3833_v39  ;;  %v3376_v49 = vmul.f32 %v6964_v29, %v3375_v17  ;;  %3722 = vrot.lane.b32.xlu1 %v3717_v10, %s4972_s28  ;;  %v3881_v17 = vpop.permute.xlu2 %3880  ;;  %v3697_v10 = vmul.f32 %v6991_v33, %v3695_v0  ;;  %v7887_v0 = vstv %s7209_s26 }
 0x5c2   : > { %v7195_v26 = vpop.permute.xlu0 %3580  ;;  %v3853_v16 = vadd.f32 %v3851_v53, %v3847_v27  ;;  %v3870_v27 = vmul.f32 %v7000_v3, %v3869_v21  ;;  %3380 = vrot.lane.b32.xlu2 %v3376_v49, %s4972_s28  ;;  %v3416_v21 = vmul.f32 %v7000_v3, %v3415_v50  ;;  %v7885_v49 = vstv %s7206_s25 }
 0x5c4   : > { %v3867_v55 = vadd.f32 %v3863_v4, %v3853_v16 }
 0x5c5   : > { %s4783_s24 = spop %4782 }
 0x5c6   : > { %v3873_v12 = vadd.f32 %v3871_v40, %v3867_v55  ;;  %s2041_s7 = sadd.f32 %s4783_s24, %s4781_s22  ;;  %s4785_s9 = spop %4784  ;;  %v3736_v40 = vmul.f32 %v7044_v46, %v3735_v34  ;;  %v3591_v55 = vmul.f32 %v7034_v54, %v7885_v49  ;;  %3420 = vrot.lane.b32.xlu0 %v3416_v21, %s4972_s28  ;;  %v3611_v21 = vmul.f32 %v7059_v31, %v7887_v0 }
 0x5c7   : > { %v3861_v53 = vpop.permute.xlu1 %3860  ;;  %s7318_s24 = sld [smem:[#allocation2 + $0x73]] }
 0x5c8   : > { %v3866_v38 = vadd.f32 %v3861_v53, %v3852_v62  ;;  %s2056_s17 = sadd.f32 %s4785_s9, %s2041_s7  ;;  %3740 = vrot.lane.b32.xlu1 %v3736_v40, %s4972_s28  ;;  %v3435_v53 = vstv %s7213_s29  ;;  %v3737_v40 = vmul.f32 %v7067_v30, %v3735_v34 }
 0x5ca   : > { %v3883_v2 = vpop.permute.xlu0 %3882  ;;  %v3872_v39 = vadd.f32 %v3870_v27, %v3866_v38  ;;  %3702 = vrot.lane.b32.xlu2 %v3697_v10, %s4972_s28  ;;  %v3603_v38 = vpop.permute.xlu2 %3602  ;;  %v2963_v10 = vrot.slane %v6996_v35, 4 }
 0x5cb   : > { %v7218_v4 = vadd.f32 %v3883_v2, %v3873_v12 }
 0x5cc   : > { %v3886_v16 = vadd.f32 %v3881_v17, %v3872_v39  ;;  %v2943_v17 = vrot.slane %v6921_v37, 4 }
 0x5cd   : > { %s4787_s20 = spop %4786 }
 0x5ce   : > { %s2079_s30 = sadd.f32 %s4787_s20, %s2056_s17  ;;  %v3892_v27 = vadd.f32 %v3890_v43, %v3886_v16  ;;  %v3437_v43 = vmul.f32 %v7034_v54, %v3435_v53  ;;  %3742 = vrot.lane.b32.xlu0 %v3737_v40, %s4972_s28  ;;  %v2964_v54 = vadd.f32 %v2963_v10, %v6996_v35 }
 0x5cf   : > { %v3583_v62 = vpop.permute.xlu1 %3582 }
 0x5d0   : > { %s2080_s6 = smul.f32 0.0009765625, %s2079_s30  ;;  %v3587_v12 = vadd.f32 %v3583_v62, %v3573_v52  ;;  %v3716_v52 = vmul.f32 %v7000_v3, %v3715_v9  ;;  %v2976_v62 = vrot.slane %v7020_v11, 4  ;;  %3442 = vrot.lane.b32.xlu1 %v3437_v43, %s4972_s28  ;;  %v7888_v9 = vstv %s7234_s5 }
 0x5d2   : > { %s2081_s8 = sadd.f32 1e-05, %s2080_s6  ;;  %v3901_v2 = vpop.permute.xlu0 %3900  ;;  %v3593_v39 = vadd.f32 %v3591_v55, %v3587_v12  ;;  %v2997_v55 = vrot.slane %v7007_v44, 4  ;;  %v2944_v12 = vadd.f32 %v2943_v17, %v6921_v37  ;;  %3720 = vrot.lane.b32.xlu2 %v3716_v52, %s4972_s28  ;;  %v3417_v17 = vmul.f32 %v7025_v24, %v3415_v50 }
 0x5d3   : > { %v7243_v16 = vadd.f32 %v3901_v2, %v3892_v27  ;;  %v2977_v27 = vadd.f32 %v2976_v62, %v7020_v11  ;;  %v3436_v50 = vmul.f32 %v7054_v25, %v3435_v53 }
 0x5d4   : > { %v2082_v49 = vstv %s2081_s8  ;;  %v3607_v42 = vadd.f32 %v3603_v38, %v3593_v39  ;;  %v2998_v38 = vadd.f32 %v2997_v55, %v7007_v44  ;;  %v2945_v2 = vrot.slane %v2944_v12, 2  ;;  %s7336_s8 = sld [smem:[#allocation2 + $0xf5]] }
 0x5d5   : > { %4848 = vrsqrt.f32 %v2082_v49  ;;  %v3756_v39 = vmul.f32 %v7050_v14, %v7888_v9  ;;  %vm2089_vm5 = vweird.f32 %v2082_v49 }
 0x5d6   : > { %v7249_v34 = vadd.f32 %v3611_v21, %v3607_v42  ;;  %v2965_v42 = vrot.slane %v2964_v54, 2  ;;  %v2978_v21 = vrot.slane %v2977_v27, 2  ;;  %v2999_v43 = vrot.slane %v2998_v38, 2 }
 0x5d7   : > { %v2946_v35 = vadd.f32 %v2945_v2, %v2944_v12  ;;  %3760 = vrot.lane.b32.xlu0 %v3756_v39, %s4972_s28  ;;  %v7265_v2 = vpop.permute.xlu1 %3600 }
 0x5d8   : > { %7959 = vst [vmem:[#allocation21_spill] sm:$0xff] %v7249_v34  ;;  %v2966_v10 = vadd.f32 %v2965_v42, %v2964_v54  ;;  %v2979_v44 = vadd.f32 %v2978_v21, %v2977_v27  ;;  %v3000_v52 = vadd.f32 %v2999_v43, %v2998_v38  ;;  %v7960_v27 = vstv %s7188_s14  ;;  %s4698_s14 = sld [smem:[#allocation2 + $0x3b]] }
 0x5d9   : > { %v2947_v55 = vrot.slane %v2946_v35, 1  ;;  %v3891_v38 = vmul.f32 %v7067_v30, %v7960_v27  ;;  %v3909_v21 = vstv %s4726_s12 }
 0x5da   : > { %3422 = vrot.lane.b32.xlu2 %v3417_v17, %s4972_s28  ;;  %v2967_v9 = vrot.slane %v2966_v10, 1  ;;  %v2980_v34 = vrot.slane %v2979_v44, 1  ;;  %v3001_v12 = vrot.slane %v3000_v52, 1 }
 0x5db   : > { %v4849_v37 = vpop.eup %4848  ;;  %v2948_v39 = vadd.f32 %v2947_v55, %v2946_v35  ;;  %v3893_v17 = vadd.f32 %v3891_v38, %v7218_v4 }
 0x5dc   : > { %v2084_v40 = vmul.f32 %v4849_v37, %v2082_v49  ;;  %vm2090_vm4 = vweird.f32 %v4849_v37  ;;  %v2981_v42 = vadd.f32 %v2980_v34, %v2979_v44  ;;  %v3002_v53 = vadd.f32 %v3001_v12, %v3000_v52  ;;  %v7271_v49 = vpop.permute.xlu2 %3620  ;;  %v7277_v52 = vpop.permute.xlu0 %3622 }
 0x5dd   : > { %vm2091_vm6 = vmor %vm2089_vm5, %vm2090_vm4 }
 0x5de   : > { %v2085_v0 = vmul.f32 %v4849_v37, %v2084_v40  ;;  %v3910_v40 = vmul.f32 %v7050_v14, %v3909_v21 }
 0x5e0   : > { %v2086_v11 = vmul.f32 0.5, %v2085_v0  ;;  %v2968_v0 = vadd.f32 %v2967_v9, %v2966_v10  ;;  %v3912_v34 = vadd.f32 %v3910_v40, %v7243_v16 }
 0x5e2   : > { %v2087_v62 = vsub.f32 1.5, %v2086_v11  ;;  %3440 = vrot.lane.b32.xlu2 %v3436_v50, %s4972_s28 }
 0x5e4   : > { %v2088_v15 = vmul.f32 %v4849_v37, %v2087_v62  ;;  %v3929_v62 = vstv %s4728_s13 }
 0x5e5   : > { %v3930_v4 = vmul.f32 %v7104_v7, %v3929_v62 }
 0x5e6   : > { %v2092_v54 = vsel %vm2091_vm6, %v4849_v37, %v2088_v15  ;;  %v3911_v15 = vmul.f32 %v7059_v31, %v3909_v21  ;;  %v3903_v37 = vpop.permute.xlu1 %3902  ;;  %v3923_v35 = vpop.permute.xlu2 %3922 }
 0x5e7   : > { %4788 = vpush %v2092_v54  ;;  %v3907_v9 = vadd.f32 %v3903_v37, %v3893_v17  ;;  %v7961_v17 = vstv %s7078_s23  ;;  %s7301_s23 = sld [smem:[#allocation2 + $0x7b]] }
 0x5e8   : > { %4790 = vpush %v2948_v39  ;;  %v3931_v39 = vmul.f32 %v7128_v41, %v3929_v62  ;;  %v3510_v21 = vmul.f32 %v6935_v63, %v7961_v17  ;;  %v7962_v62 = vstv %s7124_s21 }
 0x5e9   : > { %4792 = vpush %v2968_v0  ;;  %v3913_v43 = vadd.f32 %v3911_v15, %v3907_v9  ;;  %v7285_v16 = vpop.permute.xlu0 %3322 }
 0x5ea   : > { %4794 = vpush %v2981_v42  ;;  %v3512_v9 = vadd.f32 %v3510_v21, %v7041_v13 }
 0x5eb   : > { %4796 = vpush %v3002_v53  ;;  %v3927_v10 = vadd.f32 %v3923_v35, %v3913_v43  ;;  %v3629_v53 = vstv %s4698_s14  ;;  %s7383_s14 = sld [smem:[#allocation2 + $0xf1]] }
 0x5ec   : > { %v3631_v37 = vmul.f32 %v6928_v6, %v3629_v53  ;;  %v3630_v43 = vmul.f32 %v6879_v5, %v3629_v53  ;;  %v3526_v63 = vadd.f32 %v7117_v51, %v3512_v9  ;;  %v3530_v6 = vmul.f32 %v6964_v29, %v7962_v62  ;;  %v7344_v62 = vld [vmem:[%s7831_s2] sm:$0xff] }
 0x5ed   : > { %v3933_v0 = vadd.f32 %v3931_v39, %v3927_v10  ;;  %v3649_v10 = vstv %s4700_s18  ;;  %v3669_v21 = vstv %s7301_s23  ;;  %s4668_s18 = sld [smem:[#allocation2 + $0x37]] }
 0x5ee   : > { %v3921_v11 = vpop.permute.xlu1 %3920  ;;  %s4670_s23 = sld [smem:[#allocation2 + $0x7f]] }
 0x5ef   : > { %v3926_v44 = vadd.f32 %v3921_v11, %v3912_v34  ;;  %v3650_v11 = vmul.f32 %v6940_v56, %v3649_v10  ;;  %v7963_v56 = vstv %s7131_s10 }
 0x5f1   : > { %v3932_v50 = vadd.f32 %v3930_v4, %v3926_v44  ;;  %v3651_v44 = vmul.f32 %v6948_v60, %v3649_v10  ;;  %v3550_v60 = vmul.f32 %v6972_v20, %v7963_v56  ;;  %v7964_v10 = vstv %s7148_s11  ;;  %s7350_s11 = sld [smem:[#allocation2 + $0xbb]] }
 0x5f2   : > { %v3941_v55 = vpop.permute.xlu2 %3940 }
 0x5f3   : > { %v7280_v12 = vadd.f32 %v3941_v55, %v3932_v50  ;;  %v3532_v50 = vadd.f32 %v3530_v6, %v3526_v63  ;;  %v3671_v63 = vmul.f32 %v6954_v57, %v3669_v21 }
 0x5f6   : > { %v7282_v54 = vpop.permute.xlu1 %3320 }
 0x5fa   : > { %v3943_v27 = vpop.permute.xlu2 %3942 }
 0x5fb   : > { %v7287_v38 = vadd.f32 %v3943_v27, %v3933_v0  ;;  %v3546_v0 = vadd.f32 %v7169_v22, %v3532_v50  ;;  %v3670_v22 = vmul.f32 %v6964_v29, %v3669_v21  ;;  %v3455_v21 = vstv %s7336_s8 }
 0x5fe   : > { %v3643_v42 = vpop.permute.xlu1 %3642  ;;  %v7292_v15 = vpop.permute.xlu0 %3340 }
 0x5ff   : > { %v3647_v34 = vadd.f32 %v3643_v42, %v3631_v37  ;;  %v3552_v37 = vadd.f32 %v3550_v60, %v3546_v0 }
 0x601   : > { %v3653_v5 = vadd.f32 %v3651_v44, %v3647_v34  ;;  %v3570_v34 = vmul.f32 %v7000_v3, %v7964_v10 }
 0x606   : > { %v7296_v40 = vpop.permute.xlu1 %3342 }
 0x60a   : > { %v3641_v35 = vpop.permute.xlu2 %3640 }
 0x60b   : > { %v3646_v13 = vadd.f32 %v3641_v35, %v3630_v43  ;;  %v3566_v35 = vadd.f32 %v7161_v45, %v3552_v37  ;;  %v3689_v45 = vstv %s7318_s24  ;;  %s4678_s24 = sld [smem:[#allocation2 + $0xff]] }
 0x60c   : > { %v3691_v0 = vmul.f32 %v6991_v33, %v3689_v45 }
 0x60d   : > { %v3652_v55 = vadd.f32 %v3650_v11, %v3646_v13  ;;  %v3572_v50 = vadd.f32 %v3570_v34, %v3566_v35  ;;  %v3456_v35 = vmul.f32 %v7050_v14, %v3455_v21 }
 0x60f   : > { %v3586_v60 = vadd.f32 %v7195_v26, %v3572_v50 }
 0x610   : > { %v3661_v4 = vpop.permute.xlu0 %3660  ;;  %v3663_v51 = vpop.permute.xlu1 %3662 }
 0x611   : > { %v3666_v39 = vadd.f32 %v3661_v4, %v3652_v55  ;;  %v3667_v17 = vadd.f32 %v3663_v51, %v3653_v5  ;;  %v7965_v51 = vstv %s7206_s25  ;;  %s4708_s25 = sld [smem:[#allocation2 + $0xb3]] }
 0x612   : > { %v7313_v42 = vpop.permute.xlu2 %3362 }
 0x613   : > { %v3672_v43 = vadd.f32 %v3670_v22, %v3666_v39  ;;  %v3673_v13 = vadd.f32 %v3671_v63, %v3667_v17 }
 0x618   : > { %s4789_s19 = spop %4788  ;;  %v7321_v9 = vpop.permute.xlu0 %3360  ;;  %v3681_v11 = vpop.permute.xlu1 %3680 }
 0x619   : > { %v7311_v27 = vstv %s4789_s19  ;;  %s4791_s22 = spop %4790  ;;  %s4672_s19 = sld [smem:[#allocation2 + $0x77]] }
 0x61a   : > { %s4793_s21 = spop %4792  ;;  %v2095_v53 = vmul.f32 %v7311_v27, %v6903_v59  ;;  %v7327_v59 = vld [vmem:[%s7831_s2 + $0x8] sm:$0xff]  ;;  %v2096_v29 = vmul.f32 %v7311_v27, %v6907_v1  ;;  %v3686_v1 = vadd.f32 %v3681_v11, %v3672_v43  ;;  %v2165_v17 = vmul.f32 %v7311_v27, %v6895_v48 }
 0x61b   : > { %s2970_s29 = sadd.f32 %s4793_s21, %s4791_s22  ;;  %s4795_s10 = spop %4794  ;;  %v3457_v48 = vmul.f32 %v7059_v31, %v3455_v21 }
 0x61c   : > { %v2097_v20 = vmax.f32 %v2095_v53, 0.0  ;;  %s4797_s9 = spop %4796  ;;  %v7338_v44 = vpop.permute.xlu2 %3380  ;;  %v2098_v5 = vmax.f32 %v2096_v29, 0.0  ;;  %v3590_v53 = vmul.f32 %v7054_v25, %v7965_v51  ;;  %v3709_v29 = vstv %s7350_s11  ;;  %s4674_s22 = sld [smem:[#allocation2 + $0xbf]] }
 0x61d   : > { %s2983_s7 = sadd.f32 %s4795_s10, %s2970_s29  ;;  %v2167_v10 = vmax.f32 %v2165_v17, 0.0  ;;  %v3710_v34 = vmul.f32 %v7000_v3, %v3709_v29  ;;  %v2166_v3 = vmul.f32 %v7311_v27, %v6899_v18  ;;  %v3729_v17 = vstv %s4708_s25 }
 0x61e   : > { %4564 = vmatmul.msk.f32.vlgmr.msra.gmra.mxu3 %vm893_vm0, %v2097_v20  ;;  %v3592_v25 = vadd.f32 %v3590_v53, %v3586_v60  ;;  %v7967_v60 = vstv %s7234_s5  ;;  %s4666_s5 = sld [smem:[#allocation2 + $0x3f]] }
 0x61f   : > { %s3004_s17 = sadd.f32 %s4797_s9, %s2983_s7  ;;  %3166 = vmatpush.msra.mxu3 %v7327_v59  ;;  %v3757_v18 = vmul.f32 %v7059_v31, %v7967_v60  ;;  %v3730_v31 = vmul.f32 %v7044_v46, %v3729_v17 }
 0x620   : > { %v3683_v39 = vpop.permute.xlu0 %3682  ;;  %v3606_v63 = vadd.f32 %v7265_v2, %v3592_v25  ;;  %s4676_s21 = sld [smem:[#allocation2 + $0xb7]] }
 0x621   : > { %s3005_s6 = smul.f32 0.0009765625, %s3004_s17  ;;  %3167 = vmatpush.msra.mxu3 %v7344_v62  ;;  %v3687_v33 = vadd.f32 %v3683_v39, %v3673_v13  ;;  %s4680_s29 = sld [smem:[#allocation2 + $0xf7]] }
 0x623   : > { %v7348_v6 = vstv %s3005_s6  ;;  %v3693_v26 = vadd.f32 %v3691_v0, %v3687_v33 }
 0x624   : > { %v7354_v4 = vsub.f32 %v6692_v19, %v7348_v6  ;;  %v7358_v57 = vsub.f32 %v6694_v58, %v7348_v6  ;;  %v7362_v55 = vsub.f32 %v6673_v36, %v7348_v6  ;;  %v3690_v36 = vmul.f32 %v7014_v32, %v3689_v45  ;;  %v7385_v32 = vpop.permute.xlu1 %3382  ;;  %v3703_v22 = vpop.permute.xlu2 %3702 }
 0x625   : > { %v7389_v37 = vsub.f32 %v6700_v28, %v7348_v6  ;;  %v3707_v43 = vadd.f32 %v3703_v22, %v3693_v26  ;;  %v7966_v45 = vstv %s7209_s26  ;;  %s7433_s26 = sld [smem:[#allocation2 + $0xfb]] }
 0x626   : > { %v3067_v56 = vmul.f32 %v7354_v4, %v7354_v4  ;;  %v3030_v19 = vmul.f32 %v7358_v57, %v7358_v57  ;;  %v3029_v58 = vmul.f32 %v7362_v55, %v7362_v55  ;;  %4565 = vmatmul.msk.f32.gmra.mxu3 %vm893_vm0, %v2098_v5  ;;  %v3692_v20 = vadd.f32 %v3690_v36, %v3686_v1 }
 0x627   : > { %v3610_v1 = vmul.f32 %v7050_v14, %v7966_v45  ;;  %v3068_v13 = vmul.f32 %v7389_v37, %v7389_v37  ;;  %v3775_v5 = vstv %s7383_s14  ;;  %v2168_v36 = vmax.f32 %v2166_v3, 0.0 }
 0x628   : > { %3071 = vrot.lane.b32.xlu0 %v3067_v56, %s4972_s28  ;;  %3035 = vrot.lane.b32.xlu1 %v3030_v19, %s4972_s28  ;;  %v3701_v11 = vpop.permute.xlu0 %3700  ;;  %v3711_v19 = vmul.f32 %v7025_v24, %v3709_v29  ;;  %v7445_v45 = vsub.f32 %v6806_v61, %v7348_v6  ;;  %v7459_v61 = vsub.f32 %v6865_v23, %v7348_v6 }
 0x629   : > { %3033 = vrot.lane.b32.xlu2 %v3029_v58, %s4972_s28  ;;  %v3706_v28 = vadd.f32 %v3701_v11, %v3692_v20  ;;  %v3612_v0 = vadd.f32 %v3610_v1, %v3606_v63  ;;  %v3777_v58 = vmul.f32 %v7128_v41, %v3775_v5 }
 0x62a   : > { %v3713_v33 = vadd.f32 %v3711_v19, %v3707_v43  ;;  %v3731_v43 = vmul.f32 %v7067_v30, %v3729_v17  ;;  %v7449_v30 = vsub.f32 %v6804_v47, %v7348_v6  ;;  %v3015_v1 = vmul.f32 %v7445_v45, %v7445_v45  ;;  %v4929_v19 = vld [vmem:[%s5015_s27 + $0x8] sm:$0xff] }
 0x62b   : > { %v3712_v2 = vadd.f32 %v3710_v34, %v3706_v28  ;;  %v7418_v51 = vadd.f32 %v7271_v49, %v3612_v0  ;;  %v3776_v49 = vmul.f32 %v7104_v7, %v3775_v5  ;;  %v3749_v46 = vstv %s7433_s26  ;;  %v4931_v17 = vld [vmem:[%s5015_s27 + $0x9] sm:$0xff] }
 0x62c   : > { %v7409_v50 = vpop.permute.xlu1 %3400  ;;  %v3721_v39 = vpop.permute.xlu2 %3720  ;;  %v3016_v28 = vmul.f32 %v7449_v30, %v7449_v30  ;;  %v7463_v47 = vsub.f32 %v6863_v8, %v7348_v6  ;;  %v3309_v0 = vstv %s4666_s5  ;;  %v4928_v8 = vld [vmem:[%s5015_s27] sm:$0xff] }
 0x62d   : > { %v3726_v56 = vadd.f32 %v3721_v39, %v3712_v2  ;;  %v3052_v2 = vmul.f32 %v7459_v61, %v7459_v61  ;;  %v3310_v6 = vmul.f32 %v4928_v8, %v3309_v0  ;;  %v4937_v8 = vld [vmem:[%s5015_s27 + $0x38] sm:$0xff] }
 0x62e   : > { %4568 = vmatmul.msk.f32.vlgmr.msrb.gmra.mxu3 %vm893_vm0, %v2167_v10  ;;  %v3750_v10 = vmul.f32 %v7050_v14, %v3749_v46  ;;  %v3017_v14 = vsel %vm893_vm0, %v3015_v1, 0.0  ;;  %v3053_v5 = vmul.f32 %v7463_v47, %v7463_v47 }
 0x62f   : > { %3236 = vmatpush.msrb.mxu3 %v7327_v59  ;;  %v3732_v26 = vadd.f32 %v3730_v31, %v3726_v56  ;;  %v3054_v39 = vsel %vm893_vm0, %v3052_v2, 0.0  ;;  %v3326_v60 = vadd.f32 %v7282_v54, %v3310_v6 }
 0x630   : > { %3462 = vrot.lane.b32.xlu0 %v3457_v48, %s4972_s28  ;;  %3460 = vrot.lane.b32.xlu1 %v3456_v35, %s4972_s28  ;;  %v7421_v53 = vpop.permute.xlu0 %3402  ;;  %v3055_v23 = vsel %vm893_vm0, %v3053_v5, 0.0 }
 0x631   : > { %3073 = vrot.lane.b32.xlu2 %v3068_v13, %s4972_s28  ;;  %3237 = vmatpush.msrb.mxu3 %v7344_v62  ;;  %v3018_v13 = vsel %vm893_vm0, %v3016_v28, 0.0  ;;  %v3056_v56 = vadd.f32 %v3055_v23, %v3054_v39  ;;  %v3389_v23 = vstv %s4674_s22 }
 0x632   : > { %v3019_v3 = vadd.f32 %v3018_v13, %v3017_v14  ;;  %v4934_v14 = vld [vmem:[%s5015_s27 + $0x19] sm:$0xff]  ;;  %v3391_v6 = vmul.f32 %v4937_v8, %v3389_v23 }
 0x634   : > { %v3723_v24 = vpop.permute.xlu1 %3722 }
 0x635   : > { %v3727_v21 = vadd.f32 %v3723_v24, %v3713_v33  ;;  %v4930_v33 = vld [vmem:[%s5015_s27 + $0x1] sm:$0xff] }
 0x636   : > { %4569 = vmatmul.msk.f32.gmra.mxu3 %vm893_vm0, %v2168_v36  ;;  %v3329_v36 = vstv %s4668_s18 }
 0x637   : > { %v3733_v29 = vadd.f32 %v3731_v43, %v3727_v21  ;;  %v3330_v24 = vmul.f32 %v4930_v33, %v3329_v36  ;;  %v3331_v21 = vmul.f32 %v4931_v17, %v3329_v36  ;;  %v4932_v43 = vld [vmem:[%s5015_s27 + $0x20] sm:$0xff]  ;;  %v3409_v36 = vstv %s4676_s21 }
 0x638   : > { %3782 = vrot.lane.b32.xlu1 %v3777_v58, %s4972_s28  ;;  %3962 = vrot.lane.b32.xlu0 %v7418_v51, %s4972_s28  ;;  %v7429_v22 = vpop.permute.xlu0 %3420  ;;  %v3311_v58 = vmul.f32 %v4929_v19, %v3309_v0  ;;  %v4936_v0 = vld [vmem:[%s5015_s27 + $0x30] sm:$0xff]  ;;  %v4938_v33 = vld [vmem:[%s5015_s27 + $0x39] sm:$0xff] }
 0x639   : > { %3762 = vrot.lane.b32.xlu2 %v3757_v18, %s4972_s28  ;;  %v3332_v31 = vadd.f32 %v3330_v24, %v3326_v60  ;;  %v3411_v24 = vmul.f32 %v4938_v33, %v3409_v36 }
 0x63a   : > { %v3327_v18 = vadd.f32 %v7285_v16, %v3311_v58 }
 0x63c   : > { %v3741_v20 = vpop.permute.xlu1 %3740 }
 0x63d   : > { %v3746_v25 = vadd.f32 %v3741_v20, %v3732_v26  ;;  %v3349_v26 = vstv %s4670_s23  ;;  %v3346_v20 = vadd.f32 %v7292_v15, %v3332_v31  ;;  %v4935_v15 = vld [vmem:[%s5015_s27 + $0x21] sm:$0xff] }
 0x63f   : > { %v3752_v34 = vadd.f32 %v3750_v10, %v3746_v25 }
 0x640   : > { %v3743_v48 = vpop.permute.xlu0 %3742 }
 0x641   : > { %3780 = vrot.lane.b32.xlu2 %v3776_v49, %s4972_s28  ;;  %v7435_v35 = vadd.f32 %v3743_v48, %v3733_v29  ;;  %v3333_v49 = vadd.f32 %v3331_v21, %v3327_v18  ;;  %v3351_v29 = vmul.f32 %v4932_v43, %v3349_v26  ;;  %v4933_v48 = vld [vmem:[%s5015_s27 + $0x18] sm:$0xff]  ;;  %v4940_v43 = vld [vmem:[%s5015_s27 + $0x48] sm:$0xff] }
 0x642   : > { %v3350_v54 = vmul.f32 %v4933_v48, %v3349_v26  ;;  %v4941_v48 = vld [vmem:[%s5015_s27 + $0x50] sm:$0xff] }
 0x643   : > { %v3347_v25 = vadd.f32 %v7296_v40, %v3333_v49  ;;  %v7968_v40 = vld [vmem:[#allocation21_spill] sm:$0xff]  ;;  %v3429_v49 = vstv %s4678_s24 }
 0x644   : > { %v3352_v16 = vadd.f32 %v3350_v54, %v3346_v20  ;;  %v7487_v2 = vadd.f32 %v7277_v52, %v7968_v40  ;;  %v3443_v26 = vpop.permute.xlu1 %3442 }
 0x645   : > { %v3353_v10 = vadd.f32 %v3351_v29, %v3347_v25  ;;  %v3430_v29 = vmul.f32 %v4940_v43, %v3429_v49 }
 0x646   : > { %v3366_v28 = vadd.f32 %v7321_v9, %v3352_v16 }
 0x647   : > { %v3367_v1 = vadd.f32 %v7313_v42, %v3353_v10 }
 0x649   : > { %v3761_v11 = vpop.permute.xlu0 %3760 }
 0x64a   : > { %v7441_v63 = vadd.f32 %v3761_v11, %v3752_v34  ;;  %v3369_v34 = vstv %s4672_s19  ;;  %v3423_v11 = vpop.permute.xlu2 %3422 }
 0x64b   : > { %v3370_v13 = vmul.f32 %v4934_v14, %v3369_v34 }
 0x64d   : > { %v3372_v5 = vadd.f32 %v3370_v13, %v3366_v28 }
 0x64f   : > { %v3386_v42 = vadd.f32 %v7338_v44, %v3372_v5  ;;  %v4939_v44 = vld [vmem:[%s5015_s27 + $0x31] sm:$0xff] }
 0x650   : > { %v3410_v17 = vmul.f32 %v4939_v44, %v3409_v36  ;;  %v4942_v5 = vld [vmem:[%s5015_s27 + $0x51] sm:$0xff] }
 0x652   : > { %v3441_v19 = vpop.permute.xlu2 %3440 }
 0x662   : > { %3020 = vadd.xlane.f32.xlu0 %v3019_v3  ;;  %v3371_v3 = vmul.f32 %v4935_v15, %v3369_v34 }
 0x664   : > { %v3373_v39 = vadd.f32 %v3371_v3, %v3367_v1  ;;  %v3449_v1 = vstv %s4680_s29 }
 0x666   : > { %v3387_v9 = vadd.f32 %v7385_v32, %v3373_v39  ;;  %v3451_v39 = vmul.f32 %v4942_v5, %v3449_v1 }
 0x668   : > { %v3393_v58 = vadd.f32 %v3391_v6, %v3387_v9 }
 0x66a   : > { %3057 = vadd.xlane.f32.xlu2 %v3056_v56  ;;  %v3390_v56 = vmul.f32 %v4936_v0, %v3389_v23  ;;  %v3407_v18 = vadd.f32 %v7421_v53, %v3393_v58  ;;  %v4943_v23 = vld [vmem:[%s5015_s27 + $0x49] sm:$0xff]  ;;  %s4712_s27 = sld [smem:[#allocation2 + $0xf3]] }
 0x66c   : > { %v3392_v52 = vadd.f32 %v3390_v56, %v3386_v42  ;;  %v3413_v21 = vadd.f32 %v3411_v24, %v3407_v18  ;;  %v3450_v42 = vmul.f32 %v4943_v23, %v3449_v1 }
 0x66e   : > { %v3406_v60 = vadd.f32 %v7409_v50, %v3392_v52  ;;  %v3427_v20 = vadd.f32 %v3423_v11, %v3413_v21  ;;  %v3431_v50 = vmul.f32 %v4941_v48, %v3429_v49 }
 0x670   : > { %v3412_v31 = vadd.f32 %v3410_v17, %v3406_v60  ;;  %v3433_v10 = vadd.f32 %v3431_v50, %v3427_v20  ;;  %v3751_v60 = vmul.f32 %v4942_v5, %v3749_v46  ;;  %v3769_v24 = vstv %s4712_s27 }
 0x671   : > { %v3771_v17 = vmul.f32 %v7128_v41, %v3769_v24  ;;  %v3770_v21 = vmul.f32 %v7104_v7, %v3769_v24 }
 0x672   : > { %v3426_v25 = vadd.f32 %v7429_v22, %v3412_v31  ;;  %v3447_v40 = vadd.f32 %v3443_v26, %v3433_v10  ;;  %v3753_v33 = vadd.f32 %v3751_v60, %v7435_v35 }
 0x673   : > { %v3772_v20 = vadd.f32 %v3770_v21, %v7441_v63 }
 0x674   : > { %v3432_v53 = vadd.f32 %v3430_v29, %v3426_v25  ;;  %v3453_v9 = vadd.f32 %v3451_v39, %v3447_v40 }
 0x676   : > { %v3446_v3 = vadd.f32 %v3441_v19, %v3432_v53 }
 0x678   : > { %v3452_v0 = vadd.f32 %v3450_v42, %v3446_v3 }
 0x682   : > { %3964 = vrot.lane.b32.xlu2 %v7487_v2, %s4972_s28 }
 0x683   : > { %v3034_v32 = vpop.permute.xlu2 %3033 }
 0x684   : > { %v3039_v28 = vsel %vm893_vm0, %v3034_v32, 0.0 }
 0x68b   : > { %v3074_v54 = vpop.permute.xlu2 %3073 }
 0x68c   : > { %v3078_v14 = vsel %vm893_vm0, %v3074_v54, 0.0 }
 0x693   : > { %v3763_v18 = vpop.permute.xlu2 %3762 }
 0x694   : > { %v3767_v44 = vadd.f32 %v3763_v18, %v3753_v33 }
 0x696   : > { %v3773_v49 = vadd.f32 %v3771_v17, %v3767_v44 }
 0x69a   : > { %v3072_v16 = vpop.permute.xlu0 %3071  ;;  %v3036_v34 = vpop.permute.xlu1 %3035 }
 0x69b   : > { %v3077_v11 = vsel %vm893_vm0, %v3072_v16, 0.0  ;;  %v3040_v22 = vsel %vm893_vm0, %v3036_v34, 0.0  ;;  %v3781_v26 = vpop.permute.xlu2 %3780 }
 0x69c   : > { %v3079_v13 = vadd.f32 %v3078_v14, %v3077_v11  ;;  %v3041_v15 = vadd.f32 %v3040_v22, %v3039_v28  ;;  %v7528_v43 = vadd.f32 %v3781_v26, %v3772_v20 }
 0x69e   : > { %3042 = vadd.xlane.f32.xlu1 %v3041_v15  ;;  %3080 = vadd.xlane.f32.xlu0 %v3079_v13  ;;  %v3981_v41 = vsel %vm893_vm0, %v7528_v43, 0.0 }
 0x6a2   : > { %v3463_v56 = vpop.permute.xlu0 %3462  ;;  %v3461_v8 = vpop.permute.xlu1 %3460 }
 0x6a3   : > { %v7508_v6 = vadd.f32 %v3463_v56, %v3453_v9  ;;  %v7510_v52 = vadd.f32 %v3461_v8, %v3452_v0 }
 0x6a5   : > { %v3949_v58 = vsel %vm893_vm0, %v7508_v6, 0.0  ;;  %v3948_v19 = vsel %vm893_vm0, %v7510_v52, 0.0 }
 0x6a6   : > { %v3950_v36 = vadd.f32 %v3949_v58, %v3948_v19 }
 0x6aa   : > { %v3963_v32 = vpop.permute.xlu0 %3962  ;;  %v3783_v31 = vpop.permute.xlu1 %3782 }
 0x6ab   : > { %3951 = vadd.xlane.f32.xlu2 %v3950_v36  ;;  %v7526_v25 = vadd.f32 %v3783_v31, %v3773_v49  ;;  %v3968_v34 = vsel %vm893_vm0, %v3963_v32, 0.0 }
 0x6ad   : > { %v3982_v35 = vsel %vm893_vm0, %v7526_v25, 0.0 }
 0x6ae   : > { %v3983_v50 = vadd.f32 %v3982_v35, %v3981_v41 }
 0x6b2   : > { %3998 = vrot.lane.b32.xlu0 %v7287_v38, %s4972_s28 }
 0x6b7   : > { %3996 = vrot.lane.b32.xlu1 %v7280_v12, %s4972_s28 }
 0x6d5   : > { %v3021_v46 = vpop.xlane.xlu0 %3020 }
 0x6d6   : > { %v3022_v29 = vrot.slane %v3021_v46, 4 }
 0x6d8   : > { %v3023_v48 = vadd.f32 %v3022_v29, %v3021_v46 }
 0x6da   : > { %v3024_v7 = vrot.slane %v3023_v48, 2 }
 0x6dc   : > { %3984 = vadd.xlane.f32.xlu0 %v3983_v50  ;;  %v3025_v54 = vadd.f32 %v3024_v7, %v3023_v48 }
 0x6dd   : > { %v3058_v53 = vpop.xlane.xlu2 %3057 }
 0x6de   : > { %v3026_v10 = vrot.slane %v3025_v54, 1  ;;  %v3059_v14 = vrot.slane %v3058_v53, 4 }
 0x6e0   : > { %v3027_v63 = vadd.f32 %v3026_v10, %v3025_v54  ;;  %v3060_v11 = vadd.f32 %v3059_v14, %v3058_v53 }
 0x6e2   : > { %4798 = vpush %v3027_v63  ;;  %v3061_v22 = vrot.slane %v3060_v11, 2 }
 0x6e4   : > { %v3062_v23 = vadd.f32 %v3061_v22, %v3060_v11 }
 0x6e5   : > { %v3965_v16 = vpop.permute.xlu2 %3964 }
 0x6e6   : > { %v3969_v1 = vsel %vm893_vm0, %v3965_v16, 0.0  ;;  %v3063_v8 = vrot.slane %v3062_v23, 1 }
 0x6e7   : > { %v3970_v28 = vadd.f32 %v3969_v1, %v3968_v34 }
 0x6e8   : > { %v3064_v18 = vadd.f32 %v3063_v8, %v3062_v23 }
 0x6e9   : > { %3971 = vadd.xlane.f32.xlu1 %v3970_v28 }
 0x711   : > { %v3043_v13 = vpop.xlane.xlu1 %3042  ;;  %v3081_v15 = vpop.xlane.xlu0 %3080 }
 0x712   : > { %v3044_v3 = vrot.slane %v3043_v13, 4  ;;  %v3082_v40 = vrot.slane %v3081_v15, 4 }
 0x713   : > { %s4799_s10 = spop %4798 }
 0x714   : > { %v3045_v5 = vadd.f32 %v3044_v3, %v3043_v13  ;;  %v3083_v39 = vadd.f32 %v3082_v40, %v3081_v15 }
 0x716   : > { %v3046_v42 = vrot.slane %v3045_v5, 2  ;;  %v3084_v9 = vrot.slane %v3083_v39, 2 }
 0x718   : > { %v3047_v0 = vadd.f32 %v3046_v42, %v3045_v5  ;;  %v3085_v56 = vadd.f32 %v3084_v9, %v3083_v39 }
 0x71a   : > { %v3048_v58 = vrot.slane %v3047_v0, 1  ;;  %v3086_v19 = vrot.slane %v3085_v56, 1 }
 0x71c   : > { %v3049_v36 = vadd.f32 %v3048_v58, %v3047_v0  ;;  %v3087_v60 = vadd.f32 %v3086_v19, %v3085_v56 }
 0x71e   : > { %4800 = vpush %v3049_v36  ;;  %v3952_v21 = vpop.xlane.xlu2 %3951 }
 0x71f   : > { %4802 = vpush %v3064_v18  ;;  %v3953_v49 = vrot.slane %v3952_v21, 4 }
 0x720   : > { %4804 = vpush %v3087_v60 }
 0x721   : > { %v3954_v46 = vadd.f32 %v3953_v49, %v3952_v21 }
 0x723   : > { %v3955_v50 = vrot.slane %v3954_v46, 2 }
 0x724   : > { %v3999_v33 = vpop.permute.xlu0 %3998 }
 0x725   : > { %v4003_v44 = vsel %vm893_vm0, %v3999_v33, 0.0  ;;  %v3956_v16 = vadd.f32 %v3955_v50, %v3954_v46  ;;  %v7970_v50 = vld [vmem:[#allocation26_spill] sm:$0xff] }
 0x727   : > { %v3957_v11 = vrot.slane %v3956_v16, 1 }
 0x729   : > { %v3997_v24 = vpop.permute.xlu1 %3996  ;;  %v3958_v40 = vadd.f32 %v3957_v11, %v3956_v16  ;;  %v7972_v16 = vld [vmem:[#allocation25_spill] sm:$0xff] }
 0x72a   : > { %v4002_v17 = vsel %vm893_vm0, %v3997_v24, 0.0 }
 0x72b   : > { %v4004_v32 = vadd.f32 %v4003_v44, %v4002_v17 }
 0x72d   : > { %4005 = vadd.xlane.f32.xlu2 %v4004_v32 }
 0x74f   : > { %s4801_s7 = spop %4800  ;;  %v3985_v31 = vpop.xlane.xlu0 %3984 }
 0x750   : > { %s3051_s9 = sadd.f32 %s4801_s7, %s4799_s10  ;;  %s4803_s17 = spop %4802  ;;  %v3986_v26 = vrot.slane %v3985_v31, 4 }
 0x751   : > { %s4805_s30 = spop %4804 }
 0x752   : > { %s3066_s20 = sadd.f32 %s4803_s17, %s3051_s9  ;;  %v3987_v48 = vadd.f32 %v3986_v26, %v3985_v31 }
 0x754   : > { %s3089_s6 = sadd.f32 %s4805_s30, %s3066_s20  ;;  %v3988_v53 = vrot.slane %v3987_v48, 2 }
 0x756   : > { %s3090_s8 = smul.f32 0.0009765625, %s3089_s6  ;;  %v3989_v28 = vadd.f32 %v3988_v53, %v3987_v48  ;;  %v7971_v53 = vld [vmem:[#allocation8_spill] sm:$0xff] }
 0x758   : > { %s3091_s12 = sadd.f32 1e-05, %s3090_s8  ;;  %v3990_v15 = vrot.slane %v3989_v28, 1 }
 0x75a   : > { %v3092_v20 = vstv %s3091_s12  ;;  %v3991_v39 = vadd.f32 %v3990_v15, %v3989_v28 }
 0x75b   : > { %4850 = vrsqrt.f32 %v3092_v20  ;;  %vm3099_vm8 = vweird.f32 %v3092_v20 }
 0x75c   : > { %v3972_v29 = vpop.xlane.xlu1 %3971 }
 0x75d   : > { %v3973_v35 = vrot.slane %v3972_v29, 4 }
 0x75f   : > { %v3974_v41 = vadd.f32 %v3973_v35, %v3972_v29 }
 0x761   : > { %v4851_v7 = vpop.eup %4850  ;;  %v3975_v54 = vrot.slane %v3974_v41, 2 }
 0x762   : > { %v3094_v10 = vmul.f32 %v4851_v7, %v3092_v20  ;;  %vm3100_vm7 = vweird.f32 %v4851_v7 }
 0x763   : > { %v3976_v34 = vadd.f32 %v3975_v54, %v3974_v41  ;;  %vm3101_vm9 = vmor %vm3099_vm8, %vm3100_vm7 }
 0x764   : > { %v3095_v63 = vmul.f32 %v4851_v7, %v3094_v10  ;;  %v1136_v10 = vmul.f32 %v7970_v50, %v7971_v53 }
 0x765   : > { %v3977_v22 = vrot.slane %v3976_v34, 1 }
 0x766   : > { %v3096_v1 = vmul.f32 0.5, %v3095_v63  ;;  %v1138_v63 = vmax.f32 %v1136_v10, 0.0 }
 0x767   : > { %v3978_v5 = vadd.f32 %v3977_v22, %v3976_v34  ;;  %v2100_v34 = vmul.f32 %v7311_v27, %v7972_v16 }
 0x768   : > { %v3097_v14 = vsub.f32 1.5, %v3096_v1 }
 0x769   : > { %v2102_v1 = vmax.f32 %v2100_v34, 0.0 }
 0x76a   : > { %v3098_v13 = vmul.f32 %v4851_v7, %v3097_v14 }
 0x76c   : > { %v3102_v3 = vsel %vm3101_vm9, %v4851_v7, %v3098_v13 }
 0x76d   : > { %4806 = vpush %v3102_v3 }
 0x76e   : > { %4808 = vpush %v3958_v40 }
 0x76f   : > { %4810 = vpush %v3978_v5 }
 0x770   : > { %4812 = vpush %v3991_v39 }
 0x79e   : > { %s4807_s13 = spop %4806 }
 0x79f   : > { %v7538_v23 = vstv %s4807_s13  ;;  %s4809_s11 = spop %4808 }
 0x7a0   : > { %v4006_v42 = vpop.xlane.xlu2 %4005  ;;  %v3105_v9 = vmul.f32 %v7538_v23, %v7445_v45  ;;  %v3106_v19 = vmul.f32 %v7538_v23, %v7449_v30  ;;  %v3175_v45 = vmul.f32 %v7538_v23, %v7459_v61  ;;  %v3176_v30 = vmul.f32 %v7538_v23, %v7463_v47  ;;  %s4811_s14 = spop %4810 }
 0x7a1   : > { %v4007_v0 = vrot.slane %v4006_v42, 4  ;;  %s3980_s25 = sadd.f32 %s4811_s14, %s4809_s11  ;;  %s4813_s26 = spop %4812  ;;  %v3109_v28 = vmul.f32 %v7538_v23, %v7362_v55  ;;  %v3180_v11 = vmul.f32 %v7538_v23, %v7389_v37  ;;  %v7973_v37 = vld [vmem:[#allocation7_spill] sm:$0xff] }
 0x7a2   : > { %v3107_v56 = vmax.f32 %v3105_v9, 0.0  ;;  %v3108_v18 = vmax.f32 %v3106_v19, 0.0  ;;  %v3177_v24 = vmax.f32 %v3175_v45, 0.0  ;;  %v3178_v44 = vmax.f32 %v3176_v30, 0.0  ;;  %v7976_v45 = vld [vmem:[#allocation23_spill] sm:$0xff] }
 0x7a3   : > { %v4008_v8 = vadd.f32 %v4007_v0, %v4006_v42  ;;  %s3993_s5 = sadd.f32 %s4813_s26, %s3980_s25  ;;  %v3111_v14 = vmax.f32 %v3109_v28, 0.0  ;;  %v3182_v22 = vmax.f32 %v3180_v11, 0.0  ;;  %v7977_v30 = vld [vmem:[#allocation27_spill] sm:$0xff] }
 0x7a4   : > { %4648 = vmatmul.msk.f32.vlgmr.msra.gmra.mxu3 %vm893_vm0, %v3107_v56  ;;  %v1065_v56 = vmul.f32 %v7970_v50, %v7973_v37 }
 0x7a5   : > { %v4009_v58 = vrot.slane %v4008_v8, 2  ;;  %4176 = vmatpush.msra.mxu3 %v7327_v59 }
 0x7a7   : > { %v4010_v36 = vadd.f32 %v4009_v58, %v4008_v8  ;;  %4177 = vmatpush.msra.mxu3 %v7344_v62  ;;  %v1067_v8 = vmax.f32 %v1065_v56, 0.0  ;;  %v7974_v58 = vld [vmem:[#allocation28_spill] sm:$0xff] }
 0x7a8   : > { %v2099_v19 = vmul.f32 %v7311_v27, %v7974_v58 }
 0x7a9   : > { %v4011_v60 = vrot.slane %v4010_v36, 1 }
 0x7ab   : > { %v4012_v33 = vadd.f32 %v4011_v60, %v4010_v36  ;;  %v7975_v36 = vld [vmem:[#allocation5_spill] sm:$0xff] }
 0x7ac   : > { %4649 = vmatmul.msk.f32.gmra.mxu3 %vm893_vm0, %v3108_v18  ;;  %v1135_v60 = vmul.f32 %v7970_v50, %v7975_v36  ;;  %v2101_v18 = vmax.f32 %v2099_v19, 0.0 }
 0x7ad   : > { %4814 = vpush %v4012_v33 }
 0x7ae   : > { %v1137_v33 = vmax.f32 %v1135_v60, 0.0 }
 0x7b4   : > { %4652 = vmatmul.msk.f32.vlgmr.msrb.gmra.mxu3 %vm893_vm0, %v3177_v24  ;;  %v2170_v24 = vmul.f32 %v7311_v27, %v7976_v45 }
 0x7b5   : > { %4246 = vmatpush.msrb.mxu3 %v7327_v59 }
 0x7b7   : > { %4247 = vmatpush.msrb.mxu3 %v7344_v62 }
 0x7bc   : > { %4653 = vmatmul.msk.f32.gmra.mxu3 %vm893_vm0, %v3178_v44  ;;  %v2169_v44 = vmul.f32 %v7311_v27, %v7977_v30 }
 0x7de   : > { %s4815_s18 = spop %4814 }
 0x7df   : > { %s4014_s23 = sadd.f32 %s4815_s18, %s3993_s5 }
 0x7e1   : > { %s4015_s19 = smul.f32 0.0009765625, %s4014_s23 }
 0x7e3   : > { %v4016_v61 = vstv %s4015_s19 }
 0x7e4   : > { %v7557_v17 = vsub.f32 %v7280_v12, %v4016_v61  ;;  %v7560_v59 = vsub.f32 %v7487_v2, %v4016_v61  ;;  %v7563_v62 = vsub.f32 %v7418_v51, %v4016_v61  ;;  %v7575_v12 = vsub.f32 %v7287_v38, %v4016_v61 }
 0x7e5   : > { %v7581_v2 = vsub.f32 %v7510_v52, %v4016_v61  ;;  %v7584_v31 = vsub.f32 %v7508_v6, %v4016_v61  ;;  %v7591_v38 = vsub.f32 %v7528_v43, %v4016_v61  ;;  %v7594_v20 = vsub.f32 %v7526_v25, %v4016_v61  ;;  %v7969_v25 = vld [vmem:[#allocation6_spill] sm:$0xff] }
 0x7e6   : > { %v4077_v47 = vmul.f32 %v7557_v17, %v7557_v17  ;;  %v4040_v32 = vmul.f32 %v7560_v59, %v7560_v59  ;;  %v4039_v21 = vmul.f32 %v7563_v62, %v7563_v62  ;;  %v4078_v51 = vmul.f32 %v7575_v12, %v7575_v12 }
 0x7e7   : > { %v4025_v49 = vmul.f32 %v7581_v2, %v7581_v2  ;;  %v4026_v26 = vmul.f32 %v7584_v31, %v7584_v31  ;;  %v4062_v6 = vmul.f32 %v7591_v38, %v7591_v38  ;;  %v4063_v35 = vmul.f32 %v7594_v20, %v7594_v20 }
 0x7e8   : > { %4081 = vrot.lane.b32.xlu2 %v4077_v47, %s4972_s28  ;;  %4045 = vrot.lane.b32.xlu0 %v4040_v32, %s4972_s28  ;;  %v1066_v7 = vmul.f32 %v7970_v50, %v7969_v25  ;;  %v2172_v61 = vmax.f32 %v2170_v24, 0.0  ;;  %v2171_v47 = vmax.f32 %v2169_v44, 0.0 }
 0x7e9   : > { %4043 = vrot.lane.b32.xlu1 %v4039_v21, %s4972_s28  ;;  %v4027_v46 = vsel %vm893_vm0, %v4025_v49, 0.0  ;;  %v4028_v52 = vsel %vm893_vm0, %v4026_v26, 0.0  ;;  %v4064_v48 = vsel %vm893_vm0, %v4062_v6, 0.0  ;;  %v4065_v43 = vsel %vm893_vm0, %v4063_v35, 0.0 }
 0x7ea   : > { %v4029_v29 = vadd.f32 %v4028_v52, %v4027_v46  ;;  %v4066_v41 = vadd.f32 %v4065_v43, %v4064_v48  ;;  %v1068_v54 = vmax.f32 %v1066_v7, 0.0  ;;  %v3179_v49 = vmul.f32 %v7538_v23, %v7354_v4  ;;  %v7647_v48 = vld [vmem:[%s7831_s2 + $0x18] sm:$0xff]  ;;  %v7652_v4 = vld [vmem:[%s7831_s2 + $0x10] sm:$0xff] }
 0x7eb   : > { %v3110_v26 = vmul.f32 %v7538_v23, %v7358_v57  ;;  %1093 = vmatpush.msra.mxu2 %v7647_v48 }
 0x7ec   : > { %v3181_v52 = vmax.f32 %v3179_v49, 0.0 }
 0x7ed   : > { %1094 = vmatpush.msra.mxu2 %v7652_v4 }
 0x7ef   : > { %1163 = vmatpush.msrb.mxu2 %v7647_v48 }
 0x7f0   : > { %4083 = vrot.lane.b32.xlu0 %v4078_v51, %s4972_s28 }
 0x7f1   : > { %1164 = vmatpush.msrb.mxu2 %v7652_v4 }
 0x813   : > { %4030 = vadd.xlane.f32.xlu1 %v4029_v29  ;;  %v3112_v29 = vmax.f32 %v3110_v26, 0.0 }
 0x81a   : > { %4067 = vadd.xlane.f32.xlu0 %v4066_v41 }
 0x82e   : > { %1073 = vrot.lane.b32.xlu0 %v1068_v54, %s4972_s28 }
 0x836   : > { %1143 = vrot.lane.b32.xlu0 %v1138_v63, %s4972_s28 }
 0x83e   : > { %2107 = vrot.lane.b32.xlu0 %v2102_v1, %s4972_s28 }
 0x842   : > { %v4082_v39 = vpop.permute.xlu2 %4081 }
 0x843   : > { %v4087_v55 = vsel %vm893_vm0, %v4082_v39, 0.0 }
 0x846   : > { %3115 = vrot.lane.b32.xlu0 %v3111_v14, %s4972_s28 }
 0x84e   : > { %3187 = vrot.lane.b32.xlu0 %v3182_v22, %s4972_s28 }
 0x85a   : > { %v4046_v13 = vpop.permute.xlu0 %4045 }
 0x85b   : > { %v4050_v15 = vsel %vm893_vm0, %v4046_v13, 0.0  ;;  %v4044_v3 = vpop.permute.xlu1 %4043 }
 0x85c   : > { %v4049_v40 = vsel %vm893_vm0, %v4044_v3, 0.0 }
 0x85d   : > { %v4051_v5 = vadd.f32 %v4050_v15, %v4049_v40 }
 0x85f   : > { %4052 = vadd.xlane.f32.xlu2 %v4051_v5 }
 0x862   : > { %v4084_v42 = vpop.permute.xlu0 %4083 }
 0x863   : > { %v4088_v9 = vsel %vm893_vm0, %v4084_v42, 0.0 }
 0x864   : > { %v4089_v0 = vadd.f32 %v4088_v9, %v4087_v55 }
 0x866   : > { %4090 = vadd.xlane.f32.xlu1 %v4089_v0 }
 0x877   : > { %1071 = vrot.lane.b32.xlu2 %v1067_v8, %s4972_s28 }
 0x87f   : > { %2105 = vrot.lane.b32.xlu2 %v2101_v18, %s4972_s28  ;;  %1141 = vrot.lane.b32.xlu1 %v1137_v33, %s4972_s28 }
 0x886   : > { %v4031_v32 = vpop.xlane.xlu1 %4030 }
 0x887   : > { %v4032_v21 = vrot.slane %v4031_v32, 4  ;;  %2177 = vrot.lane.b32.xlu2 %v2172_v61, %s4972_s28  ;;  %2175 = vrot.lane.b32.xlu1 %v2171_v47, %s4972_s28  ;;  %v1125_v61 = vpop.f32.mrf.mxu3 }
 0x889   : > { %v4033_v51 = vadd.f32 %v4032_v21, %v4031_v32 }
 0x88b   : > { %v4034_v46 = vrot.slane %v4033_v51, 2 }
 0x88d   : > { %v4035_v6 = vadd.f32 %v4034_v46, %v4033_v51  ;;  %v4068_v57 = vpop.xlane.xlu0 %4067 }
 0x88e   : > { %v4069_v23 = vrot.slane %v4068_v57, 4 }
 0x88f   : > { %3185 = vrot.lane.b32.xlu2 %v3181_v52, %s4972_s28  ;;  %3117 = vrot.lane.b32.xlu1 %v3112_v29, %s4972_s28  ;;  %v4036_v27 = vrot.slane %v4035_v6, 1  ;;  %v1128_v47 = vpop.f32.mrf.mxu3 }
 0x890   : > { %v4070_v43 = vadd.f32 %v4069_v23, %v4068_v57 }
 0x891   : > { %v4037_v35 = vadd.f32 %v4036_v27, %v4035_v6 }
 0x892   : > { %v4071_v41 = vrot.slane %v4070_v43, 2 }
 0x893   : > { %4816 = vpush %v4037_v35 }
 0x894   : > { %v4072_v54 = vadd.f32 %v4071_v41, %v4070_v43 }
 0x896   : > { %v4073_v1 = vrot.slane %v4072_v54, 1 }
 0x898   : > { %v4074_v13 = vadd.f32 %v4073_v1, %v4072_v54  ;;  %v7701_v1 = vld [vmem:[%s7832_s3] sm:$0xff] }
 0x8a0   : > { %v1074_v3 = vpop.permute.xlu0 %1073 }
 0x8a8   : > { %v1144_v42 = vpop.permute.xlu0 %1143 }
 0x8b0   : > { %v2108_v9 = vpop.permute.xlu0 %2107 }
 0x8b8   : > { %v3116_v8 = vpop.permute.xlu0 %3115 }
 0x8c0   : > { %v3188_v44 = vpop.permute.xlu0 %3187 }
 0x8c4   : > { %s4817_s27 = spop %4816 }
 0x8d2   : > { %v4053_v25 = vpop.xlane.xlu2 %4052 }
 0x8d3   : > { %v4054_v50 = vrot.slane %v4053_v25, 4 }
 0x8d5   : > { %v4055_v7 = vadd.f32 %v4054_v50, %v4053_v25 }
 0x8d7   : > { %v4056_v53 = vrot.slane %v4055_v7, 2 }
 0x8d9   : > { %v4091_v10 = vpop.xlane.xlu1 %4090  ;;  %v4057_v63 = vadd.f32 %v4056_v53, %v4055_v7 }
 0x8da   : > { %v1072_v16 = vpop.permute.xlu2 %1071  ;;  %v4092_v34 = vrot.slane %v4091_v10, 4 }
 0x8db   : > { %4482 = vmatmul.msk.f32.vlgmr.msra.gmra.mxu2 %vm893_vm0, %v1072_v16  ;;  %v4058_v28 = vrot.slane %v4057_v63, 1 }
 0x8dc   : > { %v4093_v14 = vadd.f32 %v4092_v34, %v4091_v10  ;;  %2127 = vmatpush.msra.mxu2 %v7647_v48 }
 0x8dd   : > { %v4059_v11 = vadd.f32 %v4058_v28, %v4057_v63 }
 0x8de   : > { %v4094_v22 = vrot.slane %v4093_v14, 2  ;;  %2128 = vmatpush.msra.mxu2 %v7652_v4 }
 0x8df   : > { %4818 = vpush %v4059_v11 }
 0x8e0   : > { %4820 = vpush %v4074_v13  ;;  %v4095_v15 = vadd.f32 %v4094_v22, %v4093_v14  ;;  %v7708_v13 = vld [vmem:[%s7832_s3 + $0x20] sm:$0xff] }
 0x8e2   : > { %v4096_v40 = vrot.slane %v4095_v15, 1  ;;  %v2106_v55 = vpop.permute.xlu2 %2105 }
 0x8e3   : > { %4483 = vmatmul.msk.f32.gmra.mxu2 %vm893_vm0, %v1074_v3 }
 0x8e4   : > { %v4097_v5 = vadd.f32 %v4096_v40, %v4095_v15 }
 0x8e6   : > { %4822 = vpush %v4097_v5 }
 0x8ea   : > { %v2178_v37 = vpop.permute.xlu2 %2177 }
 0x8f1   : > { %v1142_v39 = vpop.permute.xlu1 %1141 }
 0x8f2   : > { %4486 = vmatmul.msk.f32.vlgmr.msrb.gmra.mxu2 %vm893_vm0, %v1142_v39  ;;  %v3186_v30 = vpop.permute.xlu2 %3185 }
 0x8f3   : > { %2197 = vmatpush.msrb.mxu2 %v7647_v48 }
 0x8f5   : > { %2198 = vmatpush.msrb.mxu2 %v7652_v4 }
 0x8f9   : > { %v2176_v0 = vpop.permute.xlu1 %2175 }
 0x8fa   : > { %4487 = vmatmul.msk.f32.gmra.mxu2 %vm893_vm0, %v1144_v42 }
 0x901   : > { %v3118_v60 = vpop.permute.xlu1 %3117 }
 0x902   : > { %4562 = vmatmul.msk.f32.vlgmr.msra.gmra.mxu2 %vm893_vm0, %v2106_v55 }
 0x903   : > { %3137 = vmatpush.msra.mxu2 %v7647_v48 }
 0x905   : > { %3138 = vmatpush.msra.mxu2 %v7652_v4 }
 0x90a   : > { %4563 = vmatmul.msk.f32.gmra.mxu2 %vm893_vm0, %v2108_v9 }
 0x910   : > { %s4819_s10 = spop %4818 }
 0x911   : > { %s4061_s7 = sadd.f32 %s4819_s10, %s4817_s27  ;;  %s4821_s9 = spop %4820 }
 0x912   : > { %4566 = vmatmul.msk.f32.vlgmr.msrb.gmra.mxu2 %vm893_vm0, %v2176_v0 }
 0x913   : > { %3207 = vmatpush.msrb.mxu2 %v7647_v48  ;;  %s4076_s17 = sadd.f32 %s4821_s9, %s4061_s7  ;;  %s4752_s7 = sshll.u32 %s7979_s16, 7 }
 0x915   : > { %3208 = vmatpush.msrb.mxu2 %v7652_v4 }
 0x917   : > { %s4823_s20 = spop %4822 }
 0x918   : > { %s4099_s30 = sadd.f32 %s4823_s20, %s4076_s17  ;;  %s7782_s20 = scalar_lea.vmem %s7833_s4, %s4752_s7 }
 0x91a   : > { %s4100_s6 = smul.f32 0.0009765625, %s4099_s30  ;;  %4567 = vmatmul.msk.f32.gmra.mxu2 %vm893_vm0, %v2178_v37 }
 0x91c   : > { %s4101_s8 = sadd.f32 1e-05, %s4100_s6 }
 0x91e   : > { %v4102_v56 = vstv %s4101_s8 }
 0x91f   : > { %4852 = vrsqrt.f32 %v4102_v56  ;;  %vm4109_vm11 = vweird.f32 %v4102_v56 }
 0x922   : > { %4646 = vmatmul.msk.f32.vlgmr.msra.gmra.mxu2 %vm893_vm0, %v3116_v8 }
 0x923   : > { %4147 = vmatpush.msra.mxu2 %v7647_v48 }
 0x925   : > { %v4853_v58 = vpop.eup %4852  ;;  %4148 = vmatpush.msra.mxu2 %v7652_v4 }
 0x926   : > { %v4104_v19 = vmul.f32 %v4853_v58, %v4102_v56  ;;  %vm4110_vm10 = vweird.f32 %v4853_v58 }
 0x927   : > { %vm4111_vm12 = vmor %vm4109_vm11, %vm4110_vm10 }
 0x928   : > { %v4105_v36 = vmul.f32 %v4853_v58, %v4104_v19 }
 0x92a   : > { %v4106_v18 = vmul.f32 0.5, %v4105_v36  ;;  %4647 = vmatmul.msk.f32.gmra.mxu2 %vm893_vm0, %v3118_v60  ;;  %v7717_v60 = vld [vmem:[%s7832_s3 + $0x28] sm:$0xff] }
 0x92c   : > { %v4107_v33 = vsub.f32 1.5, %v4106_v18  ;;  %v245_v18 = vld [vmem:[%s7832_s3 + $0x8] sm:$0xff] }
 0x92e   : > { %v4108_v45 = vmul.f32 %v4853_v58, %v4107_v33 }
 0x930   : > { %v4112_v24 = vsel %vm4111_vm12, %v4853_v58, %v4108_v45  ;;  %v7728_v45 = vld [vmem:[%s7832_s3 + $0x30] sm:$0xff] }
 0x931   : > { %4824 = vpush %v4112_v24  ;;  %v246_v24 = vld [vmem:[%s7832_s3 + $0x10] sm:$0xff] }
 0x932   : > { %4650 = vmatmul.msk.f32.vlgmr.msrb.gmra.mxu2 %vm893_vm0, %v3186_v30 }
 0x933   : > { %4217 = vmatpush.msrb.mxu2 %v7647_v48  ;;  %v1195_v48 = vpop.f32.mrf.mxu3 }
 0x935   : > { %4218 = vmatpush.msrb.mxu2 %v7652_v4 }
 0x93a   : > { %4651 = vmatmul.msk.f32.gmra.mxu2 %vm893_vm0, %v3188_v44  ;;  %v7740_v44 = vld [vmem:[%s7832_s3 + $0x38] sm:$0xff] }
 0x93b   : > { %v1198_v23 = vpop.f32.mrf.mxu3 }
 0x943   : > { %v2159_v50 = vpop.f32.mrf.mxu3 }
 0x94b   : > { %v2162_v10 = vpop.f32.mrf.mxu3 }
 0x953   : > { %v2229_v16 = vpop.f32.mrf.mxu3 }
 0x95b   : > { %v2232_v14 = vpop.f32.mrf.mxu3 }
 0x95e   : > { %v1096_v32 = vpop.f32.mrf.mxu2 }
 0x95f   : > { %v1126_v57 = vadd.f32 %v1125_v61, %v1096_v32  ;;  %v247_v61 = vld [vmem:[%s7832_s3 + $0x18] sm:$0xff] }
 0x962   : > { %s4825_s12 = spop %4824 }
 0x963   : > { %v4114_v21 = vstv %s4825_s12  ;;  %v3169_v15 = vpop.f32.mrf.mxu3 }
 0x964   : > { %v4189_v51 = vmul.f32 %v4114_v21, %v7557_v17  ;;  %v4120_v49 = vmul.f32 %v4114_v21, %v7560_v59  ;;  %v4119_v26 = vmul.f32 %v4114_v21, %v7563_v62  ;;  %v4115_v46 = vmul.f32 %v4114_v21, %v7581_v2 }
 0x965   : > { %v4190_v17 = vmul.f32 %v4114_v21, %v7575_v12  ;;  %v4116_v59 = vmul.f32 %v4114_v21, %v7584_v31  ;;  %v4185_v43 = vmul.f32 %v4114_v21, %v7591_v38  ;;  %v4186_v7 = vmul.f32 %v4114_v21, %v7594_v20 }
 0x966   : > { %v1099_v52 = vpop.f32.mrf.mxu2  ;;  %v4191_v29 = vmax.f32 %v4189_v51, 0.0  ;;  %v4122_v6 = vmax.f32 %v4120_v49, 0.0  ;;  %v4121_v27 = vmax.f32 %v4119_v26, 0.0  ;;  %v4117_v35 = vmax.f32 %v4115_v46, 0.0 }
 0x967   : > { %v1129_v4 = vadd.f32 %v1128_v47, %v1099_v52  ;;  %v4192_v62 = vmax.f32 %v4190_v17, 0.0  ;;  %v4118_v2 = vmax.f32 %v4116_v59, 0.0  ;;  %v4187_v25 = vmax.f32 %v4185_v43, 0.0 }
 0x968   : > { %4195 = vrot.lane.b32.xlu0 %v4191_v29, %s4972_s28  ;;  %4127 = vrot.lane.b32.xlu2 %v4122_v6, %s4972_s28  ;;  %v4188_v31 = vmax.f32 %v4186_v7, 0.0 }
 0x969   : > { %1268 = vmatpush.msra.mxu1 %v1129_v4  ;;  %4125 = vrot.lane.b32.xlu1 %v4121_v27, %s4972_s28 }
 0x96a   : > { %4732 = vmatmul.msk.f32.vlgmr.msra.gmra.mxu3 %vm893_vm0, %v4117_v35 }
 0x96b   : > { %1269 = vmatpush.msra.mxu1 %v1126_v57  ;;  %v3172_v5 = vpop.f32.mrf.mxu3 }
 0x96c   : > { %4494 = vmatmul.msk.f32.vlgmr.msra.gmra.mxu1 %vm893_vm0, %v7701_v1 }
 0x971   : > { %4197 = vrot.lane.b32.xlu1 %v4192_v62, %s4972_s28 }
 0x972   : > { %4733 = vmatmul.msk.f32.gmra.mxu3 %vm893_vm0, %v4118_v2 }
 0x973   : > { %v3239_v9 = vpop.f32.mrf.mxu3 }
 0x974   : > { %4495 = vmatmul.msk.f32.gmra.mxu1 %vm893_vm0, %v245_v18 }
 0x975   : > { %v1166_v41 = vpop.f32.mrf.mxu2 }
 0x976   : > { %v1196_v53 = vadd.f32 %v1195_v48, %v1166_v41 }
 0x97a   : > { %4736 = vmatmul.msk.f32.vlgmr.msrb.gmra.mxu3 %vm893_vm0, %v4187_v25 }
 0x97b   : > { %v3242_v37 = vpop.f32.mrf.mxu3 }
 0x97c   : > { %4496 = vmatmul.msk.f32.gmra.mxu1 %vm893_vm0, %v246_v24 }
 0x97d   : > { %v1169_v54 = vpop.f32.mrf.mxu2 }
 0x97e   : > { %v1199_v12 = vadd.f32 %v1198_v23, %v1169_v54 }
 0x980   : > { %1227 = vmatpush.msra.mxu0 %v1199_v12 }
 0x982   : > { %4737 = vmatmul.msk.f32.gmra.mxu3 %vm893_vm0, %v4188_v31  ;;  %1228 = vmatpush.msra.mxu0 %v1196_v53 }
 0x983   : > { %4490 = vmatmul.msk.f32.vlgmr.msra.gmra.mxu0 %vm893_vm0, %v7708_v13 }
 0x984   : > { %4497 = vmatmul.msk.f32.gmra.mxu1 %vm893_vm0, %v247_v61 }
 0x985   : > { %v2130_v63 = vpop.f32.mrf.mxu2 }
 0x986   : > { %v2160_v20 = vadd.f32 %v2159_v50, %v2130_v63 }
 0x98b   : > { %4491 = vmatmul.msk.f32.gmra.mxu0 %vm893_vm0, %v7717_v60 }
 0x98d   : > { %v2133_v34 = vpop.f32.mrf.mxu2 }
 0x98e   : > { %v2163_v38 = vadd.f32 %v2162_v10, %v2133_v34 }
 0x990   : > { %2278 = vmatpush.msrb.mxu1 %v2163_v38 }
 0x992   : > { %2279 = vmatpush.msrb.mxu1 %v2160_v20 }
 0x993   : > { %4492 = vmatmul.msk.f32.gmra.mxu0 %vm893_vm0, %v7728_v45  ;;  %4574 = vmatmul.msk.f32.vlgmr.msrb.gmra.mxu1 %vm893_vm0, %v7701_v1 }
 0x995   : > { %v2200_v28 = vpop.f32.mrf.mxu2 }
 0x996   : > { %v2230_v3 = vadd.f32 %v2229_v16, %v2200_v28 }
 0x99b   : > { %4493 = vmatmul.msk.f32.gmra.mxu0 %vm893_vm0, %v7740_v44  ;;  %4575 = vmatmul.msk.f32.gmra.mxu1 %vm893_vm0, %v245_v18 }
 0x99d   : > { %v2203_v11 = vpop.f32.mrf.mxu2 }
 0x99e   : > { %v2233_v22 = vadd.f32 %v2232_v14, %v2203_v11 }
 0x9a0   : > { %2249 = vmatpush.msrb.mxu0 %v2233_v22 }
 0x9a2   : > { %2250 = vmatpush.msrb.mxu0 %v2230_v3 }
 0x9a3   : > { %4570 = vmatmul.msk.f32.vlgmr.msrb.gmra.mxu0 %vm893_vm0, %v7708_v13  ;;  %4576 = vmatmul.msk.f32.gmra.mxu1 %vm893_vm0, %v246_v24 }
 0x9a5   : > { %v3140_v40 = vpop.f32.mrf.mxu2 }
 0x9a6   : > { %v3170_v55 = vadd.f32 %v3169_v15, %v3140_v40 }
 0x9ab   : > { %4571 = vmatmul.msk.f32.gmra.mxu0 %vm893_vm0, %v7717_v60  ;;  %4577 = vmatmul.msk.f32.gmra.mxu1 %vm893_vm0, %v247_v61 }
 0x9ad   : > { %v3143_v39 = vpop.f32.mrf.mxu2 }
 0x9ae   : > { %v3173_v42 = vadd.f32 %v3172_v5, %v3143_v39 }
 0x9b0   : > { %3288 = vmatpush.msra.mxu1 %v3173_v42 }
 0x9b2   : > { %3289 = vmatpush.msra.mxu1 %v3170_v55 }
 0x9b3   : > { %4572 = vmatmul.msk.f32.gmra.mxu0 %vm893_vm0, %v7728_v45  ;;  %4658 = vmatmul.msk.f32.vlgmr.msra.gmra.mxu1 %vm893_vm0, %v7701_v1 }
 0x9b5   : > { %v3210_v0 = vpop.f32.mrf.mxu2 }
 0x9b6   : > { %v3240_v58 = vadd.f32 %v3239_v9, %v3210_v0 }
 0x9bb   : > { %4573 = vmatmul.msk.f32.gmra.mxu0 %vm893_vm0, %v7740_v44  ;;  %4659 = vmatmul.msk.f32.gmra.mxu1 %vm893_vm0, %v245_v18 }
 0x9bd   : > { %v3213_v56 = vpop.f32.mrf.mxu2 }
 0x9be   : > { %v3243_v8 = vadd.f32 %v3242_v37, %v3213_v56 }
 0x9c0   : > { %3259 = vmatpush.msra.mxu0 %v3243_v8 }
 0x9c2   : > { %3260 = vmatpush.msra.mxu0 %v3240_v58  ;;  %v4128_v36 = vpop.permute.xlu2 %4127 }
 0x9c3   : > { %4654 = vmatmul.msk.f32.vlgmr.msra.gmra.mxu0 %vm893_vm0, %v7708_v13  ;;  %4660 = vmatmul.msk.f32.gmra.mxu1 %vm893_vm0, %v246_v24 }
 0x9cb   : > { %4655 = vmatmul.msk.f32.gmra.mxu0 %vm893_vm0, %v7717_v60  ;;  %4661 = vmatmul.msk.f32.gmra.mxu1 %vm893_vm0, %v247_v61 }
 0x9d3   : > { %4656 = vmatmul.msk.f32.gmra.mxu0 %vm893_vm0, %v7728_v45 }
 0x9da   : > { %v4196_v33 = vpop.permute.xlu0 %4195 }
 0x9db   : > { %v4126_v19 = vpop.permute.xlu1 %4125  ;;  %4657 = vmatmul.msk.f32.gmra.mxu0 %vm893_vm0, %v7740_v44 }
 0x9dc   : > { %4730 = vmatmul.msk.f32.vlgmr.msra.gmra.mxu2 %vm893_vm0, %v4126_v19 }
 0x9e3   : > { %v4198_v30 = vpop.permute.xlu1 %4197 }
 0x9e4   : > { %4731 = vmatmul.msk.f32.gmra.mxu2 %vm893_vm0, %v4128_v36 }
 0x9e9   : > { %v1271_v6 = vpop.f32.mrf.mxu1 }
 0x9ec   : > { %4734 = vmatmul.msk.f32.vlgmr.msrb.gmra.mxu2 %vm893_vm0, %v4196_v33 }
 0x9ed   : > { %v4179_v47 = vpop.f32.mrf.mxu3 }
 0x9f1   : > { %v1274_v59 = vpop.f32.mrf.mxu1 }
 0x9f4   : > { %4735 = vmatmul.msk.f32.gmra.mxu2 %vm893_vm0, %v4198_v30 }
 0x9f5   : > { %v4182_v21 = vpop.f32.mrf.mxu3 }
 0x9f9   : > { %v1277_v23 = vpop.f32.mrf.mxu1 }
 0x9fd   : > { %v4249_v46 = vpop.f32.mrf.mxu3 }
 0xa00   : > { %v1230_v29 = vpop.f32.mrf.mxu0 }
 0xa01   : > { %v1272_v27 = vadd.f32 %v1271_v6, %v1230_v29  ;;  %v1280_v25 = vpop.f32.mrf.mxu1 }
 0xa03   : > { %1284 = vst.msk [vmem:[%s7782_s20] sm:$0xff] %vm1283_vm13, %v1272_v27 }
 0xa05   : > { %v4252_v35 = vpop.f32.mrf.mxu3 }
 0xa08   : > { %v1233_v17 = vpop.f32.mrf.mxu0 }
 0xa09   : > { %v1275_v62 = vadd.f32 %v1274_v59, %v1233_v17 }
 0xa0b   : > { %1285 = vst.msk [vmem:[%s7782_s20 + $0x8] sm:$0xff] %vm1283_vm13, %v1275_v62 }
 0xa10   : > { %v1236_v2 = vpop.f32.mrf.mxu0  ;;  %v2281_v54 = vpop.f32.mrf.mxu1 }
 0xa11   : > { %v1278_v43 = vadd.f32 %v1277_v23, %v1236_v2 }
 0xa13   : > { %1286 = vst.msk [vmem:[%s7782_s20 + $0x10] sm:$0xff] %vm1283_vm13, %v1278_v43 }
 0xa18   : > { %v1239_v41 = vpop.f32.mrf.mxu0  ;;  %v2284_v31 = vpop.f32.mrf.mxu1 }
 0xa19   : > { %v1281_v50 = vadd.f32 %v1280_v25, %v1239_v41 }
 0xa1b   : > { %1287 = vst.msk [vmem:[%s7782_s20 + $0x18] sm:$0xff] %vm1283_vm13, %v1281_v50 }
 0xa20   : > { %v2252_v7 = vpop.f32.mrf.mxu0  ;;  %v2287_v16 = vpop.f32.mrf.mxu1 }
 0xa21   : > { %v2282_v12 = vadd.f32 %v2281_v54, %v2252_v7 }
 0xa23   : > { %4578 = vst.msk [vmem:[%s7782_s20 + $0x20] sm:$0xff] %vm1283_vm13, %v2282_v12 }
 0xa28   : > { %v2255_v53 = vpop.f32.mrf.mxu0 }
 0xa29   : > { %v2285_v10 = vadd.f32 %v2284_v31, %v2255_v53 }
 0xa2b   : > { %4579 = vst.msk [vmem:[%s7782_s20 + $0x28] sm:$0xff] %vm1283_vm13, %v2285_v10 }
 0xa30   : > { %v2258_v63 = vpop.f32.mrf.mxu0 }
 0xa31   : > { %v2288_v34 = vadd.f32 %v2287_v16, %v2258_v63 }
 0xa33   : > { %4580 = vst.msk [vmem:[%s7782_s20 + $0x30] sm:$0xff] %vm1283_vm13, %v2288_v34 }
 0xa38   : > { %v2261_v38 = vpop.f32.mrf.mxu0 }
 0xa40   : > { %v3262_v28 = vpop.f32.mrf.mxu0 }
 0xa48   : > { %v3265_v22 = vpop.f32.mrf.mxu0 }
 0xa50   : > { %v3268_v3 = vpop.f32.mrf.mxu0 }
 0xa58   : > { %v3271_v39 = vpop.f32.mrf.mxu0 }
 0xa5f   : > { %v4150_v32 = vpop.f32.mrf.mxu2 }
 0xa60   : > { %v4180_v26 = vadd.f32 %v4179_v47, %v4150_v32 }
 0xa67   : > { %v4153_v51 = vpop.f32.mrf.mxu2 }
 0xa68   : > { %v4183_v49 = vadd.f32 %v4182_v21, %v4153_v51 }
 0xa6a   : > { %4298 = vmatpush.msrb.mxu1 %v4183_v49 }
 0xa6c   : > { %4299 = vmatpush.msrb.mxu1 %v4180_v26 }
 0xa6d   : > { %4742 = vmatmul.msk.f32.vlgmr.msrb.gmra.mxu1 %vm893_vm0, %v7701_v1  ;;  %v2290_v1 = vpop.f32.mrf.mxu1 }
 0xa6e   : > { %v2291_v20 = vadd.f32 %v2290_v1, %v2261_v38 }
 0xa6f   : > { %v4220_v52 = vpop.f32.mrf.mxu2 }
 0xa70   : > { %v4250_v57 = vadd.f32 %v4249_v46, %v4220_v52  ;;  %4581 = vst.msk [vmem:[%s7782_s20 + $0x38] sm:$0xff] %vm1283_vm13, %v2291_v20 }
 0xa75   : > { %4743 = vmatmul.msk.f32.gmra.mxu1 %vm893_vm0, %v245_v18  ;;  %v3291_v14 = vpop.f32.mrf.mxu1 }
 0xa76   : > { %v3292_v11 = vadd.f32 %v3291_v14, %v3262_v28 }
 0xa77   : > { %v4223_v48 = vpop.f32.mrf.mxu2 }
 0xa78   : > { %v4253_v4 = vadd.f32 %v4252_v35, %v4223_v48  ;;  %4662 = vst.msk [vmem:[%s7782_s20 + $0x40] sm:$0xff] %vm1283_vm13, %v3292_v11 }
 0xa7a   : > { %4269 = vmatpush.msrb.mxu0 %v4253_v4 }
 0xa7c   : > { %4270 = vmatpush.msrb.mxu0 %v4250_v57 }
 0xa7d   : > { %4738 = vmatmul.msk.f32.vlgmr.msrb.gmra.mxu0 %vm893_vm0, %v7708_v13  ;;  %4744 = vmatmul.msk.f32.gmra.mxu1 %vm893_vm0, %v246_v24  ;;  %v3294_v13 = vpop.f32.mrf.mxu1 }
 0xa7e   : > { %v3295_v15 = vadd.f32 %v3294_v13, %v3265_v22 }
 0xa80   : > { %4663 = vst.msk [vmem:[%s7782_s20 + $0x48] sm:$0xff] %vm1283_vm13, %v3295_v15 }
 0xa85   : > { %4739 = vmatmul.msk.f32.gmra.mxu0 %vm893_vm0, %v7717_v60  ;;  %4745 = vmatmul.msk.f32.gmra.mxu1 %vm893_vm0, %v247_v61  ;;  %v3297_v40 = vpop.f32.mrf.mxu1 }
 0xa86   : > { %v3298_v5 = vadd.f32 %v3297_v40, %v3268_v3 }
 0xa88   : > { %4664 = vst.msk [vmem:[%s7782_s20 + $0x50] sm:$0xff] %vm1283_vm13, %v3298_v5 }
 0xa8d   : > { %4740 = vmatmul.msk.f32.gmra.mxu0 %vm893_vm0, %v7728_v45  ;;  %v3300_v42 = vpop.f32.mrf.mxu1 }
 0xa8e   : > { %v3301_v55 = vadd.f32 %v3300_v42, %v3271_v39 }
 0xa90   : > { %4665 = vst.msk [vmem:[%s7782_s20 + $0x58] sm:$0xff] %vm1283_vm13, %v3301_v55 }
 0xa95   : > { %4741 = vmatmul.msk.f32.gmra.mxu0 %vm893_vm0, %v7740_v44 }
 0xaea   : > { %v4301_v9 = vpop.f32.mrf.mxu1 }
 0xaf2   : > { %v4304_v56 = vpop.f32.mrf.mxu1 }
 0xafa   : > { %v4272_v0 = vpop.f32.mrf.mxu0  ;;  %v4307_v19 = vpop.f32.mrf.mxu1 }
 0xafb   : > { %v4302_v37 = vadd.f32 %v4301_v9, %v4272_v0 }
 0xafd   : > { %4746 = vst.msk [vmem:[%s7782_s20 + $0x60] sm:$0xff] %vm1283_vm13, %v4302_v37 }
 0xb02   : > { %v4275_v8 = vpop.f32.mrf.mxu0  ;;  %v4310_v18 = vpop.f32.mrf.mxu1 }
 0xb03   : > { %v4305_v58 = vadd.f32 %v4304_v56, %v4275_v8 }
 0xb05   : > { %4747 = vst.msk [vmem:[%s7782_s20 + $0x68] sm:$0xff] %vm1283_vm13, %v4305_v58 }
 0xb0a   : > { %v4278_v36 = vpop.f32.mrf.mxu0 }
 0xb0b   : > { %v4308_v60 = vadd.f32 %v4307_v19, %v4278_v36 }
 0xb0d   : > { %4748 = vst.msk [vmem:[%s7782_s20 + $0x70] sm:$0xff] %vm1283_vm13, %v4308_v60 }
 0xb12   : > { %v4281_v33 = vpop.f32.mrf.mxu0 }
 0xb13   : > { %v4311_v45 = vadd.f32 %v4310_v18, %v4281_v33 }
 0xb15   : > { %4749 = vst.msk [vmem:[%s7782_s20 + $0x78] sm:$0xff] %vm1283_vm13, %v4311_v45 }
 0xb16 PF: > { %s15_s15 = sadd.s32 1, %s4969_s15  }
 0xb17   : > { %p12_p7 = scmp.ge.s32.totalorder %s15_s15, 4  }
 0xb19   :  { %14 = sbr.rel (!%p12_p7) target bundleno = 1 (0x1), region = 79 }
 0xb1e   :  { %4339 = vsyncpa [#allocation3], 1 }
 0xb1f   :  { %4341 = vsyncpa [#allocation3 + $0x1], 1 }

</bundles_post_ra>
